<compile_context>
chip_gen: v6e
topology: v6e:2x2x1
jax: 0.10.0
libtpu: 0.0.40
codegen_flags: <defaults>
</compile_context>

<pallas_src>
import functools
import numpy as np
import jax
import jax.numpy as jnp
from jax.experimental import pallas as pl
from jax.experimental.pallas import tpu as pltpu

LATENT = 100
OUT_NC = 64
EPS = 1e-5  # PyTorch BatchNorm2d default eps

# ConvTranspose2d(k=4, s=2, p=1): output row 2*i + d receives exactly the two
# kernel taps _KTAP[d] from input rows i + _IOFF[d] (identically along W).
# Out-of-range input rows are zeros (handled by a 1-pixel spatial zero pad).
_KTAP = {0: (1, 3), 1: (0, 2)}
_IOFF = {0: (0, -1), 1: (1, 0)}


def _round_up(v, m):
    return (v + m - 1) // m * m


# ----------------------------- Pallas kernel --------------------------------
def _parity_gemm_bn_act_kernel(a_ref, w_ref, g_ref, b_ref, o_ref, *, act):
    """Grid axis 0 = output parity p in [0, 4).

    a_ref: (1, M, K) bf16  patches for parity p
    w_ref: (1, K, C) bf16  weight slice for parity p (double-buffered DMA)
    g_ref, b_ref: (1, C) f32
    o_ref: (4, M, C) f32   resident in VMEM across the whole grid
    """
    p = pl.program_id(0)
    # MXU GEMM with f32 accumulation.
    y = jnp.dot(a_ref[0], w_ref[0], preferred_element_type=jnp.float32)
    o_ref[pl.ds(p, 1), :, :] = y[None]

    # Finalize at the last parity: training-mode BatchNorm over all
    # (parity, row) = (N, H, W) positions, then activation, rewriting the
    # resident output in place (written back to HBM once at grid end).
    @pl.when(p == pl.num_programs(0) - 1)
    def _():
        yall = o_ref[...]                                            # (4, M, C)
        cnt = yall.shape[0] * yall.shape[1]
        mean = jnp.sum(yall, axis=(0, 1), keepdims=True) / cnt
        var = jnp.sum(jnp.square(yall - mean), axis=(0, 1), keepdims=True) / cnt
        yn = (yall - mean) * jax.lax.rsqrt(var + EPS)
        yn = yn * g_ref[...] + b_ref[...]
        if act == "relu":
            yn = jnp.maximum(yn, 0.0)
        else:  # "tanh"
            yn = jnp.tanh(yn)
        o_ref[...] = yn


def fused_parity_gemm_bn_act(A, Wm, gamma, beta, act):
    """A: (4, M, K) bf16, Wm: (4, K, C) bf16, gamma/beta: (1, C) f32."""
    P, M, K = A.shape
    C = Wm.shape[-1]
    kern = functools.partial(_parity_gemm_bn_act_kernel, act=act)
    return pl.pallas_call(
        kern,
        out_shape=jax.ShapeDtypeStruct((P, M, C), jnp.float32),
        grid=(P,),
        in_specs=[
            pl.BlockSpec((1, M, K), lambda p: (p, 0, 0)),
            pl.BlockSpec((1, K, C), lambda p: (p, 0, 0)),
            pl.BlockSpec((1, C), lambda p: (0, 0)),
            pl.BlockSpec((1, C), lambda p: (0, 0)),
        ],
        out_specs=pl.BlockSpec((P, M, C), lambda p: (0, 0, 0)),
        compiler_params=pltpu.CompilerParams(
            dimension_semantics=("arbitrary",),
            vmem_limit_bytes=32 << 20,   # safe on v5e/v6e/v7x
        ),
    )(A, Wm, gamma, beta)


# ------------------------------ JAX glue -------------------------------------
def parity_im2col(x):
    """x: (N, H, W, C) channels-last -> (4, N*H*W, 4*C): one (M, 4*C) patch
    matrix per output parity (dy, dx), taps ordered (a, b, cin)."""
    N, H, W, C = x.shape
    xp = jnp.pad(x, ((0, 0), (1, 1), (1, 1), (0, 0)))
    mats = []
    for dy in (0, 1):
        for dx in (0, 1):
            taps = []
            for a in (0, 1):
                for b in (0, 1):
                    oy = _IOFF[dy][a]
                    ox = _IOFF[dx][b]
                    taps.append(xp[:, 1 + oy:1 + oy + H, 1 + ox:1 + ox + W, :])
            mats.append(jnp.concatenate(taps, axis=-1).reshape(N * H * W, 4 * C))
    return jnp.stack(mats, axis=0)


def parity_weight(Wt):
    """Wt: (Cin, Cout, 4, 4) PyTorch ConvTranspose2d layout ->
    (4, 4*Cin, Cout); rows ordered (a, b, cin) to match parity_im2col."""
    mats = []
    for dy in (0, 1):
        for dx in (0, 1):
            taps = []
            for a in (0, 1):
                for b in (0, 1):
                    ky = _KTAP[dy][a]
                    kx = _KTAP[dx][b]
                    taps.append(Wt[:, :, ky, kx])        # (Cin, Cout)
            mats.append(jnp.concatenate(taps, axis=0))    # (4*Cin, Cout)
    return jnp.stack(mats, axis=0)


def generator_forward(x_nchw, params):
    # Single NCHW -> NHWC transpose on the tiny latent; channels-last after that.
    x = jnp.transpose(x_nchw, (0, 2, 3, 1)).astype(jnp.float32)
    # Pad the latent channel dim (100 -> 128) so K = 4*Cin is a lane multiple.
    c0 = x.shape[-1]
    c0p = _round_up(c0, 32)
    if c0p != c0:
        x = jnp.pad(x, ((0, 0), (0, 0), (0, 0), (0, c0p - c0)))

    n_layers = len(params)
    for idx, (Wt, gamma, beta) in enumerate(params):
        Cin, Cout = Wt.shape[0], Wt.shape[1]
        last = idx == n_layers - 1
        Cin_p = x.shape[-1]                                  # may exceed Cin (layer 1 pad)
        Cout_p = _round_up(Cout, 128) if last else Cout      # lane-dense final stores
        Wt = jnp.pad(Wt, ((0, Cin_p - Cin), (0, Cout_p - Cout), (0, 0), (0, 0)))
        gamma = jnp.pad(gamma, (0, Cout_p - Cout))           # zeros -> pad channels stay 0
        beta = jnp.pad(beta, (0, Cout_p - Cout))

        N, H, W, _ = x.shape
        A = parity_im2col(x).astype(jnp.bfloat16)            # (4, N*H*W, 4*Cin_p)
        Wm = parity_weight(Wt).astype(jnp.bfloat16)          # (4, 4*Cin_p, Cout_p)
        act = "tanh" if last else "relu"
        y4 = fused_parity_gemm_bn_act(A, Wm, gamma[None, :], beta[None, :], act)

        # Interleave the 4 parity outputs into (N, 2H, 2W, C), staying channels-last.
        x = (y4.reshape(2, 2, N, H, W, Cout_p)
               .transpose(2, 3, 0, 4, 1, 5)
               .reshape(N, 2 * H, 2 * W, Cout_p))

    Cout_last = params[-1][0].shape[1]
    return jnp.transpose(x[..., :Cout_last], (0, 3, 1, 2))   # back to NCHW (PyTorch API)


# -------------------------- pure-JAX reference --------------------------------
def reference_forward(x, params):
    n_layers = len(params)
    for idx, (Wt, gamma, beta) in enumerate(params):
        rhs = jnp.transpose(Wt[:, :, ::-1, ::-1], (1, 0, 2, 3))  # (Cout, Cin, 4, 4)
        y = jax.lax.conv_general_dilated(
            x, rhs, window_strides=(1, 1), padding=[(2, 2), (2, 2)],
            lhs_dilation=(2, 2),
            dimension_numbers=("NCHW", "OIHW", "NCHW"))
        mean = jnp.mean(y, axis=(0, 2, 3), keepdims=True)
        var = jnp.mean(jnp.square(y - mean), axis=(0, 2, 3), keepdims=True)
        yn = (y - mean) / jnp.sqrt(var + EPS)
        yn = yn * gamma[None, :, None, None] + beta[None, :, None, None]
        x = jnp.tanh(yn) if idx == n_layers - 1 else jnp.maximum(yn, 0.0)
    return x


# ------------------------------ parameters ------------------------------------
def init_params(key):
    # Channel plan from the module: 100 -> 512 -> 256 -> 128 -> 64 -> 3
    dims = [(LATENT, OUT_NC * 8), (OUT_NC * 8, OUT_NC * 4),
            (OUT_NC * 4, OUT_NC * 2), (OUT_NC * 2, OUT_NC), (OUT_NC, 3)]
    params = []
    for (cin, cout) in dims:
        key, sub = jax.random.split(key)
        W = 0.02 * jax.random.normal(sub, (cin, cout, 4, 4), jnp.float32)
        gamma = jnp.ones((cout,), jnp.float32)   # BatchNorm2d default weight
        beta = jnp.zeros((cout,), jnp.float32)   # BatchNorm2d default bias
        params.append((W, gamma, beta))
    return params


if __name__ == "__main__":
    key = jax.random.PRNGKey(0)
    kx, kp = jax.random.split(key)
    # DCGAN latent input is (N, 100, 1, 1); output is (N, 3, 32, 32).
    x = jax.random.normal(kx, (2, LATENT, 1, 1), jnp.float32)
    params = init_params(kp)

    out = jax.block_until_ready(jax.jit(generator_forward)(x, params))
    assert out.shape == (2, 3, 32, 32), out.shape

    ref = jax.block_until_ready(jax.jit(reference_forward)(x, params))
    np.testing.assert_allclose(np.asarray(out), np.asarray(ref), atol=5e-2, rtol=5e-2)

    print("KERNEL_OK")
</pallas_src>

<mosaic_0001>
module attributes {stable_mosaic.version = 11 : i64} {
  func.func @_parity_gemm_bn_act_kernel(%arg0: i32, %arg1: memref<1x2x512xbf16, #tpu.memory_space<vmem>>, %arg2: memref<1x512x512xbf16, #tpu.memory_space<vmem>>, %arg3: memref<1x512xf32, #tpu.memory_space<vmem>>, %arg4: memref<1x512xf32, #tpu.memory_space<vmem>>, %arg5: memref<4x2x512xf32, #tpu.memory_space<vmem>>) attributes {dimension_semantics = [#tpu.dimension_semantics<arbitrary>], iteration_bounds = array<i64: 4>, scalar_prefetch = 0 : i64, scratch_operands = 0 : i64, tpu.core_type = #tpu.core_type<tc>, window_params = [{transform_indices = @transform_0, window_bounds = array<i64: 1, 2, 512>}, {transform_indices = @transform_1, window_bounds = array<i64: 1, 512, 512>}, {pipeline_mode = #tpu.pipeline_mode<synchronous>, transform_indices = @transform_2, window_bounds = array<i64: 1, 512>}, {pipeline_mode = #tpu.pipeline_mode<synchronous>, transform_indices = @transform_3, window_bounds = array<i64: 1, 512>}, {pipeline_mode = #tpu.pipeline_mode<synchronous>, transform_indices = @transform_4, window_bounds = array<i64: 4, 2, 512>}]} {
    %c0 = arith.constant 0 : index
    %c0_0 = arith.constant 0 : index
    %c0_1 = arith.constant 0 : index
    %0 = vector.load %arg1[%c0, %c0_0, %c0_1] : memref<1x2x512xbf16, #tpu.memory_space<vmem>>, vector<1x2x512xbf16>
    %1 = vector.shape_cast %0 : vector<1x2x512xbf16> to vector<2x512xbf16>
    %c0_2 = arith.constant 0 : index
    %c0_3 = arith.constant 0 : index
    %c0_4 = arith.constant 0 : index
    %2 = vector.load %arg2[%c0_2, %c0_3, %c0_4] : memref<1x512x512xbf16, #tpu.memory_space<vmem>>, vector<1x512x512xbf16>
    %3 = vector.shape_cast %2 : vector<1x512x512xbf16> to vector<512x512xbf16>
    %cst = arith.constant dense<0.000000e+00> : vector<2x512xf32>
    %4 = tpu.matmul %1, %3, %cst {dimension_numbers = #tpu.dot_dimension_numbers<[1], [0], [0], [1], [0, 0, 1, 1], [], []>} : vector<2x512xbf16>, vector<512x512xbf16>, vector<2x512xf32> -> vector<2x512xf32>
    %5 = vector.shape_cast %4 : vector<2x512xf32> to vector<1x2x512xf32>
    %6 = arith.index_cast %arg0 : i32 to index
    %c0_5 = arith.constant 0 : index
    %c0_6 = arith.constant 0 : index
    %7 = vector.load %arg5[%6, %c0_5, %c0_6] : memref<4x2x512xf32, #tpu.memory_space<vmem>>, vector<1x2x512xf32>
    tpu.vector_store %arg5[%6, %c0_5, %c0_6], %5 {strides = array<i32>} : memref<4x2x512xf32, #tpu.memory_space<vmem>>, vector<1x2x512xf32>,
    %c3_i32 = arith.constant 3 : i32
    %8 = arith.cmpi eq, %arg0, %c3_i32 : i32
    %9 = arith.extui %8 : i1 to i32
    %c0_i32 = arith.constant 0 : i32
    %10 = arith.cmpi ne, %9, %c0_i32 : i32
    scf.if %10 {
      %c0_7 = arith.constant 0 : index
      %c0_8 = arith.constant 0 : index
      %c0_9 = arith.constant 0 : index
      %11 = vector.load %arg5[%c0_7, %c0_8, %c0_9] : memref<4x2x512xf32, #tpu.memory_space<vmem>>, vector<4x2x512xf32>
      %cst_10 = arith.constant dense<0.000000e+00> : vector<512xf32>
      %12 = vector.multi_reduction <add>, %11, %cst_10 [0, 1] : vector<4x2x512xf32> to vector<512xf32>
      %13 = vector.shape_cast %12 : vector<512xf32> to vector<1x1x512xf32>
      %cst_11 = arith.constant 8.000000e+00 : f32
      %14 = vector.broadcast %cst_11 : f32 to vector<1x1x512xf32>
      %15 = arith.divf %13, %14 : vector<1x1x512xf32>
      %16 = vector.broadcast %15 : vector<1x1x512xf32> to vector<4x2x512xf32>
      %17 = arith.subf %11, %16 : vector<4x2x512xf32>
      %18 = arith.mulf %17, %17 : vector<4x2x512xf32>
      %cst_12 = arith.constant dense<0.000000e+00> : vector<512xf32>
      %19 = vector.multi_reduction <add>, %18, %cst_12 [0, 1] : vector<4x2x512xf32> to vector<512xf32>
      %20 = vector.shape_cast %19 : vector<512xf32> to vector<1x1x512xf32>
      %cst_13 = arith.constant 8.000000e+00 : f32
      %21 = vector.broadcast %cst_13 : f32 to vector<1x1x512xf32>
      %22 = arith.divf %20, %21 : vector<1x1x512xf32>
      %23 = vector.broadcast %15 : vector<1x1x512xf32> to vector<4x2x512xf32>
      %24 = arith.subf %11, %23 : vector<4x2x512xf32>
      %cst_14 = arith.constant 9.99999974E-6 : f32
      %25 = vector.broadcast %cst_14 : f32 to vector<1x1x512xf32>
      %26 = arith.addf %22, %25 : vector<1x1x512xf32>
      %27 = math.rsqrt %26 : vector<1x1x512xf32>
      %28 = vector.broadcast %27 : vector<1x1x512xf32> to vector<4x2x512xf32>
      %29 = arith.mulf %24, %28 : vector<4x2x512xf32>
      %c0_15 = arith.constant 0 : index
      %c0_16 = arith.constant 0 : index
      %30 = vector.load %arg3[%c0_15, %c0_16] : memref<1x512xf32, #tpu.memory_space<vmem>>, vector<1x512xf32>
      %31 = vector.shape_cast %30 : vector<1x512xf32> to vector<1x1x512xf32>
      %32 = vector.broadcast %31 : vector<1x1x512xf32> to vector<4x2x512xf32>
      %33 = arith.mulf %29, %32 : vector<4x2x512xf32>
      %c0_17 = arith.constant 0 : index
      %c0_18 = arith.constant 0 : index
      %34 = vector.load %arg4[%c0_17, %c0_18] : memref<1x512xf32, #tpu.memory_space<vmem>>, vector<1x512xf32>
      %35 = vector.shape_cast %34 : vector<1x512xf32> to vector<1x1x512xf32>
      %36 = vector.broadcast %35 : vector<1x1x512xf32> to vector<4x2x512xf32>
      %37 = arith.addf %33, %36 : vector<4x2x512xf32>
      %cst_19 = arith.constant 0.000000e+00 : f32
      %38 = vector.broadcast %cst_19 : f32 to vector<4x2x512xf32>
      %39 = arith.maximumf %37, %38 : vector<4x2x512xf32>
      %c0_20 = arith.constant 0 : index
      %c0_21 = arith.constant 0 : index
      %c0_22 = arith.constant 0 : index
      %40 = vector.load %arg5[%c0_20, %c0_21, %c0_22] : memref<4x2x512xf32, #tpu.memory_space<vmem>>, vector<4x2x512xf32>
      tpu.vector_store %arg5[%c0_20, %c0_21, %c0_22], %39 {strides = array<i32>} : memref<4x2x512xf32, #tpu.memory_space<vmem>>, vector<4x2x512xf32>,
    } else {
    }
    return
  }
  func.func @transform_0(%arg0: i32) -> (i32, i32, i32) {
    %c0_i32 = arith.constant 0 : i32
    %c0_i32_0 = arith.constant 0 : i32
    %c0_i32_1 = arith.constant 0 : i32
    return %arg0, %c0_i32, %c0_i32_0 : i32, i32, i32
  }
  func.func @transform_1(%arg0: i32) -> (i32, i32, i32) {
    %c0_i32 = arith.constant 0 : i32
    %c0_i32_0 = arith.constant 0 : i32
    %c0_i32_1 = arith.constant 0 : i32
    return %arg0, %c0_i32, %c0_i32_0 : i32, i32, i32
  }
  func.func @transform_2(%arg0: i32) -> (i32, i32) {
    %c0_i32 = arith.constant 0 : i32
    %c0_i32_0 = arith.constant 0 : i32
    %c0_i32_1 = arith.constant 0 : i32
    return %c0_i32, %c0_i32_0 : i32, i32
  }
  func.func @transform_3(%arg0: i32) -> (i32, i32) {
    %c0_i32 = arith.constant 0 : i32
    %c0_i32_0 = arith.constant 0 : i32
    %c0_i32_1 = arith.constant 0 : i32
    return %c0_i32, %c0_i32_0 : i32, i32
  }
  func.func @transform_4(%arg0: i32) -> (i32, i32, i32) {
    %c0_i32 = arith.constant 0 : i32
    %c0_i32_0 = arith.constant 0 : i32
    %c0_i32_1 = arith.constant 0 : i32
    %c0_i32_2 = arith.constant 0 : i32
    return %c0_i32, %c0_i32_0, %c0_i32_1 : i32, i32, i32
  }
}

module attributes {stable_mosaic.version = 11 : i64} {
  func.func @_parity_gemm_bn_act_kernel(%arg0: i32, %arg1: memref<1x8x2048xbf16, #tpu.memory_space<vmem>>, %arg2: memref<1x2048x256xbf16, #tpu.memory_space<vmem>>, %arg3: memref<1x256xf32, #tpu.memory_space<vmem>>, %arg4: memref<1x256xf32, #tpu.memory_space<vmem>>, %arg5: memref<4x8x256xf32, #tpu.memory_space<vmem>>) attributes {dimension_semantics = [#tpu.dimension_semantics<arbitrary>], iteration_bounds = array<i64: 4>, scalar_prefetch = 0 : i64, scratch_operands = 0 : i64, tpu.core_type = #tpu.core_type<tc>, window_params = [{transform_indices = @transform_0, window_bounds = array<i64: 1, 8, 2048>}, {transform_indices = @transform_1, window_bounds = array<i64: 1, 2048, 256>}, {pipeline_mode = #tpu.pipeline_mode<synchronous>, transform_indices = @transform_2, window_bounds = array<i64: 1, 256>}, {pipeline_mode = #tpu.pipeline_mode<synchronous>, transform_indices = @transform_3, window_bounds = array<i64: 1, 256>}, {pipeline_mode = #tpu.pipeline_mode<synchronous>, transform_indices = @transform_4, window_bounds = array<i64: 4, 8, 256>}]} {
    %c0 = arith.constant 0 : index
    %c0_0 = arith.constant 0 : index
    %c0_1 = arith.constant 0 : index
    %0 = vector.load %arg1[%c0, %c0_0, %c0_1] : memref<1x8x2048xbf16, #tpu.memory_space<vmem>>, vector<1x8x2048xbf16>
    %1 = vector.shape_cast %0 : vector<1x8x2048xbf16> to vector<8x2048xbf16>
    %c0_2 = arith.constant 0 : index
    %c0_3 = arith.constant 0 : index
    %c0_4 = arith.constant 0 : index
    %2 = vector.load %arg2[%c0_2, %c0_3, %c0_4] : memref<1x2048x256xbf16, #tpu.memory_space<vmem>>, vector<1x2048x256xbf16>
    %3 = vector.shape_cast %2 : vector<1x2048x256xbf16> to vector<2048x256xbf16>
    %cst = arith.constant dense<0.000000e+00> : vector<8x256xf32>
    %4 = tpu.matmul %1, %3, %cst {dimension_numbers = #tpu.dot_dimension_numbers<[1], [0], [0], [1], [0, 0, 1, 1], [], []>} : vector<8x2048xbf16>, vector<2048x256xbf16>, vector<8x256xf32> -> vector<8x256xf32>
    %5 = vector.shape_cast %4 : vector<8x256xf32> to vector<1x8x256xf32>
    %6 = arith.index_cast %arg0 : i32 to index
    %c0_5 = arith.constant 0 : index
    %c0_6 = arith.constant 0 : index
    %7 = vector.load %arg5[%6, %c0_5, %c0_6] : memref<4x8x256xf32, #tpu.memory_space<vmem>>, vector<1x8x256xf32>
    tpu.vector_store %arg5[%6, %c0_5, %c0_6], %5 {strides = array<i32>} : memref<4x8x256xf32, #tpu.memory_space<vmem>>, vector<1x8x256xf32>,
    %c3_i32 = arith.constant 3 : i32
    %8 = arith.cmpi eq, %arg0, %c3_i32 : i32
    %9 = arith.extui %8 : i1 to i32
    %c0_i32 = arith.constant 0 : i32
    %10 = arith.cmpi ne, %9, %c0_i32 : i32
    scf.if %10 {
      %c0_7 = arith.constant 0 : index
      %c0_8 = arith.constant 0 : index
      %c0_9 = arith.constant 0 : index
      %11 = vector.load %arg5[%c0_7, %c0_8, %c0_9] : memref<4x8x256xf32, #tpu.memory_space<vmem>>, vector<4x8x256xf32>
      %cst_10 = arith.constant dense<0.000000e+00> : vector<256xf32>
      %12 = vector.multi_reduction <add>, %11, %cst_10 [0, 1] : vector<4x8x256xf32> to vector<256xf32>
      %13 = vector.shape_cast %12 : vector<256xf32> to vector<1x1x256xf32>
      %cst_11 = arith.constant 3.200000e+01 : f32
      %14 = vector.broadcast %cst_11 : f32 to vector<1x1x256xf32>
      %15 = arith.divf %13, %14 : vector<1x1x256xf32>
      %16 = vector.broadcast %15 : vector<1x1x256xf32> to vector<4x8x256xf32>
      %17 = arith.subf %11, %16 : vector<4x8x256xf32>
      %18 = arith.mulf %17, %17 : vector<4x8x256xf32>
      %cst_12 = arith.constant dense<0.000000e+00> : vector<256xf32>
      %19 = vector.multi_reduction <add>, %18, %cst_12 [0, 1] : vector<4x8x256xf32> to vector<256xf32>
      %20 = vector.shape_cast %19 : vector<256xf32> to vector<1x1x256xf32>
      %cst_13 = arith.constant 3.200000e+01 : f32
      %21 = vector.broadcast %cst_13 : f32 to vector<1x1x256xf32>
      %22 = arith.divf %20, %21 : vector<1x1x256xf32>
      %23 = vector.broadcast %15 : vector<1x1x256xf32> to vector<4x8x256xf32>
      %24 = arith.subf %11, %23 : vector<4x8x256xf32>
      %cst_14 = arith.constant 9.99999974E-6 : f32
      %25 = vector.broadcast %cst_14 : f32 to vector<1x1x256xf32>
      %26 = arith.addf %22, %25 : vector<1x1x256xf32>
      %27 = math.rsqrt %26 : vector<1x1x256xf32>
      %28 = vector.broadcast %27 : vector<1x1x256xf32> to vector<4x8x256xf32>
      %29 = arith.mulf %24, %28 : vector<4x8x256xf32>
      %c0_15 = arith.constant 0 : index
      %c0_16 = arith.constant 0 : index
      %30 = vector.load %arg3[%c0_15, %c0_16] : memref<1x256xf32, #tpu.memory_space<vmem>>, vector<1x256xf32>
      %31 = vector.shape_cast %30 : vector<1x256xf32> to vector<1x1x256xf32>
      %32 = vector.broadcast %31 : vector<1x1x256xf32> to vector<4x8x256xf32>
      %33 = arith.mulf %29, %32 : vector<4x8x256xf32>
      %c0_17 = arith.constant 0 : index
      %c0_18 = arith.constant 0 : index
      %34 = vector.load %arg4[%c0_17, %c0_18] : memref<1x256xf32, #tpu.memory_space<vmem>>, vector<1x256xf32>
      %35 = vector.shape_cast %34 : vector<1x256xf32> to vector<1x1x256xf32>
      %36 = vector.broadcast %35 : vector<1x1x256xf32> to vector<4x8x256xf32>
      %37 = arith.addf %33, %36 : vector<4x8x256xf32>
      %cst_19 = arith.constant 0.000000e+00 : f32
      %38 = vector.broadcast %cst_19 : f32 to vector<4x8x256xf32>
      %39 = arith.maximumf %37, %38 : vector<4x8x256xf32>
      %c0_20 = arith.constant 0 : index
      %c0_21 = arith.constant 0 : index
      %c0_22 = arith.constant 0 : index
      %40 = vector.load %arg5[%c0_20, %c0_21, %c0_22] : memref<4x8x256xf32, #tpu.memory_space<vmem>>, vector<4x8x256xf32>
      tpu.vector_store %arg5[%c0_20, %c0_21, %c0_22], %39 {strides = array<i32>} : memref<4x8x256xf32, #tpu.memory_space<vmem>>, vector<4x8x256xf32>,
    } else {
    }
    return
  }
  func.func @transform_0(%arg0: i32) -> (i32, i32, i32) {
    %c0_i32 = arith.constant 0 : i32
    %c0_i32_0 = arith.constant 0 : i32
    %c0_i32_1 = arith.constant 0 : i32
    return %arg0, %c0_i32, %c0_i32_0 : i32, i32, i32
  }
  func.func @transform_1(%arg0: i32) -> (i32, i32, i32) {
    %c0_i32 = arith.constant 0 : i32
    %c0_i32_0 = arith.constant 0 : i32
    %c0_i32_1 = arith.constant 0 : i32
    return %arg0, %c0_i32, %c0_i32_0 : i32, i32, i32
  }
  func.func @transform_2(%arg0: i32) -> (i32, i32) {
    %c0_i32 = arith.constant 0 : i32
    %c0_i32_0 = arith.constant 0 : i32
    %c0_i32_1 = arith.constant 0 : i32
    return %c0_i32, %c0_i32_0 : i32, i32
  }
  func.func @transform_3(%arg0: i32) -> (i32, i32) {
    %c0_i32 = arith.constant 0 : i32
    %c0_i32_0 = arith.constant 0 : i32
    %c0_i32_1 = arith.constant 0 : i32
    return %c0_i32, %c0_i32_0 : i32, i32
  }
  func.func @transform_4(%arg0: i32) -> (i32, i32, i32) {
    %c0_i32 = arith.constant 0 : i32
    %c0_i32_0 = arith.constant 0 : i32
    %c0_i32_1 = arith.constant 0 : i32
    %c0_i32_2 = arith.constant 0 : i32
    return %c0_i32, %c0_i32_0, %c0_i32_1 : i32, i32, i32
  }
}

module attributes {stable_mosaic.version = 11 : i64} {
  func.func @_parity_gemm_bn_act_kernel(%arg0: i32, %arg1: memref<1x32x1024xbf16, #tpu.memory_space<vmem>>, %arg2: memref<1x1024x128xbf16, #tpu.memory_space<vmem>>, %arg3: memref<1x128xf32, #tpu.memory_space<vmem>>, %arg4: memref<1x128xf32, #tpu.memory_space<vmem>>, %arg5: memref<4x32x128xf32, #tpu.memory_space<vmem>>) attributes {dimension_semantics = [#tpu.dimension_semantics<arbitrary>], iteration_bounds = array<i64: 4>, scalar_prefetch = 0 : i64, scratch_operands = 0 : i64, tpu.core_type = #tpu.core_type<tc>, window_params = [{transform_indices = @transform_0, window_bounds = array<i64: 1, 32, 1024>}, {transform_indices = @transform_1, window_bounds = array<i64: 1, 1024, 128>}, {pipeline_mode = #tpu.pipeline_mode<synchronous>, transform_indices = @transform_2, window_bounds = array<i64: 1, 128>}, {pipeline_mode = #tpu.pipeline_mode<synchronous>, transform_indices = @transform_3, window_bounds = array<i64: 1, 128>}, {pipeline_mode = #tpu.pipeline_mode<synchronous>, transform_indices = @transform_4, window_bounds = array<i64: 4, 32, 128>}]} {
    %c0 = arith.constant 0 : index
    %c0_0 = arith.constant 0 : index
    %c0_1 = arith.constant 0 : index
    %0 = vector.load %arg1[%c0, %c0_0, %c0_1] : memref<1x32x1024xbf16, #tpu.memory_space<vmem>>, vector<1x32x1024xbf16>
    %1 = vector.shape_cast %0 : vector<1x32x1024xbf16> to vector<32x1024xbf16>
    %c0_2 = arith.constant 0 : index
    %c0_3 = arith.constant 0 : index
    %c0_4 = arith.constant 0 : index
    %2 = vector.load %arg2[%c0_2, %c0_3, %c0_4] : memref<1x1024x128xbf16, #tpu.memory_space<vmem>>, vector<1x1024x128xbf16>
    %3 = vector.shape_cast %2 : vector<1x1024x128xbf16> to vector<1024x128xbf16>
    %cst = arith.constant dense<0.000000e+00> : vector<32x128xf32>
    %4 = tpu.matmul %1, %3, %cst {dimension_numbers = #tpu.dot_dimension_numbers<[1], [0], [0], [1], [0, 0, 1, 1], [], []>} : vector<32x1024xbf16>, vector<1024x128xbf16>, vector<32x128xf32> -> vector<32x128xf32>
    %5 = vector.shape_cast %4 : vector<32x128xf32> to vector<1x32x128xf32>
    %6 = arith.index_cast %arg0 : i32 to index
    %c0_5 = arith.constant 0 : index
    %c0_6 = arith.constant 0 : index
    %7 = vector.load %arg5[%6, %c0_5, %c0_6] : memref<4x32x128xf32, #tpu.memory_space<vmem>>, vector<1x32x128xf32>
    tpu.vector_store %arg5[%6, %c0_5, %c0_6], %5 {strides = array<i32>} : memref<4x32x128xf32, #tpu.memory_space<vmem>>, vector<1x32x128xf32>,
    %c3_i32 = arith.constant 3 : i32
    %8 = arith.cmpi eq, %arg0, %c3_i32 : i32
    %9 = arith.extui %8 : i1 to i32
    %c0_i32 = arith.constant 0 : i32
    %10 = arith.cmpi ne, %9, %c0_i32 : i32
    scf.if %10 {
      %c0_7 = arith.constant 0 : index
      %c0_8 = arith.constant 0 : index
      %c0_9 = arith.constant 0 : index
      %11 = vector.load %arg5[%c0_7, %c0_8, %c0_9] : memref<4x32x128xf32, #tpu.memory_space<vmem>>, vector<4x32x128xf32>
      %cst_10 = arith.constant dense<0.000000e+00> : vector<128xf32>
      %12 = vector.multi_reduction <add>, %11, %cst_10 [0, 1] : vector<4x32x128xf32> to vector<128xf32>
      %13 = vector.shape_cast %12 : vector<128xf32> to vector<1x1x128xf32>
      %cst_11 = arith.constant 1.280000e+02 : f32
      %14 = vector.broadcast %cst_11 : f32 to vector<1x1x128xf32>
      %15 = arith.divf %13, %14 : vector<1x1x128xf32>
      %16 = vector.broadcast %15 : vector<1x1x128xf32> to vector<4x32x128xf32>
      %17 = arith.subf %11, %16 : vector<4x32x128xf32>
      %18 = arith.mulf %17, %17 : vector<4x32x128xf32>
      %cst_12 = arith.constant dense<0.000000e+00> : vector<128xf32>
      %19 = vector.multi_reduction <add>, %18, %cst_12 [0, 1] : vector<4x32x128xf32> to vector<128xf32>
      %20 = vector.shape_cast %19 : vector<128xf32> to vector<1x1x128xf32>
      %cst_13 = arith.constant 1.280000e+02 : f32
      %21 = vector.broadcast %cst_13 : f32 to vector<1x1x128xf32>
      %22 = arith.divf %20, %21 : vector<1x1x128xf32>
      %23 = vector.broadcast %15 : vector<1x1x128xf32> to vector<4x32x128xf32>
      %24 = arith.subf %11, %23 : vector<4x32x128xf32>
      %cst_14 = arith.constant 9.99999974E-6 : f32
      %25 = vector.broadcast %cst_14 : f32 to vector<1x1x128xf32>
      %26 = arith.addf %22, %25 : vector<1x1x128xf32>
      %27 = math.rsqrt %26 : vector<1x1x128xf32>
      %28 = vector.broadcast %27 : vector<1x1x128xf32> to vector<4x32x128xf32>
      %29 = arith.mulf %24, %28 : vector<4x32x128xf32>
      %c0_15 = arith.constant 0 : index
      %c0_16 = arith.constant 0 : index
      %30 = vector.load %arg3[%c0_15, %c0_16] : memref<1x128xf32, #tpu.memory_space<vmem>>, vector<1x128xf32>
      %31 = vector.shape_cast %30 : vector<1x128xf32> to vector<1x1x128xf32>
      %32 = vector.broadcast %31 : vector<1x1x128xf32> to vector<4x32x128xf32>
      %33 = arith.mulf %29, %32 : vector<4x32x128xf32>
      %c0_17 = arith.constant 0 : index
      %c0_18 = arith.constant 0 : index
      %34 = vector.load %arg4[%c0_17, %c0_18] : memref<1x128xf32, #tpu.memory_space<vmem>>, vector<1x128xf32>
      %35 = vector.shape_cast %34 : vector<1x128xf32> to vector<1x1x128xf32>
      %36 = vector.broadcast %35 : vector<1x1x128xf32> to vector<4x32x128xf32>
      %37 = arith.addf %33, %36 : vector<4x32x128xf32>
      %cst_19 = arith.constant 0.000000e+00 : f32
      %38 = vector.broadcast %cst_19 : f32 to vector<4x32x128xf32>
      %39 = arith.maximumf %37, %38 : vector<4x32x128xf32>
      %c0_20 = arith.constant 0 : index
      %c0_21 = arith.constant 0 : index
      %c0_22 = arith.constant 0 : index
      %40 = vector.load %arg5[%c0_20, %c0_21, %c0_22] : memref<4x32x128xf32, #tpu.memory_space<vmem>>, vector<4x32x128xf32>
      tpu.vector_store %arg5[%c0_20, %c0_21, %c0_22], %39 {strides = array<i32>} : memref<4x32x128xf32, #tpu.memory_space<vmem>>, vector<4x32x128xf32>,
    } else {
    }
    return
  }
  func.func @transform_0(%arg0: i32) -> (i32, i32, i32) {
    %c0_i32 = arith.constant 0 : i32
    %c0_i32_0 = arith.constant 0 : i32
    %c0_i32_1 = arith.constant 0 : i32
    return %arg0, %c0_i32, %c0_i32_0 : i32, i32, i32
  }
  func.func @transform_1(%arg0: i32) -> (i32, i32, i32) {
    %c0_i32 = arith.constant 0 : i32
    %c0_i32_0 = arith.constant 0 : i32
    %c0_i32_1 = arith.constant 0 : i32
    return %arg0, %c0_i32, %c0_i32_0 : i32, i32, i32
  }
  func.func @transform_2(%arg0: i32) -> (i32, i32) {
    %c0_i32 = arith.constant 0 : i32
    %c0_i32_0 = arith.constant 0 : i32
    %c0_i32_1 = arith.constant 0 : i32
    return %c0_i32, %c0_i32_0 : i32, i32
  }
  func.func @transform_3(%arg0: i32) -> (i32, i32) {
    %c0_i32 = arith.constant 0 : i32
    %c0_i32_0 = arith.constant 0 : i32
    %c0_i32_1 = arith.constant 0 : i32
    return %c0_i32, %c0_i32_0 : i32, i32
  }
  func.func @transform_4(%arg0: i32) -> (i32, i32, i32) {
    %c0_i32 = arith.constant 0 : i32
    %c0_i32_0 = arith.constant 0 : i32
    %c0_i32_1 = arith.constant 0 : i32
    %c0_i32_2 = arith.constant 0 : i32
    return %c0_i32, %c0_i32_0, %c0_i32_1 : i32, i32, i32
  }
}

module attributes {stable_mosaic.version = 11 : i64} {
  func.func @_parity_gemm_bn_act_kernel(%arg0: i32, %arg1: memref<1x128x512xbf16, #tpu.memory_space<vmem>>, %arg2: memref<1x512x64xbf16, #tpu.memory_space<vmem>>, %arg3: memref<1x64xf32, #tpu.memory_space<vmem>>, %arg4: memref<1x64xf32, #tpu.memory_space<vmem>>, %arg5: memref<4x128x64xf32, #tpu.memory_space<vmem>>) attributes {dimension_semantics = [#tpu.dimension_semantics<arbitrary>], iteration_bounds = array<i64: 4>, scalar_prefetch = 0 : i64, scratch_operands = 0 : i64, tpu.core_type = #tpu.core_type<tc>, window_params = [{transform_indices = @transform_0, window_bounds = array<i64: 1, 128, 512>}, {transform_indices = @transform_1, window_bounds = array<i64: 1, 512, 64>}, {pipeline_mode = #tpu.pipeline_mode<synchronous>, transform_indices = @transform_2, window_bounds = array<i64: 1, 64>}, {pipeline_mode = #tpu.pipeline_mode<synchronous>, transform_indices = @transform_3, window_bounds = array<i64: 1, 64>}, {pipeline_mode = #tpu.pipeline_mode<synchronous>, transform_indices = @transform_4, window_bounds = array<i64: 4, 128, 64>}]} {
    %c0 = arith.constant 0 : index
    %c0_0 = arith.constant 0 : index
    %c0_1 = arith.constant 0 : index
    %0 = vector.load %arg1[%c0, %c0_0, %c0_1] : memref<1x128x512xbf16, #tpu.memory_space<vmem>>, vector<1x128x512xbf16>
    %1 = vector.shape_cast %0 : vector<1x128x512xbf16> to vector<128x512xbf16>
    %c0_2 = arith.constant 0 : index
    %c0_3 = arith.constant 0 : index
    %c0_4 = arith.constant 0 : index
    %2 = vector.load %arg2[%c0_2, %c0_3, %c0_4] : memref<1x512x64xbf16, #tpu.memory_space<vmem>>, vector<1x512x64xbf16>
    %3 = vector.shape_cast %2 : vector<1x512x64xbf16> to vector<512x64xbf16>
    %cst = arith.constant dense<0.000000e+00> : vector<128x64xf32>
    %4 = tpu.matmul %1, %3, %cst {dimension_numbers = #tpu.dot_dimension_numbers<[1], [0], [0], [1], [0, 0, 1, 1], [], []>} : vector<128x512xbf16>, vector<512x64xbf16>, vector<128x64xf32> -> vector<128x64xf32>
    %5 = vector.shape_cast %4 : vector<128x64xf32> to vector<1x128x64xf32>
    %6 = arith.index_cast %arg0 : i32 to index
    %c0_5 = arith.constant 0 : index
    %c0_6 = arith.constant 0 : index
    %7 = vector.load %arg5[%6, %c0_5, %c0_6] : memref<4x128x64xf32, #tpu.memory_space<vmem>>, vector<1x128x64xf32>
    tpu.vector_store %arg5[%6, %c0_5, %c0_6], %5 {strides = array<i32>} : memref<4x128x64xf32, #tpu.memory_space<vmem>>, vector<1x128x64xf32>,
    %c3_i32 = arith.constant 3 : i32
    %8 = arith.cmpi eq, %arg0, %c3_i32 : i32
    %9 = arith.extui %8 : i1 to i32
    %c0_i32 = arith.constant 0 : i32
    %10 = arith.cmpi ne, %9, %c0_i32 : i32
    scf.if %10 {
      %c0_7 = arith.constant 0 : index
      %c0_8 = arith.constant 0 : index
      %c0_9 = arith.constant 0 : index
      %11 = vector.load %arg5[%c0_7, %c0_8, %c0_9] : memref<4x128x64xf32, #tpu.memory_space<vmem>>, vector<4x128x64xf32>
      %cst_10 = arith.constant dense<0.000000e+00> : vector<64xf32>
      %12 = vector.multi_reduction <add>, %11, %cst_10 [0, 1] : vector<4x128x64xf32> to vector<64xf32>
      %13 = vector.shape_cast %12 : vector<64xf32> to vector<1x1x64xf32>
      %cst_11 = arith.constant 5.120000e+02 : f32
      %14 = vector.broadcast %cst_11 : f32 to vector<1x1x64xf32>
      %15 = arith.divf %13, %14 : vector<1x1x64xf32>
      %16 = vector.broadcast %15 : vector<1x1x64xf32> to vector<4x128x64xf32>
      %17 = arith.subf %11, %16 : vector<4x128x64xf32>
      %18 = arith.mulf %17, %17 : vector<4x128x64xf32>
      %cst_12 = arith.constant dense<0.000000e+00> : vector<64xf32>
      %19 = vector.multi_reduction <add>, %18, %cst_12 [0, 1] : vector<4x128x64xf32> to vector<64xf32>
      %20 = vector.shape_cast %19 : vector<64xf32> to vector<1x1x64xf32>
      %cst_13 = arith.constant 5.120000e+02 : f32
      %21 = vector.broadcast %cst_13 : f32 to vector<1x1x64xf32>
      %22 = arith.divf %20, %21 : vector<1x1x64xf32>
      %23 = vector.broadcast %15 : vector<1x1x64xf32> to vector<4x128x64xf32>
      %24 = arith.subf %11, %23 : vector<4x128x64xf32>
      %cst_14 = arith.constant 9.99999974E-6 : f32
      %25 = vector.broadcast %cst_14 : f32 to vector<1x1x64xf32>
      %26 = arith.addf %22, %25 : vector<1x1x64xf32>
      %27 = math.rsqrt %26 : vector<1x1x64xf32>
      %28 = vector.broadcast %27 : vector<1x1x64xf32> to vector<4x128x64xf32>
      %29 = arith.mulf %24, %28 : vector<4x128x64xf32>
      %c0_15 = arith.constant 0 : index
      %c0_16 = arith.constant 0 : index
      %30 = vector.load %arg3[%c0_15, %c0_16] : memref<1x64xf32, #tpu.memory_space<vmem>>, vector<1x64xf32>
      %31 = vector.shape_cast %30 : vector<1x64xf32> to vector<1x1x64xf32>
      %32 = vector.broadcast %31 : vector<1x1x64xf32> to vector<4x128x64xf32>
      %33 = arith.mulf %29, %32 : vector<4x128x64xf32>
      %c0_17 = arith.constant 0 : index
      %c0_18 = arith.constant 0 : index
      %34 = vector.load %arg4[%c0_17, %c0_18] : memref<1x64xf32, #tpu.memory_space<vmem>>, vector<1x64xf32>
      %35 = vector.shape_cast %34 : vector<1x64xf32> to vector<1x1x64xf32>
      %36 = vector.broadcast %35 : vector<1x1x64xf32> to vector<4x128x64xf32>
      %37 = arith.addf %33, %36 : vector<4x128x64xf32>
      %cst_19 = arith.constant 0.000000e+00 : f32
      %38 = vector.broadcast %cst_19 : f32 to vector<4x128x64xf32>
      %39 = arith.maximumf %37, %38 : vector<4x128x64xf32>
      %c0_20 = arith.constant 0 : index
      %c0_21 = arith.constant 0 : index
      %c0_22 = arith.constant 0 : index
      %40 = vector.load %arg5[%c0_20, %c0_21, %c0_22] : memref<4x128x64xf32, #tpu.memory_space<vmem>>, vector<4x128x64xf32>
      tpu.vector_store %arg5[%c0_20, %c0_21, %c0_22], %39 {strides = array<i32>} : memref<4x128x64xf32, #tpu.memory_space<vmem>>, vector<4x128x64xf32>,
    } else {
    }
    return
  }
  func.func @transform_0(%arg0: i32) -> (i32, i32, i32) {
    %c0_i32 = arith.constant 0 : i32
    %c0_i32_0 = arith.constant 0 : i32
    %c0_i32_1 = arith.constant 0 : i32
    return %arg0, %c0_i32, %c0_i32_0 : i32, i32, i32
  }
  func.func @transform_1(%arg0: i32) -> (i32, i32, i32) {
    %c0_i32 = arith.constant 0 : i32
    %c0_i32_0 = arith.constant 0 : i32
    %c0_i32_1 = arith.constant 0 : i32
    return %arg0, %c0_i32, %c0_i32_0 : i32, i32, i32
  }
  func.func @transform_2(%arg0: i32) -> (i32, i32) {
    %c0_i32 = arith.constant 0 : i32
    %c0_i32_0 = arith.constant 0 : i32
    %c0_i32_1 = arith.constant 0 : i32
    return %c0_i32, %c0_i32_0 : i32, i32
  }
  func.func @transform_3(%arg0: i32) -> (i32, i32) {
    %c0_i32 = arith.constant 0 : i32
    %c0_i32_0 = arith.constant 0 : i32
    %c0_i32_1 = arith.constant 0 : i32
    return %c0_i32, %c0_i32_0 : i32, i32
  }
  func.func @transform_4(%arg0: i32) -> (i32, i32, i32) {
    %c0_i32 = arith.constant 0 : i32
    %c0_i32_0 = arith.constant 0 : i32
    %c0_i32_1 = arith.constant 0 : i32
    %c0_i32_2 = arith.constant 0 : i32
    return %c0_i32, %c0_i32_0, %c0_i32_1 : i32, i32, i32
  }
}

module attributes {stable_mosaic.version = 11 : i64} {
  func.func @_parity_gemm_bn_act_kernel(%arg0: i32, %arg1: memref<1x512x256xbf16, #tpu.memory_space<vmem>>, %arg2: memref<1x256x128xbf16, #tpu.memory_space<vmem>>, %arg3: memref<1x128xf32, #tpu.memory_space<vmem>>, %arg4: memref<1x128xf32, #tpu.memory_space<vmem>>, %arg5: memref<4x512x128xf32, #tpu.memory_space<vmem>>) attributes {dimension_semantics = [#tpu.dimension_semantics<arbitrary>], iteration_bounds = array<i64: 4>, scalar_prefetch = 0 : i64, scratch_operands = 0 : i64, tpu.core_type = #tpu.core_type<tc>, window_params = [{transform_indices = @transform_0, window_bounds = array<i64: 1, 512, 256>}, {transform_indices = @transform_1, window_bounds = array<i64: 1, 256, 128>}, {pipeline_mode = #tpu.pipeline_mode<synchronous>, transform_indices = @transform_2, window_bounds = array<i64: 1, 128>}, {pipeline_mode = #tpu.pipeline_mode<synchronous>, transform_indices = @transform_3, window_bounds = array<i64: 1, 128>}, {pipeline_mode = #tpu.pipeline_mode<synchronous>, transform_indices = @transform_4, window_bounds = array<i64: 4, 512, 128>}]} {
    %c0 = arith.constant 0 : index
    %c0_0 = arith.constant 0 : index
    %c0_1 = arith.constant 0 : index
    %0 = vector.load %arg1[%c0, %c0_0, %c0_1] : memref<1x512x256xbf16, #tpu.memory_space<vmem>>, vector<1x512x256xbf16>
    %1 = vector.shape_cast %0 : vector<1x512x256xbf16> to vector<512x256xbf16>
    %c0_2 = arith.constant 0 : index
    %c0_3 = arith.constant 0 : index
    %c0_4 = arith.constant 0 : index
    %2 = vector.load %arg2[%c0_2, %c0_3, %c0_4] : memref<1x256x128xbf16, #tpu.memory_space<vmem>>, vector<1x256x128xbf16>
    %3 = vector.shape_cast %2 : vector<1x256x128xbf16> to vector<256x128xbf16>
    %cst = arith.constant dense<0.000000e+00> : vector<512x128xf32>
    %4 = tpu.matmul %1, %3, %cst {dimension_numbers = #tpu.dot_dimension_numbers<[1], [0], [0], [1], [0, 0, 1, 1], [], []>} : vector<512x256xbf16>, vector<256x128xbf16>, vector<512x128xf32> -> vector<512x128xf32>
    %5 = vector.shape_cast %4 : vector<512x128xf32> to vector<1x512x128xf32>
    %6 = arith.index_cast %arg0 : i32 to index
    %c0_5 = arith.constant 0 : index
    %c0_6 = arith.constant 0 : index
    %7 = vector.load %arg5[%6, %c0_5, %c0_6] : memref<4x512x128xf32, #tpu.memory_space<vmem>>, vector<1x512x128xf32>
    tpu.vector_store %arg5[%6, %c0_5, %c0_6], %5 {strides = array<i32>} : memref<4x512x128xf32, #tpu.memory_space<vmem>>, vector<1x512x128xf32>,
    %c3_i32 = arith.constant 3 : i32
    %8 = arith.cmpi eq, %arg0, %c3_i32 : i32
    %9 = arith.extui %8 : i1 to i32
    %c0_i32 = arith.constant 0 : i32
    %10 = arith.cmpi ne, %9, %c0_i32 : i32
    scf.if %10 {
      %c0_7 = arith.constant 0 : index
      %c0_8 = arith.constant 0 : index
      %c0_9 = arith.constant 0 : index
      %11 = vector.load %arg5[%c0_7, %c0_8, %c0_9] : memref<4x512x128xf32, #tpu.memory_space<vmem>>, vector<4x512x128xf32>
      %cst_10 = arith.constant dense<0.000000e+00> : vector<128xf32>
      %12 = vector.multi_reduction <add>, %11, %cst_10 [0, 1] : vector<4x512x128xf32> to vector<128xf32>
      %13 = vector.shape_cast %12 : vector<128xf32> to vector<1x1x128xf32>
      %cst_11 = arith.constant 2.048000e+03 : f32
      %14 = vector.broadcast %cst_11 : f32 to vector<1x1x128xf32>
      %15 = arith.divf %13, %14 : vector<1x1x128xf32>
      %16 = vector.broadcast %15 : vector<1x1x128xf32> to vector<4x512x128xf32>
      %17 = arith.subf %11, %16 : vector<4x512x128xf32>
      %18 = arith.mulf %17, %17 : vector<4x512x128xf32>
      %cst_12 = arith.constant dense<0.000000e+00> : vector<128xf32>
      %19 = vector.multi_reduction <add>, %18, %cst_12 [0, 1] : vector<4x512x128xf32> to vector<128xf32>
      %20 = vector.shape_cast %19 : vector<128xf32> to vector<1x1x128xf32>
      %cst_13 = arith.constant 2.048000e+03 : f32
      %21 = vector.broadcast %cst_13 : f32 to vector<1x1x128xf32>
      %22 = arith.divf %20, %21 : vector<1x1x128xf32>
      %23 = vector.broadcast %15 : vector<1x1x128xf32> to vector<4x512x128xf32>
      %24 = arith.subf %11, %23 : vector<4x512x128xf32>
      %cst_14 = arith.constant 9.99999974E-6 : f32
      %25 = vector.broadcast %cst_14 : f32 to vector<1x1x128xf32>
      %26 = arith.addf %22, %25 : vector<1x1x128xf32>
      %27 = math.rsqrt %26 : vector<1x1x128xf32>
      %28 = vector.broadcast %27 : vector<1x1x128xf32> to vector<4x512x128xf32>
      %29 = arith.mulf %24, %28 : vector<4x512x128xf32>
      %c0_15 = arith.constant 0 : index
      %c0_16 = arith.constant 0 : index
      %30 = vector.load %arg3[%c0_15, %c0_16] : memref<1x128xf32, #tpu.memory_space<vmem>>, vector<1x128xf32>
      %31 = vector.shape_cast %30 : vector<1x128xf32> to vector<1x1x128xf32>
      %32 = vector.broadcast %31 : vector<1x1x128xf32> to vector<4x512x128xf32>
      %33 = arith.mulf %29, %32 : vector<4x512x128xf32>
      %c0_17 = arith.constant 0 : index
      %c0_18 = arith.constant 0 : index
      %34 = vector.load %arg4[%c0_17, %c0_18] : memref<1x128xf32, #tpu.memory_space<vmem>>, vector<1x128xf32>
      %35 = vector.shape_cast %34 : vector<1x128xf32> to vector<1x1x128xf32>
      %36 = vector.broadcast %35 : vector<1x1x128xf32> to vector<4x512x128xf32>
      %37 = arith.addf %33, %36 : vector<4x512x128xf32>
      %38 = math.tanh %37 : vector<4x512x128xf32>
      %c0_19 = arith.constant 0 : index
      %c0_20 = arith.constant 0 : index
      %c0_21 = arith.constant 0 : index
      %39 = vector.load %arg5[%c0_19, %c0_20, %c0_21] : memref<4x512x128xf32, #tpu.memory_space<vmem>>, vector<4x512x128xf32>
      tpu.vector_store %arg5[%c0_19, %c0_20, %c0_21], %38 {strides = array<i32>} : memref<4x512x128xf32, #tpu.memory_space<vmem>>, vector<4x512x128xf32>,
    } else {
    }
    return
  }
  func.func @transform_0(%arg0: i32) -> (i32, i32, i32) {
    %c0_i32 = arith.constant 0 : i32
    %c0_i32_0 = arith.constant 0 : i32
    %c0_i32_1 = arith.constant 0 : i32
    return %arg0, %c0_i32, %c0_i32_0 : i32, i32, i32
  }
  func.func @transform_1(%arg0: i32) -> (i32, i32, i32) {
    %c0_i32 = arith.constant 0 : i32
    %c0_i32_0 = arith.constant 0 : i32
    %c0_i32_1 = arith.constant 0 : i32
    return %arg0, %c0_i32, %c0_i32_0 : i32, i32, i32
  }
  func.func @transform_2(%arg0: i32) -> (i32, i32) {
    %c0_i32 = arith.constant 0 : i32
    %c0_i32_0 = arith.constant 0 : i32
    %c0_i32_1 = arith.constant 0 : i32
    return %c0_i32, %c0_i32_0 : i32, i32
  }
  func.func @transform_3(%arg0: i32) -> (i32, i32) {
    %c0_i32 = arith.constant 0 : i32
    %c0_i32_0 = arith.constant 0 : i32
    %c0_i32_1 = arith.constant 0 : i32
    return %c0_i32, %c0_i32_0 : i32, i32
  }
  func.func @transform_4(%arg0: i32) -> (i32, i32, i32) {
    %c0_i32 = arith.constant 0 : i32
    %c0_i32_0 = arith.constant 0 : i32
    %c0_i32_1 = arith.constant 0 : i32
    %c0_i32_2 = arith.constant 0 : i32
    return %c0_i32, %c0_i32_0, %c0_i32_1 : i32, i32, i32
  }
}

</mosaic_0001>

<bundles_post_ra>
// kernel: generator_forward.5
= control target key start
LH: loop header
LB: loop body
LE: loop exit
PB: predicated region body
PF: predicated region fallthrough
CT: control target
= control target key end

     0   :  { %s2072_s15 = smov 0   ;;  %s2384_s0 = inlined_call_operand.vmem [shape: bf16[4,2,512], index: 0, kind: input, shape index: {}]   ;;  %s2385_s1 = inlined_call_operand.vmem [shape: bf16[4,512,512], index: 1, kind: input, shape index: {}]   ;;  %s2386_s2 = inlined_call_operand.vmem [shape: f32[1,512], index: 2, kind: input, shape index: {}]   ;;  %s2387_s3 = inlined_call_operand.vmem [shape: f32[1,512], index: 3, kind: input, shape index: {}]   ;;  %s2388_s4 = inlined_call_operand.vmem [shape: f32[4,2,512], index: 4, kind: output, shape index: {}]  }
   0x1 LB: > { %s2078_s16 = sadd.s32 4294967295, %s2043_s15   ;;  %p1683_p0 = scmp.ge.s32.totalorder %s2043_s15, 1  ;;  %s2043_s15 = sphi %s2072_s15, %s14_s15  }
   0x2   : > { %p166_p1 = scmp.lt.s32.totalorder %s2043_s15, 5 }
   0x4   : > { %p167_p2 = pnand %p1683_p0, %p166_p1 }
   0x5   : > { %p191_p3 = scmp.lt.s32.totalorder (!%p167_p2), %s2078_s16, 3  ;;  %s1822_s26 = sshll.u32 (!%p167_p2), %s2078_s16, 3 }
   0x6   : > { %170 = sbr.rel (%p167_p2) target bundleno = 458 (0x1ca), region = 36  ;;  %s1186_s29 = scalar_lea.vmem (!%p167_p2), %s2388_s4, %s1822_s26 }
   0x7   : > { %p1818_p4 = scmp.ne.s32.totalorder (!%p167_p2), %s2078_s16, 3 }
   0xb   : > { %s2084_s17 = scalar_select %p191_p3, %s2078_s16, 3  ;;  %v2045_v38 = vmov 1966171168   ;;  %v341_v40 = vlaneseq }
   0xc   : > { %v339_v39 = vunpack.c.l.s4 %v2045_v38 }
   0xd   : > { %s1821_s18 = sshll.u32 %s2084_s17, 10  ;;  %s1684_s22 = sshll.u32 %s2084_s17, 2  ;;  %v2135_v46 = vshrl.u32 %v341_v40, 7 }
   0xe   : > { %s2090_s21 = scalar_lea.vmem %s2385_s1, %s1821_s18  ;;  %v340_v45 = vunpack.c.0.s8 %v339_v39  ;;  %s194_s25 = scalar_lea.vmem %s2384_s0, %s1684_s22 }
   0xf   : > { %v1833_v0 = vld [vmem:[%s2090_s21 + $0xe4] ss:$16 sps:$4 sm:$0xff]   ;;  %v1837_v2 = vld [vmem:[%s2090_s21 + $0xe0] ss:$16 sps:$4 sm:$0xff]   ;;  %v1965_v38 = vld [vmem:[%s2090_s21 + $0x28] ss:$16 sps:$4 sm:$0xff]  }
  0x10   : > { %v1835_v1 = vld [vmem:[%s2090_s21 + $0x2e4] ss:$16 sps:$4 sm:$0xff]   ;;  %998 = vmatprep.subr.bf16.mxu0 %v1833_v0  ;;  %v1838_v3 = vld [vmem:[%s2090_s21 + $0x2e0] ss:$16 sps:$4 sm:$0xff]   ;;  %v343_v51 = vsub.s32 %v340_v45, %v2135_v46  ;;  %v1968_v39 = vld [vmem:[%s2090_s21 + $0x228] ss:$16 sps:$4 sm:$0xff]  }
  0x11   : > { %1039 = vmatprep.subr.bf16.mxu1 %v1835_v1  ;;  %v1839_v4 = vld [vmem:[%s2090_s21 + $0xc4] ss:$16 sps:$4 sm:$0xff]   ;;  %999 = vmatpush1.bf16.msra.mxu0 %v1837_v2  ;;  %v1843_v6 = vld [vmem:[%s2090_s21 + $0xc0] ss:$16 sps:$4 sm:$0xff]   ;;  %v1973_v40 = vld [vmem:[%s2090_s21 + $0xc] ss:$16 sps:$4 sm:$0xff]  }
  0x12   : > { %1040 = vmatpush1.bf16.msra.mxu1 %v1838_v3  ;;  %v1841_v5 = vld [vmem:[%s2090_s21 + $0x2c4] ss:$16 sps:$4 sm:$0xff]   ;;  %1000 = vmatprep.subr.bf16.mxu0 %v1839_v4  ;;  %v1844_v7 = vld [vmem:[%s2090_s21 + $0x2c0] ss:$16 sps:$4 sm:$0xff]   ;;  %v1982_v45 = vld [vmem:[%s2090_s21 + $0x3ec] ss:$16 sps:$4 sm:$0xff]  }
  0x13   : > { %1041 = vmatprep.subr.bf16.mxu1 %v1841_v5  ;;  %v1845_v8 = vld [vmem:[%s2090_s21 + $0xa4] ss:$16 sps:$4 sm:$0xff]   ;;  %v1849_v10 = vld [vmem:[%s2090_s21 + $0xa0] ss:$16 sps:$4 sm:$0xff]  }
  0x14   : > { %v1847_v9 = vld [vmem:[%s2090_s21 + $0x2a4] ss:$16 sps:$4 sm:$0xff]   ;;  %v1850_v11 = vld [vmem:[%s2090_s21 + $0x2a0] ss:$16 sps:$4 sm:$0xff]  }
  0x15   : > { %1001 = vmatpush1.bf16.msra.mxu0 %v1843_v6  ;;  %v1851_v12 = vld [vmem:[%s2090_s21 + $0x84] ss:$16 sps:$4 sm:$0xff]   ;;  %v1855_v14 = vld [vmem:[%s2090_s21 + $0x80] ss:$16 sps:$4 sm:$0xff]  }
  0x16   : > { %1042 = vmatpush1.bf16.msra.mxu1 %v1844_v7  ;;  %1002 = vmatprep.subr.bf16.mxu0 %v1845_v8  ;;  %v1853_v13 = vld [vmem:[%s2090_s21 + $0x284] ss:$16 sps:$4 sm:$0xff]   ;;  %v1856_v15 = vld [vmem:[%s2090_s21 + $0x280] ss:$16 sps:$4 sm:$0xff]  }
  0x17   : > { %1043 = vmatprep.subr.bf16.mxu1 %v1847_v9  ;;  %v1857_v16 = vld [vmem:[%s2090_s21 + $0x64] ss:$16 sps:$4 sm:$0xff]   ;;  %v1861_v18 = vld [vmem:[%s2090_s21 + $0x60] ss:$16 sps:$4 sm:$0xff]  }
  0x18   : > { %v1859_v17 = vld [vmem:[%s2090_s21 + $0x264] ss:$16 sps:$4 sm:$0xff]   ;;  %v1862_v19 = vld [vmem:[%s2090_s21 + $0x260] ss:$16 sps:$4 sm:$0xff]  }
  0x19   : > { %1003 = vmatpush1.bf16.msra.mxu0 %v1849_v10  ;;  %v1863_v20 = vld [vmem:[%s2090_s21 + $0x44] ss:$16 sps:$4 sm:$0xff]   ;;  %v1867_v22 = vld [vmem:[%s2090_s21 + $0x40] ss:$16 sps:$4 sm:$0xff]  }
  0x1a   : > { %1044 = vmatpush1.bf16.msra.mxu1 %v1850_v11  ;;  %1004 = vmatprep.subr.bf16.mxu0 %v1851_v12  ;;  %v1865_v21 = vld [vmem:[%s2090_s21 + $0x244] ss:$16 sps:$4 sm:$0xff]   ;;  %v1868_v23 = vld [vmem:[%s2090_s21 + $0x240] ss:$16 sps:$4 sm:$0xff]   ;;  %v1931_v11 = vld [vmem:[%s2090_s21 + $0xec] ss:$16 sps:$4 sm:$0xff]  }
  0x1b   : > { %1045 = vmatprep.subr.bf16.mxu1 %v1853_v13  ;;  %v1869_v24 = vld [vmem:[%s2090_s21 + $0x24] ss:$16 sps:$4 sm:$0xff]   ;;  %v1873_v26 = vld [vmem:[%s2090_s21 + $0x20] ss:$16 sps:$4 sm:$0xff]   ;;  %v1934_v12 = vld [vmem:[%s2090_s21 + $0x2ec] ss:$16 sps:$4 sm:$0xff]  }
  0x1c   : > { %v1871_v25 = vld [vmem:[%s2090_s21 + $0x224] ss:$16 sps:$4 sm:$0xff]   ;;  %v1874_v27 = vld [vmem:[%s2090_s21 + $0x220] ss:$16 sps:$4 sm:$0xff]  }
  0x1d   : > { %1005 = vmatpush1.bf16.msra.mxu0 %v1855_v14  ;;  %v1875_v28 = vld [vmem:[%s2090_s21 + $0x4] ss:$16 sps:$4 sm:$0xff]   ;;  %v1879_v30 = vld [vmem:[%s2090_s21] ss:$16 sps:$4 sm:$0xff]   ;;  %v1929_v14 = vld [vmem:[%s2090_s21 + $0xe8] ss:$16 sps:$4 sm:$0xff]  }
  0x1e   : > { %1046 = vmatpush1.bf16.msra.mxu1 %v1856_v15  ;;  %1006 = vmatprep.subr.bf16.mxu0 %v1857_v16  ;;  %v1877_v29 = vld [vmem:[%s2090_s21 + $0x204] ss:$16 sps:$4 sm:$0xff]   ;;  %v1880_v31 = vld [vmem:[%s2090_s21 + $0x200] ss:$16 sps:$4 sm:$0xff]   ;;  %v1932_v15 = vld [vmem:[%s2090_s21 + $0x2e8] ss:$16 sps:$4 sm:$0xff]  }
  0x1f   : > { %1047 = vmatprep.subr.bf16.mxu1 %v1859_v17  ;;  %v1881_v32 = vld [vmem:[%s2090_s21 + $0x1e4] ss:$16 sps:$4 sm:$0xff]   ;;  %v1885_v34 = vld [vmem:[%s2090_s21 + $0x1e0] ss:$16 sps:$4 sm:$0xff]   ;;  %v1937_v16 = vld [vmem:[%s2090_s21 + $0xcc] ss:$16 sps:$4 sm:$0xff]  }
  0x20   : > { %v1883_v33 = vld [vmem:[%s2090_s21 + $0x3e4] ss:$16 sps:$4 sm:$0xff]   ;;  %v1886_v35 = vld [vmem:[%s2090_s21 + $0x3e0] ss:$16 sps:$4 sm:$0xff]   ;;  %v1940_v17 = vld [vmem:[%s2090_s21 + $0x2cc] ss:$16 sps:$4 sm:$0xff]  }
  0x21   : > { %1007 = vmatpush1.bf16.msra.mxu0 %v1861_v18  ;;  %v1887_v36 = vld [vmem:[%s2090_s21 + $0x1c4] ss:$16 sps:$4 sm:$0xff]   ;;  %v1891_v41 = vld [vmem:[%s2090_s21 + $0x1c0] ss:$16 sps:$4 sm:$0xff]   ;;  %v1935_v18 = vld [vmem:[%s2090_s21 + $0xc8] ss:$16 sps:$4 sm:$0xff]  }
  0x22   : > { %1048 = vmatpush1.bf16.msra.mxu1 %v1862_v19  ;;  %1008 = vmatprep.subr.bf16.mxu0 %v1863_v20  ;;  %v1889_v37 = vld [vmem:[%s2090_s21 + $0x3c4] ss:$16 sps:$4 sm:$0xff]   ;;  %v1892_v42 = vld [vmem:[%s2090_s21 + $0x3c0] ss:$16 sps:$4 sm:$0xff]   ;;  %v1938_v19 = vld [vmem:[%s2090_s21 + $0x2c8] ss:$16 sps:$4 sm:$0xff]  }
  0x23   : > { %1049 = vmatprep.subr.bf16.mxu1 %v1865_v21  ;;  %v1893_v43 = vld [vmem:[%s2090_s21 + $0x1a4] ss:$16 sps:$4 sm:$0xff]   ;;  %v1897_v47 = vld [vmem:[%s2090_s21 + $0x1a0] ss:$16 sps:$4 sm:$0xff]   ;;  %v1943_v20 = vld [vmem:[%s2090_s21 + $0xac] ss:$16 sps:$4 sm:$0xff]  }
  0x24   : > { %v1895_v44 = vld [vmem:[%s2090_s21 + $0x3a4] ss:$16 sps:$4 sm:$0xff]   ;;  %v1898_v48 = vld [vmem:[%s2090_s21 + $0x3a0] ss:$16 sps:$4 sm:$0xff]   ;;  %v1946_v21 = vld [vmem:[%s2090_s21 + $0x2ac] ss:$16 sps:$4 sm:$0xff]  }
  0x25   : > { %1009 = vmatpush1.bf16.msra.mxu0 %v1867_v22  ;;  %v1899_v49 = vld [vmem:[%s2090_s21 + $0x184] ss:$16 sps:$4 sm:$0xff]   ;;  %v1687_v52 = vld.sshfl [vmem:[%s194_s25] sm:$0x33 pattern:$0x75316420] }
  0x26   : > { %1050 = vmatpush1.bf16.msra.mxu1 %v1868_v23  ;;  %1010 = vmatprep.subr.bf16.mxu0 %v1869_v24  ;;  %v1901_v50 = vld [vmem:[%s2090_s21 + $0x384] ss:$16 sps:$4 sm:$0xff]   ;;  %v1903_v53 = vld [vmem:[%s2090_s21 + $0x180] ss:$16 sps:$4 sm:$0xff]   ;;  %v337_v55 = vcombine.high %v1687_v52, %v1687_v52  ;;  %v2162_v9 = vrot.slane %v1687_v52, %v343_v51  ;;  %v1941_v22 = vld [vmem:[%s2090_s21 + $0xa8] ss:$16 sps:$4 sm:$0xff]  }
  0x27   : > { %1051 = vmatprep.subr.bf16.mxu1 %v1871_v25  ;;  %v1904_v54 = vld [vmem:[%s2090_s21 + $0x380] ss:$16 sps:$4 sm:$0xff]   ;;  %v1905_v56 = vld [vmem:[%s2090_s21 + $0x164] ss:$16 sps:$4 sm:$0xff]   ;;  %v1944_v23 = vld [vmem:[%s2090_s21 + $0x2a8] ss:$16 sps:$4 sm:$0xff]  }
  0x28   : > { %v1907_v57 = vld [vmem:[%s2090_s21 + $0x364] ss:$16 sps:$4 sm:$0xff]   ;;  %v351_v58 = vrot.slane %v337_v55, %v343_v51  ;;  %v1909_v59 = vld [vmem:[%s2090_s21 + $0x160] ss:$16 sps:$4 sm:$0xff]   ;;  %v2169_v13 = vcombine.high %v2162_v9, %v2162_v9  ;;  %v1949_v24 = vld [vmem:[%s2090_s21 + $0x8c] ss:$16 sps:$4 sm:$0xff]  }
  0x29   : > { %1011 = vmatpush1.bf16.msra.mxu0 %v1873_v26  ;;  %v1910_v60 = vld [vmem:[%s2090_s21 + $0x360] ss:$16 sps:$4 sm:$0xff]   ;;  %v1911_v62 = vld [vmem:[%s2090_s21 + $0x144] ss:$16 sps:$4 sm:$0xff]   ;;  %v1952_v25 = vld [vmem:[%s2090_s21 + $0x28c] ss:$16 sps:$4 sm:$0xff]  }
  0x2a   : > { %1052 = vmatpush1.bf16.msra.mxu1 %v1874_v27  ;;  %1012 = vmatprep.subr.bf16.mxu0 %v1875_v28  ;;  %v353_v61 = vcombine.high %v351_v58, %v351_v58  ;;  %v1913_v63 = vld [vmem:[%s2090_s21 + $0x344] ss:$16 sps:$4 sm:$0xff]   ;;  %v1915_v0 = vld [vmem:[%s2090_s21 + $0x140] ss:$16 sps:$4 sm:$0xff]   ;;  %v1947_v26 = vld [vmem:[%s2090_s21 + $0x88] ss:$16 sps:$4 sm:$0xff]  }
  0x2b   : > { %1053 = vmatprep.subr.bf16.mxu1 %v1877_v29  ;;  %1030 = vmatprep.mubr.bf16.mxu0 %v351_v58  ;;  %v1916_v1 = vld [vmem:[%s2090_s21 + $0x340] ss:$16 sps:$4 sm:$0xff]   ;;  %v1917_v2 = vld [vmem:[%s2090_s21 + $0x124] ss:$16 sps:$4 sm:$0xff]   ;;  %v1950_v27 = vld [vmem:[%s2090_s21 + $0x288] ss:$16 sps:$4 sm:$0xff]  }
  0x2c   : > { %1071 = vmatprep.mubr.bf16.mxu1 %v353_v61  ;;  %v1919_v3 = vld [vmem:[%s2090_s21 + $0x324] ss:$16 sps:$4 sm:$0xff]   ;;  %v1921_v4 = vld [vmem:[%s2090_s21 + $0x120] ss:$16 sps:$4 sm:$0xff]   ;;  %v1955_v28 = vld [vmem:[%s2090_s21 + $0x6c] ss:$16 sps:$4 sm:$0xff]  }
  0x2d   : > { %1013 = vmatpush1.bf16.msra.mxu0 %v1879_v30  ;;  %v1922_v5 = vld [vmem:[%s2090_s21 + $0x320] ss:$16 sps:$4 sm:$0xff]   ;;  %v1923_v6 = vld [vmem:[%s2090_s21 + $0x104] ss:$16 sps:$4 sm:$0xff]   ;;  %v1958_v29 = vld [vmem:[%s2090_s21 + $0x26c] ss:$16 sps:$4 sm:$0xff]  }
  0x2e   : > { %1054 = vmatpush1.bf16.msra.mxu1 %v1880_v31  ;;  %1014 = vmatprep.subr.bf16.mxu0 %v1881_v32  ;;  %v1925_v7 = vld [vmem:[%s2090_s21 + $0x304] ss:$16 sps:$4 sm:$0xff]   ;;  %v1927_v8 = vld [vmem:[%s2090_s21 + $0x100] ss:$16 sps:$4 sm:$0xff]   ;;  %v1953_v30 = vld [vmem:[%s2090_s21 + $0x68] ss:$16 sps:$4 sm:$0xff]  }
  0x2f   : > { %1055 = vmatprep.subr.bf16.mxu1 %v1883_v33  ;;  %v1928_v10 = vld [vmem:[%s2090_s21 + $0x300] ss:$16 sps:$4 sm:$0xff]   ;;  %v1956_v31 = vld [vmem:[%s2090_s21 + $0x268] ss:$16 sps:$4 sm:$0xff]   ;;  %v1961_v32 = vld [vmem:[%s2090_s21 + $0x4c] ss:$16 sps:$4 sm:$0xff]  }
  0x30   : > { %v1964_v33 = vld [vmem:[%s2090_s21 + $0x24c] ss:$16 sps:$4 sm:$0xff]   ;;  %v1983_v51 = vld [vmem:[%s2090_s21 + $0x1c8] ss:$16 sps:$4 sm:$0xff]  }
  0x31   : > { %1015 = vmatpush2.bf16.msra.mxu0 %v1885_v34  ;;  %v1959_v34 = vld [vmem:[%s2090_s21 + $0x48] ss:$16 sps:$4 sm:$0xff]  }
  0x32   : > { %1056 = vmatpush2.bf16.msra.mxu1 %v1886_v35  ;;  %1016 = vmatprep.subr.bf16.mxu0 %v1887_v36  ;;  %v1962_v35 = vld [vmem:[%s2090_s21 + $0x248] ss:$16 sps:$4 sm:$0xff]   ;;  %v1967_v36 = vld [vmem:[%s2090_s21 + $0x2c] ss:$16 sps:$4 sm:$0xff]  }
  0x33   : > { %1057 = vmatprep.subr.bf16.mxu1 %v1889_v37  ;;  %v1970_v37 = vld [vmem:[%s2090_s21 + $0x22c] ss:$16 sps:$4 sm:$0xff]   ;;  %v1986_v52 = vld [vmem:[%s2090_s21 + $0x3c8] ss:$16 sps:$4 sm:$0xff]  }
  0x34   : > { %v1989_v55 = vld [vmem:[%s2090_s21 + $0x1a8] ss:$16 sps:$4 sm:$0xff]  }
  0x35   : > { %1017 = vmatpush2.bf16.msra.mxu0 %v1891_v41  ;;  %v1976_v41 = vld [vmem:[%s2090_s21 + $0x20c] ss:$16 sps:$4 sm:$0xff]  }
  0x36   : > { %1058 = vmatpush2.bf16.msra.mxu1 %v1892_v42  ;;  %1018 = vmatprep.subr.bf16.mxu0 %v1893_v43  ;;  %v1971_v42 = vld [vmem:[%s2090_s21 + $0x8] ss:$16 sps:$4 sm:$0xff]  }
  0x37   : > { %1059 = vmatprep.subr.bf16.mxu1 %v1895_v44  ;;  %v1974_v43 = vld [vmem:[%s2090_s21 + $0x208] ss:$16 sps:$4 sm:$0xff]   ;;  %v1979_v44 = vld [vmem:[%s2090_s21 + $0x1ec] ss:$16 sps:$4 sm:$0xff]  }
  0x39   : > { %1019 = vmatpush2.bf16.msra.mxu0 %v1897_v47  ;;  %v1977_v47 = vld [vmem:[%s2090_s21 + $0x1e8] ss:$16 sps:$4 sm:$0xff]  }
  0x3a   : > { %1060 = vmatpush2.bf16.msra.mxu1 %v1898_v48  ;;  %1020 = vmatprep.subr.bf16.mxu0 %v1899_v49  ;;  %v1980_v48 = vld [vmem:[%s2090_s21 + $0x3e8] ss:$16 sps:$4 sm:$0xff]   ;;  %v1985_v49 = vld [vmem:[%s2090_s21 + $0x1cc] ss:$16 sps:$4 sm:$0xff]  }
  0x3b   : > { %1061 = vmatprep.subr.bf16.mxu1 %v1901_v50  ;;  %v1988_v50 = vld [vmem:[%s2090_s21 + $0x3cc] ss:$16 sps:$4 sm:$0xff]  }
  0x3d   : > { %1021 = vmatpush2.bf16.msra.mxu0 %v1903_v53  ;;  %v1991_v53 = vld [vmem:[%s2090_s21 + $0x1ac] ss:$16 sps:$4 sm:$0xff]  }
  0x3e   : > { %1062 = vmatpush2.bf16.msra.mxu1 %v1904_v54  ;;  %1022 = vmatprep.subr.bf16.mxu0 %v1905_v56  ;;  %v1994_v54 = vld [vmem:[%s2090_s21 + $0x3ac] ss:$16 sps:$4 sm:$0xff]   ;;  %v1992_v56 = vld [vmem:[%s2090_s21 + $0x3a8] ss:$16 sps:$4 sm:$0xff]  }
  0x3f   : > { %1063 = vmatprep.subr.bf16.mxu1 %v1907_v57  ;;  %v1997_v57 = vld [vmem:[%s2090_s21 + $0x18c] ss:$16 sps:$4 sm:$0xff]  }
  0x41   : > { %1023 = vmatpush2.bf16.msra.mxu0 %v1909_v59  ;;  %v1995_v59 = vld [vmem:[%s2090_s21 + $0x188] ss:$16 sps:$4 sm:$0xff]  }
  0x42   : > { %1064 = vmatpush2.bf16.msra.mxu1 %v1910_v60  ;;  %1024 = vmatprep.subr.bf16.mxu0 %v1911_v62  ;;  %v1998_v60 = vld [vmem:[%s2090_s21 + $0x388] ss:$16 sps:$4 sm:$0xff]   ;;  %v2006_v62 = vld [vmem:[%s2090_s21 + $0x36c] ss:$16 sps:$4 sm:$0xff]  }
  0x43   : > { %1065 = vmatprep.subr.bf16.mxu1 %v1913_v63  ;;  %v2001_v63 = vld [vmem:[%s2090_s21 + $0x168] ss:$16 sps:$4 sm:$0xff]  }
  0x45   : > { %1025 = vmatpush2.bf16.msra.mxu0 %v1915_v0  ;;  %v2004_v0 = vld [vmem:[%s2090_s21 + $0x368] ss:$16 sps:$4 sm:$0xff]  }
  0x46   : > { %1066 = vmatpush2.bf16.msra.mxu1 %v1916_v1  ;;  %1026 = vmatprep.subr.bf16.mxu0 %v1917_v2  ;;  %v2009_v1 = vld [vmem:[%s2090_s21 + $0x14c] ss:$16 sps:$4 sm:$0xff]  }
  0x47   : > { %1067 = vmatprep.subr.bf16.mxu1 %v1919_v3  ;;  %v2012_v2 = vld [vmem:[%s2090_s21 + $0x34c] ss:$16 sps:$4 sm:$0xff]   ;;  %v2007_v3 = vld [vmem:[%s2090_s21 + $0x148] ss:$16 sps:$4 sm:$0xff]  }
  0x49   : > { %1027 = vmatpush2.bf16.msra.mxu0 %v1921_v4  ;;  %v2010_v4 = vld [vmem:[%s2090_s21 + $0x348] ss:$16 sps:$4 sm:$0xff]  }
  0x4a   : > { %1068 = vmatpush2.bf16.msra.mxu1 %v1922_v5  ;;  %1028 = vmatprep.subr.bf16.mxu0 %v1923_v6  ;;  %v2015_v5 = vld [vmem:[%s2090_s21 + $0x12c] ss:$16 sps:$4 sm:$0xff]  }
  0x4b   : > { %1069 = vmatprep.subr.bf16.mxu1 %v1925_v7  ;;  %v2018_v6 = vld [vmem:[%s2090_s21 + $0x32c] ss:$16 sps:$4 sm:$0xff]   ;;  %v2013_v7 = vld [vmem:[%s2090_s21 + $0x128] ss:$16 sps:$4 sm:$0xff]  }
  0x4d   : > { %1029 = vmatpush2.bf16.msra.mxu0 %v1927_v8  ;;  %v2016_v8 = vld [vmem:[%s2090_s21 + $0x328] ss:$16 sps:$4 sm:$0xff]  }
  0x4e   : > { %1070 = vmatpush2.bf16.msra.mxu1 %v1928_v10  ;;  %1080 = vmatprep.subr.bf16.mxu0 %v1931_v11  ;;  %v2021_v10 = vld [vmem:[%s2090_s21 + $0x10c] ss:$16 sps:$4 sm:$0xff]  }
  0x4f   : > { %1121 = vmatprep.subr.bf16.mxu1 %v1934_v12  ;;  %v2024_v11 = vld [vmem:[%s2090_s21 + $0x30c] ss:$16 sps:$4 sm:$0xff]   ;;  %v2019_v12 = vld [vmem:[%s2090_s21 + $0x108] ss:$16 sps:$4 sm:$0xff]  }
  0x50   : > { %1031 = vmatmul.mubr.bf16.vlgmr.msra.gmra.mxu0 %v2162_v9 }
  0x51   : > { %1072 = vmatmul.mubr.bf16.vlgmr.msra.gmra.mxu1 %v2169_v13  ;;  %1081 = vmatpush1.bf16.msra.mxu0 %v1929_v14  ;;  %v2022_v14 = vld [vmem:[%s2090_s21 + $0x308] ss:$16 sps:$4 sm:$0xff]  }
  0x52   : > { %1122 = vmatpush1.bf16.msra.mxu1 %v1932_v15  ;;  %1082 = vmatprep.subr.bf16.mxu0 %v1937_v16 }
  0x53   : > { %1123 = vmatprep.subr.bf16.mxu1 %v1940_v17  ;;  %1112 = vmatprep.mubr.bf16.mxu0 %v351_v58  ;;  %v2000_v58 = vld [vmem:[%s2090_s21 + $0x38c] ss:$16 sps:$4 sm:$0xff]  }
  0x54   : > { %1153 = vmatprep.mubr.bf16.mxu1 %v353_v61  ;;  %v2003_v61 = vld [vmem:[%s2090_s21 + $0x16c] ss:$16 sps:$4 sm:$0xff]  }
  0x55   : > { %1083 = vmatpush1.bf16.msra.mxu0 %v1935_v18 }
  0x56   : > { %1124 = vmatpush1.bf16.msra.mxu1 %v1938_v19  ;;  %1084 = vmatprep.subr.bf16.mxu0 %v1943_v20 }
  0x57   : > { %1125 = vmatprep.subr.bf16.mxu1 %v1946_v21 }
  0x59   : > { %1085 = vmatpush1.bf16.msra.mxu0 %v1941_v22 }
  0x5a   : > { %1126 = vmatpush1.bf16.msra.mxu1 %v1944_v23  ;;  %1086 = vmatprep.subr.bf16.mxu0 %v1949_v24 }
  0x5b   : > { %1127 = vmatprep.subr.bf16.mxu1 %v1952_v25 }
  0x5d   : > { %1087 = vmatpush1.bf16.msra.mxu0 %v1947_v26  ;;  %v2046_v26 = vmov 1983009808  }
  0x5e   : > { %1128 = vmatpush1.bf16.msra.mxu1 %v1950_v27  ;;  %1088 = vmatprep.subr.bf16.mxu0 %v1955_v28  ;;  %v1169_v27 = vunpack.c.l.s4 %v2046_v26 }
  0x5f   : > { %1129 = vmatprep.subr.bf16.mxu1 %v1958_v29 }
  0x60   : > { %v1170_v28 = vunpack.c.0.s8 %v1169_v27 }
  0x61   : > { %1089 = vmatpush1.bf16.msra.mxu0 %v1953_v30 }
  0x62   : > { %1130 = vmatpush1.bf16.msra.mxu1 %v1956_v31  ;;  %1090 = vmatprep.subr.bf16.mxu0 %v1961_v32 }
  0x63   : > { %1131 = vmatprep.subr.bf16.mxu1 %v1964_v33 }
  0x65   : > { %1091 = vmatpush1.bf16.msra.mxu0 %v1959_v34 }
  0x66   : > { %1132 = vmatpush1.bf16.msra.mxu1 %v1962_v35  ;;  %1092 = vmatprep.subr.bf16.mxu0 %v1967_v36 }
  0x67   : > { %1133 = vmatprep.subr.bf16.mxu1 %v1970_v37 }
  0x69   : > { %1093 = vmatpush1.bf16.msra.mxu0 %v1965_v38 }
  0x6a   : > { %1134 = vmatpush1.bf16.msra.mxu1 %v1968_v39  ;;  %1094 = vmatprep.subr.bf16.mxu0 %v1973_v40 }
  0x6b   : > { %1135 = vmatprep.subr.bf16.mxu1 %v1976_v41 }
  0x6d   : > { %1095 = vmatpush1.bf16.msra.mxu0 %v1971_v42 }
  0x6e   : > { %1136 = vmatpush1.bf16.msra.mxu1 %v1974_v43  ;;  %1096 = vmatprep.subr.bf16.mxu0 %v1979_v44 }
  0x6f   : > { %1137 = vmatprep.subr.bf16.mxu1 %v1982_v45 }
  0x71   : > { %1097 = vmatpush2.bf16.msra.mxu0 %v1977_v47 }
  0x72   : > { %1138 = vmatpush2.bf16.msra.mxu1 %v1980_v48  ;;  %1098 = vmatprep.subr.bf16.mxu0 %v1985_v49 }
  0x73   : > { %1139 = vmatprep.subr.bf16.mxu1 %v1988_v50 }
  0x75   : > { %1099 = vmatpush2.bf16.msra.mxu0 %v1983_v51 }
  0x76   : > { %1140 = vmatpush2.bf16.msra.mxu1 %v1986_v52  ;;  %1100 = vmatprep.subr.bf16.mxu0 %v1991_v53 }
  0x77   : > { %1141 = vmatprep.subr.bf16.mxu1 %v1994_v54 }
  0x79   : > { %1101 = vmatpush2.bf16.msra.mxu0 %v1989_v55 }
  0x7a   : > { %1142 = vmatpush2.bf16.msra.mxu1 %v1992_v56  ;;  %1102 = vmatprep.subr.bf16.mxu0 %v1997_v57 }
  0x7b   : > { %1143 = vmatprep.subr.bf16.mxu1 %v2000_v58 }
  0x7d   : > { %1103 = vmatpush2.bf16.msra.mxu0 %v1995_v59 }
  0x7e   : > { %1144 = vmatpush2.bf16.msra.mxu1 %v1998_v60  ;;  %1104 = vmatprep.subr.bf16.mxu0 %v2003_v61 }
  0x7f   : > { %1145 = vmatprep.subr.bf16.mxu1 %v2006_v62 }
  0x81   : > { %1105 = vmatpush2.bf16.msra.mxu0 %v2001_v63 }
  0x82   : > { %1146 = vmatpush2.bf16.msra.mxu1 %v2004_v0  ;;  %1106 = vmatprep.subr.bf16.mxu0 %v2009_v1 }
  0x83   : > { %1147 = vmatprep.subr.bf16.mxu1 %v2012_v2 }
  0x85   : > { %1107 = vmatpush2.bf16.msra.mxu0 %v2007_v3 }
  0x86   : > { %1148 = vmatpush2.bf16.msra.mxu1 %v2010_v4  ;;  %1108 = vmatprep.subr.bf16.mxu0 %v2015_v5 }
  0x87   : > { %1149 = vmatprep.subr.bf16.mxu1 %v2018_v6 }
  0x89   : > { %1109 = vmatpush2.bf16.msra.mxu0 %v2013_v7 }
  0x8a   : > { %1150 = vmatpush2.bf16.msra.mxu1 %v2016_v8  ;;  %1110 = vmatprep.subr.bf16.mxu0 %v2021_v10 }
  0x8b   : > { %1151 = vmatprep.subr.bf16.mxu1 %v2024_v11 }
  0x8d   : > { %1111 = vmatpush2.bf16.msra.mxu0 %v2019_v12 }
  0x8e   : > { %1152 = vmatpush2.bf16.msra.mxu1 %v2022_v14 }
  0x90   : > { %1113 = vmatmul.mubr.bf16.vlgmr.msra.gmra.mxu0 %v2162_v9 }
  0x91   : > { %1154 = vmatmul.mubr.bf16.vlgmr.msra.gmra.mxu1 %v2169_v13  ;;  %v2238_v13 = vsub.s32 %v1170_v28, %v2135_v46 }
 0x110   : > { %v1032_v15 = vpop.f32.mrf.mxu0 }
 0x111   : > { %v1073_v16 = vpop.f32.mrf.mxu1 }
 0x112   : > { %v1074_v17 = vadd.f32 %v1073_v16, %v1032_v15  ;;  %v1034_v18 = vpop.f32.mrf.mxu0 }
 0x113   : > { %v1075_v19 = vpop.f32.mrf.mxu1 }
 0x114   : > { %v1076_v20 = vadd.f32 %v1075_v19, %v1034_v18  ;;  %v1036_v21 = vpop.f32.mrf.mxu0 }
 0x115   : > { %v1077_v22 = vpop.f32.mrf.mxu1 }
 0x116   : > { %v1166_v23 = vcombine.low %v1074_v17, %v1076_v20  ;;  %v1037_v24 = vpop.f32.mrf.mxu0 }
 0x117   : > { %v1078_v25 = vpop.f32.mrf.mxu1 }
 0x118   : > { %v1174_v39 = vrot.slane %v1166_v23, %v2238_v13 }
 0x150   : > { %v1114_v29 = vpop.f32.mrf.mxu0 }
 0x151   : > { %v1155_v30 = vpop.f32.mrf.mxu1 }
 0x152   : > { %v1116_v9 = vpop.f32.mrf.mxu0  ;;  %v1156_v32 = vadd.f32 %v1155_v30, %v1114_v29 }
 0x153   : > { %v1157_v31 = vpop.f32.mrf.mxu1 }
 0x154   : > { %v1158_v33 = vadd.f32 %v1157_v31, %v1116_v9  ;;  %v1118_v34 = vpop.f32.mrf.mxu0 }
 0x155   : > { %v1159_v35 = vpop.f32.mrf.mxu1 }
 0x156   : > { %v1167_v36 = vcombine.low %v1156_v32, %v1158_v33  ;;  %v1119_v37 = vpop.f32.mrf.mxu0 }
 0x157   : > { %v1160_v38 = vpop.f32.mrf.mxu1 }
 0x158   : > { %v1181_v40 = vrot.slane %v1167_v36, %v2238_v13  ;;  %1191 = sbr.rel (%p1818_p4) target bundleno = 458 (0x1ca), region = 40 }
 0x15a   : > { %v1182_v41 = vcombine.low %v1174_v39, %v1181_v40 }
 0x15c   : > { %1187 = vst [vmem:[%s1186_s29] sm:$0xff] %v1182_v41 }
 0x15d   : > { %vm1284_vm0 = vcmask 1041408  }
 0x163   : > { %v2250_v42 = vld [vmem:[%s2388_s4] sm:$0xff]  ;;  %v2255_v43 = vld [vmem:[%s2388_s4 + $0x8] sm:$0xff]  ;;  %v2260_v44 = vld [vmem:[%s2388_s4 + $0x10] sm:$0xff] }
 0x164   : > { %v2265_v45 = vld [vmem:[%s2388_s4 + $0x18] sm:$0xff]  ;;  %v1200_v47 = vcombine.high %v2250_v42, %v2250_v42  ;;  %v1207_v48 = vrot.slane %v2250_v42, %v2238_v13  ;;  %v1217_v49 = vcombine.high %v2255_v43, %v2255_v43  ;;  %v1224_v50 = vrot.slane %v2255_v43, %v2238_v13 }
 0x165   : > { %v1234_v51 = vcombine.high %v2260_v44, %v2260_v44  ;;  %v1241_v52 = vrot.slane %v2260_v44, %v2238_v13  ;;  %v1251_v53 = vcombine.high %v2265_v45, %v2265_v45  ;;  %v1258_v54 = vrot.slane %v2265_v45, %v2238_v13 }
 0x166   : > { %v1214_v55 = vrot.slane %v1200_v47, %v2238_v13  ;;  %v1215_v56 = vcombine.high %v1207_v48, %v1207_v48  ;;  %v1231_v57 = vrot.slane %v1217_v49, %v2238_v13  ;;  %v1232_v58 = vcombine.high %v1224_v50, %v1224_v50 }
 0x167   : > { %v1248_v59 = vrot.slane %v1234_v51, %v2238_v13  ;;  %v1249_v60 = vcombine.high %v1241_v52, %v1241_v52  ;;  %v1265_v61 = vrot.slane %v1251_v53, %v2238_v13  ;;  %v1266_v63 = vcombine.high %v1258_v54, %v1258_v54 }
 0x168   : > { %v1216_v62 = vcombine.high %v1214_v55, %v1214_v55  ;;  %v1285_v0 = vsel %vm1284_vm0, %v1207_v48, 0.0  ;;  %v1286_v1 = vsel %vm1284_vm0, %v1224_v50, 0.0  ;;  %v1233_v2 = vcombine.high %v1231_v57, %v1231_v57 }
 0x169   : > { %v1250_v3 = vcombine.high %v1248_v59, %v1248_v59  ;;  %v1287_v4 = vadd.f32 %v1286_v1, %v1285_v0  ;;  %v1288_v5 = vsel %vm1284_vm0, %v1241_v52, 0.0  ;;  %v1290_v6 = vsel %vm1284_vm0, %v1258_v54, 0.0 }
 0x16a   : > { %v1298_v7 = vsel %vm1284_vm0, %v1215_v56, 0.0  ;;  %v1299_v8 = vsel %vm1284_vm0, %v1232_v58, 0.0  ;;  %v1301_v10 = vsel %vm1284_vm0, %v1249_v60, 0.0  ;;  %v1267_v11 = vcombine.high %v1265_v61, %v1265_v61 }
 0x16b   : > { %v1289_v12 = vadd.f32 %v1288_v5, %v1287_v4  ;;  %v1300_v14 = vadd.f32 %v1299_v8, %v1298_v7  ;;  %v1311_v15 = vsel %vm1284_vm0, %v1214_v55, 0.0  ;;  %v1303_v16 = vsel %vm1284_vm0, %v1266_v63, 0.0 }
 0x16c   : > { %v1312_v17 = vsel %vm1284_vm0, %v1231_v57, 0.0  ;;  %v1314_v18 = vsel %vm1284_vm0, %v1248_v59, 0.0  ;;  %v1324_v19 = vsel %vm1284_vm0, %v1216_v62, 0.0  ;;  %v1325_v23 = vsel %vm1284_vm0, %v1233_v2, 0.0 }
 0x16d   : > { %v1291_v20 = vadd.f32 %v1290_v6, %v1289_v12  ;;  %v1302_v21 = vadd.f32 %v1301_v10, %v1300_v14  ;;  %v1313_v22 = vadd.f32 %v1312_v17, %v1311_v15  ;;  %v1316_v24 = vsel %vm1284_vm0, %v1265_v61, 0.0 }
 0x16e   : > { %v1326_v25 = vadd.f32 %v1325_v23, %v1324_v19  ;;  %v1327_v26 = vsel %vm1284_vm0, %v1250_v3, 0.0  ;;  %v1329_v30 = vsel %vm1284_vm0, %v1267_v11, 0.0 }
 0x16f   : > { %v1292_v27 = vrot.slane %v1291_v20, 4  ;;  %v1304_v28 = vadd.f32 %v1303_v16, %v1302_v21  ;;  %v1315_v29 = vadd.f32 %v1314_v18, %v1313_v22 }
 0x170   : > { %v1328_v9 = vadd.f32 %v1327_v26, %v1326_v25 }
 0x171   : > { %v1293_v31 = vadd.f32 %v1292_v27, %v1291_v20  ;;  %v1305_v32 = vrot.slane %v1304_v28, 4  ;;  %v1317_v33 = vadd.f32 %v1316_v24, %v1315_v29 }
 0x172   : > { %v1330_v34 = vadd.f32 %v1329_v30, %v1328_v9 }
 0x173   : > { %v1294_v35 = vrot.slane %v1293_v31, 2  ;;  %v1306_v36 = vadd.f32 %v1305_v32, %v1304_v28  ;;  %v1318_v37 = vrot.slane %v1317_v33, 4 }
 0x174   : > { %v1331_v38 = vrot.slane %v1330_v34, 4 }
 0x175   : > { %v1295_v39 = vadd.f32 %v1294_v35, %v1293_v31  ;;  %v1307_v40 = vrot.slane %v1306_v36, 2  ;;  %v1319_v41 = vadd.f32 %v1318_v37, %v1317_v33 }
 0x176   : > { %v1332_v47 = vadd.f32 %v1331_v38, %v1330_v34 }
 0x177   : > { %v1296_v48 = vrot.slane %v1295_v39, 1  ;;  %v1308_v49 = vadd.f32 %v1307_v40, %v1306_v36  ;;  %v1320_v50 = vrot.slane %v1319_v41, 2 }
 0x178   : > { %v1333_v51 = vrot.slane %v1332_v47, 2 }
 0x179   : > { %v1297_v52 = vadd.f32 %v1296_v48, %v1295_v39  ;;  %v1309_v53 = vrot.slane %v1308_v49, 1  ;;  %v1321_v54 = vadd.f32 %v1320_v50, %v1319_v41 }
 0x17a   : > { %v1334_v55 = vadd.f32 %v1333_v51, %v1332_v47 }
 0x17b   : > { %v1310_v56 = vadd.f32 %v1309_v53, %v1308_v49  ;;  %v1322_v57 = vrot.slane %v1321_v54, 1  ;;  %v1338_v58 = vmul.f32 0.125, %v1297_v52 }
 0x17c   : > { %v1335_v59 = vrot.slane %v1334_v55, 1 }
 0x17d   : > { %v1323_v60 = vadd.f32 %v1322_v57, %v1321_v54  ;;  %v1339_v61 = vmul.f32 0.125, %v1310_v56 }
 0x17e   : > { %v1336_v62 = vadd.f32 %v1335_v59, %v1334_v55 }
 0x17f   : > { %v1340_v63 = vmul.f32 0.125, %v1323_v60  ;;  %v1346_v0 = vcombine.low %v1338_v58, %v1339_v61 }
 0x180   : > { %v1341_v1 = vmul.f32 0.125, %v1336_v62 }
 0x181   : > { %v1354_v3 = vrot.slane %v1346_v0, %v2238_v13 }
 0x182   : > { %v1347_v2 = vcombine.low %v1340_v63, %v1341_v1 }
 0x184   : > { %v1361_v4 = vrot.slane %v1347_v2, %v2238_v13 }
 0x186   : > { %v1362_v5 = vcombine.low %v1354_v3, %v1361_v4 }
 0x188   : > { %v2306_v6 = vsub.f32 %v2250_v42, %v1362_v5  ;;  %v2309_v7 = vsub.f32 %v2255_v43, %v1362_v5  ;;  %v2312_v8 = vsub.f32 %v2260_v44, %v1362_v5  ;;  %v2315_v10 = vsub.f32 %v2265_v45, %v1362_v5 }
 0x18a   : > { %v1368_v11 = vmul.f32 %v2306_v6, %v2306_v6  ;;  %v1369_v12 = vmul.f32 %v2309_v7, %v2309_v7  ;;  %v1370_v14 = vmul.f32 %v2312_v8, %v2312_v8  ;;  %v1371_v42 = vmul.f32 %v2315_v10, %v2315_v10 }
 0x18c   : > { %v1376_v43 = vcombine.high %v1368_v11, %v1368_v11  ;;  %v1383_v15 = vrot.slane %v1368_v11, %v2238_v13  ;;  %v1393_v44 = vcombine.high %v1369_v12, %v1369_v12  ;;  %v1400_v16 = vrot.slane %v1369_v12, %v2238_v13 }
 0x18d   : > { %v1410_v45 = vcombine.high %v1370_v14, %v1370_v14  ;;  %v1417_v17 = vrot.slane %v1370_v14, %v2238_v13  ;;  %v1427_v18 = vcombine.high %v1371_v42, %v1371_v42  ;;  %v1434_v19 = vrot.slane %v1371_v42, %v2238_v13 }
 0x18e   : > { %v1390_v20 = vrot.slane %v1376_v43, %v2238_v13  ;;  %v1391_v21 = vcombine.high %v1383_v15, %v1383_v15  ;;  %v1407_v22 = vrot.slane %v1393_v44, %v2238_v13  ;;  %v1408_v23 = vcombine.high %v1400_v16, %v1400_v16 }
 0x18f   : > { %v1424_v24 = vrot.slane %v1410_v45, %v2238_v13  ;;  %v1425_v25 = vcombine.high %v1417_v17, %v1417_v17  ;;  %v1441_v26 = vrot.slane %v1427_v18, %v2238_v13  ;;  %v1442_v28 = vcombine.high %v1434_v19, %v1434_v19 }
 0x190   : > { %v1392_v27 = vcombine.high %v1390_v20, %v1390_v20  ;;  %v1460_v29 = vsel %vm1284_vm0, %v1383_v15, 0.0  ;;  %v1461_v30 = vsel %vm1284_vm0, %v1400_v16, 0.0  ;;  %v1409_v9 = vcombine.high %v1407_v22, %v1407_v22 }
 0x191   : > { %v1426_v31 = vcombine.high %v1424_v24, %v1424_v24  ;;  %v1462_v32 = vadd.f32 %v1461_v30, %v1460_v29  ;;  %v1463_v33 = vsel %vm1284_vm0, %v1417_v17, 0.0  ;;  %v1465_v34 = vsel %vm1284_vm0, %v1434_v19, 0.0 }
 0x192   : > { %v1473_v35 = vsel %vm1284_vm0, %v1391_v21, 0.0  ;;  %v1474_v36 = vsel %vm1284_vm0, %v1408_v23, 0.0  ;;  %v1476_v37 = vsel %vm1284_vm0, %v1425_v25, 0.0  ;;  %v1443_v38 = vcombine.high %v1441_v26, %v1441_v26 }
 0x193   : > { %v1464_v39 = vadd.f32 %v1463_v33, %v1462_v32  ;;  %v1475_v40 = vadd.f32 %v1474_v36, %v1473_v35  ;;  %v1486_v41 = vsel %vm1284_vm0, %v1390_v20, 0.0  ;;  %v1478_v47 = vsel %vm1284_vm0, %v1442_v28, 0.0 }
 0x194   : > { %v1487_v48 = vsel %vm1284_vm0, %v1407_v22, 0.0  ;;  %v1489_v49 = vsel %vm1284_vm0, %v1424_v24, 0.0  ;;  %v1499_v50 = vsel %vm1284_vm0, %v1392_v27, 0.0  ;;  %v1500_v54 = vsel %vm1284_vm0, %v1409_v9, 0.0 }
 0x195   : > { %v1466_v51 = vadd.f32 %v1465_v34, %v1464_v39  ;;  %v1477_v52 = vadd.f32 %v1476_v37, %v1475_v40  ;;  %v1488_v53 = vadd.f32 %v1487_v48, %v1486_v41  ;;  %v1491_v55 = vsel %vm1284_vm0, %v1441_v26, 0.0  ;;  %v1550_v37 = vld [vmem:[%s2386_s2] sm:$0xf] }
 0x196   : > { %v1501_v56 = vadd.f32 %v1500_v54, %v1499_v50  ;;  %v1502_v57 = vsel %vm1284_vm0, %v1426_v31, 0.0  ;;  %v1504_v61 = vsel %vm1284_vm0, %v1443_v38, 0.0  ;;  %v1554_v33 = vsub.s32 0, %v2135_v46  ;;  %v1590_v38 = vld [vmem:[%s2387_s3] sm:$0xf] }
 0x197   : > { %v1467_v58 = vrot.slane %v1466_v51, 4  ;;  %v1479_v59 = vadd.f32 %v1478_v47, %v1477_v52  ;;  %v1490_v60 = vadd.f32 %v1489_v49, %v1488_v53  ;;  %v1558_v34 = vsub.s32 1, %v2135_v46 }
 0x198   : > { %v1503_v62 = vadd.f32 %v1502_v57, %v1501_v56  ;;  %v1562_v35 = vsub.s32 2, %v2135_v46  ;;  %v1566_v36 = vsub.s32 3, %v2135_v46  ;;  %v1555_v39 = vrot.slane %v1550_v37, %v1554_v33 }
 0x199   : > { %v1468_v63 = vadd.f32 %v1467_v58, %v1466_v51  ;;  %v1480_v0 = vrot.slane %v1479_v59, 4  ;;  %v1492_v1 = vadd.f32 %v1491_v55, %v1490_v60  ;;  %v1559_v40 = vrot.slane %v1550_v37, %v1558_v34 }
 0x19a   : > { %v1505_v2 = vadd.f32 %v1504_v61, %v1503_v62  ;;  %v1563_v41 = vrot.slane %v1550_v37, %v1562_v35  ;;  %v1567_v47 = vrot.slane %v1550_v37, %v1566_v36  ;;  %v1595_v48 = vrot.slane %v1590_v38, %v1554_v33 }
 0x19b   : > { %v1469_v3 = vrot.slane %v1468_v63, 2  ;;  %v1481_v4 = vadd.f32 %v1480_v0, %v1479_v59  ;;  %v1493_v5 = vrot.slane %v1492_v1, 4  ;;  %v1599_v49 = vrot.slane %v1590_v38, %v1558_v34 }
 0x19c   : > { %v1506_v11 = vrot.slane %v1505_v2, 4  ;;  %v1603_v50 = vrot.slane %v1590_v38, %v1562_v35  ;;  %v1607_v51 = vrot.slane %v1590_v38, %v1566_v36  ;;  %v1568_v54 = vcombine.low %v1555_v39, %v1559_v40 }
 0x19d   : > { %v1470_v12 = vadd.f32 %v1469_v3, %v1468_v63  ;;  %v1482_v14 = vrot.slane %v1481_v4, 2  ;;  %v1494_v42 = vadd.f32 %v1493_v5, %v1492_v1  ;;  %v1569_v46 = vcombine.low %v1563_v41, %v1567_v47 }
 0x19e   : > { %v1507_v43 = vadd.f32 %v1506_v11, %v1505_v2  ;;  %v1608_v56 = vcombine.low %v1595_v48, %v1599_v49  ;;  %v1609_v57 = vcombine.low %v1603_v50, %v1607_v51  ;;  %v1576_v62 = vrot.slane %v1568_v54, %v2238_v13 }
 0x19f   : > { %v1471_v15 = vrot.slane %v1470_v12, 1  ;;  %v1483_v44 = vadd.f32 %v1482_v14, %v1481_v4  ;;  %v1495_v16 = vrot.slane %v1494_v42, 2  ;;  %v1583_v63 = vrot.slane %v1569_v46, %v2238_v13 }
 0x1a0   : > { %v1508_v45 = vrot.slane %v1507_v43, 2  ;;  %v1616_v0 = vrot.slane %v1608_v56, %v2238_v13  ;;  %v1623_v1 = vrot.slane %v1609_v57, %v2238_v13 }
 0x1a1   : > { %v1472_v17 = vadd.f32 %v1471_v15, %v1470_v12  ;;  %v1484_v18 = vrot.slane %v1483_v44, 1  ;;  %v1496_v19 = vadd.f32 %v1495_v16, %v1494_v42  ;;  %v1584_v4 = vcombine.low %v1576_v62, %v1583_v63 }
 0x1a2   : > { %v1509_v20 = vadd.f32 %v1508_v45, %v1507_v43  ;;  %v1624_v5 = vcombine.low %v1616_v0, %v1623_v1 }
 0x1a3   : > { %v1485_v21 = vadd.f32 %v1484_v18, %v1483_v44  ;;  %v1497_v22 = vrot.slane %v1496_v19, 1  ;;  %v1512_v23 = vmul.f32 0.125, %v1472_v17 }
 0x1a4   : > { %v1510_v24 = vrot.slane %v1509_v20, 1 }
 0x1a5   : > { %v1498_v25 = vadd.f32 %v1497_v22, %v1496_v19  ;;  %v1513_v26 = vmul.f32 0.125, %v1485_v21  ;;  %v1516_v27 = vadd.f32 1e-05, %v1512_v23 }
 0x1a6   : > { %v1511_v28 = vadd.f32 %v1510_v24, %v1509_v20 }
 0x1a7   : > { %v1514_v29 = vmul.f32 0.125, %v1498_v25  ;;  %v1517_v30 = vadd.f32 1e-05, %v1513_v26  ;;  %2029 = vrsqrt.f32 %v1516_v27 }
 0x1a8   : > { %v1515_v9 = vmul.f32 0.125, %v1511_v28 }
 0x1a9   : > { %v1518_v31 = vadd.f32 1e-05, %v1514_v29  ;;  %2031 = vrsqrt.f32 %v1517_v30 }
 0x1aa   : > { %v1519_v32 = vadd.f32 1e-05, %v1515_v9 }
 0x1ab   : > { %2033 = vrsqrt.f32 %v1518_v31 }
 0x1ac   : > { %2035 = vrsqrt.f32 %v1519_v32 }
 0x1b4   : > { %v2030_v52 = vpop.eup %2029 }
 0x1b6   : > { %v2032_v53 = vpop.eup %2031 }
 0x1b7   : > { %v1528_v55 = vcombine.low %v2030_v52, %v2032_v53 }
 0x1b8   : > { %v2034_v58 = vpop.eup %2033 }
 0x1b9   : > { %v2036_v59 = vpop.eup %2035  ;;  %v1536_v61 = vrot.slane %v1528_v55, %v2238_v13 }
 0x1ba   : > { %v1529_v60 = vcombine.low %v2034_v58, %v2036_v59 }
 0x1bc   : > { %v1543_v2 = vrot.slane %v1529_v60, %v2238_v13 }
 0x1be   : > { %v1544_v3 = vcombine.low %v1536_v61, %v1543_v2 }
 0x1c0   : > { %v1546_v11 = vmul.f32 %v1544_v3, %v2306_v6  ;;  %v1547_v12 = vmul.f32 %v1544_v3, %v2309_v7  ;;  %v1548_v14 = vmul.f32 %v1544_v3, %v2312_v8  ;;  %v1549_v42 = vmul.f32 %v1544_v3, %v2315_v10 }
 0x1c2   : > { %v1586_v43 = vmul.f32 %v1584_v4, %v1546_v11  ;;  %v1587_v15 = vmul.f32 %v1584_v4, %v1547_v12  ;;  %v1588_v44 = vmul.f32 %v1584_v4, %v1548_v14  ;;  %v1589_v16 = vmul.f32 %v1584_v4, %v1549_v42 }
 0x1c4   : > { %v1626_v45 = vadd.f32 %v1624_v5, %v1586_v43  ;;  %v1627_v17 = vadd.f32 %v1624_v5, %v1587_v15  ;;  %v1628_v18 = vadd.f32 %v1624_v5, %v1588_v44  ;;  %v1629_v19 = vadd.f32 %v1624_v5, %v1589_v16 }
 0x1c6   : > { %v1630_v13 = vmax.f32 %v1626_v45, 0.0  ;;  %v1631_v20 = vmax.f32 %v1627_v17, 0.0  ;;  %v1632_v21 = vmax.f32 %v1628_v18, 0.0  ;;  %v1633_v22 = vmax.f32 %v1629_v19, 0.0 }
 0x1c8   : > { %1634 = vst [vmem:[%s2388_s4] sm:$0xff] %v1630_v13  ;;  %1635 = vst [vmem:[%s2388_s4 + $0x8] sm:$0xff] %v1631_v20 }
 0x1c9   : > { %1636 = vst [vmem:[%s2388_s4 + $0x10] sm:$0xff] %v1632_v21  ;;  %1637 = vst [vmem:[%s2388_s4 + $0x18] sm:$0xff] %v1633_v22 }
 0x1ca PF: > { %s14_s15 = sadd.s32 1, %s2043_s15  }
 0x1cb   : > { %p11_p5 = scmp.ge.s32.totalorder %s14_s15, 6  }
 0x1cd   :  { %13 = sbr.rel (!%p11_p5) target bundleno = 1 (0x1), region = 70 }

// kernel: generator_forward.6
= control target key start
LH: loop header
LB: loop body
LE: loop exit
PB: predicated region body
PF: predicated region fallthrough
CT: control target
= control target key end

     0   :  { %s3048_s15 = smov 0   ;;  %s3436_s0 = inlined_call_operand.vmem [shape: bf16[4,8,2048], index: 0, kind: input, shape index: {}]   ;;  %s3437_s1 = inlined_call_operand.vmem [shape: bf16[4,2048,256], index: 1, kind: input, shape index: {}]   ;;  %s3438_s2 = inlined_call_operand.vmem [shape: f32[1,256], index: 2, kind: input, shape index: {}]   ;;  %s3439_s3 = inlined_call_operand.vmem [shape: f32[1,256], index: 3, kind: input, shape index: {}]   ;;  %s3440_s4 = inlined_call_operand.vmem [shape: f32[4,8,256], index: 4, kind: output, shape index: {}]  }
   0x1 LB: > { %s3054_s16 = sadd.s32 4294967295, %s3021_s15   ;;  %p2318_p0 = scmp.ge.s32.totalorder %s3021_s15, 1  ;;  %s3021_s15 = sphi %s3048_s15, %s14_s15  }
   0x2   : > { %p167_p1 = scmp.lt.s32.totalorder %s3021_s15, 5 }
   0x4   : > { %p168_p2 = pnand %p2318_p0, %p167_p1 }
   0x5   : > { %p193_p3 = scmp.lt.s32.totalorder (!%p168_p2), %s3054_s16, 3  ;;  %s2602_s26 = sshll.u32 (!%p168_p2), %s3054_s16, 4 }
   0x6   : > { %171 = sbr.rel (%p168_p2) target bundleno = 551 (0x227), region = 36  ;;  %s2133_s29 = scalar_lea.vmem (!%p168_p2), %s3440_s4, %s2602_s26 }
   0x7   : > { %p2597_p4 = scmp.ne.s32.totalorder (!%p168_p2), %s3054_s16, 3 }
   0xb   : > { %s3060_s17 = scalar_select %p193_p3, %s3054_s16, 3 }
   0xd   : > { %s2601_s18 = sshll.u32 %s3060_s17, 11  ;;  %s2600_s22 = sshll.u32 %s3060_s17, 6 }
   0xe   : > { %s3066_s21 = scalar_lea.vmem %s3437_s1, %s2601_s18  ;;  %s3116_s25 = scalar_lea.vmem %s3436_s0, %s2600_s22 }
   0xf   : > { %v2611_v0 = vld [vmem:[%s3066_s21 + $0x74] ss:$8 sps:$4 sm:$0xff]   ;;  %v2615_v2 = vld [vmem:[%s3066_s21 + $0x70] ss:$8 sps:$4 sm:$0xff]   ;;  %v2617_v4 = vld [vmem:[%s3066_s21 + $0x64] ss:$8 sps:$4 sm:$0xff]  }
  0x10   : > { %v2613_v1 = vld [vmem:[%s3066_s21 + $0x174] ss:$8 sps:$4 sm:$0xff]   ;;  %1803 = vmatprep.subr.bf16.mxu0 %v2611_v0  ;;  %v2616_v3 = vld [vmem:[%s3066_s21 + $0x170] ss:$8 sps:$4 sm:$0xff]   ;;  %v2619_v5 = vld [vmem:[%s3066_s21 + $0x164] ss:$8 sps:$4 sm:$0xff]  }
  0x11   : > { %1844 = vmatprep.subr.bf16.mxu1 %v2613_v1  ;;  %1804 = vmatpush1.bf16.msra.mxu0 %v2615_v2  ;;  %v2621_v6 = vld [vmem:[%s3066_s21 + $0x60] ss:$8 sps:$4 sm:$0xff]   ;;  %v2623_v8 = vld [vmem:[%s3066_s21 + $0x54] ss:$8 sps:$4 sm:$0xff]   ;;  %v2627_v10 = vld [vmem:[%s3066_s21 + $0x50] ss:$8 sps:$4 sm:$0xff]  }
  0x12   : > { %1845 = vmatpush1.bf16.msra.mxu1 %v2616_v3  ;;  %1805 = vmatprep.subr.bf16.mxu0 %v2617_v4  ;;  %v2622_v7 = vld [vmem:[%s3066_s21 + $0x160] ss:$8 sps:$4 sm:$0xff]   ;;  %v2625_v9 = vld [vmem:[%s3066_s21 + $0x154] ss:$8 sps:$4 sm:$0xff]   ;;  %v2628_v11 = vld [vmem:[%s3066_s21 + $0x150] ss:$8 sps:$4 sm:$0xff]  }
  0x13   : > { %1846 = vmatprep.subr.bf16.mxu1 %v2619_v5  ;;  %v2629_v12 = vld [vmem:[%s3066_s21 + $0x44] ss:$8 sps:$4 sm:$0xff]   ;;  %v2633_v14 = vld [vmem:[%s3066_s21 + $0x40] ss:$8 sps:$4 sm:$0xff]   ;;  %v2635_v16 = vld [vmem:[%s3066_s21 + $0x34] ss:$8 sps:$4 sm:$0xff]  }
  0x14   : > { %v2631_v13 = vld [vmem:[%s3066_s21 + $0x144] ss:$8 sps:$4 sm:$0xff]   ;;  %v2634_v15 = vld [vmem:[%s3066_s21 + $0x140] ss:$8 sps:$4 sm:$0xff]   ;;  %v2637_v17 = vld [vmem:[%s3066_s21 + $0x134] ss:$8 sps:$4 sm:$0xff]  }
  0x15   : > { %1806 = vmatpush1.bf16.msra.mxu0 %v2621_v6  ;;  %v2639_v18 = vld [vmem:[%s3066_s21 + $0x30] ss:$8 sps:$4 sm:$0xff]   ;;  %v2641_v20 = vld [vmem:[%s3066_s21 + $0x24] ss:$8 sps:$4 sm:$0xff]   ;;  %v2645_v22 = vld [vmem:[%s3066_s21 + $0x20] ss:$8 sps:$4 sm:$0xff]  }
  0x16   : > { %1847 = vmatpush1.bf16.msra.mxu1 %v2622_v7  ;;  %1807 = vmatprep.subr.bf16.mxu0 %v2623_v8  ;;  %v2640_v19 = vld [vmem:[%s3066_s21 + $0x130] ss:$8 sps:$4 sm:$0xff]   ;;  %v2643_v21 = vld [vmem:[%s3066_s21 + $0x124] ss:$8 sps:$4 sm:$0xff]   ;;  %v2646_v23 = vld [vmem:[%s3066_s21 + $0x120] ss:$8 sps:$4 sm:$0xff]  }
  0x17   : > { %1848 = vmatprep.subr.bf16.mxu1 %v2625_v9  ;;  %v2647_v24 = vld [vmem:[%s3066_s21 + $0x14] ss:$8 sps:$4 sm:$0xff]   ;;  %v2651_v26 = vld [vmem:[%s3066_s21 + $0x10] ss:$8 sps:$4 sm:$0xff]   ;;  %v2653_v28 = vld [vmem:[%s3066_s21 + $0x4] ss:$8 sps:$4 sm:$0xff]  }
  0x18   : > { %v2649_v25 = vld [vmem:[%s3066_s21 + $0x114] ss:$8 sps:$4 sm:$0xff]   ;;  %v2652_v27 = vld [vmem:[%s3066_s21 + $0x110] ss:$8 sps:$4 sm:$0xff]   ;;  %v2655_v29 = vld [vmem:[%s3066_s21 + $0x104] ss:$8 sps:$4 sm:$0xff]  }
  0x19   : > { %1808 = vmatpush1.bf16.msra.mxu0 %v2627_v10  ;;  %v2657_v30 = vld [vmem:[%s3066_s21] ss:$8 sps:$4 sm:$0xff]   ;;  %v2659_v32 = vld [vmem:[%s3066_s21 + $0xf4] ss:$8 sps:$4 sm:$0xff]   ;;  %v2663_v34 = vld [vmem:[%s3066_s21 + $0xf0] ss:$8 sps:$4 sm:$0xff]  }
  0x1a   : > { %1849 = vmatpush1.bf16.msra.mxu1 %v2628_v11  ;;  %1809 = vmatprep.subr.bf16.mxu0 %v2629_v12  ;;  %v2658_v31 = vld [vmem:[%s3066_s21 + $0x100] ss:$8 sps:$4 sm:$0xff]   ;;  %v2661_v33 = vld [vmem:[%s3066_s21 + $0x1f4] ss:$8 sps:$4 sm:$0xff]   ;;  %v2664_v35 = vld [vmem:[%s3066_s21 + $0x1f0] ss:$8 sps:$4 sm:$0xff]  }
  0x1b   : > { %1850 = vmatprep.subr.bf16.mxu1 %v2631_v13  ;;  %v2665_v36 = vld [vmem:[%s3066_s21 + $0xe4] ss:$8 sps:$4 sm:$0xff]   ;;  %v2669_v38 = vld [vmem:[%s3066_s21 + $0xe0] ss:$8 sps:$4 sm:$0xff]   ;;  %v2671_v40 = vld [vmem:[%s3066_s21 + $0xd4] ss:$8 sps:$4 sm:$0xff]  }
  0x1c   : > { %v2667_v37 = vld [vmem:[%s3066_s21 + $0x1e4] ss:$8 sps:$4 sm:$0xff]   ;;  %v2670_v39 = vld [vmem:[%s3066_s21 + $0x1e0] ss:$8 sps:$4 sm:$0xff]   ;;  %v2673_v41 = vld [vmem:[%s3066_s21 + $0x1d4] ss:$8 sps:$4 sm:$0xff]  }
  0x1d   : > { %1810 = vmatpush1.bf16.msra.mxu0 %v2633_v14  ;;  %v2675_v42 = vld [vmem:[%s3066_s21 + $0xd0] ss:$8 sps:$4 sm:$0xff]   ;;  %v2677_v44 = vld [vmem:[%s3066_s21 + $0xc4] ss:$8 sps:$4 sm:$0xff]   ;;  %v2681_v49 = vld [vmem:[%s3066_s21 + $0xc0] ss:$8 sps:$4 sm:$0xff]  }
  0x1e   : > { %1851 = vmatpush1.bf16.msra.mxu1 %v2634_v15  ;;  %1811 = vmatprep.subr.bf16.mxu0 %v2635_v16  ;;  %v2676_v43 = vld [vmem:[%s3066_s21 + $0x1d0] ss:$8 sps:$4 sm:$0xff]   ;;  %v2679_v45 = vld [vmem:[%s3066_s21 + $0x1c4] ss:$8 sps:$4 sm:$0xff]   ;;  %v2682_v50 = vld [vmem:[%s3066_s21 + $0x1c0] ss:$8 sps:$4 sm:$0xff]  }
  0x1f   : > { %1852 = vmatprep.subr.bf16.mxu1 %v2637_v17  ;;  %v203_v46 = vld [vmem:[%s3116_s25] sm:$0xff]  ;;  %v204_v48 = vld [vmem:[%s3116_s25 + $0x8] sm:$0xff]  ;;  %v2683_v52 = vld [vmem:[%s3066_s21 + $0xb4] ss:$8 sps:$4 sm:$0xff]  }
  0x20   : > { %v2324_v47 = vcombine.high %v203_v46, %v203_v46  ;;  %v2326_v51 = vcombine.high %v204_v48, %v204_v48  ;;  %v2685_v53 = vld [vmem:[%s3066_s21 + $0x1b4] ss:$8 sps:$4 sm:$0xff]   ;;  %v2687_v54 = vld [vmem:[%s3066_s21 + $0xb0] ss:$8 sps:$4 sm:$0xff]   ;;  %v2689_v56 = vld [vmem:[%s3066_s21 + $0xa4] ss:$8 sps:$4 sm:$0xff]   ;;  %v2323_v6 = vcombine.low %v203_v46, %v203_v46  ;;  %v2325_v7 = vcombine.low %v204_v48, %v204_v48 }
  0x21   : > { %1812 = vmatpush1.bf16.msra.mxu0 %v2639_v18  ;;  %v2688_v55 = vld [vmem:[%s3066_s21 + $0x1b0] ss:$8 sps:$4 sm:$0xff]   ;;  %v2691_v57 = vld [vmem:[%s3066_s21 + $0x1a4] ss:$8 sps:$4 sm:$0xff]   ;;  %v2693_v58 = vld [vmem:[%s3066_s21 + $0xa0] ss:$8 sps:$4 sm:$0xff]  }
  0x22   : > { %1853 = vmatpush1.bf16.msra.mxu1 %v2640_v19  ;;  %1813 = vmatprep.subr.bf16.mxu0 %v2641_v20  ;;  %v2694_v59 = vld [vmem:[%s3066_s21 + $0x1a0] ss:$8 sps:$4 sm:$0xff]   ;;  %v2695_v60 = vld [vmem:[%s3066_s21 + $0x94] ss:$8 sps:$4 sm:$0xff]   ;;  %v2699_v62 = vld [vmem:[%s3066_s21 + $0x90] ss:$8 sps:$4 sm:$0xff]  }
  0x23   : > { %1854 = vmatprep.subr.bf16.mxu1 %v2643_v21  ;;  %1835 = vmatprep.mubr.bf16.mxu0 %v2324_v47  ;;  %v2697_v61 = vld [vmem:[%s3066_s21 + $0x194] ss:$8 sps:$4 sm:$0xff]   ;;  %v2700_v63 = vld [vmem:[%s3066_s21 + $0x190] ss:$8 sps:$4 sm:$0xff]   ;;  %v2701_v0 = vld [vmem:[%s3066_s21 + $0x84] ss:$8 sps:$4 sm:$0xff]  }
  0x24   : > { %1876 = vmatprep.mubr.bf16.mxu1 %v2326_v51  ;;  %v2703_v1 = vld [vmem:[%s3066_s21 + $0x184] ss:$8 sps:$4 sm:$0xff]   ;;  %v2705_v2 = vld [vmem:[%s3066_s21 + $0x80] ss:$8 sps:$4 sm:$0xff]   ;;  %v2713_v4 = vld [vmem:[%s3066_s21 + $0x274] ss:$8 sps:$4 sm:$0xff]  }
  0x25   : > { %1814 = vmatpush1.bf16.msra.mxu0 %v2645_v22  ;;  %v2706_v3 = vld [vmem:[%s3066_s21 + $0x180] ss:$8 sps:$4 sm:$0xff]   ;;  %v2716_v5 = vld [vmem:[%s3066_s21 + $0x374] ss:$8 sps:$4 sm:$0xff]   ;;  %v2711_v8 = vld [vmem:[%s3066_s21 + $0x270] ss:$8 sps:$4 sm:$0xff]  }
  0x26   : > { %1855 = vmatpush1.bf16.msra.mxu1 %v2646_v23  ;;  %1815 = vmatprep.subr.bf16.mxu0 %v2647_v24  ;;  %v2714_v9 = vld [vmem:[%s3066_s21 + $0x370] ss:$8 sps:$4 sm:$0xff]   ;;  %v2719_v10 = vld [vmem:[%s3066_s21 + $0x264] ss:$8 sps:$4 sm:$0xff]   ;;  %v2717_v12 = vld [vmem:[%s3066_s21 + $0x260] ss:$8 sps:$4 sm:$0xff]  }
  0x27   : > { %1856 = vmatprep.subr.bf16.mxu1 %v2649_v25  ;;  %v2722_v11 = vld [vmem:[%s3066_s21 + $0x364] ss:$8 sps:$4 sm:$0xff]   ;;  %v2720_v13 = vld [vmem:[%s3066_s21 + $0x360] ss:$8 sps:$4 sm:$0xff]   ;;  %v2725_v14 = vld [vmem:[%s3066_s21 + $0x254] ss:$8 sps:$4 sm:$0xff]  }
  0x28   : > { %v2728_v15 = vld [vmem:[%s3066_s21 + $0x354] ss:$8 sps:$4 sm:$0xff]   ;;  %v2723_v16 = vld [vmem:[%s3066_s21 + $0x250] ss:$8 sps:$4 sm:$0xff]   ;;  %v2731_v18 = vld [vmem:[%s3066_s21 + $0x244] ss:$8 sps:$4 sm:$0xff]  }
  0x29   : > { %1816 = vmatpush1.bf16.msra.mxu0 %v2651_v26  ;;  %v2726_v17 = vld [vmem:[%s3066_s21 + $0x350] ss:$8 sps:$4 sm:$0xff]   ;;  %v2734_v19 = vld [vmem:[%s3066_s21 + $0x344] ss:$8 sps:$4 sm:$0xff]   ;;  %v2729_v20 = vld [vmem:[%s3066_s21 + $0x240] ss:$8 sps:$4 sm:$0xff]  }
  0x2a   : > { %1857 = vmatpush1.bf16.msra.mxu1 %v2652_v27  ;;  %1817 = vmatprep.subr.bf16.mxu0 %v2653_v28  ;;  %v2732_v21 = vld [vmem:[%s3066_s21 + $0x340] ss:$8 sps:$4 sm:$0xff]   ;;  %v2737_v22 = vld [vmem:[%s3066_s21 + $0x234] ss:$8 sps:$4 sm:$0xff]   ;;  %v2735_v24 = vld [vmem:[%s3066_s21 + $0x230] ss:$8 sps:$4 sm:$0xff]  }
  0x2b   : > { %1858 = vmatprep.subr.bf16.mxu1 %v2655_v29  ;;  %v2740_v23 = vld [vmem:[%s3066_s21 + $0x334] ss:$8 sps:$4 sm:$0xff]   ;;  %v2738_v25 = vld [vmem:[%s3066_s21 + $0x330] ss:$8 sps:$4 sm:$0xff]   ;;  %v2743_v26 = vld [vmem:[%s3066_s21 + $0x224] ss:$8 sps:$4 sm:$0xff]  }
  0x2c   : > { %v2746_v27 = vld [vmem:[%s3066_s21 + $0x324] ss:$8 sps:$4 sm:$0xff]   ;;  %v2741_v28 = vld [vmem:[%s3066_s21 + $0x220] ss:$8 sps:$4 sm:$0xff]   ;;  %v2776_v51 = vld [vmem:[%s3066_s21 + $0x3d4] ss:$8 sps:$4 sm:$0xff]  }
  0x2d   : > { %1818 = vmatpush1.bf16.msra.mxu0 %v2657_v30  ;;  %v2744_v29 = vld [vmem:[%s3066_s21 + $0x320] ss:$8 sps:$4 sm:$0xff]   ;;  %v2749_v30 = vld [vmem:[%s3066_s21 + $0x214] ss:$8 sps:$4 sm:$0xff]   ;;  %v2767_v46 = vld [vmem:[%s3066_s21 + $0x2e4] ss:$8 sps:$4 sm:$0xff]  }
  0x2e   : > { %1859 = vmatpush1.bf16.msra.mxu1 %v2658_v31  ;;  %1819 = vmatprep.subr.bf16.mxu0 %v2659_v32  ;;  %v2752_v31 = vld [vmem:[%s3066_s21 + $0x314] ss:$8 sps:$4 sm:$0xff]   ;;  %v2770_v47 = vld [vmem:[%s3066_s21 + $0x3e4] ss:$8 sps:$4 sm:$0xff]   ;;  %v2765_v48 = vld [vmem:[%s3066_s21 + $0x2e0] ss:$8 sps:$4 sm:$0xff]  }
  0x2f   : > { %1860 = vmatprep.subr.bf16.mxu1 %v2661_v33  ;;  %v3167_v32 = vld [vmem:[%s3116_s25 + $0x10] sm:$0xff]  ;;  %v3170_v33 = vld [vmem:[%s3116_s25 + $0x18] sm:$0xff] }
  0x31   : > { %1820 = vmatpush2.bf16.msra.mxu0 %v2663_v34  ;;  %v2747_v34 = vld [vmem:[%s3066_s21 + $0x210] ss:$8 sps:$4 sm:$0xff]  }
  0x32   : > { %1861 = vmatpush2.bf16.msra.mxu1 %v2664_v35  ;;  %1821 = vmatprep.subr.bf16.mxu0 %v2665_v36  ;;  %v2750_v35 = vld [vmem:[%s3066_s21 + $0x310] ss:$8 sps:$4 sm:$0xff]   ;;  %v2328_v36 = vcombine.high %v3167_v32, %v3167_v32 }
  0x33   : > { %1862 = vmatprep.subr.bf16.mxu1 %v2667_v37  ;;  %v2330_v37 = vcombine.high %v3170_v33, %v3170_v33 }
  0x35   : > { %1822 = vmatpush2.bf16.msra.mxu0 %v2669_v38  ;;  %v2755_v38 = vld [vmem:[%s3066_s21 + $0x204] ss:$8 sps:$4 sm:$0xff]  }
  0x36   : > { %1863 = vmatpush2.bf16.msra.mxu1 %v2670_v39  ;;  %1823 = vmatprep.subr.bf16.mxu0 %v2671_v40  ;;  %v2758_v39 = vld [vmem:[%s3066_s21 + $0x304] ss:$8 sps:$4 sm:$0xff]   ;;  %v2753_v40 = vld [vmem:[%s3066_s21 + $0x200] ss:$8 sps:$4 sm:$0xff]  }
  0x37   : > { %1864 = vmatprep.subr.bf16.mxu1 %v2673_v41  ;;  %v2756_v41 = vld [vmem:[%s3066_s21 + $0x300] ss:$8 sps:$4 sm:$0xff]  }
  0x39   : > { %1824 = vmatpush2.bf16.msra.mxu0 %v2675_v42  ;;  %v2761_v42 = vld [vmem:[%s3066_s21 + $0x2f4] ss:$8 sps:$4 sm:$0xff]  }
  0x3a   : > { %1865 = vmatpush2.bf16.msra.mxu1 %v2676_v43  ;;  %1825 = vmatprep.subr.bf16.mxu0 %v2677_v44  ;;  %v2764_v43 = vld [vmem:[%s3066_s21 + $0x3f4] ss:$8 sps:$4 sm:$0xff]   ;;  %v2759_v44 = vld [vmem:[%s3066_s21 + $0x2f0] ss:$8 sps:$4 sm:$0xff]  }
  0x3b   : > { %1866 = vmatprep.subr.bf16.mxu1 %v2679_v45  ;;  %v2762_v45 = vld [vmem:[%s3066_s21 + $0x3f0] ss:$8 sps:$4 sm:$0xff]  }
  0x3d   : > { %1826 = vmatpush2.bf16.msra.mxu0 %v2681_v49  ;;  %v2768_v49 = vld [vmem:[%s3066_s21 + $0x3e0] ss:$8 sps:$4 sm:$0xff]  }
  0x3e   : > { %1867 = vmatpush2.bf16.msra.mxu1 %v2682_v50  ;;  %1827 = vmatprep.subr.bf16.mxu0 %v2683_v52  ;;  %v2773_v50 = vld [vmem:[%s3066_s21 + $0x2d4] ss:$8 sps:$4 sm:$0xff]   ;;  %v2771_v52 = vld [vmem:[%s3066_s21 + $0x2d0] ss:$8 sps:$4 sm:$0xff]  }
  0x3f   : > { %1868 = vmatprep.subr.bf16.mxu1 %v2685_v53  ;;  %v2774_v53 = vld [vmem:[%s3066_s21 + $0x3d0] ss:$8 sps:$4 sm:$0xff]  }
  0x41   : > { %1828 = vmatpush2.bf16.msra.mxu0 %v2687_v54  ;;  %v2779_v54 = vld [vmem:[%s3066_s21 + $0x2c4] ss:$8 sps:$4 sm:$0xff]  }
  0x42   : > { %1869 = vmatpush2.bf16.msra.mxu1 %v2688_v55  ;;  %1829 = vmatprep.subr.bf16.mxu0 %v2689_v56  ;;  %v2782_v55 = vld [vmem:[%s3066_s21 + $0x3c4] ss:$8 sps:$4 sm:$0xff]   ;;  %v2777_v56 = vld [vmem:[%s3066_s21 + $0x2c0] ss:$8 sps:$4 sm:$0xff]  }
  0x43   : > { %1870 = vmatprep.subr.bf16.mxu1 %v2691_v57  ;;  %v2780_v57 = vld [vmem:[%s3066_s21 + $0x3c0] ss:$8 sps:$4 sm:$0xff]  }
  0x45   : > { %1830 = vmatpush2.bf16.msra.mxu0 %v2693_v58  ;;  %v2785_v58 = vld [vmem:[%s3066_s21 + $0x2b4] ss:$8 sps:$4 sm:$0xff]  }
  0x46   : > { %1871 = vmatpush2.bf16.msra.mxu1 %v2694_v59  ;;  %1831 = vmatprep.subr.bf16.mxu0 %v2695_v60  ;;  %v2788_v59 = vld [vmem:[%s3066_s21 + $0x3b4] ss:$8 sps:$4 sm:$0xff]   ;;  %v2783_v60 = vld [vmem:[%s3066_s21 + $0x2b0] ss:$8 sps:$4 sm:$0xff]  }
  0x47   : > { %1872 = vmatprep.subr.bf16.mxu1 %v2697_v61  ;;  %v2786_v61 = vld [vmem:[%s3066_s21 + $0x3b0] ss:$8 sps:$4 sm:$0xff]  }
  0x49   : > { %1832 = vmatpush2.bf16.msra.mxu0 %v2699_v62  ;;  %v2791_v62 = vld [vmem:[%s3066_s21 + $0x2a4] ss:$8 sps:$4 sm:$0xff]  }
  0x4a   : > { %1873 = vmatpush2.bf16.msra.mxu1 %v2700_v63  ;;  %1833 = vmatprep.subr.bf16.mxu0 %v2701_v0  ;;  %v2794_v63 = vld [vmem:[%s3066_s21 + $0x3a4] ss:$8 sps:$4 sm:$0xff]   ;;  %v2789_v0 = vld [vmem:[%s3066_s21 + $0x2a0] ss:$8 sps:$4 sm:$0xff]  }
  0x4b   : > { %1874 = vmatprep.subr.bf16.mxu1 %v2703_v1  ;;  %v2792_v1 = vld [vmem:[%s3066_s21 + $0x3a0] ss:$8 sps:$4 sm:$0xff]  }
  0x4d   : > { %1834 = vmatpush2.bf16.msra.mxu0 %v2705_v2  ;;  %v2797_v2 = vld [vmem:[%s3066_s21 + $0x294] ss:$8 sps:$4 sm:$0xff]  }
  0x4e   : > { %1875 = vmatpush2.bf16.msra.mxu1 %v2706_v3  ;;  %1885 = vmatprep.subr.bf16.mxu0 %v2713_v4  ;;  %v2800_v3 = vld [vmem:[%s3066_s21 + $0x394] ss:$8 sps:$4 sm:$0xff]   ;;  %v2795_v4 = vld [vmem:[%s3066_s21 + $0x290] ss:$8 sps:$4 sm:$0xff]  }
  0x4f   : > { %1926 = vmatprep.subr.bf16.mxu1 %v2716_v5  ;;  %v2798_v5 = vld [vmem:[%s3066_s21 + $0x390] ss:$8 sps:$4 sm:$0xff]  }
  0x50   : > { %1836 = vmatmul.mubr.bf16.vlgmr.msra.gmra.mxu0 %v2323_v6  ;;  %v2803_v6 = vld [vmem:[%s3066_s21 + $0x284] ss:$8 sps:$4 sm:$0xff]  }
  0x51   : > { %1877 = vmatmul.mubr.bf16.vlgmr.msra.gmra.mxu1 %v2325_v7  ;;  %1886 = vmatpush1.bf16.msra.mxu0 %v2711_v8  ;;  %v2806_v7 = vld [vmem:[%s3066_s21 + $0x384] ss:$8 sps:$4 sm:$0xff]   ;;  %v2801_v8 = vld [vmem:[%s3066_s21 + $0x280] ss:$8 sps:$4 sm:$0xff]  }
  0x52   : > { %1927 = vmatpush1.bf16.msra.mxu1 %v2714_v9  ;;  %1887 = vmatprep.subr.bf16.mxu0 %v2719_v10  ;;  %v2804_v9 = vld [vmem:[%s3066_s21 + $0x380] ss:$8 sps:$4 sm:$0xff]   ;;  %v2813_v10 = vld [vmem:[%s3066_s21 + $0x474] ss:$8 sps:$4 sm:$0xff]  }
  0x53   : > { %1928 = vmatprep.subr.bf16.mxu1 %v2722_v11  ;;  %1917 = vmatprep.mubr.bf16.mxu0 %v2328_v36  ;;  %v2816_v11 = vld [vmem:[%s3066_s21 + $0x574] ss:$8 sps:$4 sm:$0xff]   ;;  %v2843_v36 = vld [vmem:[%s3066_s21 + $0x424] ss:$8 sps:$4 sm:$0xff]  }
  0x54   : > { %1958 = vmatprep.mubr.bf16.mxu1 %v2330_v37  ;;  %v2846_v37 = vld [vmem:[%s3066_s21 + $0x524] ss:$8 sps:$4 sm:$0xff]  }
  0x55   : > { %1888 = vmatpush1.bf16.msra.mxu0 %v2717_v12  ;;  %v2327_v12 = vcombine.low %v3167_v32, %v3167_v32  ;;  %v2837_v32 = vld [vmem:[%s3066_s21 + $0x434] ss:$8 sps:$4 sm:$0xff]  }
  0x56   : > { %1929 = vmatpush1.bf16.msra.mxu1 %v2720_v13  ;;  %1889 = vmatprep.subr.bf16.mxu0 %v2725_v14  ;;  %v2329_v13 = vcombine.low %v3170_v33, %v3170_v33  ;;  %v2811_v14 = vld [vmem:[%s3066_s21 + $0x470] ss:$8 sps:$4 sm:$0xff]   ;;  %v2840_v33 = vld [vmem:[%s3066_s21 + $0x534] ss:$8 sps:$4 sm:$0xff]  }
  0x57   : > { %1930 = vmatprep.subr.bf16.mxu1 %v2728_v15  ;;  %v2814_v15 = vld [vmem:[%s3066_s21 + $0x570] ss:$8 sps:$4 sm:$0xff]  }
  0x59   : > { %1890 = vmatpush1.bf16.msra.mxu0 %v2723_v16  ;;  %v2819_v16 = vld [vmem:[%s3066_s21 + $0x464] ss:$8 sps:$4 sm:$0xff]  }
  0x5a   : > { %1931 = vmatpush1.bf16.msra.mxu1 %v2726_v17  ;;  %1891 = vmatprep.subr.bf16.mxu0 %v2731_v18  ;;  %v2822_v17 = vld [vmem:[%s3066_s21 + $0x564] ss:$8 sps:$4 sm:$0xff]  }
  0x5b   : > { %1932 = vmatprep.subr.bf16.mxu1 %v2734_v19  ;;  %v3225_v18 = vld [vmem:[%s3116_s25 + $0x20] sm:$0xff]  ;;  %v3228_v19 = vld [vmem:[%s3116_s25 + $0x28] sm:$0xff] }
  0x5d   : > { %1892 = vmatpush1.bf16.msra.mxu0 %v2729_v20  ;;  %v2332_v20 = vcombine.high %v3225_v18, %v3225_v18 }
  0x5e   : > { %1933 = vmatpush1.bf16.msra.mxu1 %v2732_v21  ;;  %1893 = vmatprep.subr.bf16.mxu0 %v2737_v22  ;;  %v2334_v21 = vcombine.high %v3228_v19, %v3228_v19  ;;  %v2817_v22 = vld [vmem:[%s3066_s21 + $0x460] ss:$8 sps:$4 sm:$0xff]  }
  0x5f   : > { %1934 = vmatprep.subr.bf16.mxu1 %v2740_v23  ;;  %v2820_v23 = vld [vmem:[%s3066_s21 + $0x560] ss:$8 sps:$4 sm:$0xff]  }
  0x61   : > { %1894 = vmatpush1.bf16.msra.mxu0 %v2735_v24  ;;  %v2825_v24 = vld [vmem:[%s3066_s21 + $0x454] ss:$8 sps:$4 sm:$0xff]  }
  0x62   : > { %1935 = vmatpush1.bf16.msra.mxu1 %v2738_v25  ;;  %1895 = vmatprep.subr.bf16.mxu0 %v2743_v26  ;;  %v2828_v25 = vld [vmem:[%s3066_s21 + $0x554] ss:$8 sps:$4 sm:$0xff]   ;;  %v2823_v26 = vld [vmem:[%s3066_s21 + $0x450] ss:$8 sps:$4 sm:$0xff]  }
  0x63   : > { %1936 = vmatprep.subr.bf16.mxu1 %v2746_v27  ;;  %v2826_v27 = vld [vmem:[%s3066_s21 + $0x550] ss:$8 sps:$4 sm:$0xff]  }
  0x65   : > { %1896 = vmatpush1.bf16.msra.mxu0 %v2741_v28  ;;  %v2831_v28 = vld [vmem:[%s3066_s21 + $0x444] ss:$8 sps:$4 sm:$0xff]  }
  0x66   : > { %1937 = vmatpush1.bf16.msra.mxu1 %v2744_v29  ;;  %1897 = vmatprep.subr.bf16.mxu0 %v2749_v30  ;;  %v2834_v29 = vld [vmem:[%s3066_s21 + $0x544] ss:$8 sps:$4 sm:$0xff]   ;;  %v2829_v30 = vld [vmem:[%s3066_s21 + $0x440] ss:$8 sps:$4 sm:$0xff]  }
  0x67   : > { %1938 = vmatprep.subr.bf16.mxu1 %v2752_v31  ;;  %v2832_v31 = vld [vmem:[%s3066_s21 + $0x540] ss:$8 sps:$4 sm:$0xff]  }
  0x69   : > { %1898 = vmatpush1.bf16.msra.mxu0 %v2747_v34  ;;  %v2835_v34 = vld [vmem:[%s3066_s21 + $0x430] ss:$8 sps:$4 sm:$0xff]  }
  0x6a   : > { %1939 = vmatpush1.bf16.msra.mxu1 %v2750_v35  ;;  %1899 = vmatprep.subr.bf16.mxu0 %v2755_v38  ;;  %v2838_v35 = vld [vmem:[%s3066_s21 + $0x530] ss:$8 sps:$4 sm:$0xff]   ;;  %v2841_v38 = vld [vmem:[%s3066_s21 + $0x420] ss:$8 sps:$4 sm:$0xff]  }
  0x6b   : > { %1940 = vmatprep.subr.bf16.mxu1 %v2758_v39  ;;  %v2844_v39 = vld [vmem:[%s3066_s21 + $0x520] ss:$8 sps:$4 sm:$0xff]  }
  0x6d   : > { %1900 = vmatpush1.bf16.msra.mxu0 %v2753_v40  ;;  %v2849_v40 = vld [vmem:[%s3066_s21 + $0x414] ss:$8 sps:$4 sm:$0xff]  }
  0x6e   : > { %1941 = vmatpush1.bf16.msra.mxu1 %v2756_v41  ;;  %1901 = vmatprep.subr.bf16.mxu0 %v2761_v42  ;;  %v2852_v41 = vld [vmem:[%s3066_s21 + $0x514] ss:$8 sps:$4 sm:$0xff]   ;;  %v2847_v42 = vld [vmem:[%s3066_s21 + $0x410] ss:$8 sps:$4 sm:$0xff]  }
  0x6f   : > { %1942 = vmatprep.subr.bf16.mxu1 %v2764_v43  ;;  %v2850_v43 = vld [vmem:[%s3066_s21 + $0x510] ss:$8 sps:$4 sm:$0xff]  }
  0x71   : > { %1902 = vmatpush2.bf16.msra.mxu0 %v2759_v44  ;;  %v2855_v44 = vld [vmem:[%s3066_s21 + $0x404] ss:$8 sps:$4 sm:$0xff]  }
  0x72   : > { %1943 = vmatpush2.bf16.msra.mxu1 %v2762_v45  ;;  %1903 = vmatprep.subr.bf16.mxu0 %v2767_v46  ;;  %v2858_v45 = vld [vmem:[%s3066_s21 + $0x504] ss:$8 sps:$4 sm:$0xff]   ;;  %v2853_v46 = vld [vmem:[%s3066_s21 + $0x400] ss:$8 sps:$4 sm:$0xff]  }
  0x73   : > { %1944 = vmatprep.subr.bf16.mxu1 %v2770_v47  ;;  %v2856_v47 = vld [vmem:[%s3066_s21 + $0x500] ss:$8 sps:$4 sm:$0xff]  }
  0x75   : > { %1904 = vmatpush2.bf16.msra.mxu0 %v2765_v48  ;;  %v2861_v48 = vld [vmem:[%s3066_s21 + $0x4f4] ss:$8 sps:$4 sm:$0xff]  }
  0x76   : > { %1945 = vmatpush2.bf16.msra.mxu1 %v2768_v49  ;;  %1905 = vmatprep.subr.bf16.mxu0 %v2773_v50  ;;  %v2864_v49 = vld [vmem:[%s3066_s21 + $0x5f4] ss:$8 sps:$4 sm:$0xff]   ;;  %v2859_v50 = vld [vmem:[%s3066_s21 + $0x4f0] ss:$8 sps:$4 sm:$0xff]  }
  0x77   : > { %1946 = vmatprep.subr.bf16.mxu1 %v2776_v51  ;;  %v2862_v51 = vld [vmem:[%s3066_s21 + $0x5f0] ss:$8 sps:$4 sm:$0xff]  }
  0x79   : > { %1906 = vmatpush2.bf16.msra.mxu0 %v2771_v52  ;;  %v2867_v52 = vld [vmem:[%s3066_s21 + $0x4e4] ss:$8 sps:$4 sm:$0xff]  }
  0x7a   : > { %1947 = vmatpush2.bf16.msra.mxu1 %v2774_v53  ;;  %1907 = vmatprep.subr.bf16.mxu0 %v2779_v54  ;;  %v2870_v53 = vld [vmem:[%s3066_s21 + $0x5e4] ss:$8 sps:$4 sm:$0xff]   ;;  %v2865_v54 = vld [vmem:[%s3066_s21 + $0x4e0] ss:$8 sps:$4 sm:$0xff]  }
  0x7b   : > { %1948 = vmatprep.subr.bf16.mxu1 %v2782_v55  ;;  %v2868_v55 = vld [vmem:[%s3066_s21 + $0x5e0] ss:$8 sps:$4 sm:$0xff]  }
  0x7d   : > { %1908 = vmatpush2.bf16.msra.mxu0 %v2777_v56  ;;  %v2873_v56 = vld [vmem:[%s3066_s21 + $0x4d4] ss:$8 sps:$4 sm:$0xff]  }
  0x7e   : > { %1949 = vmatpush2.bf16.msra.mxu1 %v2780_v57  ;;  %1909 = vmatprep.subr.bf16.mxu0 %v2785_v58  ;;  %v2876_v57 = vld [vmem:[%s3066_s21 + $0x5d4] ss:$8 sps:$4 sm:$0xff]   ;;  %v2871_v58 = vld [vmem:[%s3066_s21 + $0x4d0] ss:$8 sps:$4 sm:$0xff]  }
  0x7f   : > { %1950 = vmatprep.subr.bf16.mxu1 %v2788_v59  ;;  %v2874_v59 = vld [vmem:[%s3066_s21 + $0x5d0] ss:$8 sps:$4 sm:$0xff]  }
  0x81   : > { %1910 = vmatpush2.bf16.msra.mxu0 %v2783_v60  ;;  %v2879_v60 = vld [vmem:[%s3066_s21 + $0x4c4] ss:$8 sps:$4 sm:$0xff]  }
  0x82   : > { %1951 = vmatpush2.bf16.msra.mxu1 %v2786_v61  ;;  %1911 = vmatprep.subr.bf16.mxu0 %v2791_v62  ;;  %v2882_v61 = vld [vmem:[%s3066_s21 + $0x5c4] ss:$8 sps:$4 sm:$0xff]   ;;  %v2877_v62 = vld [vmem:[%s3066_s21 + $0x4c0] ss:$8 sps:$4 sm:$0xff]  }
  0x83   : > { %1952 = vmatprep.subr.bf16.mxu1 %v2794_v63  ;;  %v2880_v63 = vld [vmem:[%s3066_s21 + $0x5c0] ss:$8 sps:$4 sm:$0xff]  }
  0x85   : > { %1912 = vmatpush2.bf16.msra.mxu0 %v2789_v0  ;;  %v2885_v0 = vld [vmem:[%s3066_s21 + $0x4b4] ss:$8 sps:$4 sm:$0xff]  }
  0x86   : > { %1953 = vmatpush2.bf16.msra.mxu1 %v2792_v1  ;;  %1913 = vmatprep.subr.bf16.mxu0 %v2797_v2  ;;  %v2888_v1 = vld [vmem:[%s3066_s21 + $0x5b4] ss:$8 sps:$4 sm:$0xff]   ;;  %v2883_v2 = vld [vmem:[%s3066_s21 + $0x4b0] ss:$8 sps:$4 sm:$0xff]  }
  0x87   : > { %1954 = vmatprep.subr.bf16.mxu1 %v2800_v3  ;;  %v2886_v3 = vld [vmem:[%s3066_s21 + $0x5b0] ss:$8 sps:$4 sm:$0xff]  }
  0x89   : > { %1914 = vmatpush2.bf16.msra.mxu0 %v2795_v4  ;;  %v2891_v4 = vld [vmem:[%s3066_s21 + $0x4a4] ss:$8 sps:$4 sm:$0xff]  }
  0x8a   : > { %1955 = vmatpush2.bf16.msra.mxu1 %v2798_v5  ;;  %1915 = vmatprep.subr.bf16.mxu0 %v2803_v6  ;;  %v2894_v5 = vld [vmem:[%s3066_s21 + $0x5a4] ss:$8 sps:$4 sm:$0xff]   ;;  %v2889_v6 = vld [vmem:[%s3066_s21 + $0x4a0] ss:$8 sps:$4 sm:$0xff]  }
  0x8b   : > { %1956 = vmatprep.subr.bf16.mxu1 %v2806_v7  ;;  %v2892_v7 = vld [vmem:[%s3066_s21 + $0x5a0] ss:$8 sps:$4 sm:$0xff]  }
  0x8d   : > { %1916 = vmatpush2.bf16.msra.mxu0 %v2801_v8  ;;  %v2897_v8 = vld [vmem:[%s3066_s21 + $0x494] ss:$8 sps:$4 sm:$0xff]  }
  0x8e   : > { %1957 = vmatpush2.bf16.msra.mxu1 %v2804_v9  ;;  %1967 = vmatprep.subr.bf16.mxu0 %v2813_v10  ;;  %v2900_v9 = vld [vmem:[%s3066_s21 + $0x594] ss:$8 sps:$4 sm:$0xff]   ;;  %v2895_v10 = vld [vmem:[%s3066_s21 + $0x490] ss:$8 sps:$4 sm:$0xff]  }
  0x8f   : > { %2008 = vmatprep.subr.bf16.mxu1 %v2816_v11  ;;  %v2898_v11 = vld [vmem:[%s3066_s21 + $0x590] ss:$8 sps:$4 sm:$0xff]  }
  0x90   : > { %1918 = vmatmul.mubr.bf16.vlgmr.msra.gmra.mxu0 %v2327_v12  ;;  %v2903_v12 = vld [vmem:[%s3066_s21 + $0x484] ss:$8 sps:$4 sm:$0xff]  }
  0x91   : > { %1959 = vmatmul.mubr.bf16.vlgmr.msra.gmra.mxu1 %v2329_v13  ;;  %1968 = vmatpush1.bf16.msra.mxu0 %v2811_v14  ;;  %v2906_v13 = vld [vmem:[%s3066_s21 + $0x584] ss:$8 sps:$4 sm:$0xff]   ;;  %v2901_v14 = vld [vmem:[%s3066_s21 + $0x480] ss:$8 sps:$4 sm:$0xff]  }
  0x92   : > { %2009 = vmatpush1.bf16.msra.mxu1 %v2814_v15  ;;  %1969 = vmatprep.subr.bf16.mxu0 %v2819_v16  ;;  %v2904_v15 = vld [vmem:[%s3066_s21 + $0x580] ss:$8 sps:$4 sm:$0xff]   ;;  %v2913_v16 = vld [vmem:[%s3066_s21 + $0x674] ss:$8 sps:$4 sm:$0xff]  }
  0x93   : > { %2010 = vmatprep.subr.bf16.mxu1 %v2822_v17  ;;  %1999 = vmatprep.mubr.bf16.mxu0 %v2332_v20  ;;  %v2916_v17 = vld [vmem:[%s3066_s21 + $0x774] ss:$8 sps:$4 sm:$0xff]   ;;  %v2331_v20 = vcombine.low %v3225_v18, %v3225_v18 }
  0x94   : > { %2040 = vmatprep.mubr.bf16.mxu1 %v2334_v21  ;;  %v2333_v21 = vcombine.low %v3228_v19, %v3228_v19 }
  0x95   : > { %1970 = vmatpush1.bf16.msra.mxu0 %v2817_v22  ;;  %v3299_v22 = vld [vmem:[%s3116_s25 + $0x30] sm:$0xff] }
  0x96   : > { %2011 = vmatpush1.bf16.msra.mxu1 %v2820_v23  ;;  %1971 = vmatprep.subr.bf16.mxu0 %v2825_v24  ;;  %v3302_v23 = vld [vmem:[%s3116_s25 + $0x38] sm:$0xff]  ;;  %v2336_v18 = vcombine.high %v3299_v22, %v3299_v22 }
  0x97   : > { %2012 = vmatprep.subr.bf16.mxu1 %v2828_v25  ;;  %v2911_v24 = vld [vmem:[%s3066_s21 + $0x670] ss:$8 sps:$4 sm:$0xff]   ;;  %v2338_v19 = vcombine.high %v3302_v23, %v3302_v23 }
  0x98   : > { %v2914_v25 = vld [vmem:[%s3066_s21 + $0x770] ss:$8 sps:$4 sm:$0xff]  }
  0x99   : > { %1972 = vmatpush1.bf16.msra.mxu0 %v2823_v26  ;;  %v2919_v26 = vld [vmem:[%s3066_s21 + $0x664] ss:$8 sps:$4 sm:$0xff]  }
  0x9a   : > { %2013 = vmatpush1.bf16.msra.mxu1 %v2826_v27  ;;  %1973 = vmatprep.subr.bf16.mxu0 %v2831_v28  ;;  %v2922_v27 = vld [vmem:[%s3066_s21 + $0x764] ss:$8 sps:$4 sm:$0xff]   ;;  %v2917_v28 = vld [vmem:[%s3066_s21 + $0x660] ss:$8 sps:$4 sm:$0xff]  }
  0x9b   : > { %2014 = vmatprep.subr.bf16.mxu1 %v2834_v29  ;;  %v2920_v29 = vld [vmem:[%s3066_s21 + $0x760] ss:$8 sps:$4 sm:$0xff]  }
  0x9d   : > { %1974 = vmatpush1.bf16.msra.mxu0 %v2829_v30  ;;  %v2925_v30 = vld [vmem:[%s3066_s21 + $0x654] ss:$8 sps:$4 sm:$0xff]  }
  0x9e   : > { %2015 = vmatpush1.bf16.msra.mxu1 %v2832_v31  ;;  %1975 = vmatprep.subr.bf16.mxu0 %v2837_v32  ;;  %v2928_v31 = vld [vmem:[%s3066_s21 + $0x754] ss:$8 sps:$4 sm:$0xff]   ;;  %v2923_v32 = vld [vmem:[%s3066_s21 + $0x650] ss:$8 sps:$4 sm:$0xff]  }
  0x9f   : > { %2016 = vmatprep.subr.bf16.mxu1 %v2840_v33  ;;  %v2926_v33 = vld [vmem:[%s3066_s21 + $0x750] ss:$8 sps:$4 sm:$0xff]  }
  0xa1   : > { %1976 = vmatpush1.bf16.msra.mxu0 %v2835_v34  ;;  %v2931_v34 = vld [vmem:[%s3066_s21 + $0x644] ss:$8 sps:$4 sm:$0xff]  }
  0xa2   : > { %2017 = vmatpush1.bf16.msra.mxu1 %v2838_v35  ;;  %1977 = vmatprep.subr.bf16.mxu0 %v2843_v36  ;;  %v2934_v35 = vld [vmem:[%s3066_s21 + $0x744] ss:$8 sps:$4 sm:$0xff]   ;;  %v2929_v36 = vld [vmem:[%s3066_s21 + $0x640] ss:$8 sps:$4 sm:$0xff]  }
  0xa3   : > { %2018 = vmatprep.subr.bf16.mxu1 %v2846_v37  ;;  %v2932_v37 = vld [vmem:[%s3066_s21 + $0x740] ss:$8 sps:$4 sm:$0xff]  }
  0xa5   : > { %1978 = vmatpush1.bf16.msra.mxu0 %v2841_v38  ;;  %v2937_v38 = vld [vmem:[%s3066_s21 + $0x634] ss:$8 sps:$4 sm:$0xff]  }
  0xa6   : > { %2019 = vmatpush1.bf16.msra.mxu1 %v2844_v39  ;;  %1979 = vmatprep.subr.bf16.mxu0 %v2849_v40  ;;  %v2940_v39 = vld [vmem:[%s3066_s21 + $0x734] ss:$8 sps:$4 sm:$0xff]   ;;  %v2935_v40 = vld [vmem:[%s3066_s21 + $0x630] ss:$8 sps:$4 sm:$0xff]  }
  0xa7   : > { %2020 = vmatprep.subr.bf16.mxu1 %v2852_v41  ;;  %v2938_v41 = vld [vmem:[%s3066_s21 + $0x730] ss:$8 sps:$4 sm:$0xff]  }
  0xa9   : > { %1980 = vmatpush1.bf16.msra.mxu0 %v2847_v42  ;;  %v2943_v42 = vld [vmem:[%s3066_s21 + $0x624] ss:$8 sps:$4 sm:$0xff]  }
  0xaa   : > { %2021 = vmatpush1.bf16.msra.mxu1 %v2850_v43  ;;  %1981 = vmatprep.subr.bf16.mxu0 %v2855_v44  ;;  %v2946_v43 = vld [vmem:[%s3066_s21 + $0x724] ss:$8 sps:$4 sm:$0xff]   ;;  %v2941_v44 = vld [vmem:[%s3066_s21 + $0x620] ss:$8 sps:$4 sm:$0xff]  }
  0xab   : > { %2022 = vmatprep.subr.bf16.mxu1 %v2858_v45  ;;  %v2944_v45 = vld [vmem:[%s3066_s21 + $0x720] ss:$8 sps:$4 sm:$0xff]  }
  0xad   : > { %1982 = vmatpush1.bf16.msra.mxu0 %v2853_v46  ;;  %v2949_v46 = vld [vmem:[%s3066_s21 + $0x614] ss:$8 sps:$4 sm:$0xff]  }
  0xae   : > { %2023 = vmatpush1.bf16.msra.mxu1 %v2856_v47  ;;  %1983 = vmatprep.subr.bf16.mxu0 %v2861_v48  ;;  %v2952_v47 = vld [vmem:[%s3066_s21 + $0x714] ss:$8 sps:$4 sm:$0xff]   ;;  %v2947_v48 = vld [vmem:[%s3066_s21 + $0x610] ss:$8 sps:$4 sm:$0xff]  }
  0xaf   : > { %2024 = vmatprep.subr.bf16.mxu1 %v2864_v49  ;;  %v2950_v49 = vld [vmem:[%s3066_s21 + $0x710] ss:$8 sps:$4 sm:$0xff]  }
  0xb1   : > { %1984 = vmatpush2.bf16.msra.mxu0 %v2859_v50  ;;  %v2955_v50 = vld [vmem:[%s3066_s21 + $0x604] ss:$8 sps:$4 sm:$0xff]  }
  0xb2   : > { %2025 = vmatpush2.bf16.msra.mxu1 %v2862_v51  ;;  %1985 = vmatprep.subr.bf16.mxu0 %v2867_v52  ;;  %v2958_v51 = vld [vmem:[%s3066_s21 + $0x704] ss:$8 sps:$4 sm:$0xff]   ;;  %v2953_v52 = vld [vmem:[%s3066_s21 + $0x600] ss:$8 sps:$4 sm:$0xff]  }
  0xb3   : > { %2026 = vmatprep.subr.bf16.mxu1 %v2870_v53  ;;  %v2956_v53 = vld [vmem:[%s3066_s21 + $0x700] ss:$8 sps:$4 sm:$0xff]  }
  0xb5   : > { %1986 = vmatpush2.bf16.msra.mxu0 %v2865_v54  ;;  %v2961_v54 = vld [vmem:[%s3066_s21 + $0x6f4] ss:$8 sps:$4 sm:$0xff]  }
  0xb6   : > { %2027 = vmatpush2.bf16.msra.mxu1 %v2868_v55  ;;  %1987 = vmatprep.subr.bf16.mxu0 %v2873_v56  ;;  %v2964_v55 = vld [vmem:[%s3066_s21 + $0x7f4] ss:$8 sps:$4 sm:$0xff]   ;;  %v2959_v56 = vld [vmem:[%s3066_s21 + $0x6f0] ss:$8 sps:$4 sm:$0xff]  }
  0xb7   : > { %2028 = vmatprep.subr.bf16.mxu1 %v2876_v57  ;;  %v2962_v57 = vld [vmem:[%s3066_s21 + $0x7f0] ss:$8 sps:$4 sm:$0xff]  }
  0xb9   : > { %1988 = vmatpush2.bf16.msra.mxu0 %v2871_v58  ;;  %v2967_v58 = vld [vmem:[%s3066_s21 + $0x6e4] ss:$8 sps:$4 sm:$0xff]  }
  0xba   : > { %2029 = vmatpush2.bf16.msra.mxu1 %v2874_v59  ;;  %1989 = vmatprep.subr.bf16.mxu0 %v2879_v60  ;;  %v2970_v59 = vld [vmem:[%s3066_s21 + $0x7e4] ss:$8 sps:$4 sm:$0xff]   ;;  %v2965_v60 = vld [vmem:[%s3066_s21 + $0x6e0] ss:$8 sps:$4 sm:$0xff]  }
  0xbb   : > { %2030 = vmatprep.subr.bf16.mxu1 %v2882_v61  ;;  %v2968_v61 = vld [vmem:[%s3066_s21 + $0x7e0] ss:$8 sps:$4 sm:$0xff]  }
  0xbd   : > { %1990 = vmatpush2.bf16.msra.mxu0 %v2877_v62  ;;  %v2973_v62 = vld [vmem:[%s3066_s21 + $0x6d4] ss:$8 sps:$4 sm:$0xff]  }
  0xbe   : > { %2031 = vmatpush2.bf16.msra.mxu1 %v2880_v63  ;;  %1991 = vmatprep.subr.bf16.mxu0 %v2885_v0  ;;  %v2976_v63 = vld [vmem:[%s3066_s21 + $0x7d4] ss:$8 sps:$4 sm:$0xff]   ;;  %v2971_v0 = vld [vmem:[%s3066_s21 + $0x6d0] ss:$8 sps:$4 sm:$0xff]  }
  0xbf   : > { %2032 = vmatprep.subr.bf16.mxu1 %v2888_v1  ;;  %v2974_v1 = vld [vmem:[%s3066_s21 + $0x7d0] ss:$8 sps:$4 sm:$0xff]  }
  0xc1   : > { %1992 = vmatpush2.bf16.msra.mxu0 %v2883_v2  ;;  %v2979_v2 = vld [vmem:[%s3066_s21 + $0x6c4] ss:$8 sps:$4 sm:$0xff]  }
  0xc2   : > { %2033 = vmatpush2.bf16.msra.mxu1 %v2886_v3  ;;  %1993 = vmatprep.subr.bf16.mxu0 %v2891_v4  ;;  %v2982_v3 = vld [vmem:[%s3066_s21 + $0x7c4] ss:$8 sps:$4 sm:$0xff]   ;;  %v2977_v4 = vld [vmem:[%s3066_s21 + $0x6c0] ss:$8 sps:$4 sm:$0xff]  }
  0xc3   : > { %2034 = vmatprep.subr.bf16.mxu1 %v2894_v5  ;;  %v2980_v5 = vld [vmem:[%s3066_s21 + $0x7c0] ss:$8 sps:$4 sm:$0xff]  }
  0xc5   : > { %1994 = vmatpush2.bf16.msra.mxu0 %v2889_v6  ;;  %v2985_v6 = vld [vmem:[%s3066_s21 + $0x6b4] ss:$8 sps:$4 sm:$0xff]  }
  0xc6   : > { %2035 = vmatpush2.bf16.msra.mxu1 %v2892_v7  ;;  %1995 = vmatprep.subr.bf16.mxu0 %v2897_v8  ;;  %v2988_v7 = vld [vmem:[%s3066_s21 + $0x7b4] ss:$8 sps:$4 sm:$0xff]   ;;  %v2983_v8 = vld [vmem:[%s3066_s21 + $0x6b0] ss:$8 sps:$4 sm:$0xff]  }
  0xc7   : > { %2036 = vmatprep.subr.bf16.mxu1 %v2900_v9  ;;  %v2986_v9 = vld [vmem:[%s3066_s21 + $0x7b0] ss:$8 sps:$4 sm:$0xff]  }
  0xc9   : > { %1996 = vmatpush2.bf16.msra.mxu0 %v2895_v10  ;;  %v2991_v10 = vld [vmem:[%s3066_s21 + $0x6a4] ss:$8 sps:$4 sm:$0xff]  }
  0xca   : > { %2037 = vmatpush2.bf16.msra.mxu1 %v2898_v11  ;;  %1997 = vmatprep.subr.bf16.mxu0 %v2903_v12  ;;  %v2994_v11 = vld [vmem:[%s3066_s21 + $0x7a4] ss:$8 sps:$4 sm:$0xff]   ;;  %v2989_v12 = vld [vmem:[%s3066_s21 + $0x6a0] ss:$8 sps:$4 sm:$0xff]  }
  0xcb   : > { %2038 = vmatprep.subr.bf16.mxu1 %v2906_v13  ;;  %v2992_v13 = vld [vmem:[%s3066_s21 + $0x7a0] ss:$8 sps:$4 sm:$0xff]  }
  0xcd   : > { %1998 = vmatpush2.bf16.msra.mxu0 %v2901_v14  ;;  %v2997_v14 = vld [vmem:[%s3066_s21 + $0x694] ss:$8 sps:$4 sm:$0xff]  }
  0xce   : > { %2039 = vmatpush2.bf16.msra.mxu1 %v2904_v15  ;;  %2049 = vmatprep.subr.bf16.mxu0 %v2913_v16  ;;  %v3000_v15 = vld [vmem:[%s3066_s21 + $0x794] ss:$8 sps:$4 sm:$0xff]   ;;  %v2995_v16 = vld [vmem:[%s3066_s21 + $0x690] ss:$8 sps:$4 sm:$0xff]  }
  0xcf   : > { %2090 = vmatprep.subr.bf16.mxu1 %v2916_v17  ;;  %v2998_v17 = vld [vmem:[%s3066_s21 + $0x790] ss:$8 sps:$4 sm:$0xff]  }
  0xd0   : > { %2000 = vmatmul.mubr.bf16.vlgmr.msra.gmra.mxu0 %v2331_v20  ;;  %v3003_v20 = vld [vmem:[%s3066_s21 + $0x684] ss:$8 sps:$4 sm:$0xff]  }
  0xd1   : > { %2041 = vmatmul.mubr.bf16.vlgmr.msra.gmra.mxu1 %v2333_v21  ;;  %2050 = vmatpush1.bf16.msra.mxu0 %v2911_v24  ;;  %v3006_v21 = vld [vmem:[%s3066_s21 + $0x784] ss:$8 sps:$4 sm:$0xff]   ;;  %v3001_v24 = vld [vmem:[%s3066_s21 + $0x680] ss:$8 sps:$4 sm:$0xff]  }
  0xd2   : > { %2091 = vmatpush1.bf16.msra.mxu1 %v2914_v25  ;;  %2051 = vmatprep.subr.bf16.mxu0 %v2919_v26  ;;  %v3004_v25 = vld [vmem:[%s3066_s21 + $0x780] ss:$8 sps:$4 sm:$0xff]   ;;  %v2335_v26 = vcombine.low %v3299_v22, %v3299_v22 }
  0xd3   : > { %2092 = vmatprep.subr.bf16.mxu1 %v2922_v27  ;;  %2081 = vmatprep.mubr.bf16.mxu0 %v2336_v18  ;;  %v2337_v27 = vcombine.low %v3302_v23, %v3302_v23 }
  0xd4   : > { %2122 = vmatprep.mubr.bf16.mxu1 %v2338_v19 }
  0xd5   : > { %2052 = vmatpush1.bf16.msra.mxu0 %v2917_v28 }
  0xd6   : > { %2093 = vmatpush1.bf16.msra.mxu1 %v2920_v29  ;;  %2053 = vmatprep.subr.bf16.mxu0 %v2925_v30 }
  0xd7   : > { %2094 = vmatprep.subr.bf16.mxu1 %v2928_v31 }
  0xd9   : > { %2054 = vmatpush1.bf16.msra.mxu0 %v2923_v32 }
  0xda   : > { %2095 = vmatpush1.bf16.msra.mxu1 %v2926_v33  ;;  %2055 = vmatprep.subr.bf16.mxu0 %v2931_v34 }
  0xdb   : > { %2096 = vmatprep.subr.bf16.mxu1 %v2934_v35 }
  0xdd   : > { %2056 = vmatpush1.bf16.msra.mxu0 %v2929_v36 }
  0xde   : > { %2097 = vmatpush1.bf16.msra.mxu1 %v2932_v37  ;;  %2057 = vmatprep.subr.bf16.mxu0 %v2937_v38 }
  0xdf   : > { %2098 = vmatprep.subr.bf16.mxu1 %v2940_v39 }
  0xe1   : > { %2058 = vmatpush1.bf16.msra.mxu0 %v2935_v40 }
  0xe2   : > { %2099 = vmatpush1.bf16.msra.mxu1 %v2938_v41  ;;  %2059 = vmatprep.subr.bf16.mxu0 %v2943_v42 }
  0xe3   : > { %2100 = vmatprep.subr.bf16.mxu1 %v2946_v43 }
  0xe5   : > { %2060 = vmatpush1.bf16.msra.mxu0 %v2941_v44 }
  0xe6   : > { %2101 = vmatpush1.bf16.msra.mxu1 %v2944_v45  ;;  %2061 = vmatprep.subr.bf16.mxu0 %v2949_v46 }
  0xe7   : > { %2102 = vmatprep.subr.bf16.mxu1 %v2952_v47 }
  0xe9   : > { %2062 = vmatpush1.bf16.msra.mxu0 %v2947_v48 }
  0xea   : > { %2103 = vmatpush1.bf16.msra.mxu1 %v2950_v49  ;;  %2063 = vmatprep.subr.bf16.mxu0 %v2955_v50 }
  0xeb   : > { %2104 = vmatprep.subr.bf16.mxu1 %v2958_v51 }
  0xed   : > { %2064 = vmatpush1.bf16.msra.mxu0 %v2953_v52 }
  0xee   : > { %2105 = vmatpush1.bf16.msra.mxu1 %v2956_v53  ;;  %2065 = vmatprep.subr.bf16.mxu0 %v2961_v54 }
  0xef   : > { %2106 = vmatprep.subr.bf16.mxu1 %v2964_v55 }
  0xf1   : > { %2066 = vmatpush2.bf16.msra.mxu0 %v2959_v56 }
  0xf2   : > { %2107 = vmatpush2.bf16.msra.mxu1 %v2962_v57  ;;  %2067 = vmatprep.subr.bf16.mxu0 %v2967_v58 }
  0xf3   : > { %2108 = vmatprep.subr.bf16.mxu1 %v2970_v59 }
  0xf5   : > { %2068 = vmatpush2.bf16.msra.mxu0 %v2965_v60 }
  0xf6   : > { %2109 = vmatpush2.bf16.msra.mxu1 %v2968_v61  ;;  %2069 = vmatprep.subr.bf16.mxu0 %v2973_v62 }
  0xf7   : > { %2110 = vmatprep.subr.bf16.mxu1 %v2976_v63 }
  0xf9   : > { %2070 = vmatpush2.bf16.msra.mxu0 %v2971_v0 }
  0xfa   : > { %2111 = vmatpush2.bf16.msra.mxu1 %v2974_v1  ;;  %2071 = vmatprep.subr.bf16.mxu0 %v2979_v2 }
  0xfb   : > { %2112 = vmatprep.subr.bf16.mxu1 %v2982_v3 }
  0xfd   : > { %2072 = vmatpush2.bf16.msra.mxu0 %v2977_v4 }
  0xfe   : > { %2113 = vmatpush2.bf16.msra.mxu1 %v2980_v5  ;;  %2073 = vmatprep.subr.bf16.mxu0 %v2985_v6 }
  0xff   : > { %2114 = vmatprep.subr.bf16.mxu1 %v2988_v7 }
 0x101   : > { %2074 = vmatpush2.bf16.msra.mxu0 %v2983_v8 }
 0x102   : > { %2115 = vmatpush2.bf16.msra.mxu1 %v2986_v9  ;;  %2075 = vmatprep.subr.bf16.mxu0 %v2991_v10 }
 0x103   : > { %2116 = vmatprep.subr.bf16.mxu1 %v2994_v11 }
 0x105   : > { %2076 = vmatpush2.bf16.msra.mxu0 %v2989_v12 }
 0x106   : > { %2117 = vmatpush2.bf16.msra.mxu1 %v2992_v13  ;;  %2077 = vmatprep.subr.bf16.mxu0 %v2997_v14 }
 0x107   : > { %2118 = vmatprep.subr.bf16.mxu1 %v3000_v15 }
 0x109   : > { %2078 = vmatpush2.bf16.msra.mxu0 %v2995_v16 }
 0x10a   : > { %2119 = vmatpush2.bf16.msra.mxu1 %v2998_v17  ;;  %2079 = vmatprep.subr.bf16.mxu0 %v3003_v20 }
 0x10b   : > { %2120 = vmatprep.subr.bf16.mxu1 %v3006_v21 }
 0x10d   : > { %2080 = vmatpush2.bf16.msra.mxu0 %v3001_v24 }
 0x10e   : > { %2121 = vmatpush2.bf16.msra.mxu1 %v3004_v25 }
 0x110   : > { %v1837_v18 = vpop.f32.mrf.mxu0  ;;  %2082 = vmatmul.mubr.bf16.vlgmr.msra.gmra.mxu0 %v2335_v26 }
 0x111   : > { %v1878_v19 = vpop.f32.mrf.mxu1  ;;  %2123 = vmatmul.mubr.bf16.vlgmr.msra.gmra.mxu1 %v2337_v27 }
 0x112   : > { %v1879_v28 = vadd.f32 %v1878_v19, %v1837_v18  ;;  %v1839_v29 = vpop.f32.mrf.mxu0 }
 0x113   : > { %v1880_v30 = vpop.f32.mrf.mxu1 }
 0x114   : > { %v1881_v31 = vadd.f32 %v1880_v30, %v1839_v29  ;;  %v1841_v32 = vpop.f32.mrf.mxu0 }
 0x115   : > { %v1882_v33 = vpop.f32.mrf.mxu1 }
 0x116   : > { %v1842_v34 = vpop.f32.mrf.mxu0 }
 0x117   : > { %v1883_v35 = vpop.f32.mrf.mxu1 }
 0x150   : > { %v1919_v36 = vpop.f32.mrf.mxu0 }
 0x151   : > { %v1960_v37 = vpop.f32.mrf.mxu1  ;;  %v1920_v22 = vadd.f32 %v1919_v36, %v1879_v28 }
 0x152   : > { %v1921_v38 = vpop.f32.mrf.mxu0 }
 0x153   : > { %v1962_v39 = vpop.f32.mrf.mxu1  ;;  %v1961_v23 = vadd.f32 %v1960_v37, %v1920_v22  ;;  %v1922_v40 = vadd.f32 %v1921_v38, %v1881_v31 }
 0x154   : > { %v1923_v41 = vpop.f32.mrf.mxu0 }
 0x155   : > { %v1964_v42 = vpop.f32.mrf.mxu1  ;;  %v1963_v43 = vadd.f32 %v1962_v39, %v1922_v40 }
 0x156   : > { %v1924_v44 = vpop.f32.mrf.mxu0 }
 0x157   : > { %v1965_v45 = vpop.f32.mrf.mxu1 }
 0x190   : > { %v2001_v46 = vpop.f32.mrf.mxu0 }
 0x191   : > { %v2042_v47 = vpop.f32.mrf.mxu1  ;;  %v2002_v54 = vadd.f32 %v2001_v46, %v1961_v23 }
 0x192   : > { %v2003_v48 = vpop.f32.mrf.mxu0 }
 0x193   : > { %v2044_v49 = vpop.f32.mrf.mxu1  ;;  %v2004_v55 = vadd.f32 %v2003_v48, %v1963_v43  ;;  %v2043_v56 = vadd.f32 %v2042_v47, %v2002_v54 }
 0x194   : > { %v2005_v50 = vpop.f32.mrf.mxu0 }
 0x195   : > { %v2046_v51 = vpop.f32.mrf.mxu1  ;;  %v2045_v59 = vadd.f32 %v2044_v49, %v2004_v55 }
 0x196   : > { %v2006_v52 = vpop.f32.mrf.mxu0 }
 0x197   : > { %v2047_v53 = vpop.f32.mrf.mxu1 }
 0x1d0   : > { %v2083_v57 = vpop.f32.mrf.mxu0 }
 0x1d1   : > { %v2124_v58 = vpop.f32.mrf.mxu1  ;;  %v2084_v60 = vadd.f32 %v2083_v57, %v2043_v56 }
 0x1d2   : > { %v2085_v61 = vpop.f32.mrf.mxu0 }
 0x1d3   : > { %v2126_v62 = vpop.f32.mrf.mxu1  ;;  %v2125_v63 = vadd.f32 %v2124_v58, %v2084_v60  ;;  %v2086_v0 = vadd.f32 %v2085_v61, %v2045_v59  ;;  %2139 = sbr.rel (%p2597_p4) target bundleno = 551 (0x227), region = 40 }
 0x1d4   : > { %v2087_v1 = vpop.f32.mrf.mxu0 }
 0x1d5   : > { %v2128_v2 = vpop.f32.mrf.mxu1  ;;  %2134 = vst [vmem:[%s2133_s29] sm:$0xff] %v2125_v63  ;;  %v2127_v3 = vadd.f32 %v2126_v62, %v2086_v0 }
 0x1d6   : > { %v2088_v4 = vpop.f32.mrf.mxu0 }
 0x1d7   : > { %v2129_v5 = vpop.f32.mrf.mxu1  ;;  %2135 = vst [vmem:[%s2133_s29 + $0x8] sm:$0xff] %v2127_v3 }
 0x1de   : > { %v2140_v6 = vld [vmem:[%s3440_s4] sm:$0xff]  ;;  %v2142_v7 = vld [vmem:[%s3440_s4 + $0x10] sm:$0xff]  ;;  %v2141_v11 = vld [vmem:[%s3440_s4 + $0x8] sm:$0xff] }
 0x1df   : > { %v2144_v8 = vld [vmem:[%s3440_s4 + $0x20] sm:$0xff]  ;;  %v2146_v9 = vld [vmem:[%s3440_s4 + $0x30] sm:$0xff]  ;;  %v2148_v10 = vadd.f32 %v2142_v7, %v2140_v6  ;;  %v2143_v12 = vld [vmem:[%s3440_s4 + $0x18] sm:$0xff] }
 0x1e0   : > { %v2145_v13 = vld [vmem:[%s3440_s4 + $0x28] sm:$0xff]  ;;  %v2157_v15 = vadd.f32 %v2143_v12, %v2141_v11  ;;  %v2147_v16 = vld [vmem:[%s3440_s4 + $0x38] sm:$0xff] }
 0x1e1   : > { %v2149_v14 = vadd.f32 %v2148_v10, %v2144_v8 }
 0x1e2   : > { %v2158_v20 = vadd.f32 %v2157_v15, %v2145_v13 }
 0x1e3   : > { %v2150_v17 = vadd.f32 %v2149_v14, %v2146_v9 }
 0x1e4   : > { %v2159_v24 = vadd.f32 %v2158_v20, %v2147_v16 }
 0x1e5   : > { %v2151_v21 = vrot.slane %v2150_v17, 4 }
 0x1e6   : > { %v2160_v26 = vrot.slane %v2159_v24, 4 }
 0x1e7   : > { %v2152_v25 = vadd.f32 %v2151_v21, %v2150_v17 }
 0x1e8   : > { %v2161_v18 = vadd.f32 %v2160_v26, %v2159_v24 }
 0x1e9   : > { %v2153_v27 = vrot.slane %v2152_v25, 2 }
 0x1ea   : > { %v2162_v28 = vrot.slane %v2161_v18, 2 }
 0x1eb   : > { %v2154_v19 = vadd.f32 %v2153_v27, %v2152_v25 }
 0x1ec   : > { %v2163_v30 = vadd.f32 %v2162_v28, %v2161_v18 }
 0x1ed   : > { %v2155_v29 = vrot.slane %v2154_v19, 1 }
 0x1ee   : > { %v2164_v32 = vrot.slane %v2163_v30, 1 }
 0x1ef   : > { %v2156_v31 = vadd.f32 %v2155_v29, %v2154_v19 }
 0x1f0   : > { %v2165_v34 = vadd.f32 %v2164_v32, %v2163_v30 }
 0x1f1   : > { %v2167_v33 = vmul.f32 0.03125, %v2156_v31 }
 0x1f2   : > { %v2168_v38 = vmul.f32 0.03125, %v2165_v34 }
 0x1f3   : > { %v2169_v35 = vsub.f32 %v2140_v6, %v2167_v33  ;;  %v2171_v36 = vsub.f32 %v2142_v7, %v2167_v33  ;;  %v2173_v37 = vsub.f32 %v2144_v8, %v2167_v33  ;;  %v2175_v22 = vsub.f32 %v2146_v9, %v2167_v33 }
 0x1f4   : > { %v2170_v41 = vsub.f32 %v2141_v11, %v2168_v38  ;;  %v2172_v42 = vsub.f32 %v2143_v12, %v2168_v38  ;;  %v2174_v43 = vsub.f32 %v2145_v13, %v2168_v38  ;;  %v2176_v44 = vsub.f32 %v2147_v16, %v2168_v38  ;;  %v2217_v11 = vld [vmem:[%s3438_s2] sm:$0x3] }
 0x1f5   : > { %v2177_v39 = vmul.f32 %v2169_v35, %v2169_v35  ;;  %v2179_v23 = vmul.f32 %v2171_v36, %v2171_v36  ;;  %v2181_v40 = vmul.f32 %v2173_v37, %v2173_v37  ;;  %v2183_v45 = vmul.f32 %v2175_v22, %v2175_v22  ;;  %v2237_v12 = vld [vmem:[%s3439_s3] sm:$0x3] }
 0x1f6   : > { %v2178_v47 = vmul.f32 %v2170_v41, %v2170_v41  ;;  %v2180_v48 = vmul.f32 %v2172_v42, %v2172_v42  ;;  %v2182_v49 = vmul.f32 %v2174_v43, %v2174_v43  ;;  %v2184_v51 = vmul.f32 %v2176_v44, %v2176_v44 }
 0x1f7   : > { %v2185_v46 = vadd.f32 %v2179_v23, %v2177_v39  ;;  %v2219_v7 = vlaneseq }
 0x1f8   : > { %v2194_v52 = vadd.f32 %v2180_v48, %v2178_v47 }
 0x1f9   : > { %v2186_v50 = vadd.f32 %v2185_v46, %v2181_v40  ;;  %v2220_v9 = vshrl.u32 %v2219_v7, 7 }
 0x1fa   : > { %v2195_v54 = vadd.f32 %v2194_v52, %v2182_v49 }
 0x1fb   : > { %v2187_v53 = vadd.f32 %v2186_v50, %v2183_v45  ;;  %v2221_v10 = vsub.s32 0, %v2220_v9  ;;  %v2225_v13 = vsub.s32 1, %v2220_v9 }
 0x1fc   : > { %v2196_v56 = vadd.f32 %v2195_v54, %v2184_v51 }
 0x1fd   : > { %v2188_v55 = vrot.slane %v2187_v53, 4  ;;  %v2222_v14 = vrot.slane %v2217_v11, %v2221_v10  ;;  %v2242_v16 = vrot.slane %v2237_v12, %v2221_v10  ;;  %v2226_v25 = vrot.slane %v2217_v11, %v2225_v13 }
 0x1fe   : > { %v2197_v58 = vrot.slane %v2196_v56, 4  ;;  %v2246_v26 = vrot.slane %v2237_v12, %v2225_v13 }
 0x1ff   : > { %v2189_v57 = vadd.f32 %v2188_v55, %v2187_v53 }
 0x200   : > { %v2198_v60 = vadd.f32 %v2197_v58, %v2196_v56 }
 0x201   : > { %v2190_v59 = vrot.slane %v2189_v57, 2 }
 0x202   : > { %v2199_v62 = vrot.slane %v2198_v60, 2 }
 0x203   : > { %v2191_v61 = vadd.f32 %v2190_v59, %v2189_v57 }
 0x204   : > { %v2200_v0 = vadd.f32 %v2199_v62, %v2198_v60 }
 0x205   : > { %v2192_v63 = vrot.slane %v2191_v61, 1 }
 0x206   : > { %v2201_v2 = vrot.slane %v2200_v0, 1 }
 0x207   : > { %v2193_v1 = vadd.f32 %v2192_v63, %v2191_v61 }
 0x208   : > { %v2202_v4 = vadd.f32 %v2201_v2, %v2200_v0 }
 0x209   : > { %v2203_v3 = vmul.f32 0.03125, %v2193_v1 }
 0x20a   : > { %v2204_v6 = vmul.f32 0.03125, %v2202_v4 }
 0x20b   : > { %v2205_v5 = vadd.f32 1e-05, %v2203_v3 }
 0x20c   : > { %v2206_v8 = vadd.f32 1e-05, %v2204_v6 }
 0x20d   : > { %3011 = vrsqrt.f32 %v2205_v5 }
 0x20e   : > { %3013 = vrsqrt.f32 %v2206_v8 }
 0x21a   : > { %v3012_v15 = vpop.eup %3011 }
 0x21b   : > { %v2209_v17 = vmul.f32 %v3012_v15, %v2169_v35  ;;  %v2211_v20 = vmul.f32 %v3012_v15, %v2171_v36  ;;  %v2213_v21 = vmul.f32 %v3012_v15, %v2173_v37  ;;  %v2215_v24 = vmul.f32 %v3012_v15, %v2175_v22  ;;  %v3014_v27 = vpop.eup %3013 }
 0x21c   : > { %v2210_v30 = vmul.f32 %v3014_v27, %v2170_v41  ;;  %v2212_v31 = vmul.f32 %v3014_v27, %v2172_v42  ;;  %v2214_v32 = vmul.f32 %v3014_v27, %v2174_v43  ;;  %v2216_v33 = vmul.f32 %v3014_v27, %v2176_v44 }
 0x21d   : > { %v2229_v18 = vmul.f32 %v2222_v14, %v2209_v17  ;;  %v2231_v19 = vmul.f32 %v2222_v14, %v2211_v20  ;;  %v2233_v28 = vmul.f32 %v2222_v14, %v2213_v21  ;;  %v2235_v29 = vmul.f32 %v2222_v14, %v2215_v24 }
 0x21e   : > { %v2230_v40 = vmul.f32 %v2226_v25, %v2210_v30  ;;  %v2232_v35 = vmul.f32 %v2226_v25, %v2212_v31  ;;  %v2234_v36 = vmul.f32 %v2226_v25, %v2214_v32  ;;  %v2236_v37 = vmul.f32 %v2226_v25, %v2216_v33 }
 0x21f   : > { %v2249_v34 = vadd.f32 %v2242_v16, %v2229_v18  ;;  %v2251_v38 = vadd.f32 %v2242_v16, %v2231_v19  ;;  %v2253_v39 = vadd.f32 %v2242_v16, %v2233_v28  ;;  %v2255_v23 = vadd.f32 %v2242_v16, %v2235_v29 }
 0x220   : > { %v2250_v48 = vadd.f32 %v2246_v26, %v2230_v40  ;;  %v2252_v49 = vadd.f32 %v2246_v26, %v2232_v35  ;;  %v2254_v50 = vadd.f32 %v2246_v26, %v2234_v36  ;;  %v2256_v51 = vadd.f32 %v2246_v26, %v2236_v37 }
 0x221   : > { %v2257_v22 = vmax.f32 %v2249_v34, 0.0  ;;  %v2259_v45 = vmax.f32 %v2251_v38, 0.0  ;;  %v2261_v46 = vmax.f32 %v2253_v39, 0.0  ;;  %v2263_v47 = vmax.f32 %v2255_v23, 0.0 }
 0x222   : > { %v2258_v41 = vmax.f32 %v2250_v48, 0.0  ;;  %v2260_v42 = vmax.f32 %v2252_v49, 0.0  ;;  %v2262_v43 = vmax.f32 %v2254_v50, 0.0  ;;  %v2264_v44 = vmax.f32 %v2256_v51, 0.0 }
 0x223   : > { %2265 = vst [vmem:[%s3440_s4] sm:$0xff] %v2257_v22  ;;  %2267 = vst [vmem:[%s3440_s4 + $0x10] sm:$0xff] %v2259_v45 }
 0x224   : > { %2269 = vst [vmem:[%s3440_s4 + $0x20] sm:$0xff] %v2261_v46  ;;  %2271 = vst [vmem:[%s3440_s4 + $0x30] sm:$0xff] %v2263_v47 }
 0x225   : > { %2266 = vst [vmem:[%s3440_s4 + $0x8] sm:$0xff] %v2258_v41  ;;  %2268 = vst [vmem:[%s3440_s4 + $0x18] sm:$0xff] %v2260_v42 }
 0x226   : > { %2270 = vst [vmem:[%s3440_s4 + $0x28] sm:$0xff] %v2262_v43  ;;  %2272 = vst [vmem:[%s3440_s4 + $0x38] sm:$0xff] %v2264_v44 }
 0x227 PF: > { %s14_s15 = sadd.s32 1, %s3021_s15  }
 0x228   : > { %p11_p5 = scmp.ge.s32.totalorder %s14_s15, 6  }
 0x22a   :  { %13 = sbr.rel (!%p11_p5) target bundleno = 1 (0x1), region = 70 }

// kernel: generator_forward.7
= control target key start
LH: loop header
LB: loop body
LE: loop exit
PB: predicated region body
PF: predicated region fallthrough
CT: control target
= control target key end

     0   :  { %s1564_s15 = smov 0   ;;  %s1826_s0 = inlined_call_operand.vmem [shape: bf16[4,32,1024], index: 0, kind: input, shape index: {}]   ;;  %s1827_s1 = inlined_call_operand.vmem [shape: bf16[4,1024,128], index: 1, kind: input, shape index: {}]   ;;  %s1828_s2 = inlined_call_operand.vmem [shape: f32[1,128], index: 2, kind: input, shape index: {}]   ;;  %s1829_s3 = inlined_call_operand.vmem [shape: f32[1,128], index: 3, kind: input, shape index: {}]   ;;  %s1830_s4 = inlined_call_operand.vmem [shape: f32[4,32,128], index: 4, kind: output, shape index: {}]  }
   0x1 LB: > { %s1570_s16 = sadd.s32 4294967295, %s1537_s15   ;;  %p1252_p0 = scmp.ge.s32.totalorder %s1537_s15, 1  ;;  %s1537_s15 = sphi %s1564_s15, %s14_s15  }
   0x2   : > { %p167_p1 = scmp.lt.s32.totalorder %s1537_s15, 5 }
   0x4   : > { %p168_p2 = pnand %p1252_p0, %p167_p1 }
   0x5   : > { %p193_p3 = scmp.lt.s32.totalorder (!%p168_p2), %s1570_s16, 3  ;;  %s1337_s26 = sshll.u32 (!%p168_p2), %s1570_s16, 5 }
   0x6   : > { %171 = sbr.rel (%p168_p2) target bundleno = 431 (0x1af), region = 36  ;;  %s1674_s29 = scalar_lea.vmem (!%p168_p2), %s1830_s4, %s1337_s26 }
   0x7   : > { %p1338_p4 = scmp.ne.s32.totalorder (!%p168_p2), %s1570_s16, 3 }
   0xb   : > { %s1576_s17 = scalar_select %p193_p3, %s1570_s16, 3 }
   0xd   : > { %s1344_s18 = sshll.u32 %s1576_s17, 9  ;;  %s1343_s22 = sshll.u32 %s1576_s17, 7 }
   0xe   : > { %s1582_s21 = scalar_lea.vmem %s1827_s1, %s1344_s18  ;;  %s1618_s25 = scalar_lea.vmem %s1826_s0, %s1343_s22 }
   0xf   : > { %v1465_v0 = vld [vmem:[%s1582_s21 + $0x78] sm:$0xff]   ;;  %v1469_v4 = vld [vmem:[%s1582_s21 + $0x70] sm:$0xff]   ;;  %v1473_v8 = vld [vmem:[%s1582_s21 + $0x68] sm:$0xff]  }
  0x10   : > { %v1466_v1 = vld [vmem:[%s1582_s21 + $0xf8] sm:$0xff]   ;;  %1345 = vmatprep.subr.bf16.mxu0 %v1465_v0  ;;  %v1470_v5 = vld [vmem:[%s1582_s21 + $0xf0] sm:$0xff]   ;;  %v1474_v9 = vld [vmem:[%s1582_s21 + $0xe8] sm:$0xff]  }
  0x11   : > { %v1467_v2 = vld [vmem:[%s1582_s21 + $0x38] sm:$0xff]   ;;  %1373 = vmatprep.subr.bf16.mxu1 %v1466_v1  ;;  %v1471_v6 = vld [vmem:[%s1582_s21 + $0x30] sm:$0xff]   ;;  %v1475_v10 = vld [vmem:[%s1582_s21 + $0x28] sm:$0xff]  }
  0x12   : > { %v1468_v3 = vld [vmem:[%s1582_s21 + $0xb8] sm:$0xff]   ;;  %1346 = vmatpush3.bf16.msra.mxu0 %v1467_v2  ;;  %v1472_v7 = vld [vmem:[%s1582_s21 + $0xb0] sm:$0xff]   ;;  %v1476_v11 = vld [vmem:[%s1582_s21 + $0xa8] sm:$0xff]  }
  0x13   : > { %1374 = vmatpush3.bf16.msra.mxu1 %v1468_v3  ;;  %1347 = vmatprep.subr.bf16.mxu0 %v1469_v4  ;;  %v1477_v12 = vld [vmem:[%s1582_s21 + $0x60] sm:$0xff]   ;;  %v1481_v16 = vld [vmem:[%s1582_s21 + $0x58] sm:$0xff]   ;;  %v1485_v20 = vld [vmem:[%s1582_s21 + $0x50] sm:$0xff]  }
  0x14   : > { %1375 = vmatprep.subr.bf16.mxu1 %v1470_v5  ;;  %v1478_v13 = vld [vmem:[%s1582_s21 + $0xe0] sm:$0xff]   ;;  %v1482_v17 = vld [vmem:[%s1582_s21 + $0xd8] sm:$0xff]   ;;  %v1486_v21 = vld [vmem:[%s1582_s21 + $0xd0] sm:$0xff]  }
  0x15   : > { %v1479_v14 = vld [vmem:[%s1582_s21 + $0x20] sm:$0xff]   ;;  %v1483_v18 = vld [vmem:[%s1582_s21 + $0x18] sm:$0xff]   ;;  %v1487_v22 = vld [vmem:[%s1582_s21 + $0x10] sm:$0xff]  }
  0x16   : > { %1348 = vmatpush3.bf16.msra.mxu0 %v1471_v6  ;;  %v1480_v15 = vld [vmem:[%s1582_s21 + $0xa0] sm:$0xff]   ;;  %v1484_v19 = vld [vmem:[%s1582_s21 + $0x98] sm:$0xff]   ;;  %v1488_v23 = vld [vmem:[%s1582_s21 + $0x90] sm:$0xff]  }
  0x17   : > { %1376 = vmatpush3.bf16.msra.mxu1 %v1472_v7  ;;  %1349 = vmatprep.subr.bf16.mxu0 %v1473_v8  ;;  %v1489_v24 = vld [vmem:[%s1582_s21 + $0x48] sm:$0xff]   ;;  %v1493_v28 = vld [vmem:[%s1582_s21 + $0x40] sm:$0xff]   ;;  %v1497_v40 = vld [vmem:[%s1582_s21 + $0x178] sm:$0xff]  }
  0x18   : > { %1377 = vmatprep.subr.bf16.mxu1 %v1474_v9  ;;  %v1490_v25 = vld [vmem:[%s1582_s21 + $0xc8] sm:$0xff]   ;;  %v1494_v29 = vld [vmem:[%s1582_s21 + $0xc0] sm:$0xff]   ;;  %v1498_v41 = vld [vmem:[%s1582_s21 + $0x1f8] sm:$0xff]  }
  0x19   : > { %v1491_v26 = vld [vmem:[%s1582_s21 + $0x8] sm:$0xff]   ;;  %v1495_v30 = vld [vmem:[%s1582_s21] sm:$0xff]   ;;  %v1499_v42 = vld [vmem:[%s1582_s21 + $0x138] sm:$0xff]  }
  0x1a   : > { %1350 = vmatpush3.bf16.msra.mxu0 %v1475_v10  ;;  %v1492_v27 = vld [vmem:[%s1582_s21 + $0x88] sm:$0xff]   ;;  %v1496_v31 = vld [vmem:[%s1582_s21 + $0x80] sm:$0xff]   ;;  %v1500_v43 = vld [vmem:[%s1582_s21 + $0x1b8] sm:$0xff]  }
  0x1b   : > { %1378 = vmatpush3.bf16.msra.mxu1 %v1476_v11  ;;  %1351 = vmatprep.subr.bf16.mxu0 %v1477_v12  ;;  %v204_v32 = vld [vmem:[%s1618_s25] sm:$0xff]  ;;  %v205_v34 = vld [vmem:[%s1618_s25 + $0x8] sm:$0xff]  ;;  %v1501_v44 = vld [vmem:[%s1582_s21 + $0x170] sm:$0xff]  }
  0x1c   : > { %1379 = vmatprep.subr.bf16.mxu1 %v1478_v13  ;;  %v208_v33 = vld [vmem:[%s1618_s25 + $0x20] sm:$0xff]  ;;  %v209_v37 = vld [vmem:[%s1618_s25 + $0x28] sm:$0xff]  ;;  %v1502_v45 = vld [vmem:[%s1582_s21 + $0x1f0] sm:$0xff]  }
  0x1d   : > { %v1257_v35 = vcombine.low %v204_v32, %v208_v33  ;;  %v1258_v36 = vcombine.high %v204_v32, %v208_v33  ;;  %v1259_v38 = vcombine.low %v205_v34, %v209_v37  ;;  %v1260_v39 = vcombine.high %v205_v34, %v209_v37  ;;  %v1503_v46 = vld [vmem:[%s1582_s21 + $0x130] sm:$0xff]   ;;  %v1505_v48 = vld [vmem:[%s1582_s21 + $0x168] sm:$0xff]   ;;  %v1509_v52 = vld [vmem:[%s1582_s21 + $0x160] sm:$0xff]  }
  0x1e   : > { %1352 = vmatpush3.bf16.msra.mxu0 %v1479_v14  ;;  %v1504_v47 = vld [vmem:[%s1582_s21 + $0x1b0] sm:$0xff]   ;;  %v1506_v49 = vld [vmem:[%s1582_s21 + $0x1e8] sm:$0xff]   ;;  %v1510_v53 = vld [vmem:[%s1582_s21 + $0x1e0] sm:$0xff]  }
  0x1f   : > { %1380 = vmatpush3.bf16.msra.mxu1 %v1480_v15  ;;  %1353 = vmatprep.subr.bf16.mxu0 %v1481_v16  ;;  %v1507_v50 = vld [vmem:[%s1582_s21 + $0x128] sm:$0xff]   ;;  %v1511_v54 = vld [vmem:[%s1582_s21 + $0x120] sm:$0xff]   ;;  %v1513_v56 = vld [vmem:[%s1582_s21 + $0x158] sm:$0xff]  }
  0x20   : > { %1381 = vmatprep.subr.bf16.mxu1 %v1482_v17  ;;  %844 = vmatprep.mubr.bf16.mxu0 %v1258_v36  ;;  %v1508_v51 = vld [vmem:[%s1582_s21 + $0x1a8] sm:$0xff]   ;;  %v1512_v55 = vld [vmem:[%s1582_s21 + $0x1a0] sm:$0xff]   ;;  %v1514_v57 = vld [vmem:[%s1582_s21 + $0x1d8] sm:$0xff]  }
  0x21   : > { %893 = vmatprep.mubr.bf16.mxu1 %v1260_v39  ;;  %v212_v58 = vld [vmem:[%s1618_s25 + $0x40] sm:$0xff]  ;;  %v213_v61 = vld [vmem:[%s1618_s25 + $0x48] sm:$0xff]  ;;  %v1515_v1 = vld [vmem:[%s1582_s21 + $0x118] sm:$0xff]  }
  0x22   : > { %1354 = vmatpush3.bf16.msra.mxu0 %v1483_v18  ;;  %v216_v59 = vld [vmem:[%s1618_s25 + $0x60] sm:$0xff]  ;;  %v217_v62 = vld [vmem:[%s1618_s25 + $0x68] sm:$0xff]  ;;  %v1516_v3 = vld [vmem:[%s1582_s21 + $0x198] sm:$0xff]  }
  0x23   : > { %1382 = vmatpush3.bf16.msra.mxu1 %v1484_v19  ;;  %1355 = vmatprep.subr.bf16.mxu0 %v1485_v20  ;;  %v1266_v60 = vcombine.high %v212_v58, %v216_v59  ;;  %v1265_v63 = vcombine.low %v212_v58, %v216_v59  ;;  %v1268_v0 = vcombine.high %v213_v61, %v217_v62  ;;  %v1517_v4 = vld [vmem:[%s1582_s21 + $0x150] sm:$0xff]   ;;  %v1521_v8 = vld [vmem:[%s1582_s21 + $0x148] sm:$0xff]   ;;  %v1525_v12 = vld [vmem:[%s1582_s21 + $0x140] sm:$0xff]  }
  0x24   : > { %1383 = vmatprep.subr.bf16.mxu1 %v1486_v21  ;;  %v1267_v2 = vcombine.low %v213_v61, %v217_v62  ;;  %v1518_v5 = vld [vmem:[%s1582_s21 + $0x1d0] sm:$0xff]   ;;  %v1522_v9 = vld [vmem:[%s1582_s21 + $0x1c8] sm:$0xff]   ;;  %v1526_v13 = vld [vmem:[%s1582_s21 + $0x1c0] sm:$0xff]  }
  0x25   : > { %v1519_v6 = vld [vmem:[%s1582_s21 + $0x110] sm:$0xff]   ;;  %v1523_v10 = vld [vmem:[%s1582_s21 + $0x108] sm:$0xff]   ;;  %v1527_v14 = vld [vmem:[%s1582_s21 + $0x100] sm:$0xff]  }
  0x26   : > { %1356 = vmatpush3.bf16.msra.mxu0 %v1487_v22  ;;  %v1520_v7 = vld [vmem:[%s1582_s21 + $0x190] sm:$0xff]   ;;  %v1524_v11 = vld [vmem:[%s1582_s21 + $0x188] sm:$0xff]   ;;  %v1528_v15 = vld [vmem:[%s1582_s21 + $0x180] sm:$0xff]  }
  0x27   : > { %1384 = vmatpush3.bf16.msra.mxu1 %v1488_v23  ;;  %1357 = vmatprep.subr.bf16.mxu0 %v1489_v24  ;;  %v206_v16 = vld [vmem:[%s1618_s25 + $0x10] sm:$0xff]  ;;  %v207_v18 = vld [vmem:[%s1618_s25 + $0x18] sm:$0xff] }
  0x28   : > { %1385 = vmatprep.subr.bf16.mxu1 %v1490_v25  ;;  %v210_v17 = vld [vmem:[%s1618_s25 + $0x30] sm:$0xff]  ;;  %v211_v19 = vld [vmem:[%s1618_s25 + $0x38] sm:$0xff] }
  0x29   : > { %v1261_v20 = vcombine.low %v206_v16, %v210_v17  ;;  %v1262_v21 = vcombine.high %v206_v16, %v210_v17  ;;  %v1263_v22 = vcombine.low %v207_v18, %v211_v19  ;;  %v1264_v23 = vcombine.high %v207_v18, %v211_v19  ;;  %v214_v24 = vld [vmem:[%s1618_s25 + $0x50] sm:$0xff] }
  0x2a   : > { %1358 = vmatpush3.bf16.msra.mxu0 %v1491_v26  ;;  %v218_v25 = vld [vmem:[%s1618_s25 + $0x70] sm:$0xff]  ;;  %v215_v26 = vld [vmem:[%s1618_s25 + $0x58] sm:$0xff] }
  0x2b   : > { %1386 = vmatpush3.bf16.msra.mxu1 %v1492_v27  ;;  %1359 = vmatprep.subr.bf16.mxu0 %v1493_v28  ;;  %v1270_v27 = vcombine.high %v214_v24, %v218_v25  ;;  %v219_v28 = vld [vmem:[%s1618_s25 + $0x78] sm:$0xff] }
  0x2c   : > { %1387 = vmatprep.subr.bf16.mxu1 %v1494_v29  ;;  %v1272_v29 = vcombine.high %v215_v26, %v219_v28 }
  0x2e   : > { %1360 = vmatpush3.bf16.msra.mxu0 %v1495_v30  ;;  %v1269_v30 = vcombine.low %v214_v24, %v218_v25 }
  0x2f   : > { %1388 = vmatpush3.bf16.msra.mxu1 %v1496_v31  ;;  %1401 = vmatprep.subr.bf16.mxu0 %v1497_v40  ;;  %v1271_v31 = vcombine.low %v215_v26, %v219_v28 }
  0x30   : > { %1429 = vmatprep.subr.bf16.mxu1 %v1498_v41 }
  0x31   : > { %845 = vmatmul.mubr.bf16.vlgmr.msra.gmra.mxu0 %v1257_v35 }
  0x32   : > { %894 = vmatmul.mubr.bf16.vlgmr.msra.gmra.mxu1 %v1259_v38  ;;  %1402 = vmatpush3.bf16.msra.mxu0 %v1499_v42 }
  0x33   : > { %1430 = vmatpush3.bf16.msra.mxu1 %v1500_v43  ;;  %1403 = vmatprep.subr.bf16.mxu0 %v1501_v44 }
  0x34   : > { %1431 = vmatprep.subr.bf16.mxu1 %v1502_v45  ;;  %852 = vmatprep.mubr.bf16.mxu0 %v1266_v60 }
  0x35   : > { %901 = vmatprep.mubr.bf16.mxu1 %v1268_v0 }
  0x36   : > { %1404 = vmatpush3.bf16.msra.mxu0 %v1503_v46 }
  0x37   : > { %1432 = vmatpush3.bf16.msra.mxu1 %v1504_v47  ;;  %1405 = vmatprep.subr.bf16.mxu0 %v1505_v48 }
  0x38   : > { %1433 = vmatprep.subr.bf16.mxu1 %v1506_v49 }
  0x39   : > { %853 = vmatmul.mubr.bf16.gmra.mxu0 %v1265_v63 }
  0x3a   : > { %1406 = vmatpush3.bf16.msra.mxu0 %v1507_v50  ;;  %902 = vmatmul.mubr.bf16.gmra.mxu1 %v1267_v2 }
  0x3b   : > { %1434 = vmatpush3.bf16.msra.mxu1 %v1508_v51  ;;  %1407 = vmatprep.subr.bf16.mxu0 %v1509_v52 }
  0x3c   : > { %1435 = vmatprep.subr.bf16.mxu1 %v1510_v53  ;;  %942 = vmatprep.mubr.bf16.mxu0 %v1262_v21 }
  0x3d   : > { %991 = vmatprep.mubr.bf16.mxu1 %v1264_v23 }
  0x3e   : > { %1408 = vmatpush3.bf16.msra.mxu0 %v1511_v54 }
  0x3f   : > { %1436 = vmatpush3.bf16.msra.mxu1 %v1512_v55  ;;  %1409 = vmatprep.subr.bf16.mxu0 %v1513_v56 }
  0x40   : > { %1437 = vmatprep.subr.bf16.mxu1 %v1514_v57 }
  0x42   : > { %1410 = vmatpush3.bf16.msra.mxu0 %v1515_v1 }
  0x43   : > { %1438 = vmatpush3.bf16.msra.mxu1 %v1516_v3  ;;  %1411 = vmatprep.subr.bf16.mxu0 %v1517_v4 }
  0x44   : > { %1439 = vmatprep.subr.bf16.mxu1 %v1518_v5 }
  0x46   : > { %1412 = vmatpush3.bf16.msra.mxu0 %v1519_v6 }
  0x47   : > { %1440 = vmatpush3.bf16.msra.mxu1 %v1520_v7  ;;  %1413 = vmatprep.subr.bf16.mxu0 %v1521_v8 }
  0x48   : > { %1441 = vmatprep.subr.bf16.mxu1 %v1522_v9 }
  0x4a   : > { %1414 = vmatpush3.bf16.msra.mxu0 %v1523_v10 }
  0x4b   : > { %1442 = vmatpush3.bf16.msra.mxu1 %v1524_v11  ;;  %1415 = vmatprep.subr.bf16.mxu0 %v1525_v12 }
  0x4c   : > { %1443 = vmatprep.subr.bf16.mxu1 %v1526_v13 }
  0x4e   : > { %1416 = vmatpush3.bf16.msra.mxu0 %v1527_v14 }
  0x4f   : > { %1444 = vmatpush3.bf16.msra.mxu1 %v1528_v15 }
  0x51   : > { %943 = vmatmul.mubr.bf16.vlgmr.msra.gmra.mxu0 %v1261_v20 }
  0x52   : > { %992 = vmatmul.mubr.bf16.vlgmr.msra.gmra.mxu1 %v1263_v22  ;;  %950 = vmatprep.mubr.bf16.mxu0 %v1270_v27 }
  0x53   : > { %999 = vmatprep.mubr.bf16.mxu1 %v1272_v29 }
  0x59   : > { %951 = vmatmul.mubr.bf16.gmra.mxu0 %v1269_v30 }
  0x5a   : > { %1000 = vmatmul.mubr.bf16.gmra.mxu1 %v1271_v31 }
  0xf1   : > { %v1361_v32 = vpop.f32.mrf.mxu0 }
  0xf2   : > { %v1389_v33 = vpop.f32.mrf.mxu1 }
  0xf3   : > { %v1362_v34 = vpop.f32.mrf.mxu0 }
  0xf4   : > { %v1390_v35 = vpop.f32.mrf.mxu1  ;;  %v1363_v48 = vadd.f32 %v1362_v34, %v1361_v32 }
  0xf5   : > { %v1364_v36 = vpop.f32.mrf.mxu0  ;;  %v1391_v49 = vadd.f32 %v1390_v35, %v1389_v33 }
  0xf6   : > { %v1392_v37 = vpop.f32.mrf.mxu1 }
  0xf7   : > { %v1365_v38 = vpop.f32.mrf.mxu0  ;;  %v896_v54 = vadd.f32 %v1391_v49, %v1363_v48 }
  0xf8   : > { %v1393_v39 = vpop.f32.mrf.mxu1  ;;  %v1366_v55 = vadd.f32 %v1365_v38, %v1364_v36 }
  0xf9   : > { %v1367_v40 = vpop.f32.mrf.mxu0  ;;  %v1394_v56 = vadd.f32 %v1393_v39, %v1392_v37 }
  0xfa   : > { %v1395_v41 = vpop.f32.mrf.mxu1 }
  0xfb   : > { %v1368_v42 = vpop.f32.mrf.mxu0  ;;  %v899_v2 = vadd.f32 %v1394_v56, %v1366_v55 }
  0xfc   : > { %v1396_v43 = vpop.f32.mrf.mxu1  ;;  %v1369_v62 = vadd.f32 %v1368_v42, %v1367_v40 }
  0xfd   : > { %v1370_v44 = vpop.f32.mrf.mxu0  ;;  %v1397_v63 = vadd.f32 %v1396_v43, %v1395_v41 }
  0xfe   : > { %v1398_v45 = vpop.f32.mrf.mxu1 }
  0xff   : > { %v1371_v46 = vpop.f32.mrf.mxu0  ;;  %v904_v9 = vadd.f32 %v1397_v63, %v1369_v62 }
 0x100   : > { %v1399_v47 = vpop.f32.mrf.mxu1  ;;  %v1372_v12 = vadd.f32 %v1371_v46, %v1370_v44 }
 0x101   : > { %v1400_v13 = vadd.f32 %v1399_v47, %v1398_v45 }
 0x103   : > { %v907_v22 = vadd.f32 %v1400_v13, %v1372_v12 }
 0x111   : > { %v1417_v50 = vpop.f32.mrf.mxu0 }
 0x112   : > { %v1445_v51 = vpop.f32.mrf.mxu1 }
 0x113   : > { %v1418_v52 = vpop.f32.mrf.mxu0 }
 0x114   : > { %v1446_v53 = vpop.f32.mrf.mxu1  ;;  %v1419_v57 = vadd.f32 %v1418_v52, %v1417_v50 }
 0x115   : > { %v1420_v58 = vpop.f32.mrf.mxu0  ;;  %v1447_v61 = vadd.f32 %v1446_v53, %v1445_v51 }
 0x116   : > { %v1448_v59 = vpop.f32.mrf.mxu1  ;;  %v945_v60 = vadd.f32 %v1419_v57, %v896_v54 }
 0x117   : > { %v1421_v0 = vpop.f32.mrf.mxu0 }
 0x118   : > { %v1449_v1 = vpop.f32.mrf.mxu1  ;;  %v994_v3 = vadd.f32 %v1447_v61, %v945_v60  ;;  %v1422_v4 = vadd.f32 %v1421_v0, %v1420_v58 }
 0x119   : > { %v1423_v5 = vpop.f32.mrf.mxu0  ;;  %v1450_v8 = vadd.f32 %v1449_v1, %v1448_v59 }
 0x11a   : > { %v1451_v6 = vpop.f32.mrf.mxu1  ;;  %1010 = vst [vmem:[%s1674_s29] sm:$0xff] %v994_v3  ;;  %v948_v7 = vadd.f32 %v1422_v4, %v899_v2 }
 0x11b   : > { %v1424_v10 = vpop.f32.mrf.mxu0 }
 0x11c   : > { %v1452_v11 = vpop.f32.mrf.mxu1  ;;  %v997_v14 = vadd.f32 %v1450_v8, %v948_v7  ;;  %v1425_v15 = vadd.f32 %v1424_v10, %v1423_v5 }
 0x11d   : > { %v1426_v16 = vpop.f32.mrf.mxu0  ;;  %v1453_v19 = vadd.f32 %v1452_v11, %v1451_v6 }
 0x11e   : > { %v1454_v17 = vpop.f32.mrf.mxu1  ;;  %1011 = vst [vmem:[%s1674_s29 + $0x8] sm:$0xff] %v997_v14  ;;  %v953_v18 = vadd.f32 %v1425_v15, %v904_v9 }
 0x11f   : > { %v1427_v20 = vpop.f32.mrf.mxu0 }
 0x120   : > { %v1455_v21 = vpop.f32.mrf.mxu1  ;;  %v1002_v23 = vadd.f32 %v1453_v19, %v953_v18  ;;  %v1428_v24 = vadd.f32 %v1427_v20, %v1426_v16 }
 0x121   : > { %v1456_v26 = vadd.f32 %v1455_v21, %v1454_v17 }
 0x122   : > { %1012 = vst [vmem:[%s1674_s29 + $0x10] sm:$0xff] %v1002_v23  ;;  %v956_v25 = vadd.f32 %v1428_v24, %v907_v22  ;;  %1017 = sbr.rel (%p1338_p4) target bundleno = 431 (0x1af), region = 40 }
 0x124   : > { %v1005_v27 = vadd.f32 %v1456_v26, %v956_v25 }
 0x126   : > { %1013 = vst [vmem:[%s1674_s29 + $0x18] sm:$0xff] %v1005_v27 }
 0x12d   : > { %v1018_v28 = vld [vmem:[%s1830_s4] sm:$0xff]  ;;  %v1019_v29 = vld [vmem:[%s1830_s4 + $0x8] sm:$0xff]  ;;  %v1020_v30 = vld [vmem:[%s1830_s4 + $0x10] sm:$0xff] }
 0x12e   : > { %v1034_v31 = vadd.f32 %v1019_v29, %v1018_v28  ;;  %v1021_v32 = vld [vmem:[%s1830_s4 + $0x18] sm:$0xff]  ;;  %v1022_v34 = vld [vmem:[%s1830_s4 + $0x20] sm:$0xff]  ;;  %v1023_v36 = vld [vmem:[%s1830_s4 + $0x28] sm:$0xff] }
 0x12f   : > { %v1024_v38 = vld [vmem:[%s1830_s4 + $0x30] sm:$0xff]  ;;  %v1025_v40 = vld [vmem:[%s1830_s4 + $0x38] sm:$0xff]  ;;  %v1026_v42 = vld [vmem:[%s1830_s4 + $0x40] sm:$0xff] }
 0x130   : > { %v1035_v33 = vadd.f32 %v1034_v31, %v1020_v30  ;;  %v1027_v44 = vld [vmem:[%s1830_s4 + $0x48] sm:$0xff]  ;;  %v1028_v46 = vld [vmem:[%s1830_s4 + $0x50] sm:$0xff]  ;;  %v1029_v48 = vld [vmem:[%s1830_s4 + $0x58] sm:$0xff] }
 0x131   : > { %v1030_v50 = vld [vmem:[%s1830_s4 + $0x60] sm:$0xff]  ;;  %v1031_v52 = vld [vmem:[%s1830_s4 + $0x68] sm:$0xff]  ;;  %v1032_v54 = vld [vmem:[%s1830_s4 + $0x70] sm:$0xff] }
 0x132   : > { %v1036_v35 = vadd.f32 %v1035_v33, %v1021_v32  ;;  %v1033_v56 = vld [vmem:[%s1830_s4 + $0x78] sm:$0xff] }
 0x134   : > { %v1037_v37 = vadd.f32 %v1036_v35, %v1022_v34 }
 0x136   : > { %v1038_v39 = vadd.f32 %v1037_v37, %v1023_v36 }
 0x138   : > { %v1039_v41 = vadd.f32 %v1038_v39, %v1024_v38 }
 0x13a   : > { %v1040_v43 = vadd.f32 %v1039_v41, %v1025_v40 }
 0x13c   : > { %v1041_v45 = vadd.f32 %v1040_v43, %v1026_v42 }
 0x13e   : > { %v1042_v47 = vadd.f32 %v1041_v45, %v1027_v44 }
 0x140   : > { %v1043_v49 = vadd.f32 %v1042_v47, %v1028_v46 }
 0x142   : > { %v1044_v51 = vadd.f32 %v1043_v49, %v1029_v48 }
 0x144   : > { %v1045_v53 = vadd.f32 %v1044_v51, %v1030_v50 }
 0x146   : > { %v1046_v55 = vadd.f32 %v1045_v53, %v1031_v52 }
 0x148   : > { %v1047_v57 = vadd.f32 %v1046_v55, %v1032_v54 }
 0x14a   : > { %v1048_v58 = vadd.f32 %v1047_v57, %v1033_v56 }
 0x14c   : > { %v1049_v59 = vrot.slane %v1048_v58, 4 }
 0x14e   : > { %v1050_v60 = vadd.f32 %v1049_v59, %v1048_v58  ;;  %v1339_v58 = vld [vmem:[%s1828_s2] ss:$0 sm:$0xff] }
 0x150   : > { %v1051_v61 = vrot.slane %v1050_v60, 2 }
 0x152   : > { %v1052_v62 = vadd.f32 %v1051_v61, %v1050_v60 }
 0x154   : > { %v1053_v63 = vrot.slane %v1052_v62, 1 }
 0x156   : > { %v1054_v0 = vadd.f32 %v1053_v63, %v1052_v62  ;;  %v1340_v63 = vld [vmem:[%s1829_s3] ss:$0 sm:$0xff] }
 0x158   : > { %v1056_v1 = vmul.f32 0.0078125, %v1054_v0 }
 0x15a   : > { %v1057_v2 = vsub.f32 %v1018_v28, %v1056_v1  ;;  %v1058_v3 = vsub.f32 %v1019_v29, %v1056_v1  ;;  %v1059_v4 = vsub.f32 %v1020_v30, %v1056_v1  ;;  %v1060_v5 = vsub.f32 %v1021_v32, %v1056_v1 }
 0x15b   : > { %v1061_v8 = vsub.f32 %v1022_v34, %v1056_v1  ;;  %v1062_v10 = vsub.f32 %v1023_v36, %v1056_v1  ;;  %v1063_v13 = vsub.f32 %v1024_v38, %v1056_v1  ;;  %v1064_v16 = vsub.f32 %v1025_v40, %v1056_v1 }
 0x15c   : > { %v1073_v6 = vmul.f32 %v1057_v2, %v1057_v2  ;;  %v1074_v7 = vmul.f32 %v1058_v3, %v1058_v3  ;;  %v1075_v9 = vmul.f32 %v1059_v4, %v1059_v4  ;;  %v1076_v11 = vmul.f32 %v1060_v5, %v1060_v5 }
 0x15d   : > { %v1077_v14 = vmul.f32 %v1061_v8, %v1061_v8  ;;  %v1078_v17 = vmul.f32 %v1062_v10, %v1062_v10  ;;  %v1729_v19 = vsub.f32 %v1026_v42, %v1056_v1  ;;  %v1079_v20 = vmul.f32 %v1063_v13, %v1063_v13 }
 0x15e   : > { %v1089_v12 = vadd.f32 %v1074_v7, %v1073_v6  ;;  %v1731_v22 = vsub.f32 %v1027_v44, %v1056_v1  ;;  %v1080_v23 = vmul.f32 %v1064_v16, %v1064_v16  ;;  %v1733_v25 = vsub.f32 %v1028_v46, %v1056_v1 }
 0x15f   : > { %v1081_v26 = vmul.f32 %v1729_v19, %v1729_v19  ;;  %v1737_v28 = vsub.f32 %v1029_v48, %v1056_v1  ;;  %v1741_v31 = vsub.f32 %v1030_v50, %v1056_v1  ;;  %v1745_v34 = vsub.f32 %v1031_v52, %v1056_v1 }
 0x160   : > { %v1090_v15 = vadd.f32 %v1089_v12, %v1075_v9  ;;  %v1082_v29 = vmul.f32 %v1731_v22, %v1731_v22  ;;  %v1083_v32 = vmul.f32 %v1733_v25, %v1733_v25  ;;  %v1749_v37 = vsub.f32 %v1032_v54, %v1056_v1 }
 0x161   : > { %v1084_v35 = vmul.f32 %v1737_v28, %v1737_v28  ;;  %v1085_v38 = vmul.f32 %v1741_v31, %v1741_v31  ;;  %v1753_v40 = vsub.f32 %v1033_v56, %v1056_v1  ;;  %v1086_v41 = vmul.f32 %v1745_v34, %v1745_v34 }
 0x162   : > { %v1091_v18 = vadd.f32 %v1090_v15, %v1076_v11  ;;  %v1087_v43 = vmul.f32 %v1749_v37, %v1749_v37 }
 0x163   : > { %v1088_v45 = vmul.f32 %v1753_v40, %v1753_v40 }
 0x164   : > { %v1092_v21 = vadd.f32 %v1091_v18, %v1077_v14 }
 0x166   : > { %v1093_v24 = vadd.f32 %v1092_v21, %v1078_v17 }
 0x168   : > { %v1094_v27 = vadd.f32 %v1093_v24, %v1079_v20 }
 0x16a   : > { %v1095_v30 = vadd.f32 %v1094_v27, %v1080_v23 }
 0x16c   : > { %v1096_v33 = vadd.f32 %v1095_v30, %v1081_v26 }
 0x16e   : > { %v1097_v36 = vadd.f32 %v1096_v33, %v1082_v29 }
 0x170   : > { %v1098_v39 = vadd.f32 %v1097_v36, %v1083_v32 }
 0x172   : > { %v1099_v42 = vadd.f32 %v1098_v39, %v1084_v35 }
 0x174   : > { %v1100_v44 = vadd.f32 %v1099_v42, %v1085_v38 }
 0x176   : > { %v1101_v46 = vadd.f32 %v1100_v44, %v1086_v41 }
 0x178   : > { %v1102_v47 = vadd.f32 %v1101_v46, %v1087_v43 }
 0x17a   : > { %v1103_v48 = vadd.f32 %v1102_v47, %v1088_v45 }
 0x17c   : > { %v1104_v49 = vrot.slane %v1103_v48, 4 }
 0x17e   : > { %v1105_v50 = vadd.f32 %v1104_v49, %v1103_v48 }
 0x180   : > { %v1106_v51 = vrot.slane %v1105_v50, 2 }
 0x182   : > { %v1107_v52 = vadd.f32 %v1106_v51, %v1105_v50 }
 0x184   : > { %v1108_v53 = vrot.slane %v1107_v52, 1 }
 0x186   : > { %v1109_v54 = vadd.f32 %v1108_v53, %v1107_v52 }
 0x188   : > { %v1110_v55 = vmul.f32 0.0078125, %v1109_v54 }
 0x18a   : > { %v1111_v56 = vadd.f32 1e-05, %v1110_v55 }
 0x18c   : > { %1529 = vrsqrt.f32 %v1111_v56 }
 0x199   : > { %v1530_v57 = vpop.eup %1529 }
 0x19a   : > { %v1113_v59 = vmul.f32 %v1530_v57, %v1057_v2  ;;  %v1114_v60 = vmul.f32 %v1530_v57, %v1058_v3  ;;  %v1115_v61 = vmul.f32 %v1530_v57, %v1059_v4  ;;  %v1116_v62 = vmul.f32 %v1530_v57, %v1060_v5 }
 0x19b   : > { %v1117_v0 = vmul.f32 %v1530_v57, %v1061_v8  ;;  %v1118_v1 = vmul.f32 %v1530_v57, %v1062_v10  ;;  %v1119_v6 = vmul.f32 %v1530_v57, %v1063_v13  ;;  %v1120_v7 = vmul.f32 %v1530_v57, %v1064_v16 }
 0x19c   : > { %v1136_v9 = vmul.f32 %v1339_v58, %v1113_v59  ;;  %v1137_v11 = vmul.f32 %v1339_v58, %v1114_v60  ;;  %v1138_v12 = vmul.f32 %v1339_v58, %v1115_v61  ;;  %v1139_v14 = vmul.f32 %v1339_v58, %v1116_v62 }
 0x19d   : > { %v1140_v15 = vmul.f32 %v1339_v58, %v1117_v0  ;;  %v1141_v17 = vmul.f32 %v1339_v58, %v1118_v1  ;;  %v1142_v18 = vmul.f32 %v1339_v58, %v1119_v6  ;;  %v1143_v20 = vmul.f32 %v1339_v58, %v1120_v7 }
 0x19e   : > { %v1159_v2 = vadd.f32 %v1340_v63, %v1136_v9  ;;  %v1160_v3 = vadd.f32 %v1340_v63, %v1137_v11  ;;  %v1161_v4 = vadd.f32 %v1340_v63, %v1138_v12  ;;  %v1162_v5 = vadd.f32 %v1340_v63, %v1139_v14 }
 0x19f   : > { %v1163_v21 = vadd.f32 %v1340_v63, %v1140_v15  ;;  %v1164_v23 = vadd.f32 %v1340_v63, %v1141_v17  ;;  %v1165_v24 = vadd.f32 %v1340_v63, %v1142_v18  ;;  %v1166_v26 = vadd.f32 %v1340_v63, %v1143_v20 }
 0x1a0   : > { %v1175_v8 = vmax.f32 %v1159_v2, 0.0  ;;  %v1176_v10 = vmax.f32 %v1160_v3, 0.0  ;;  %v1177_v13 = vmax.f32 %v1161_v4, 0.0  ;;  %v1178_v16 = vmax.f32 %v1162_v5, 0.0 }
 0x1a1   : > { %v1179_v27 = vmax.f32 %v1163_v21, 0.0  ;;  %v1180_v29 = vmax.f32 %v1164_v23, 0.0  ;;  %v1181_v30 = vmax.f32 %v1165_v24, 0.0  ;;  %v1182_v32 = vmax.f32 %v1166_v26, 0.0 }
 0x1a2   : > { %1191 = vst [vmem:[%s1830_s4] sm:$0xff] %v1175_v8  ;;  %1192 = vst [vmem:[%s1830_s4 + $0x8] sm:$0xff] %v1176_v10  ;;  %v1121_v33 = vmul.f32 %v1530_v57, %v1729_v19  ;;  %v1122_v35 = vmul.f32 %v1530_v57, %v1731_v22  ;;  %v1123_v36 = vmul.f32 %v1530_v57, %v1733_v25 }
 0x1a3   : > { %1193 = vst [vmem:[%s1830_s4 + $0x10] sm:$0xff] %v1177_v13  ;;  %1194 = vst [vmem:[%s1830_s4 + $0x18] sm:$0xff] %v1178_v16  ;;  %v1124_v38 = vmul.f32 %v1530_v57, %v1737_v28  ;;  %v1125_v19 = vmul.f32 %v1530_v57, %v1741_v31  ;;  %v1126_v22 = vmul.f32 %v1530_v57, %v1745_v34 }
 0x1a4   : > { %1195 = vst [vmem:[%s1830_s4 + $0x20] sm:$0xff] %v1179_v27  ;;  %1196 = vst [vmem:[%s1830_s4 + $0x28] sm:$0xff] %v1180_v29  ;;  %v1127_v25 = vmul.f32 %v1530_v57, %v1749_v37  ;;  %v1128_v28 = vmul.f32 %v1530_v57, %v1753_v40  ;;  %v1144_v39 = vmul.f32 %v1339_v58, %v1121_v33 }
 0x1a5   : > { %1197 = vst [vmem:[%s1830_s4 + $0x30] sm:$0xff] %v1181_v30  ;;  %1198 = vst [vmem:[%s1830_s4 + $0x38] sm:$0xff] %v1182_v32  ;;  %v1145_v41 = vmul.f32 %v1339_v58, %v1122_v35  ;;  %v1146_v42 = vmul.f32 %v1339_v58, %v1123_v36  ;;  %v1147_v43 = vmul.f32 %v1339_v58, %v1124_v38 }
 0x1a6   : > { %v1148_v44 = vmul.f32 %v1339_v58, %v1125_v19  ;;  %v1149_v45 = vmul.f32 %v1339_v58, %v1126_v22  ;;  %v1150_v46 = vmul.f32 %v1339_v58, %v1127_v25  ;;  %v1151_v47 = vmul.f32 %v1339_v58, %v1128_v28 }
 0x1a7   : > { %v1167_v48 = vadd.f32 %v1340_v63, %v1144_v39  ;;  %v1168_v49 = vadd.f32 %v1340_v63, %v1145_v41  ;;  %v1169_v50 = vadd.f32 %v1340_v63, %v1146_v42  ;;  %v1170_v51 = vadd.f32 %v1340_v63, %v1147_v43 }
 0x1a8   : > { %v1171_v52 = vadd.f32 %v1340_v63, %v1148_v44  ;;  %v1172_v31 = vadd.f32 %v1340_v63, %v1149_v45  ;;  %v1173_v53 = vadd.f32 %v1340_v63, %v1150_v46  ;;  %v1174_v34 = vadd.f32 %v1340_v63, %v1151_v47 }
 0x1a9   : > { %v1183_v54 = vmax.f32 %v1167_v48, 0.0  ;;  %v1184_v37 = vmax.f32 %v1168_v49, 0.0  ;;  %v1185_v55 = vmax.f32 %v1169_v50, 0.0  ;;  %v1186_v40 = vmax.f32 %v1170_v51, 0.0 }
 0x1aa   : > { %v1187_v56 = vmax.f32 %v1171_v52, 0.0  ;;  %v1188_v57 = vmax.f32 %v1172_v31, 0.0  ;;  %v1189_v59 = vmax.f32 %v1173_v53, 0.0  ;;  %v1190_v60 = vmax.f32 %v1174_v34, 0.0 }
 0x1ab   : > { %1199 = vst [vmem:[%s1830_s4 + $0x40] sm:$0xff] %v1183_v54  ;;  %1200 = vst [vmem:[%s1830_s4 + $0x48] sm:$0xff] %v1184_v37 }
 0x1ac   : > { %1201 = vst [vmem:[%s1830_s4 + $0x50] sm:$0xff] %v1185_v55  ;;  %1202 = vst [vmem:[%s1830_s4 + $0x58] sm:$0xff] %v1186_v40 }
 0x1ad   : > { %1203 = vst [vmem:[%s1830_s4 + $0x60] sm:$0xff] %v1187_v56  ;;  %1204 = vst [vmem:[%s1830_s4 + $0x68] sm:$0xff] %v1188_v57 }
 0x1ae   : > { %1205 = vst [vmem:[%s1830_s4 + $0x70] sm:$0xff] %v1189_v59  ;;  %1206 = vst [vmem:[%s1830_s4 + $0x78] sm:$0xff] %v1190_v60 }
 0x1af PF: > { %s14_s15 = sadd.s32 1, %s1537_s15  }
 0x1b0   : > { %p11_p5 = scmp.ge.s32.totalorder %s14_s15, 6  }
 0x1b2   :  { %13 = sbr.rel (!%p11_p5) target bundleno = 1 (0x1), region = 70 }

// kernel: generator_forward.8
= control target key start
LH: loop header
LB: loop body
LE: loop exit
PB: predicated region body
PF: predicated region fallthrough
CT: control target
= control target key end

     0   :  { %s2039_s15 = smov 0   ;;  %s3596_s0 = inlined_call_operand.vmem [shape: bf16[4,128,512], index: 0, kind: input, shape index: {}]   ;;  %s3597_s1 = inlined_call_operand.vmem [shape: bf16[4,512,64], index: 1, kind: input, shape index: {}]   ;;  %s3598_s2 = inlined_call_operand.vmem [shape: f32[1,64], index: 2, kind: input, shape index: {}]   ;;  %s3599_s3 = inlined_call_operand.vmem [shape: f32[1,64], index: 3, kind: input, shape index: {}]   ;;  %s3600_s4 = inlined_call_operand.vmem [shape: f32[4,128,64], index: 4, kind: output, shape index: {}]  }
   0x1 LB: > { %s2045_s16 = sadd.s32 4294967295, %s2012_s15   ;;  %p1711_p0 = scmp.ge.s32.totalorder %s2012_s15, 1  ;;  %s2012_s15 = sphi %s2039_s15, %s14_s15  }
   0x2   : > { %p167_p1 = scmp.lt.s32.totalorder %s2012_s15, 5 }
   0x4   : > { %p168_p2 = pnand %p1711_p0, %p167_p1 }
   0x5   : > { %p193_p3 = scmp.lt.s32.totalorder (!%p168_p2), %s2045_s16, 3  ;;  %s1780_s25 = sshll.u32 (!%p168_p2), %s2045_s16, 7 }
   0x6   : > { %171 = sbr.rel (%p168_p2) target bundleno = 694 (0x2b6), region = 36  ;;  %s2136_s28 = scalar_lea.vmem (!%p168_p2), %s3600_s4, %s1780_s25 }
   0x7   : > { %p1781_p4 = scmp.ne.s32.totalorder (!%p168_p2), %s2045_s16, 3 }
   0xb   : > { %s2051_s17 = scalar_select %p193_p3, %s2045_s16, 3  ;;  %vm848_vm0 = vcmask 523264  }
   0xd   : > { %s1786_s18 = sshll.u32 %s2051_s17, 8 }
   0xe   : > { %s2059_s21 = scalar_lea.vmem %s3597_s1, %s1786_s18  ;;  %s2096_s24 = scalar_lea.vmem %s3596_s0, %s1786_s18 }
   0xf   : > { %v1924_v0 = vld [vmem:[%s2059_s21 + $0x78] sm:$0xff]   ;;  %v1928_v4 = vld [vmem:[%s2059_s21 + $0x70] sm:$0xff]   ;;  %v1932_v8 = vld [vmem:[%s2059_s21 + $0x68] sm:$0xff]  }
  0x10   : > { %v1925_v1 = vld [vmem:[%s2059_s21 + $0xf8] sm:$0xff]   ;;  %1788 = vmatprep.subr.bf16.mxu0 %v1924_v0  ;;  %v1929_v5 = vld [vmem:[%s2059_s21 + $0xf0] sm:$0xff]   ;;  %v1933_v9 = vld [vmem:[%s2059_s21 + $0xe8] sm:$0xff]  }
  0x11   : > { %v1926_v2 = vld [vmem:[%s2059_s21 + $0x38] sm:$0xff]   ;;  %1852 = vmatprep.subr.bf16.mxu1 %v1925_v1  ;;  %v1930_v6 = vld [vmem:[%s2059_s21 + $0x30] sm:$0xff]   ;;  %v1934_v10 = vld [vmem:[%s2059_s21 + $0x28] sm:$0xff]  }
  0x12   : > { %v1927_v3 = vld [vmem:[%s2059_s21 + $0xb8] sm:$0xff]   ;;  %1789 = vmatpush3.bf16.msra.mxu0 %v1926_v2  ;;  %v1931_v7 = vld [vmem:[%s2059_s21 + $0xb0] sm:$0xff]   ;;  %v1935_v11 = vld [vmem:[%s2059_s21 + $0xa8] sm:$0xff]  }
  0x13   : > { %1853 = vmatpush3.bf16.msra.mxu1 %v1927_v3  ;;  %1790 = vmatprep.subr.bf16.mxu0 %v1928_v4  ;;  %v1936_v12 = vld [vmem:[%s2059_s21 + $0x60] sm:$0xff]   ;;  %v1940_v16 = vld [vmem:[%s2059_s21 + $0x58] sm:$0xff]   ;;  %v1944_v20 = vld [vmem:[%s2059_s21 + $0x50] sm:$0xff]  }
  0x14   : > { %1854 = vmatprep.subr.bf16.mxu1 %v1929_v5  ;;  %v1937_v13 = vld [vmem:[%s2059_s21 + $0xe0] sm:$0xff]   ;;  %v1941_v17 = vld [vmem:[%s2059_s21 + $0xd8] sm:$0xff]   ;;  %v1945_v21 = vld [vmem:[%s2059_s21 + $0xd0] sm:$0xff]  }
  0x15   : > { %v1938_v14 = vld [vmem:[%s2059_s21 + $0x20] sm:$0xff]   ;;  %v1942_v18 = vld [vmem:[%s2059_s21 + $0x18] sm:$0xff]   ;;  %v1946_v22 = vld [vmem:[%s2059_s21 + $0x10] sm:$0xff]  }
  0x16   : > { %1791 = vmatpush3.bf16.msra.mxu0 %v1930_v6  ;;  %v1939_v15 = vld [vmem:[%s2059_s21 + $0xa0] sm:$0xff]   ;;  %v1943_v19 = vld [vmem:[%s2059_s21 + $0x98] sm:$0xff]   ;;  %v1947_v23 = vld [vmem:[%s2059_s21 + $0x90] sm:$0xff]  }
  0x17   : > { %1855 = vmatpush3.bf16.msra.mxu1 %v1931_v7  ;;  %1792 = vmatprep.subr.bf16.mxu0 %v1932_v8  ;;  %v1948_v24 = vld [vmem:[%s2059_s21 + $0x48] sm:$0xff]   ;;  %v1952_v28 = vld [vmem:[%s2059_s21 + $0x40] sm:$0xff]  }
  0x18   : > { %1856 = vmatprep.subr.bf16.mxu1 %v1933_v9  ;;  %v1949_v25 = vld [vmem:[%s2059_s21 + $0xc8] sm:$0xff]   ;;  %v1953_v29 = vld [vmem:[%s2059_s21 + $0xc0] sm:$0xff]  }
  0x19   : > { %v1950_v26 = vld [vmem:[%s2059_s21 + $0x8] sm:$0xff]   ;;  %v1954_v30 = vld [vmem:[%s2059_s21] sm:$0xff]  }
  0x1a   : > { %1793 = vmatpush3.bf16.msra.mxu0 %v1934_v10  ;;  %v1951_v27 = vld [vmem:[%s2059_s21 + $0x88] sm:$0xff]   ;;  %v1955_v31 = vld [vmem:[%s2059_s21 + $0x80] sm:$0xff]  }
  0x1b   : > { %1857 = vmatpush3.bf16.msra.mxu1 %v1935_v11  ;;  %1794 = vmatprep.subr.bf16.mxu0 %v1936_v12  ;;  %v1956_v32 = vld [vmem:[%s2096_s24] ss:$16 sps:$4 sm:$0xff]   ;;  %v1958_v33 = vld [vmem:[%s2096_s24 + $0x4] ss:$16 sps:$4 sm:$0xff]   ;;  %v1959_v34 = vld [vmem:[%s2096_s24 + $0x8] ss:$16 sps:$4 sm:$0xff]  }
  0x1c   : > { %1858 = vmatprep.subr.bf16.mxu1 %v1937_v13  ;;  %v1961_v35 = vld [vmem:[%s2096_s24 + $0xc] ss:$16 sps:$4 sm:$0xff]   ;;  %684 = vmatprep.mubr.bf16.mxu0 %v1958_v33  ;;  %v1962_v36 = vld [vmem:[%s2096_s24 + $0x24] ss:$16 sps:$4 sm:$0xff]   ;;  %v1966_v38 = vld [vmem:[%s2096_s24 + $0x20] ss:$16 sps:$4 sm:$0xff]  }
  0x1d   : > { %781 = vmatprep.mubr.bf16.mxu1 %v1961_v35  ;;  %v1964_v37 = vld [vmem:[%s2096_s24 + $0x2c] ss:$16 sps:$4 sm:$0xff]   ;;  %v1967_v39 = vld [vmem:[%s2096_s24 + $0x28] ss:$16 sps:$4 sm:$0xff]   ;;  %v1968_v40 = vld [vmem:[%s2096_s24 + $0x44] ss:$16 sps:$4 sm:$0xff]  }
  0x1e   : > { %1795 = vmatpush3.bf16.msra.mxu0 %v1938_v14  ;;  %v1970_v41 = vld [vmem:[%s2096_s24 + $0x4c] ss:$16 sps:$4 sm:$0xff]   ;;  %v1972_v42 = vld [vmem:[%s2096_s24 + $0x40] ss:$16 sps:$4 sm:$0xff]   ;;  %v1973_v43 = vld [vmem:[%s2096_s24 + $0x48] ss:$16 sps:$4 sm:$0xff]  }
  0x1f   : > { %1859 = vmatpush3.bf16.msra.mxu1 %v1939_v15  ;;  %1796 = vmatprep.subr.bf16.mxu0 %v1940_v16  ;;  %v1974_v44 = vld [vmem:[%s2096_s24 + $0x64] ss:$16 sps:$4 sm:$0xff]   ;;  %v1976_v45 = vld [vmem:[%s2096_s24 + $0x6c] ss:$16 sps:$4 sm:$0xff]   ;;  %v1978_v46 = vld [vmem:[%s2096_s24 + $0x60] ss:$16 sps:$4 sm:$0xff]  }
  0x20   : > { %1860 = vmatprep.subr.bf16.mxu1 %v1941_v17  ;;  %v1979_v47 = vld [vmem:[%s2096_s24 + $0x68] ss:$16 sps:$4 sm:$0xff]   ;;  %v1980_v48 = vld [vmem:[%s2096_s24 + $0x84] ss:$16 sps:$4 sm:$0xff]   ;;  %v1982_v49 = vld [vmem:[%s2096_s24 + $0x8c] ss:$16 sps:$4 sm:$0xff]  }
  0x21   : > { %v1984_v50 = vld [vmem:[%s2096_s24 + $0x80] ss:$16 sps:$4 sm:$0xff]   ;;  %v1985_v51 = vld [vmem:[%s2096_s24 + $0x88] ss:$16 sps:$4 sm:$0xff]   ;;  %v1986_v52 = vld [vmem:[%s2096_s24 + $0xa4] ss:$16 sps:$4 sm:$0xff]  }
  0x22   : > { %1797 = vmatpush3.bf16.msra.mxu0 %v1942_v18  ;;  %v1988_v53 = vld [vmem:[%s2096_s24 + $0xac] ss:$16 sps:$4 sm:$0xff]   ;;  %v1990_v54 = vld [vmem:[%s2096_s24 + $0xa0] ss:$16 sps:$4 sm:$0xff]   ;;  %v1991_v55 = vld [vmem:[%s2096_s24 + $0xa8] ss:$16 sps:$4 sm:$0xff]  }
  0x23   : > { %1861 = vmatpush3.bf16.msra.mxu1 %v1943_v19  ;;  %1798 = vmatprep.subr.bf16.mxu0 %v1944_v20  ;;  %v1992_v56 = vld [vmem:[%s2096_s24 + $0xc4] ss:$16 sps:$4 sm:$0xff]   ;;  %v1994_v57 = vld [vmem:[%s2096_s24 + $0xcc] ss:$16 sps:$4 sm:$0xff]   ;;  %v1996_v58 = vld [vmem:[%s2096_s24 + $0xc0] ss:$16 sps:$4 sm:$0xff]  }
  0x24   : > { %1862 = vmatprep.subr.bf16.mxu1 %v1945_v21  ;;  %v1997_v59 = vld [vmem:[%s2096_s24 + $0xc8] ss:$16 sps:$4 sm:$0xff]   ;;  %v1998_v60 = vld [vmem:[%s2096_s24 + $0xe4] ss:$16 sps:$4 sm:$0xff]   ;;  %v2000_v61 = vld [vmem:[%s2096_s24 + $0xec] ss:$16 sps:$4 sm:$0xff]  }
  0x25   : > { %v2002_v62 = vld [vmem:[%s2096_s24 + $0xe0] ss:$16 sps:$4 sm:$0xff]   ;;  %v2003_v63 = vld [vmem:[%s2096_s24 + $0xe8] ss:$16 sps:$4 sm:$0xff]  }
  0x26   : > { %1799 = vmatpush3.bf16.msra.mxu0 %v1946_v22 }
  0x27   : > { %1863 = vmatpush3.bf16.msra.mxu1 %v1947_v23  ;;  %1800 = vmatprep.subr.bf16.mxu0 %v1948_v24 }
  0x28   : > { %1864 = vmatprep.subr.bf16.mxu1 %v1949_v25 }
  0x2a   : > { %1801 = vmatpush3.bf16.msra.mxu0 %v1950_v26 }
  0x2b   : > { %1865 = vmatpush3.bf16.msra.mxu1 %v1951_v27  ;;  %1802 = vmatprep.subr.bf16.mxu0 %v1952_v28 }
  0x2c   : > { %1866 = vmatprep.subr.bf16.mxu1 %v1953_v29 }
  0x2e   : > { %1803 = vmatpush3.bf16.msra.mxu0 %v1954_v30 }
  0x2f   : > { %1867 = vmatpush3.bf16.msra.mxu1 %v1955_v31 }
  0x31   : > { %685 = vmatmul.mubr.bf16.vlgmr.msra.gmra.mxu0 %v1956_v32 }
  0x32   : > { %782 = vmatmul.mubr.bf16.vlgmr.msra.gmra.mxu1 %v1959_v34  ;;  %692 = vmatprep.mubr.bf16.mxu0 %v1962_v36 }
  0x33   : > { %789 = vmatprep.mubr.bf16.mxu1 %v1964_v37 }
  0x39   : > { %693 = vmatmul.mubr.bf16.gmra.mxu0 %v1966_v38 }
  0x3a   : > { %790 = vmatmul.mubr.bf16.gmra.mxu1 %v1967_v39  ;;  %700 = vmatprep.mubr.bf16.mxu0 %v1968_v40 }
  0x3b   : > { %797 = vmatprep.mubr.bf16.mxu1 %v1970_v41 }
  0x41   : > { %701 = vmatmul.mubr.bf16.gmra.mxu0 %v1972_v42 }
  0x42   : > { %798 = vmatmul.mubr.bf16.gmra.mxu1 %v1973_v43  ;;  %708 = vmatprep.mubr.bf16.mxu0 %v1974_v44 }
  0x43   : > { %805 = vmatprep.mubr.bf16.mxu1 %v1976_v45 }
  0x49   : > { %709 = vmatmul.mubr.bf16.gmra.mxu0 %v1978_v46 }
  0x4a   : > { %806 = vmatmul.mubr.bf16.gmra.mxu1 %v1979_v47  ;;  %716 = vmatprep.mubr.bf16.mxu0 %v1980_v48 }
  0x4b   : > { %813 = vmatprep.mubr.bf16.mxu1 %v1982_v49 }
  0x51   : > { %717 = vmatmul.mubr.bf16.gmra.mxu0 %v1984_v50 }
  0x52   : > { %814 = vmatmul.mubr.bf16.gmra.mxu1 %v1985_v51  ;;  %724 = vmatprep.mubr.bf16.mxu0 %v1986_v52 }
  0x53   : > { %821 = vmatprep.mubr.bf16.mxu1 %v1988_v53 }
  0x59   : > { %725 = vmatmul.mubr.bf16.gmra.mxu0 %v1990_v54 }
  0x5a   : > { %822 = vmatmul.mubr.bf16.gmra.mxu1 %v1991_v55  ;;  %732 = vmatprep.mubr.bf16.mxu0 %v1992_v56 }
  0x5b   : > { %829 = vmatprep.mubr.bf16.mxu1 %v1994_v57 }
  0x61   : > { %733 = vmatmul.mubr.bf16.gmra.mxu0 %v1996_v58 }
  0x62   : > { %830 = vmatmul.mubr.bf16.gmra.mxu1 %v1997_v59  ;;  %740 = vmatprep.mubr.bf16.mxu0 %v1998_v60 }
  0x63   : > { %837 = vmatprep.mubr.bf16.mxu1 %v2000_v61 }
  0x69   : > { %741 = vmatmul.mubr.bf16.gmra.mxu0 %v2002_v62 }
  0x6a   : > { %838 = vmatmul.mubr.bf16.gmra.mxu1 %v2003_v63 }
  0xf1   : > { %v1804_v0 = vpop.f32.mrf.mxu0 }
  0xf2   : > { %v1868_v1 = vpop.f32.mrf.mxu1 }
  0xf3   : > { %v1805_v2 = vpop.f32.mrf.mxu0 }
  0xf4   : > { %v1806_v3 = vadd.f32 %v1805_v2, %v1804_v0  ;;  %v1869_v4 = vpop.f32.mrf.mxu1 }
  0xf5   : > { %v1870_v5 = vadd.f32 %v1869_v4, %v1868_v1  ;;  %v1807_v6 = vpop.f32.mrf.mxu0 }
  0xf6   : > { %v1871_v7 = vpop.f32.mrf.mxu1 }
  0xf7   : > { %v784_v8 = vadd.f32 %v1870_v5, %v1806_v3  ;;  %v1808_v9 = vpop.f32.mrf.mxu0 }
  0xf8   : > { %v1809_v10 = vadd.f32 %v1808_v9, %v1807_v6  ;;  %v1872_v11 = vpop.f32.mrf.mxu1 }
  0xf9   : > { %849 = vst.msk [vmem:[%s2136_s28] sm:$0xff] %vm848_vm0, %v784_v8  ;;  %v1873_v12 = vadd.f32 %v1872_v11, %v1871_v7  ;;  %v1810_v13 = vpop.f32.mrf.mxu0 }
  0xfa   : > { %v1874_v14 = vpop.f32.mrf.mxu1 }
  0xfb   : > { %v787_v15 = vadd.f32 %v1873_v12, %v1809_v10  ;;  %v1811_v16 = vpop.f32.mrf.mxu0 }
  0xfc   : > { %v1812_v17 = vadd.f32 %v1811_v16, %v1810_v13  ;;  %v1875_v18 = vpop.f32.mrf.mxu1 }
  0xfd   : > { %850 = vst.msk [vmem:[%s2136_s28 + $0x8] sm:$0xff] %vm848_vm0, %v787_v15  ;;  %v1876_v19 = vadd.f32 %v1875_v18, %v1874_v14  ;;  %v1813_v20 = vpop.f32.mrf.mxu0 }
  0xfe   : > { %v1877_v21 = vpop.f32.mrf.mxu1 }
  0xff   : > { %v792_v22 = vadd.f32 %v1876_v19, %v1812_v17  ;;  %v1814_v23 = vpop.f32.mrf.mxu0 }
 0x100   : > { %v1815_v24 = vadd.f32 %v1814_v23, %v1813_v20  ;;  %v1878_v25 = vpop.f32.mrf.mxu1 }
 0x101   : > { %851 = vst.msk [vmem:[%s2136_s28 + $0x10] sm:$0xff] %vm848_vm0, %v792_v22  ;;  %v1879_v26 = vadd.f32 %v1878_v25, %v1877_v21  ;;  %v1816_v27 = vpop.f32.mrf.mxu0 }
 0x102   : > { %v1880_v28 = vpop.f32.mrf.mxu1 }
 0x103   : > { %v795_v29 = vadd.f32 %v1879_v26, %v1815_v24  ;;  %v1817_v30 = vpop.f32.mrf.mxu0 }
 0x104   : > { %v1818_v31 = vadd.f32 %v1817_v30, %v1816_v27  ;;  %v1881_v32 = vpop.f32.mrf.mxu1 }
 0x105   : > { %852 = vst.msk [vmem:[%s2136_s28 + $0x18] sm:$0xff] %vm848_vm0, %v795_v29  ;;  %v1882_v33 = vadd.f32 %v1881_v32, %v1880_v28  ;;  %v1819_v34 = vpop.f32.mrf.mxu0 }
 0x106   : > { %v1883_v35 = vpop.f32.mrf.mxu1 }
 0x107   : > { %v800_v36 = vadd.f32 %v1882_v33, %v1818_v31  ;;  %v1820_v37 = vpop.f32.mrf.mxu0 }
 0x108   : > { %v1821_v38 = vadd.f32 %v1820_v37, %v1819_v34  ;;  %v1884_v39 = vpop.f32.mrf.mxu1 }
 0x109   : > { %853 = vst.msk [vmem:[%s2136_s28 + $0x20] sm:$0xff] %vm848_vm0, %v800_v36  ;;  %v1885_v40 = vadd.f32 %v1884_v39, %v1883_v35  ;;  %v1822_v41 = vpop.f32.mrf.mxu0 }
 0x10a   : > { %v1886_v42 = vpop.f32.mrf.mxu1 }
 0x10b   : > { %v803_v43 = vadd.f32 %v1885_v40, %v1821_v38  ;;  %v1823_v44 = vpop.f32.mrf.mxu0 }
 0x10c   : > { %v1824_v45 = vadd.f32 %v1823_v44, %v1822_v41  ;;  %v1887_v46 = vpop.f32.mrf.mxu1 }
 0x10d   : > { %854 = vst.msk [vmem:[%s2136_s28 + $0x28] sm:$0xff] %vm848_vm0, %v803_v43  ;;  %v1888_v47 = vadd.f32 %v1887_v46, %v1886_v42  ;;  %v1825_v48 = vpop.f32.mrf.mxu0 }
 0x10e   : > { %v1889_v49 = vpop.f32.mrf.mxu1 }
 0x10f   : > { %v808_v50 = vadd.f32 %v1888_v47, %v1824_v45  ;;  %v1826_v51 = vpop.f32.mrf.mxu0 }
 0x110   : > { %v1827_v52 = vadd.f32 %v1826_v51, %v1825_v48  ;;  %v1890_v53 = vpop.f32.mrf.mxu1 }
 0x111   : > { %855 = vst.msk [vmem:[%s2136_s28 + $0x30] sm:$0xff] %vm848_vm0, %v808_v50  ;;  %v1891_v54 = vadd.f32 %v1890_v53, %v1889_v49  ;;  %v1828_v55 = vpop.f32.mrf.mxu0 }
 0x112   : > { %v1892_v56 = vpop.f32.mrf.mxu1 }
 0x113   : > { %v811_v57 = vadd.f32 %v1891_v54, %v1827_v52  ;;  %v1829_v58 = vpop.f32.mrf.mxu0 }
 0x114   : > { %v1830_v59 = vadd.f32 %v1829_v58, %v1828_v55  ;;  %v1893_v60 = vpop.f32.mrf.mxu1 }
 0x115   : > { %856 = vst.msk [vmem:[%s2136_s28 + $0x38] sm:$0xff] %vm848_vm0, %v811_v57  ;;  %v1894_v61 = vadd.f32 %v1893_v60, %v1892_v56  ;;  %v1831_v62 = vpop.f32.mrf.mxu0 }
 0x116   : > { %v1895_v63 = vpop.f32.mrf.mxu1 }
 0x117   : > { %v816_v0 = vadd.f32 %v1894_v61, %v1830_v59  ;;  %v1832_v1 = vpop.f32.mrf.mxu0 }
 0x118   : > { %v1833_v2 = vadd.f32 %v1832_v1, %v1831_v62  ;;  %v1896_v3 = vpop.f32.mrf.mxu1 }
 0x119   : > { %857 = vst.msk [vmem:[%s2136_s28 + $0x40] sm:$0xff] %vm848_vm0, %v816_v0  ;;  %v1897_v4 = vadd.f32 %v1896_v3, %v1895_v63  ;;  %v1834_v5 = vpop.f32.mrf.mxu0 }
 0x11a   : > { %v1898_v6 = vpop.f32.mrf.mxu1 }
 0x11b   : > { %v819_v7 = vadd.f32 %v1897_v4, %v1833_v2  ;;  %v1835_v8 = vpop.f32.mrf.mxu0 }
 0x11c   : > { %v1836_v9 = vadd.f32 %v1835_v8, %v1834_v5  ;;  %v1899_v10 = vpop.f32.mrf.mxu1 }
 0x11d   : > { %858 = vst.msk [vmem:[%s2136_s28 + $0x48] sm:$0xff] %vm848_vm0, %v819_v7  ;;  %v1900_v11 = vadd.f32 %v1899_v10, %v1898_v6  ;;  %v1837_v12 = vpop.f32.mrf.mxu0 }
 0x11e   : > { %v1901_v13 = vpop.f32.mrf.mxu1 }
 0x11f   : > { %v824_v14 = vadd.f32 %v1900_v11, %v1836_v9  ;;  %v1838_v15 = vpop.f32.mrf.mxu0 }
 0x120   : > { %v1839_v16 = vadd.f32 %v1838_v15, %v1837_v12  ;;  %v1902_v17 = vpop.f32.mrf.mxu1 }
 0x121   : > { %859 = vst.msk [vmem:[%s2136_s28 + $0x50] sm:$0xff] %vm848_vm0, %v824_v14  ;;  %v1903_v18 = vadd.f32 %v1902_v17, %v1901_v13  ;;  %v1840_v19 = vpop.f32.mrf.mxu0 }
 0x122   : > { %v1904_v20 = vpop.f32.mrf.mxu1 }
 0x123   : > { %v827_v21 = vadd.f32 %v1903_v18, %v1839_v16  ;;  %v1841_v22 = vpop.f32.mrf.mxu0 }
 0x124   : > { %v1842_v23 = vadd.f32 %v1841_v22, %v1840_v19  ;;  %v1905_v24 = vpop.f32.mrf.mxu1 }
 0x125   : > { %860 = vst.msk [vmem:[%s2136_s28 + $0x58] sm:$0xff] %vm848_vm0, %v827_v21  ;;  %v1906_v25 = vadd.f32 %v1905_v24, %v1904_v20  ;;  %v1843_v26 = vpop.f32.mrf.mxu0 }
 0x126   : > { %v1907_v27 = vpop.f32.mrf.mxu1 }
 0x127   : > { %v832_v28 = vadd.f32 %v1906_v25, %v1842_v23  ;;  %v1844_v29 = vpop.f32.mrf.mxu0 }
 0x128   : > { %v1845_v30 = vadd.f32 %v1844_v29, %v1843_v26  ;;  %v1908_v31 = vpop.f32.mrf.mxu1 }
 0x129   : > { %861 = vst.msk [vmem:[%s2136_s28 + $0x60] sm:$0xff] %vm848_vm0, %v832_v28  ;;  %v1909_v32 = vadd.f32 %v1908_v31, %v1907_v27  ;;  %v1846_v33 = vpop.f32.mrf.mxu0 }
 0x12a   : > { %v1910_v34 = vpop.f32.mrf.mxu1 }
 0x12b   : > { %v835_v35 = vadd.f32 %v1909_v32, %v1845_v30  ;;  %v1847_v36 = vpop.f32.mrf.mxu0 }
 0x12c   : > { %v1848_v37 = vadd.f32 %v1847_v36, %v1846_v33  ;;  %v1911_v38 = vpop.f32.mrf.mxu1 }
 0x12d   : > { %862 = vst.msk [vmem:[%s2136_s28 + $0x68] sm:$0xff] %vm848_vm0, %v835_v35  ;;  %v1912_v39 = vadd.f32 %v1911_v38, %v1910_v34  ;;  %v1849_v40 = vpop.f32.mrf.mxu0 }
 0x12e   : > { %v1913_v41 = vpop.f32.mrf.mxu1 }
 0x12f   : > { %v840_v42 = vadd.f32 %v1912_v39, %v1848_v37  ;;  %v1850_v43 = vpop.f32.mrf.mxu0 }
 0x130   : > { %v1851_v44 = vadd.f32 %v1850_v43, %v1849_v40  ;;  %v1914_v45 = vpop.f32.mrf.mxu1 }
 0x131   : > { %863 = vst.msk [vmem:[%s2136_s28 + $0x70] sm:$0xff] %vm848_vm0, %v840_v42  ;;  %v1915_v46 = vadd.f32 %v1914_v45, %v1913_v41  ;;  %868 = sbr.rel (%p1781_p4) target bundleno = 694 (0x2b6), region = 40 }
 0x133   : > { %v843_v47 = vadd.f32 %v1915_v46, %v1851_v44 }
 0x135   : > { %864 = vst.msk [vmem:[%s2136_s28 + $0x78] sm:$0xff] %vm848_vm0, %v843_v47 }
 0x13c   : > { %v2174_v48 = vld [vmem:[%s3600_s4] sm:$0xff]  ;;  %v2179_v49 = vld [vmem:[%s3600_s4 + $0x8] sm:$0xff]  ;;  %v2184_v50 = vld [vmem:[%s3600_s4 + $0x10] sm:$0xff] }
 0x13d   : > { %v2189_v51 = vld [vmem:[%s3600_s4 + $0x18] sm:$0xff]  ;;  %v933_v52 = vsel %vm848_vm0, %v2174_v48, 0.0  ;;  %v934_v53 = vsel %vm848_vm0, %v2179_v49, 0.0  ;;  %v936_v54 = vsel %vm848_vm0, %v2184_v50, 0.0  ;;  %v2200_v55 = vld [vmem:[%s3600_s4 + $0x20] sm:$0xff]  ;;  %v2207_v58 = vld [vmem:[%s3600_s4 + $0x28] sm:$0xff] }
 0x13e   : > { %v935_v56 = vadd.f32 %v934_v53, %v933_v52  ;;  %v938_v57 = vsel %vm848_vm0, %v2189_v51, 0.0  ;;  %v940_v60 = vsel %vm848_vm0, %v2200_v55, 0.0  ;;  %v2214_v61 = vld [vmem:[%s3600_s4 + $0x30] sm:$0xff]  ;;  %v942_v63 = vsel %vm848_vm0, %v2207_v58, 0.0  ;;  %v2221_v0 = vld [vmem:[%s3600_s4 + $0x38] sm:$0xff]  ;;  %v2228_v3 = vld [vmem:[%s3600_s4 + $0x40] sm:$0xff] }
 0x13f   : > { %v944_v2 = vsel %vm848_vm0, %v2214_v61, 0.0  ;;  %v946_v5 = vsel %vm848_vm0, %v2221_v0, 0.0  ;;  %v2235_v6 = vld [vmem:[%s3600_s4 + $0x48] sm:$0xff]  ;;  %v948_v8 = vsel %vm848_vm0, %v2228_v3, 0.0  ;;  %v2242_v9 = vld [vmem:[%s3600_s4 + $0x50] sm:$0xff]  ;;  %v2249_v12 = vld [vmem:[%s3600_s4 + $0x58] sm:$0xff] }
 0x140   : > { %v937_v59 = vadd.f32 %v936_v54, %v935_v56  ;;  %v950_v11 = vsel %vm848_vm0, %v2235_v6, 0.0  ;;  %v952_v14 = vsel %vm848_vm0, %v2242_v9, 0.0  ;;  %v2256_v15 = vld [vmem:[%s3600_s4 + $0x60] sm:$0xff]  ;;  %v954_v17 = vsel %vm848_vm0, %v2249_v12, 0.0  ;;  %v2263_v18 = vld [vmem:[%s3600_s4 + $0x68] sm:$0xff]  ;;  %v2270_v21 = vld [vmem:[%s3600_s4 + $0x70] sm:$0xff] }
 0x141   : > { %v956_v20 = vsel %vm848_vm0, %v2256_v15, 0.0  ;;  %v958_v23 = vsel %vm848_vm0, %v2263_v18, 0.0  ;;  %v2277_v24 = vld [vmem:[%s3600_s4 + $0x78] sm:$0xff]  ;;  %v960_v26 = vsel %vm848_vm0, %v2270_v21, 0.0  ;;  %v2284_v27 = vld [vmem:[%s3600_s4 + $0x80] sm:$0xff]  ;;  %v2291_v30 = vld [vmem:[%s3600_s4 + $0x88] sm:$0xff] }
 0x142   : > { %v939_v62 = vadd.f32 %v938_v57, %v937_v59  ;;  %v962_v29 = vsel %vm848_vm0, %v2277_v24, 0.0  ;;  %v964_v32 = vsel %vm848_vm0, %v2284_v27, 0.0  ;;  %v2298_v33 = vld [vmem:[%s3600_s4 + $0x90] sm:$0xff]  ;;  %v966_v35 = vsel %vm848_vm0, %v2291_v30, 0.0  ;;  %v2305_v36 = vld [vmem:[%s3600_s4 + $0x98] sm:$0xff]  ;;  %v2312_v39 = vld [vmem:[%s3600_s4 + $0xa0] sm:$0xff] }
 0x143   : > { %v968_v38 = vsel %vm848_vm0, %v2298_v33, 0.0  ;;  %v970_v41 = vsel %vm848_vm0, %v2305_v36, 0.0  ;;  %v2319_v42 = vld [vmem:[%s3600_s4 + $0xa8] sm:$0xff]  ;;  %v972_v44 = vsel %vm848_vm0, %v2312_v39, 0.0  ;;  %v2326_v45 = vld [vmem:[%s3600_s4 + $0xb0] sm:$0xff]  ;;  %v2333_v52 = vld [vmem:[%s3600_s4 + $0xb8] sm:$0xff] }
 0x144   : > { %v941_v1 = vadd.f32 %v940_v60, %v939_v62  ;;  %v974_v47 = vsel %vm848_vm0, %v2319_v42, 0.0  ;;  %v976_v54 = vsel %vm848_vm0, %v2326_v45, 0.0  ;;  %v2340_v56 = vld [vmem:[%s3600_s4 + $0xc0] sm:$0xff]  ;;  %v978_v59 = vsel %vm848_vm0, %v2333_v52, 0.0  ;;  %v2347_v60 = vld [vmem:[%s3600_s4 + $0xc8] sm:$0xff] }
 0x146   : > { %v943_v4 = vadd.f32 %v942_v63, %v941_v1  ;;  %v980_v63 = vsel %vm848_vm0, %v2340_v56, 0.0  ;;  %v2354_v1 = vld [vmem:[%s3600_s4 + $0xd0] sm:$0xff] }
 0x148   : > { %v945_v7 = vadd.f32 %v944_v2, %v943_v4  ;;  %v982_v4 = vsel %vm848_vm0, %v2347_v60, 0.0 }
 0x14a   : > { %v947_v10 = vadd.f32 %v946_v5, %v945_v7  ;;  %v2361_v5 = vld [vmem:[%s3600_s4 + $0xd8] sm:$0xff] }
 0x14c   : > { %v949_v13 = vadd.f32 %v948_v8, %v947_v10  ;;  %v984_v8 = vsel %vm848_vm0, %v2354_v1, 0.0  ;;  %v2368_v10 = vld [vmem:[%s3600_s4 + $0xe0] sm:$0xff] }
 0x14e   : > { %v951_v16 = vadd.f32 %v950_v11, %v949_v13  ;;  %v986_v13 = vsel %vm848_vm0, %v2361_v5, 0.0 }
 0x150   : > { %v953_v19 = vadd.f32 %v952_v14, %v951_v16  ;;  %v2375_v14 = vld [vmem:[%s3600_s4 + $0xe8] sm:$0xff] }
 0x152   : > { %v955_v22 = vadd.f32 %v954_v17, %v953_v19  ;;  %v988_v17 = vsel %vm848_vm0, %v2368_v10, 0.0  ;;  %v2382_v19 = vld [vmem:[%s3600_s4 + $0xf0] sm:$0xff] }
 0x154   : > { %v957_v25 = vadd.f32 %v956_v20, %v955_v22  ;;  %v990_v22 = vsel %vm848_vm0, %v2375_v14, 0.0 }
 0x156   : > { %v959_v28 = vadd.f32 %v958_v23, %v957_v25  ;;  %v2389_v23 = vld [vmem:[%s3600_s4 + $0xf8] sm:$0xff] }
 0x158   : > { %v961_v31 = vadd.f32 %v960_v26, %v959_v28  ;;  %v992_v26 = vsel %vm848_vm0, %v2382_v19, 0.0  ;;  %v2396_v28 = vld [vmem:[%s3600_s4 + $0x100] sm:$0xff] }
 0x15a   : > { %v963_v34 = vadd.f32 %v962_v29, %v961_v31  ;;  %v994_v31 = vsel %vm848_vm0, %v2389_v23, 0.0 }
 0x15c   : > { %v965_v37 = vadd.f32 %v964_v32, %v963_v34  ;;  %v2403_v32 = vld [vmem:[%s3600_s4 + $0x108] sm:$0xff] }
 0x15e   : > { %v967_v40 = vadd.f32 %v966_v35, %v965_v37  ;;  %v996_v35 = vsel %vm848_vm0, %v2396_v28, 0.0  ;;  %v2410_v37 = vld [vmem:[%s3600_s4 + $0x110] sm:$0xff] }
 0x160   : > { %v969_v43 = vadd.f32 %v968_v38, %v967_v40  ;;  %v998_v40 = vsel %vm848_vm0, %v2403_v32, 0.0 }
 0x162   : > { %v971_v46 = vadd.f32 %v970_v41, %v969_v43  ;;  %v2417_v41 = vld [vmem:[%s3600_s4 + $0x118] sm:$0xff] }
 0x164   : > { %v973_v53 = vadd.f32 %v972_v44, %v971_v46  ;;  %v1000_v44 = vsel %vm848_vm0, %v2410_v37, 0.0  ;;  %v2424_v46 = vld [vmem:[%s3600_s4 + $0x120] sm:$0xff] }
 0x166   : > { %v975_v57 = vadd.f32 %v974_v47, %v973_v53  ;;  %v1002_v53 = vsel %vm848_vm0, %v2417_v41, 0.0 }
 0x168   : > { %v977_v62 = vadd.f32 %v976_v54, %v975_v57  ;;  %v2431_v54 = vld [vmem:[%s3600_s4 + $0x128] sm:$0xff] }
 0x16a   : > { %v979_v2 = vadd.f32 %v978_v59, %v977_v62  ;;  %v1004_v59 = vsel %vm848_vm0, %v2424_v46, 0.0  ;;  %v2438_v62 = vld [vmem:[%s3600_s4 + $0x130] sm:$0xff] }
 0x16c   : > { %v981_v7 = vadd.f32 %v980_v63, %v979_v2  ;;  %v1006_v2 = vsel %vm848_vm0, %v2431_v54, 0.0 }
 0x16e   : > { %v983_v11 = vadd.f32 %v982_v4, %v981_v7  ;;  %v2445_v4 = vld [vmem:[%s3600_s4 + $0x138] sm:$0xff] }
 0x170   : > { %v985_v16 = vadd.f32 %v984_v8, %v983_v11  ;;  %v1008_v8 = vsel %vm848_vm0, %v2438_v62, 0.0  ;;  %v2452_v11 = vld [vmem:[%s3600_s4 + $0x140] sm:$0xff] }
 0x172   : > { %v987_v20 = vadd.f32 %v986_v13, %v985_v16  ;;  %v1010_v16 = vsel %vm848_vm0, %v2445_v4, 0.0 }
 0x174   : > { %v989_v25 = vadd.f32 %v988_v17, %v987_v20  ;;  %v2459_v17 = vld [vmem:[%s3600_s4 + $0x148] sm:$0xff] }
 0x176   : > { %v991_v29 = vadd.f32 %v990_v22, %v989_v25  ;;  %v1012_v22 = vsel %vm848_vm0, %v2452_v11, 0.0  ;;  %v2466_v25 = vld [vmem:[%s3600_s4 + $0x150] sm:$0xff] }
 0x178   : > { %v993_v34 = vadd.f32 %v992_v26, %v991_v29  ;;  %v1014_v29 = vsel %vm848_vm0, %v2459_v17, 0.0 }
 0x17a   : > { %v995_v38 = vadd.f32 %v994_v31, %v993_v34  ;;  %v2473_v31 = vld [vmem:[%s3600_s4 + $0x158] sm:$0xff] }
 0x17c   : > { %v997_v43 = vadd.f32 %v996_v35, %v995_v38  ;;  %v1016_v35 = vsel %vm848_vm0, %v2466_v25, 0.0  ;;  %v2480_v38 = vld [vmem:[%s3600_s4 + $0x160] sm:$0xff] }
 0x17e   : > { %v999_v47 = vadd.f32 %v998_v40, %v997_v43  ;;  %v1018_v43 = vsel %vm848_vm0, %v2473_v31, 0.0 }
 0x180   : > { %v1001_v57 = vadd.f32 %v1000_v44, %v999_v47  ;;  %v2487_v44 = vld [vmem:[%s3600_s4 + $0x168] sm:$0xff] }
 0x182   : > { %v1003_v63 = vadd.f32 %v1002_v53, %v1001_v57  ;;  %v1020_v53 = vsel %vm848_vm0, %v2480_v38, 0.0  ;;  %v2494_v57 = vld [vmem:[%s3600_s4 + $0x170] sm:$0xff] }
 0x184   : > { %v1005_v7 = vadd.f32 %v1004_v59, %v1003_v63  ;;  %v1022_v63 = vsel %vm848_vm0, %v2487_v44, 0.0 }
 0x186   : > { %v1007_v13 = vadd.f32 %v1006_v2, %v1005_v7  ;;  %v2501_v2 = vld [vmem:[%s3600_s4 + $0x178] sm:$0xff] }
 0x188   : > { %v1009_v20 = vadd.f32 %v1008_v8, %v1007_v13  ;;  %v1024_v8 = vsel %vm848_vm0, %v2494_v57, 0.0  ;;  %v2508_v13 = vld [vmem:[%s3600_s4 + $0x180] sm:$0xff] }
 0x18a   : > { %v1011_v26 = vadd.f32 %v1010_v16, %v1009_v20  ;;  %v1026_v20 = vsel %vm848_vm0, %v2501_v2, 0.0 }
 0x18c   : > { %v1013_v34 = vadd.f32 %v1012_v22, %v1011_v26  ;;  %v2515_v22 = vld [vmem:[%s3600_s4 + $0x188] sm:$0xff] }
 0x18d   : > { %3636 = vst [vmem:[#allocation2_spill] sm:$0xff] %v2515_v22 }
 0x18e   : > { %v1015_v40 = vadd.f32 %v1014_v29, %v1013_v34  ;;  %v1028_v29 = vsel %vm848_vm0, %v2508_v13, 0.0  ;;  %v2522_v34 = vld [vmem:[%s3600_s4 + $0x190] sm:$0xff] }
 0x18f   : > { %3637 = vst [vmem:[#allocation3_spill] sm:$0xff] %v2522_v34 }
 0x190   : > { %v1017_v47 = vadd.f32 %v1016_v35, %v1015_v40  ;;  %v1030_v40 = vsel %vm848_vm0, %v2515_v22, 0.0 }
 0x192   : > { %v1019_v59 = vadd.f32 %v1018_v43, %v1017_v47  ;;  %v2529_v43 = vld [vmem:[%s3600_s4 + $0x198] sm:$0xff] }
 0x193   : > { %3638 = vst [vmem:[#allocation4_spill] sm:$0xff] %v2529_v43 }
 0x194   : > { %v1021_v7 = vadd.f32 %v1020_v53, %v1019_v59  ;;  %v1032_v53 = vsel %vm848_vm0, %v2522_v34, 0.0  ;;  %v2536_v59 = vld [vmem:[%s3600_s4 + $0x1a0] sm:$0xff] }
 0x195   : > { %3639 = vst [vmem:[#allocation5_spill] sm:$0xff] %v2536_v59 }
 0x196   : > { %v1023_v16 = vadd.f32 %v1022_v63, %v1021_v7  ;;  %v1034_v7 = vsel %vm848_vm0, %v2529_v43, 0.0 }
 0x198   : > { %v1025_v26 = vadd.f32 %v1024_v8, %v1023_v16  ;;  %v2543_v8 = vld [vmem:[%s3600_s4 + $0x1a8] sm:$0xff] }
 0x199   : > { %3640 = vst [vmem:[#allocation6_spill] sm:$0xff] %v2543_v8 }
 0x19a   : > { %v1027_v35 = vadd.f32 %v1026_v20, %v1025_v26  ;;  %v1036_v20 = vsel %vm848_vm0, %v2536_v59, 0.0  ;;  %v2550_v26 = vld [vmem:[%s3600_s4 + $0x1b0] sm:$0xff] }
 0x19b   : > { %3641 = vst [vmem:[#allocation7_spill] sm:$0xff] %v2550_v26 }
 0x19c   : > { %v1029_v47 = vadd.f32 %v1028_v29, %v1027_v35  ;;  %v1038_v35 = vsel %vm848_vm0, %v2543_v8, 0.0 }
 0x19e   : > { %v1031_v63 = vadd.f32 %v1030_v40, %v1029_v47  ;;  %v2557_v40 = vld [vmem:[%s3600_s4 + $0x1b8] sm:$0xff] }
 0x19f   : > { %3642 = vst [vmem:[#allocation8_spill] sm:$0xff] %v2557_v40 }
 0x1a0   : > { %v1033_v16 = vadd.f32 %v1032_v53, %v1031_v63  ;;  %v1040_v53 = vsel %vm848_vm0, %v2550_v26, 0.0  ;;  %v2564_v63 = vld [vmem:[%s3600_s4 + $0x1c0] sm:$0xff] }
 0x1a1   : > { %3643 = vst [vmem:[#allocation9_spill] sm:$0xff] %v2564_v63 }
 0x1a2   : > { %v1035_v29 = vadd.f32 %v1034_v7, %v1033_v16  ;;  %v1042_v7 = vsel %vm848_vm0, %v2557_v40, 0.0  ;;  %v2571_v16 = vld [vmem:[%s3600_s4 + $0x1c8] sm:$0xff] }
 0x1a3   : > { %3644 = vst [vmem:[#allocation10_spill] sm:$0xff] %v2571_v16 }
 0x1a4   : > { %v1037_v47 = vadd.f32 %v1036_v20, %v1035_v29  ;;  %v1044_v20 = vsel %vm848_vm0, %v2564_v63, 0.0  ;;  %v2578_v29 = vld [vmem:[%s3600_s4 + $0x1d0] sm:$0xff] }
 0x1a5   : > { %3645 = vst [vmem:[#allocation11_spill] sm:$0xff] %v2578_v29 }
 0x1a6   : > { %v1039_v59 = vadd.f32 %v1038_v35, %v1037_v47  ;;  %v1046_v35 = vsel %vm848_vm0, %v2571_v16, 0.0  ;;  %v2585_v47 = vld [vmem:[%s3600_s4 + $0x1d8] sm:$0xff] }
 0x1a7   : > { %3646 = vst [vmem:[#allocation12_spill] sm:$0xff] %v2585_v47  ;;  %v1050_v63 = vsel %vm848_vm0, %v2585_v47, 0.0 }
 0x1a8   : > { %v1041_v8 = vadd.f32 %v1040_v53, %v1039_v59  ;;  %v1048_v59 = vsel %vm848_vm0, %v2578_v29, 0.0 }
 0x1aa   : > { %v1043_v26 = vadd.f32 %v1042_v7, %v1041_v8  ;;  %v2594_v8 = vld [vmem:[%s3600_s4 + $0x1e0] sm:$0xff] }
 0x1ab   : > { %3647 = vst [vmem:[#allocation13_spill] sm:$0xff] %v2594_v8  ;;  %v1052_v43 = vsel %vm848_vm0, %v2594_v8, 0.0 }
 0x1ac   : > { %v1045_v40 = vadd.f32 %v1044_v20, %v1043_v26  ;;  %v2601_v26 = vld [vmem:[%s3600_s4 + $0x1e8] sm:$0xff] }
 0x1ad   : > { %3648 = vst [vmem:[#allocation14_spill] sm:$0xff] %v2601_v26 }
 0x1ae   : > { %v1047_v53 = vadd.f32 %v1046_v35, %v1045_v40  ;;  %v1054_v40 = vsel %vm848_vm0, %v2601_v26, 0.0  ;;  %v2608_v35 = vld [vmem:[%s3600_s4 + $0x1f0] sm:$0xff] }
 0x1af   : > { %3649 = vst [vmem:[#allocation15_spill] sm:$0xff] %v2608_v35 }
 0x1b0   : > { %v1049_v7 = vadd.f32 %v1048_v59, %v1047_v53  ;;  %v2615_v59 = vld [vmem:[%s3600_s4 + $0x1f8] sm:$0xff] }
 0x1b2   : > { %v1051_v16 = vadd.f32 %v1050_v63, %v1049_v7  ;;  %v1056_v63 = vsel %vm848_vm0, %v2608_v35, 0.0 }
 0x1b4   : > { %v1053_v20 = vadd.f32 %v1052_v43, %v1051_v16  ;;  %v1058_v43 = vsel %vm848_vm0, %v2615_v59, 0.0 }
 0x1b6   : > { %v1055_v47 = vadd.f32 %v1054_v40, %v1053_v20 }
 0x1b8   : > { %v1057_v53 = vadd.f32 %v1056_v63, %v1055_v47 }
 0x1ba   : > { %v1059_v16 = vadd.f32 %v1058_v43, %v1057_v53 }
 0x1bc   : > { %v1060_v7 = vrot.slane %v1059_v16, 4 }
 0x1be   : > { %v1061_v26 = vadd.f32 %v1060_v7, %v1059_v16 }
 0x1c0   : > { %v1062_v8 = vrot.slane %v1061_v26, 2 }
 0x1c2   : > { %v1063_v29 = vadd.f32 %v1062_v8, %v1061_v26 }
 0x1c4   : > { %v1064_v34 = vrot.slane %v1063_v29, 1 }
 0x1c6   : > { %v1065_v22 = vadd.f32 %v1064_v34, %v1063_v29 }
 0x1c8   : > { %v2619_v20 = vmul.f32 0.001953125, %v1065_v22 }
 0x1ca   : > { %v2623_v40 = vsub.f32 %v2174_v48, %v2619_v20  ;;  %v2627_v35 = vsub.f32 %v2179_v49, %v2619_v20  ;;  %v2631_v47 = vsub.f32 %v2184_v50, %v2619_v20  ;;  %v2635_v63 = vsub.f32 %v2189_v51, %v2619_v20 }
 0x1cb   : > { %v2639_v22 = vsub.f32 %v2200_v55, %v2619_v20  ;;  %v2649_v50 = vsub.f32 %v2207_v58, %v2619_v20  ;;  %v2655_v55 = vsub.f32 %v2214_v61, %v2619_v20  ;;  %v2664_v58 = vsub.f32 %v2221_v0, %v2619_v20 }
 0x1cc   : > { %v1132_v48 = vmul.f32 %v2623_v40, %v2623_v40  ;;  %v1133_v34 = vmul.f32 %v2627_v35, %v2627_v35  ;;  %v1134_v49 = vmul.f32 %v2631_v47, %v2631_v47  ;;  %v1135_v51 = vmul.f32 %v2635_v63, %v2635_v63 }
 0x1cd   : > { %3650 = vst [vmem:[#allocation16_spill] sm:$0xff] %v2639_v22  ;;  %v1136_v29 = vmul.f32 %v2639_v22, %v2639_v22  ;;  %v1137_v16 = vmul.f32 %v2649_v50, %v2649_v50  ;;  %v2671_v22 = vsub.f32 %v2228_v3, %v2619_v20  ;;  %v2678_v0 = vsub.f32 %v2235_v6, %v2619_v20 }
 0x1ce   : > { %v1196_v8 = vsel %vm848_vm0, %v1132_v48, 0.0  ;;  %v1197_v26 = vsel %vm848_vm0, %v1133_v34, 0.0  ;;  %v1199_v53 = vsel %vm848_vm0, %v1134_v49, 0.0  ;;  %v1201_v61 = vsel %vm848_vm0, %v1135_v51, 0.0 }
 0x1cf   : > { %v1198_v43 = vadd.f32 %v1197_v26, %v1196_v8  ;;  %v1138_v48 = vmul.f32 %v2655_v55, %v2655_v55  ;;  %v1203_v34 = vsel %vm848_vm0, %v1136_v29, 0.0  ;;  %v1139_v8 = vmul.f32 %v2664_v58, %v2664_v58 }
 0x1d0   : > { %v1205_v51 = vsel %vm848_vm0, %v1137_v16, 0.0  ;;  %v2685_v3 = vsub.f32 %v2242_v9, %v2619_v20  ;;  %v2692_v6 = vsub.f32 %v2249_v12, %v2619_v20  ;;  %v2699_v9 = vsub.f32 %v2256_v15, %v2619_v20 }
 0x1d1   : > { %v1200_v7 = vadd.f32 %v1199_v53, %v1198_v43  ;;  %v1140_v53 = vmul.f32 %v2671_v22, %v2671_v22  ;;  %v1207_v29 = vsel %vm848_vm0, %v1138_v48, 0.0  ;;  %v1209_v16 = vsel %vm848_vm0, %v1139_v8, 0.0 }
 0x1d2   : > { %v2706_v12 = vsub.f32 %v2263_v18, %v2619_v20  ;;  %v2713_v15 = vsub.f32 %v2270_v21, %v2619_v20  ;;  %v2720_v18 = vsub.f32 %v2277_v24, %v2619_v20  ;;  %v2727_v21 = vsub.f32 %v2284_v27, %v2619_v20 }
 0x1d3   : > { %v1202_v49 = vadd.f32 %v1201_v61, %v1200_v7  ;;  %v1141_v61 = vmul.f32 %v2678_v0, %v2678_v0  ;;  %v1211_v48 = vsel %vm848_vm0, %v1140_v53, 0.0  ;;  %v2734_v24 = vsub.f32 %v2291_v30, %v2619_v20 }
 0x1d4   : > { %v2741_v27 = vsub.f32 %v2298_v33, %v2619_v20  ;;  %v2748_v30 = vsub.f32 %v2305_v36, %v2619_v20  ;;  %v2755_v33 = vsub.f32 %v2312_v39, %v2619_v20  ;;  %v2762_v36 = vsub.f32 %v2319_v42, %v2619_v20 }
 0x1d5   : > { %v1204_v26 = vadd.f32 %v1203_v34, %v1202_v49  ;;  %v1142_v34 = vmul.f32 %v2685_v3, %v2685_v3  ;;  %v1213_v8 = vsel %vm848_vm0, %v1141_v61, 0.0  ;;  %v2769_v39 = vsub.f32 %v2326_v45, %v2619_v20 }
 0x1d6   : > { %v2776_v42 = vsub.f32 %v2333_v52, %v2619_v20  ;;  %v2783_v45 = vsub.f32 %v2340_v56, %v2619_v20  ;;  %v2790_v52 = vsub.f32 %v2347_v60, %v2619_v20  ;;  %v2797_v56 = vsub.f32 %v2354_v1, %v2619_v20 }
 0x1d7   : > { %v1206_v43 = vadd.f32 %v1205_v51, %v1204_v26  ;;  %v1143_v51 = vmul.f32 %v2692_v6, %v2692_v6  ;;  %v1215_v53 = vsel %vm848_vm0, %v1142_v34, 0.0  ;;  %v2804_v60 = vsub.f32 %v2361_v5, %v2619_v20 }
 0x1d8   : > { %v2811_v1 = vsub.f32 %v2368_v10, %v2619_v20  ;;  %v2818_v5 = vsub.f32 %v2375_v14, %v2619_v20  ;;  %v2825_v10 = vsub.f32 %v2382_v19, %v2619_v20  ;;  %v2832_v14 = vsub.f32 %v2389_v23, %v2619_v20 }
 0x1d9   : > { %v1208_v7 = vadd.f32 %v1207_v29, %v1206_v43  ;;  %v1144_v29 = vmul.f32 %v2699_v9, %v2699_v9  ;;  %v1217_v61 = vsel %vm848_vm0, %v1143_v51, 0.0  ;;  %v2839_v19 = vsub.f32 %v2396_v28, %v2619_v20 }
 0x1da   : > { %v2846_v23 = vsub.f32 %v2403_v32, %v2619_v20  ;;  %v2853_v28 = vsub.f32 %v2410_v37, %v2619_v20  ;;  %v2860_v32 = vsub.f32 %v2417_v41, %v2619_v20  ;;  %v2867_v37 = vsub.f32 %v2424_v46, %v2619_v20 }
 0x1db   : > { %v1210_v49 = vadd.f32 %v1209_v16, %v1208_v7  ;;  %v1145_v16 = vmul.f32 %v2706_v12, %v2706_v12  ;;  %v1219_v34 = vsel %vm848_vm0, %v1144_v29, 0.0  ;;  %v2874_v41 = vsub.f32 %v2431_v54, %v2619_v20 }
 0x1dc   : > { %v2881_v46 = vsub.f32 %v2438_v62, %v2619_v20  ;;  %v2888_v54 = vsub.f32 %v2445_v4, %v2619_v20  ;;  %v2895_v62 = vsub.f32 %v2452_v11, %v2619_v20  ;;  %v2902_v4 = vsub.f32 %v2459_v17, %v2619_v20 }
 0x1dd   : > { %v1212_v26 = vadd.f32 %v1211_v48, %v1210_v49  ;;  %v1146_v48 = vmul.f32 %v2713_v15, %v2713_v15  ;;  %v1221_v51 = vsel %vm848_vm0, %v1145_v16, 0.0  ;;  %v2909_v11 = vsub.f32 %v2466_v25, %v2619_v20 }
 0x1de   : > { %v2916_v17 = vsub.f32 %v2473_v31, %v2619_v20  ;;  %v2923_v25 = vsub.f32 %v2480_v38, %v2619_v20  ;;  %v2930_v31 = vsub.f32 %v2487_v44, %v2619_v20  ;;  %v2937_v38 = vsub.f32 %v2494_v57, %v2619_v20 }
 0x1df   : > { %v1214_v43 = vadd.f32 %v1213_v8, %v1212_v26  ;;  %v1147_v8 = vmul.f32 %v2720_v18, %v2720_v18  ;;  %v1223_v29 = vsel %vm848_vm0, %v1146_v48, 0.0  ;;  %v2944_v44 = vsub.f32 %v2501_v2, %v2619_v20 }
 0x1e0   : > { %3651 = vst [vmem:[#allocation17_spill] sm:$0xff] %v2923_v25  ;;  %3652 = vst [vmem:[#allocation18_spill] sm:$0xff] %v2930_v31  ;;  %v2951_v57 = vsub.f32 %v2508_v13, %v2619_v20 }
 0x1e1   : > { %v1216_v7 = vadd.f32 %v1215_v53, %v1214_v43  ;;  %v1148_v53 = vmul.f32 %v2727_v21, %v2727_v21  ;;  %v1225_v16 = vsel %vm848_vm0, %v1147_v8, 0.0  ;;  %3653 = vst [vmem:[#allocation19_spill] sm:$0xff] %v2937_v38  ;;  %3654 = vst [vmem:[#allocation20_spill] sm:$0xff] %v2944_v44 }
 0x1e2   : > { %3655 = vst [vmem:[#allocation21_spill] sm:$0xff] %v2951_v57 }
 0x1e3   : > { %v1218_v49 = vadd.f32 %v1217_v61, %v1216_v7  ;;  %v1149_v61 = vmul.f32 %v2734_v24, %v2734_v24  ;;  %v1227_v48 = vsel %vm848_vm0, %v1148_v53, 0.0 }
 0x1e5   : > { %v1220_v26 = vadd.f32 %v1219_v34, %v1218_v49  ;;  %v1150_v34 = vmul.f32 %v2741_v27, %v2741_v27  ;;  %v1229_v8 = vsel %vm848_vm0, %v1149_v61, 0.0 }
 0x1e7   : > { %v1222_v43 = vadd.f32 %v1221_v51, %v1220_v26  ;;  %v1151_v51 = vmul.f32 %v2748_v30, %v2748_v30  ;;  %v1231_v53 = vsel %vm848_vm0, %v1150_v34, 0.0 }
 0x1e9   : > { %v1224_v7 = vadd.f32 %v1223_v29, %v1222_v43  ;;  %v1152_v29 = vmul.f32 %v2755_v33, %v2755_v33  ;;  %v1233_v61 = vsel %vm848_vm0, %v1151_v51, 0.0 }
 0x1eb   : > { %v1226_v49 = vadd.f32 %v1225_v16, %v1224_v7  ;;  %v1153_v16 = vmul.f32 %v2762_v36, %v2762_v36  ;;  %v1235_v34 = vsel %vm848_vm0, %v1152_v29, 0.0 }
 0x1ed   : > { %v1228_v26 = vadd.f32 %v1227_v48, %v1226_v49  ;;  %v1154_v48 = vmul.f32 %v2769_v39, %v2769_v39  ;;  %v1237_v51 = vsel %vm848_vm0, %v1153_v16, 0.0 }
 0x1ef   : > { %v1230_v43 = vadd.f32 %v1229_v8, %v1228_v26  ;;  %v1155_v8 = vmul.f32 %v2776_v42, %v2776_v42  ;;  %v1239_v29 = vsel %vm848_vm0, %v1154_v48, 0.0 }
 0x1f1   : > { %v1232_v7 = vadd.f32 %v1231_v53, %v1230_v43  ;;  %v1156_v53 = vmul.f32 %v2783_v45, %v2783_v45  ;;  %v1241_v16 = vsel %vm848_vm0, %v1155_v8, 0.0 }
 0x1f3   : > { %v1234_v49 = vadd.f32 %v1233_v61, %v1232_v7  ;;  %v1157_v61 = vmul.f32 %v2790_v52, %v2790_v52  ;;  %v1243_v48 = vsel %vm848_vm0, %v1156_v53, 0.0 }
 0x1f5   : > { %v1236_v26 = vadd.f32 %v1235_v34, %v1234_v49  ;;  %v1158_v34 = vmul.f32 %v2797_v56, %v2797_v56  ;;  %v1245_v8 = vsel %vm848_vm0, %v1157_v61, 0.0 }
 0x1f7   : > { %v1238_v43 = vadd.f32 %v1237_v51, %v1236_v26  ;;  %v1159_v51 = vmul.f32 %v2804_v60, %v2804_v60  ;;  %v1247_v53 = vsel %vm848_vm0, %v1158_v34, 0.0 }
 0x1f9   : > { %v1240_v7 = vadd.f32 %v1239_v29, %v1238_v43  ;;  %v1160_v29 = vmul.f32 %v2811_v1, %v2811_v1  ;;  %v1249_v61 = vsel %vm848_vm0, %v1159_v51, 0.0 }
 0x1fb   : > { %v1242_v49 = vadd.f32 %v1241_v16, %v1240_v7  ;;  %v1161_v16 = vmul.f32 %v2818_v5, %v2818_v5  ;;  %v1251_v34 = vsel %vm848_vm0, %v1160_v29, 0.0 }
 0x1fd   : > { %v1244_v26 = vadd.f32 %v1243_v48, %v1242_v49  ;;  %v1162_v48 = vmul.f32 %v2825_v10, %v2825_v10  ;;  %v1253_v51 = vsel %vm848_vm0, %v1161_v16, 0.0 }
 0x1ff   : > { %v1246_v43 = vadd.f32 %v1245_v8, %v1244_v26  ;;  %v1163_v8 = vmul.f32 %v2832_v14, %v2832_v14  ;;  %v1255_v29 = vsel %vm848_vm0, %v1162_v48, 0.0 }
 0x201   : > { %v1248_v7 = vadd.f32 %v1247_v53, %v1246_v43  ;;  %v1164_v53 = vmul.f32 %v2839_v19, %v2839_v19  ;;  %v1257_v16 = vsel %vm848_vm0, %v1163_v8, 0.0 }
 0x203   : > { %v1250_v49 = vadd.f32 %v1249_v61, %v1248_v7  ;;  %v1165_v61 = vmul.f32 %v2846_v23, %v2846_v23  ;;  %v1259_v48 = vsel %vm848_vm0, %v1164_v53, 0.0 }
 0x205   : > { %v1252_v26 = vadd.f32 %v1251_v34, %v1250_v49  ;;  %v1166_v34 = vmul.f32 %v2853_v28, %v2853_v28  ;;  %v1261_v8 = vsel %vm848_vm0, %v1165_v61, 0.0 }
 0x207   : > { %v1254_v43 = vadd.f32 %v1253_v51, %v1252_v26  ;;  %v1167_v51 = vmul.f32 %v2860_v32, %v2860_v32  ;;  %v1263_v53 = vsel %vm848_vm0, %v1166_v34, 0.0 }
 0x209   : > { %v1256_v7 = vadd.f32 %v1255_v29, %v1254_v43  ;;  %v1168_v29 = vmul.f32 %v2867_v37, %v2867_v37  ;;  %v1265_v61 = vsel %vm848_vm0, %v1167_v51, 0.0 }
 0x20b   : > { %v1258_v49 = vadd.f32 %v1257_v16, %v1256_v7  ;;  %v1169_v16 = vmul.f32 %v2874_v41, %v2874_v41  ;;  %v1267_v34 = vsel %vm848_vm0, %v1168_v29, 0.0 }
 0x20d   : > { %v1260_v26 = vadd.f32 %v1259_v48, %v1258_v49  ;;  %v1170_v48 = vmul.f32 %v2881_v46, %v2881_v46  ;;  %v1269_v51 = vsel %vm848_vm0, %v1169_v16, 0.0 }
 0x20f   : > { %v1262_v43 = vadd.f32 %v1261_v8, %v1260_v26  ;;  %v1171_v8 = vmul.f32 %v2888_v54, %v2888_v54  ;;  %v1271_v29 = vsel %vm848_vm0, %v1170_v48, 0.0 }
 0x211   : > { %v1264_v7 = vadd.f32 %v1263_v53, %v1262_v43  ;;  %v1172_v53 = vmul.f32 %v2895_v62, %v2895_v62  ;;  %v1273_v16 = vsel %vm848_vm0, %v1171_v8, 0.0 }
 0x213   : > { %v1266_v49 = vadd.f32 %v1265_v61, %v1264_v7  ;;  %v1173_v61 = vmul.f32 %v2902_v4, %v2902_v4  ;;  %v1275_v48 = vsel %vm848_vm0, %v1172_v53, 0.0 }
 0x215   : > { %v1268_v26 = vadd.f32 %v1267_v34, %v1266_v49  ;;  %v1174_v34 = vmul.f32 %v2909_v11, %v2909_v11  ;;  %v1277_v8 = vsel %vm848_vm0, %v1173_v61, 0.0 }
 0x217   : > { %v1270_v43 = vadd.f32 %v1269_v51, %v1268_v26  ;;  %v1175_v51 = vmul.f32 %v2916_v17, %v2916_v17  ;;  %v1279_v53 = vsel %vm848_vm0, %v1174_v34, 0.0 }
 0x219   : > { %v1272_v7 = vadd.f32 %v1271_v29, %v1270_v43  ;;  %v1176_v29 = vmul.f32 %v2923_v25, %v2923_v25  ;;  %v1281_v61 = vsel %vm848_vm0, %v1175_v51, 0.0 }
 0x21b   : > { %v1274_v49 = vadd.f32 %v1273_v16, %v1272_v7  ;;  %v1177_v16 = vmul.f32 %v2930_v31, %v2930_v31  ;;  %v1283_v34 = vsel %vm848_vm0, %v1176_v29, 0.0 }
 0x21d   : > { %v1276_v26 = vadd.f32 %v1275_v48, %v1274_v49  ;;  %v1178_v48 = vmul.f32 %v2937_v38, %v2937_v38  ;;  %v1285_v51 = vsel %vm848_vm0, %v1177_v16, 0.0  ;;  %v1180_v38 = vmul.f32 %v2951_v57, %v2951_v57 }
 0x21f   : > { %v1278_v43 = vadd.f32 %v1277_v8, %v1276_v26  ;;  %v3656_v8 = vld [vmem:[#allocation2_spill] sm:$0xff]  ;;  %v1179_v26 = vmul.f32 %v2944_v44, %v2944_v44  ;;  %v1287_v29 = vsel %vm848_vm0, %v1178_v48, 0.0  ;;  %v1291_v48 = vsel %vm848_vm0, %v1180_v38, 0.0 }
 0x220   : > { %v2958_v2 = vsub.f32 %v3656_v8, %v2619_v20 }
 0x221   : > { %v1280_v7 = vadd.f32 %v1279_v53, %v1278_v43  ;;  %v3658_v43 = vld [vmem:[#allocation3_spill] sm:$0xff]  ;;  %v1289_v16 = vsel %vm848_vm0, %v1179_v26, 0.0 }
 0x222   : > { %3657 = vst [vmem:[#allocation2_spill] sm:$0xff] %v2958_v2  ;;  %v2965_v13 = vsub.f32 %v3658_v43, %v2619_v20  ;;  %v1181_v44 = vmul.f32 %v2958_v2, %v2958_v2 }
 0x223   : > { %v1282_v49 = vadd.f32 %v1281_v61, %v1280_v7  ;;  %v3660_v7 = vld [vmem:[#allocation4_spill] sm:$0xff] }
 0x224   : > { %3659 = vst [vmem:[#allocation3_spill] sm:$0xff] %v2965_v13  ;;  %v2972_v8 = vsub.f32 %v3660_v7, %v2619_v20  ;;  %v1182_v57 = vmul.f32 %v2965_v13, %v2965_v13  ;;  %v1293_v26 = vsel %vm848_vm0, %v1181_v44, 0.0 }
 0x225   : > { %v1284_v53 = vadd.f32 %v1283_v34, %v1282_v49  ;;  %v3662_v49 = vld [vmem:[#allocation5_spill] sm:$0xff] }
 0x226   : > { %3661 = vst [vmem:[#allocation4_spill] sm:$0xff] %v2972_v8  ;;  %v2979_v43 = vsub.f32 %v3662_v49, %v2619_v20  ;;  %v1183_v2 = vmul.f32 %v2972_v8, %v2972_v8  ;;  %v1295_v38 = vsel %vm848_vm0, %v1182_v57, 0.0 }
 0x227   : > { %v1286_v61 = vadd.f32 %v1285_v51, %v1284_v53  ;;  %v3664_v53 = vld [vmem:[#allocation6_spill] sm:$0xff] }
 0x228   : > { %3663 = vst [vmem:[#allocation5_spill] sm:$0xff] %v2979_v43  ;;  %v2986_v7 = vsub.f32 %v3664_v53, %v2619_v20  ;;  %v1184_v13 = vmul.f32 %v2979_v43, %v2979_v43  ;;  %v1297_v44 = vsel %vm848_vm0, %v1183_v2, 0.0 }
 0x229   : > { %v1288_v34 = vadd.f32 %v1287_v29, %v1286_v61  ;;  %v3666_v61 = vld [vmem:[#allocation7_spill] sm:$0xff] }
 0x22a   : > { %3665 = vst [vmem:[#allocation6_spill] sm:$0xff] %v2986_v7  ;;  %v2993_v49 = vsub.f32 %v3666_v61, %v2619_v20  ;;  %v1185_v8 = vmul.f32 %v2986_v7, %v2986_v7  ;;  %v1299_v57 = vsel %vm848_vm0, %v1184_v13, 0.0 }
 0x22b   : > { %v1290_v51 = vadd.f32 %v1289_v16, %v1288_v34  ;;  %v3668_v34 = vld [vmem:[#allocation8_spill] sm:$0xff] }
 0x22c   : > { %3667 = vst [vmem:[#allocation7_spill] sm:$0xff] %v2993_v49  ;;  %v3000_v53 = vsub.f32 %v3668_v34, %v2619_v20  ;;  %v1186_v43 = vmul.f32 %v2993_v49, %v2993_v49  ;;  %v1301_v2 = vsel %vm848_vm0, %v1185_v8, 0.0 }
 0x22d   : > { %v1292_v29 = vadd.f32 %v1291_v48, %v1290_v51  ;;  %v3670_v51 = vld [vmem:[#allocation9_spill] sm:$0xff] }
 0x22e   : > { %3669 = vst [vmem:[#allocation8_spill] sm:$0xff] %v3000_v53  ;;  %v3007_v61 = vsub.f32 %v3670_v51, %v2619_v20  ;;  %v1187_v7 = vmul.f32 %v3000_v53, %v3000_v53  ;;  %v1303_v13 = vsel %vm848_vm0, %v1186_v43, 0.0 }
 0x22f   : > { %v1294_v16 = vadd.f32 %v1293_v26, %v1292_v29  ;;  %v3672_v29 = vld [vmem:[#allocation10_spill] sm:$0xff] }
 0x230   : > { %3671 = vst [vmem:[#allocation9_spill] sm:$0xff] %v3007_v61  ;;  %v3014_v34 = vsub.f32 %v3672_v29, %v2619_v20  ;;  %v1188_v49 = vmul.f32 %v3007_v61, %v3007_v61  ;;  %v1305_v8 = vsel %vm848_vm0, %v1187_v7, 0.0 }
 0x231   : > { %v1296_v48 = vadd.f32 %v1295_v38, %v1294_v16  ;;  %v3674_v16 = vld [vmem:[#allocation11_spill] sm:$0xff] }
 0x232   : > { %3673 = vst [vmem:[#allocation10_spill] sm:$0xff] %v3014_v34  ;;  %v3021_v51 = vsub.f32 %v3674_v16, %v2619_v20  ;;  %v1189_v53 = vmul.f32 %v3014_v34, %v3014_v34  ;;  %v1307_v43 = vsel %vm848_vm0, %v1188_v49, 0.0 }
 0x233   : > { %v1298_v26 = vadd.f32 %v1297_v44, %v1296_v48  ;;  %v3676_v48 = vld [vmem:[#allocation12_spill] sm:$0xff] }
 0x234   : > { %3675 = vst [vmem:[#allocation11_spill] sm:$0xff] %v3021_v51  ;;  %v3028_v29 = vsub.f32 %v3676_v48, %v2619_v20  ;;  %v1190_v61 = vmul.f32 %v3021_v51, %v3021_v51  ;;  %v1309_v7 = vsel %vm848_vm0, %v1189_v53, 0.0 }
 0x235   : > { %v1300_v38 = vadd.f32 %v1299_v57, %v1298_v26  ;;  %v3678_v26 = vld [vmem:[#allocation13_spill] sm:$0xff] }
 0x236   : > { %3677 = vst [vmem:[#allocation12_spill] sm:$0xff] %v3028_v29  ;;  %v3035_v16 = vsub.f32 %v3678_v26, %v2619_v20  ;;  %v1191_v34 = vmul.f32 %v3028_v29, %v3028_v29  ;;  %v1311_v49 = vsel %vm848_vm0, %v1190_v61, 0.0 }
 0x237   : > { %v1302_v44 = vadd.f32 %v1301_v2, %v1300_v38  ;;  %v3680_v38 = vld [vmem:[#allocation14_spill] sm:$0xff] }
 0x238   : > { %3679 = vst [vmem:[#allocation13_spill] sm:$0xff] %v3035_v16  ;;  %v3042_v48 = vsub.f32 %v3680_v38, %v2619_v20  ;;  %v1192_v51 = vmul.f32 %v3035_v16, %v3035_v16  ;;  %v1313_v53 = vsel %vm848_vm0, %v1191_v34, 0.0 }
 0x239   : > { %v1304_v57 = vadd.f32 %v1303_v13, %v1302_v44  ;;  %v3682_v44 = vld [vmem:[#allocation15_spill] sm:$0xff] }
 0x23a   : > { %3681 = vst [vmem:[#allocation14_spill] sm:$0xff] %v3042_v48  ;;  %v3049_v26 = vsub.f32 %v3682_v44, %v2619_v20  ;;  %v1193_v38 = vmul.f32 %v3042_v48, %v3042_v48  ;;  %v1315_v44 = vsel %vm848_vm0, %v1192_v51, 0.0 }
 0x23b   : > { %v1306_v2 = vadd.f32 %v1305_v8, %v1304_v57  ;;  %v3056_v57 = vsub.f32 %v2615_v59, %v2619_v20 }
 0x23c   : > { %3683 = vst [vmem:[#allocation15_spill] sm:$0xff] %v3049_v26 }
 0x23d   : > { %v1308_v13 = vadd.f32 %v1307_v43, %v1306_v2  ;;  %3684 = vst [vmem:[#allocation22_spill] sm:$0xff] %v3056_v57  ;;  %v1194_v2 = vmul.f32 %v3049_v26, %v3049_v26  ;;  %v1195_v61 = vmul.f32 %v3056_v57, %v3056_v57 }
 0x23f   : > { %v1310_v8 = vadd.f32 %v1309_v7, %v1308_v13  ;;  %v1317_v7 = vsel %vm848_vm0, %v1193_v38, 0.0  ;;  %v1319_v59 = vsel %vm848_vm0, %v1194_v2, 0.0  ;;  %v1321_v48 = vsel %vm848_vm0, %v1195_v61, 0.0 }
 0x241   : > { %v1312_v43 = vadd.f32 %v1311_v49, %v1310_v8 }
 0x243   : > { %v1314_v29 = vadd.f32 %v1313_v53, %v1312_v43 }
 0x245   : > { %v1316_v13 = vadd.f32 %v1315_v44, %v1314_v29  ;;  %v3074_v29 = vld [vmem:[%s3598_s2] ss:$0 sm:$0xff] }
 0x247   : > { %v1318_v20 = vadd.f32 %v1317_v7, %v1316_v13 }
 0x249   : > { %v1320_v16 = vadd.f32 %v1319_v59, %v1318_v20 }
 0x24b   : > { %v1322_v34 = vadd.f32 %v1321_v48, %v1320_v16  ;;  %v3087_v48 = vld [vmem:[%s3599_s3] ss:$0 sm:$0xff] }
 0x24d   : > { %v1323_v49 = vrot.slane %v1322_v34, 4 }
 0x24f   : > { %v1324_v8 = vadd.f32 %v1323_v49, %v1322_v34 }
 0x251   : > { %v1325_v31 = vrot.slane %v1324_v8, 2 }
 0x253   : > { %v1326_v26 = vadd.f32 %v1325_v31, %v1324_v8 }
 0x255   : > { %v1327_v25 = vrot.slane %v1326_v26, 1 }
 0x257   : > { %v1328_v51 = vadd.f32 %v1327_v25, %v1326_v26  ;;  %v3685_v26 = vld [vmem:[#allocation16_spill] sm:$0xff] }
 0x259   : > { %v1329_v53 = vmul.f32 0.001953125, %v1328_v51 }
 0x25b   : > { %v1330_v43 = vadd.f32 1e-05, %v1329_v53 }
 0x25d   : > { %2004 = vrsqrt.f32 %v1330_v43 }
 0x26a   : > { %v3069_v57 = vpop.eup %2004 }
 0x26b   : > { %v1332_v38 = vmul.f32 %v3069_v57, %v2623_v40  ;;  %v1333_v16 = vmul.f32 %v3069_v57, %v2627_v35  ;;  %v1334_v31 = vmul.f32 %v3069_v57, %v2631_v47  ;;  %v1335_v25 = vmul.f32 %v3069_v57, %v2635_v63 }
 0x26c   : > { %v1336_v2 = vmul.f32 %v3069_v57, %v3685_v26  ;;  %v1337_v40 = vmul.f32 %v3069_v57, %v2649_v50  ;;  %v1338_v35 = vmul.f32 %v3069_v57, %v2655_v55  ;;  %v1339_v47 = vmul.f32 %v3069_v57, %v2664_v58 }
 0x26d   : > { %v1403_v44 = vmul.f32 %v3074_v29, %v1332_v38  ;;  %v1404_v63 = vmul.f32 %v3074_v29, %v1333_v16  ;;  %v1405_v61 = vmul.f32 %v3074_v29, %v1334_v31  ;;  %v1406_v7 = vmul.f32 %v3074_v29, %v1335_v25 }
 0x26e   : > { %v1407_v13 = vmul.f32 %v3074_v29, %v1336_v2  ;;  %v1408_v59 = vmul.f32 %v3074_v29, %v1337_v40  ;;  %v1409_v50 = vmul.f32 %v3074_v29, %v1338_v35  ;;  %v1410_v20 = vmul.f32 %v3074_v29, %v1339_v47 }
 0x26f   : > { %v1474_v55 = vadd.f32 %v3087_v48, %v1403_v44  ;;  %v1475_v58 = vadd.f32 %v3087_v48, %v1404_v63  ;;  %v1476_v34 = vadd.f32 %v3087_v48, %v1405_v61  ;;  %v1477_v49 = vadd.f32 %v3087_v48, %v1406_v7 }
 0x270   : > { %v1478_v8 = vadd.f32 %v3087_v48, %v1407_v13  ;;  %v1479_v51 = vadd.f32 %v3087_v48, %v1408_v59  ;;  %v1480_v53 = vadd.f32 %v3087_v48, %v1409_v50  ;;  %v1481_v43 = vadd.f32 %v3087_v48, %v1410_v20 }
 0x271   : > { %v1538_v38 = vmax.f32 %v1474_v55, 0.0  ;;  %v1539_v16 = vmax.f32 %v1475_v58, 0.0  ;;  %v1540_v31 = vmax.f32 %v1476_v34, 0.0  ;;  %v1541_v25 = vmax.f32 %v1477_v49, 0.0 }
 0x272   : > { %v1542_v26 = vmax.f32 %v1478_v8, 0.0  ;;  %v1543_v2 = vmax.f32 %v1479_v51, 0.0  ;;  %v1544_v40 = vmax.f32 %v1480_v53, 0.0  ;;  %v1545_v35 = vmax.f32 %v1481_v43, 0.0 }
 0x273   : > { %1602 = vst.msk [vmem:[%s3600_s4] sm:$0xff] %vm848_vm0, %v1538_v38  ;;  %1603 = vst.msk [vmem:[%s3600_s4 + $0x8] sm:$0xff] %vm848_vm0, %v1539_v16  ;;  %v1340_v47 = vmul.f32 %v3069_v57, %v2671_v22  ;;  %v1341_v44 = vmul.f32 %v3069_v57, %v2678_v0  ;;  %v1342_v63 = vmul.f32 %v3069_v57, %v2685_v3 }
 0x274   : > { %1604 = vst.msk [vmem:[%s3600_s4 + $0x10] sm:$0xff] %vm848_vm0, %v1540_v31  ;;  %1605 = vst.msk [vmem:[%s3600_s4 + $0x18] sm:$0xff] %vm848_vm0, %v1541_v25  ;;  %v1343_v61 = vmul.f32 %v3069_v57, %v2692_v6  ;;  %v1344_v22 = vmul.f32 %v3069_v57, %v2699_v9  ;;  %v1345_v0 = vmul.f32 %v3069_v57, %v2706_v12 }
 0x275   : > { %1606 = vst.msk [vmem:[%s3600_s4 + $0x20] sm:$0xff] %vm848_vm0, %v1542_v26  ;;  %1607 = vst.msk [vmem:[%s3600_s4 + $0x28] sm:$0xff] %vm848_vm0, %v1543_v2  ;;  %v1346_v3 = vmul.f32 %v3069_v57, %v2713_v15  ;;  %v1347_v6 = vmul.f32 %v3069_v57, %v2720_v18  ;;  %v1411_v7 = vmul.f32 %v3074_v29, %v1340_v47 }
 0x276   : > { %1608 = vst.msk [vmem:[%s3600_s4 + $0x30] sm:$0xff] %vm848_vm0, %v1544_v40  ;;  %1609 = vst.msk [vmem:[%s3600_s4 + $0x38] sm:$0xff] %vm848_vm0, %v1545_v35  ;;  %v1412_v13 = vmul.f32 %v3074_v29, %v1341_v44  ;;  %v1413_v59 = vmul.f32 %v3074_v29, %v1342_v63  ;;  %v1414_v50 = vmul.f32 %v3074_v29, %v1343_v61 }
 0x277   : > { %v1415_v20 = vmul.f32 %v3074_v29, %v1344_v22  ;;  %v1416_v9 = vmul.f32 %v3074_v29, %v1345_v0  ;;  %v1417_v12 = vmul.f32 %v3074_v29, %v1346_v3  ;;  %v1418_v55 = vmul.f32 %v3074_v29, %v1347_v6 }
 0x278   : > { %v1482_v15 = vadd.f32 %v3087_v48, %v1411_v7  ;;  %v1483_v18 = vadd.f32 %v3087_v48, %v1412_v13  ;;  %v1484_v58 = vadd.f32 %v3087_v48, %v1413_v59  ;;  %v1485_v34 = vadd.f32 %v3087_v48, %v1414_v50 }
 0x279   : > { %v1486_v49 = vadd.f32 %v3087_v48, %v1415_v20  ;;  %v1487_v8 = vadd.f32 %v3087_v48, %v1416_v9  ;;  %v1488_v51 = vadd.f32 %v3087_v48, %v1417_v12  ;;  %v1489_v53 = vadd.f32 %v3087_v48, %v1418_v55 }
 0x27a   : > { %v1546_v43 = vmax.f32 %v1482_v15, 0.0  ;;  %v1547_v38 = vmax.f32 %v1483_v18, 0.0  ;;  %v1548_v16 = vmax.f32 %v1484_v58, 0.0  ;;  %v1549_v31 = vmax.f32 %v1485_v34, 0.0 }
 0x27b   : > { %v1550_v25 = vmax.f32 %v1486_v49, 0.0  ;;  %v1551_v26 = vmax.f32 %v1487_v8, 0.0  ;;  %v1552_v2 = vmax.f32 %v1488_v51, 0.0  ;;  %v1553_v40 = vmax.f32 %v1489_v53, 0.0 }
 0x27c   : > { %1610 = vst.msk [vmem:[%s3600_s4 + $0x40] sm:$0xff] %vm848_vm0, %v1546_v43  ;;  %1611 = vst.msk [vmem:[%s3600_s4 + $0x48] sm:$0xff] %vm848_vm0, %v1547_v38  ;;  %v1348_v35 = vmul.f32 %v3069_v57, %v2727_v21  ;;  %v1349_v47 = vmul.f32 %v3069_v57, %v2734_v24  ;;  %v1350_v44 = vmul.f32 %v3069_v57, %v2741_v27 }
 0x27d   : > { %1612 = vst.msk [vmem:[%s3600_s4 + $0x50] sm:$0xff] %vm848_vm0, %v1548_v16  ;;  %1613 = vst.msk [vmem:[%s3600_s4 + $0x58] sm:$0xff] %vm848_vm0, %v1549_v31  ;;  %v1351_v63 = vmul.f32 %v3069_v57, %v2748_v30  ;;  %v1352_v21 = vmul.f32 %v3069_v57, %v2755_v33  ;;  %v1353_v24 = vmul.f32 %v3069_v57, %v2762_v36 }
 0x27e   : > { %1614 = vst.msk [vmem:[%s3600_s4 + $0x60] sm:$0xff] %vm848_vm0, %v1550_v25  ;;  %1615 = vst.msk [vmem:[%s3600_s4 + $0x68] sm:$0xff] %vm848_vm0, %v1551_v26  ;;  %v1354_v27 = vmul.f32 %v3069_v57, %v2769_v39  ;;  %v1355_v30 = vmul.f32 %v3069_v57, %v2776_v42  ;;  %v1419_v61 = vmul.f32 %v3074_v29, %v1348_v35 }
 0x27f   : > { %1616 = vst.msk [vmem:[%s3600_s4 + $0x70] sm:$0xff] %vm848_vm0, %v1552_v2  ;;  %1617 = vst.msk [vmem:[%s3600_s4 + $0x78] sm:$0xff] %vm848_vm0, %v1553_v40  ;;  %v1420_v22 = vmul.f32 %v3074_v29, %v1349_v47  ;;  %v1421_v0 = vmul.f32 %v3074_v29, %v1350_v44  ;;  %v1422_v3 = vmul.f32 %v3074_v29, %v1351_v63 }
 0x280   : > { %v1423_v6 = vmul.f32 %v3074_v29, %v1352_v21  ;;  %v1424_v33 = vmul.f32 %v3074_v29, %v1353_v24  ;;  %v1425_v36 = vmul.f32 %v3074_v29, %v1354_v27  ;;  %v1426_v7 = vmul.f32 %v3074_v29, %v1355_v30 }
 0x281   : > { %v1490_v39 = vadd.f32 %v3087_v48, %v1419_v61  ;;  %v1491_v42 = vadd.f32 %v3087_v48, %v1420_v22  ;;  %v1492_v13 = vadd.f32 %v3087_v48, %v1421_v0  ;;  %v1493_v59 = vadd.f32 %v3087_v48, %v1422_v3 }
 0x282   : > { %v1494_v50 = vadd.f32 %v3087_v48, %v1423_v6  ;;  %v1495_v20 = vadd.f32 %v3087_v48, %v1424_v33  ;;  %v1496_v9 = vadd.f32 %v3087_v48, %v1425_v36  ;;  %v1497_v12 = vadd.f32 %v3087_v48, %v1426_v7 }
 0x283   : > { %v1554_v55 = vmax.f32 %v1490_v39, 0.0  ;;  %v1555_v15 = vmax.f32 %v1491_v42, 0.0  ;;  %v1556_v18 = vmax.f32 %v1492_v13, 0.0  ;;  %v1557_v58 = vmax.f32 %v1493_v59, 0.0 }
 0x284   : > { %v1558_v34 = vmax.f32 %v1494_v50, 0.0  ;;  %v1559_v49 = vmax.f32 %v1495_v20, 0.0  ;;  %v1560_v8 = vmax.f32 %v1496_v9, 0.0  ;;  %v1561_v51 = vmax.f32 %v1497_v12, 0.0 }
 0x285   : > { %1618 = vst.msk [vmem:[%s3600_s4 + $0x80] sm:$0xff] %vm848_vm0, %v1554_v55  ;;  %1619 = vst.msk [vmem:[%s3600_s4 + $0x88] sm:$0xff] %vm848_vm0, %v1555_v15  ;;  %v1356_v53 = vmul.f32 %v3069_v57, %v2783_v45  ;;  %v1357_v43 = vmul.f32 %v3069_v57, %v2790_v52  ;;  %v1358_v38 = vmul.f32 %v3069_v57, %v2797_v56 }
 0x286   : > { %1620 = vst.msk [vmem:[%s3600_s4 + $0x90] sm:$0xff] %vm848_vm0, %v1556_v18  ;;  %1621 = vst.msk [vmem:[%s3600_s4 + $0x98] sm:$0xff] %vm848_vm0, %v1557_v58  ;;  %v1359_v16 = vmul.f32 %v3069_v57, %v2804_v60  ;;  %v1360_v45 = vmul.f32 %v3069_v57, %v2811_v1  ;;  %v1361_v52 = vmul.f32 %v3069_v57, %v2818_v5 }
 0x287   : > { %1622 = vst.msk [vmem:[%s3600_s4 + $0xa0] sm:$0xff] %vm848_vm0, %v1558_v34  ;;  %1623 = vst.msk [vmem:[%s3600_s4 + $0xa8] sm:$0xff] %vm848_vm0, %v1559_v49  ;;  %v1362_v56 = vmul.f32 %v3069_v57, %v2825_v10  ;;  %v1363_v60 = vmul.f32 %v3069_v57, %v2832_v14  ;;  %v1427_v31 = vmul.f32 %v3074_v29, %v1356_v53 }
 0x288   : > { %1624 = vst.msk [vmem:[%s3600_s4 + $0xb0] sm:$0xff] %vm848_vm0, %v1560_v8  ;;  %1625 = vst.msk [vmem:[%s3600_s4 + $0xb8] sm:$0xff] %vm848_vm0, %v1561_v51  ;;  %v1428_v25 = vmul.f32 %v3074_v29, %v1357_v43  ;;  %v1429_v26 = vmul.f32 %v3074_v29, %v1358_v38  ;;  %v1430_v2 = vmul.f32 %v3074_v29, %v1359_v16 }
 0x289   : > { %v1431_v40 = vmul.f32 %v3074_v29, %v1360_v45  ;;  %v1432_v1 = vmul.f32 %v3074_v29, %v1361_v52  ;;  %v1433_v5 = vmul.f32 %v3074_v29, %v1362_v56  ;;  %v1434_v35 = vmul.f32 %v3074_v29, %v1363_v60 }
 0x28a   : > { %v1498_v10 = vadd.f32 %v3087_v48, %v1427_v31  ;;  %v1499_v14 = vadd.f32 %v3087_v48, %v1428_v25  ;;  %v1500_v47 = vadd.f32 %v3087_v48, %v1429_v26  ;;  %v1501_v44 = vadd.f32 %v3087_v48, %v1430_v2  ;;  %v3688_v2 = vld [vmem:[#allocation19_spill] sm:$0xff] }
 0x28b   : > { %v1502_v63 = vadd.f32 %v3087_v48, %v1431_v40  ;;  %v1503_v21 = vadd.f32 %v3087_v48, %v1432_v1  ;;  %v1504_v24 = vadd.f32 %v3087_v48, %v1433_v5  ;;  %v1505_v27 = vadd.f32 %v3087_v48, %v1434_v35  ;;  %v3689_v1 = vld [vmem:[#allocation20_spill] sm:$0xff] }
 0x28c   : > { %v1562_v30 = vmax.f32 %v1498_v10, 0.0  ;;  %v1563_v61 = vmax.f32 %v1499_v14, 0.0  ;;  %v1564_v22 = vmax.f32 %v1500_v47, 0.0  ;;  %v1565_v0 = vmax.f32 %v1501_v44, 0.0 }
 0x28d   : > { %v1566_v3 = vmax.f32 %v1502_v63, 0.0  ;;  %v1567_v6 = vmax.f32 %v1503_v21, 0.0  ;;  %v1568_v33 = vmax.f32 %v1504_v24, 0.0  ;;  %v1569_v36 = vmax.f32 %v1505_v27, 0.0 }
 0x28e   : > { %1626 = vst.msk [vmem:[%s3600_s4 + $0xc0] sm:$0xff] %vm848_vm0, %v1562_v30  ;;  %1627 = vst.msk [vmem:[%s3600_s4 + $0xc8] sm:$0xff] %vm848_vm0, %v1563_v61  ;;  %v1364_v7 = vmul.f32 %v3069_v57, %v2839_v19  ;;  %v1365_v39 = vmul.f32 %v3069_v57, %v2846_v23  ;;  %v1366_v42 = vmul.f32 %v3069_v57, %v2853_v28 }
 0x28f   : > { %1628 = vst.msk [vmem:[%s3600_s4 + $0xd0] sm:$0xff] %vm848_vm0, %v1564_v22  ;;  %1629 = vst.msk [vmem:[%s3600_s4 + $0xd8] sm:$0xff] %vm848_vm0, %v1565_v0  ;;  %v1367_v13 = vmul.f32 %v3069_v57, %v2860_v32  ;;  %v1368_v19 = vmul.f32 %v3069_v57, %v2867_v37  ;;  %v1369_v23 = vmul.f32 %v3069_v57, %v2874_v41 }
 0x290   : > { %1630 = vst.msk [vmem:[%s3600_s4 + $0xe0] sm:$0xff] %vm848_vm0, %v1566_v3  ;;  %1631 = vst.msk [vmem:[%s3600_s4 + $0xe8] sm:$0xff] %vm848_vm0, %v1567_v6  ;;  %v1370_v28 = vmul.f32 %v3069_v57, %v2881_v46  ;;  %v1371_v32 = vmul.f32 %v3069_v57, %v2888_v54  ;;  %v1435_v59 = vmul.f32 %v3074_v29, %v1364_v7 }
 0x291   : > { %1632 = vst.msk [vmem:[%s3600_s4 + $0xf0] sm:$0xff] %vm848_vm0, %v1568_v33  ;;  %1633 = vst.msk [vmem:[%s3600_s4 + $0xf8] sm:$0xff] %vm848_vm0, %v1569_v36  ;;  %v1436_v50 = vmul.f32 %v3074_v29, %v1365_v39  ;;  %v1437_v20 = vmul.f32 %v3074_v29, %v1366_v42  ;;  %v1438_v9 = vmul.f32 %v3074_v29, %v1367_v13 }
 0x292   : > { %v1439_v12 = vmul.f32 %v3074_v29, %v1368_v19  ;;  %v1440_v37 = vmul.f32 %v3074_v29, %v1369_v23  ;;  %v1441_v41 = vmul.f32 %v3074_v29, %v1370_v28  ;;  %v1442_v55 = vmul.f32 %v3074_v29, %v1371_v32  ;;  %v3690_v32 = vld [vmem:[#allocation21_spill] sm:$0xff] }
 0x293   : > { %v1506_v46 = vadd.f32 %v3087_v48, %v1435_v59  ;;  %v1507_v54 = vadd.f32 %v3087_v48, %v1436_v50  ;;  %v1508_v15 = vadd.f32 %v3087_v48, %v1437_v20  ;;  %v1509_v18 = vadd.f32 %v3087_v48, %v1438_v9  ;;  %v3691_v50 = vld [vmem:[#allocation2_spill] sm:$0xff]  ;;  %v3692_v9 = vld [vmem:[#allocation3_spill] sm:$0xff] }
 0x294   : > { %v1510_v58 = vadd.f32 %v3087_v48, %v1439_v12  ;;  %v1511_v34 = vadd.f32 %v3087_v48, %v1440_v37  ;;  %v1512_v49 = vadd.f32 %v3087_v48, %v1441_v41  ;;  %v1513_v8 = vadd.f32 %v3087_v48, %v1442_v55  ;;  %v3693_v37 = vld [vmem:[#allocation4_spill] sm:$0xff]  ;;  %v3694_v55 = vld [vmem:[#allocation5_spill] sm:$0xff] }
 0x295   : > { %v1570_v51 = vmax.f32 %v1506_v46, 0.0  ;;  %v1571_v53 = vmax.f32 %v1507_v54, 0.0  ;;  %v1572_v43 = vmax.f32 %v1508_v15, 0.0  ;;  %v1573_v38 = vmax.f32 %v1509_v18, 0.0  ;;  %v3695_v54 = vld [vmem:[#allocation6_spill] sm:$0xff]  ;;  %v3696_v18 = vld [vmem:[#allocation7_spill] sm:$0xff] }
 0x296   : > { %v1574_v16 = vmax.f32 %v1510_v58, 0.0  ;;  %v1575_v45 = vmax.f32 %v1511_v34, 0.0  ;;  %v1576_v52 = vmax.f32 %v1512_v49, 0.0  ;;  %v1577_v56 = vmax.f32 %v1513_v8, 0.0  ;;  %v3697_v34 = vld [vmem:[#allocation8_spill] sm:$0xff] }
 0x297   : > { %1634 = vst.msk [vmem:[%s3600_s4 + $0x100] sm:$0xff] %vm848_vm0, %v1570_v51  ;;  %1635 = vst.msk [vmem:[%s3600_s4 + $0x108] sm:$0xff] %vm848_vm0, %v1571_v53  ;;  %v1372_v60 = vmul.f32 %v3069_v57, %v2895_v62  ;;  %v1373_v31 = vmul.f32 %v3069_v57, %v2902_v4  ;;  %v1374_v25 = vmul.f32 %v3069_v57, %v2909_v11  ;;  %v3686_v62 = vld [vmem:[#allocation17_spill] sm:$0xff]  ;;  %v3687_v11 = vld [vmem:[#allocation18_spill] sm:$0xff] }
 0x298   : > { %1636 = vst.msk [vmem:[%s3600_s4 + $0x110] sm:$0xff] %vm848_vm0, %v1572_v43  ;;  %1637 = vst.msk [vmem:[%s3600_s4 + $0x118] sm:$0xff] %vm848_vm0, %v1573_v38  ;;  %v1375_v26 = vmul.f32 %v3069_v57, %v2916_v17  ;;  %v1376_v4 = vmul.f32 %v3069_v57, %v3686_v62  ;;  %v1377_v17 = vmul.f32 %v3069_v57, %v3687_v11 }
 0x299   : > { %1638 = vst.msk [vmem:[%s3600_s4 + $0x120] sm:$0xff] %vm848_vm0, %v1574_v16  ;;  %1639 = vst.msk [vmem:[%s3600_s4 + $0x128] sm:$0xff] %vm848_vm0, %v1575_v45  ;;  %v1378_v40 = vmul.f32 %v3069_v57, %v3688_v2  ;;  %v1379_v5 = vmul.f32 %v3069_v57, %v3689_v1  ;;  %v1443_v35 = vmul.f32 %v3074_v29, %v1372_v60 }
 0x29a   : > { %1640 = vst.msk [vmem:[%s3600_s4 + $0x130] sm:$0xff] %vm848_vm0, %v1576_v52  ;;  %1641 = vst.msk [vmem:[%s3600_s4 + $0x138] sm:$0xff] %vm848_vm0, %v1577_v56  ;;  %v1444_v10 = vmul.f32 %v3074_v29, %v1373_v31  ;;  %v1445_v14 = vmul.f32 %v3074_v29, %v1374_v25  ;;  %v1446_v47 = vmul.f32 %v3074_v29, %v1375_v26 }
 0x29b   : > { %v1447_v44 = vmul.f32 %v3074_v29, %v1376_v4  ;;  %v1448_v63 = vmul.f32 %v3074_v29, %v1377_v17  ;;  %v1449_v21 = vmul.f32 %v3074_v29, %v1378_v40  ;;  %v1450_v24 = vmul.f32 %v3074_v29, %v1379_v5 }
 0x29c   : > { %v1514_v27 = vadd.f32 %v3087_v48, %v1443_v35  ;;  %v1515_v30 = vadd.f32 %v3087_v48, %v1444_v10  ;;  %v1516_v61 = vadd.f32 %v3087_v48, %v1445_v14  ;;  %v1517_v22 = vadd.f32 %v3087_v48, %v1446_v47  ;;  %v3698_v47 = vld [vmem:[#allocation9_spill] sm:$0xff] }
 0x29d   : > { %v1518_v0 = vadd.f32 %v3087_v48, %v1447_v44  ;;  %v1519_v3 = vadd.f32 %v3087_v48, %v1448_v63  ;;  %v1520_v6 = vadd.f32 %v3087_v48, %v1449_v21  ;;  %v1521_v33 = vadd.f32 %v3087_v48, %v1450_v24  ;;  %v3699_v63 = vld [vmem:[#allocation10_spill] sm:$0xff]  ;;  %v3700_v24 = vld [vmem:[#allocation11_spill] sm:$0xff] }
 0x29e   : > { %v1578_v36 = vmax.f32 %v1514_v27, 0.0  ;;  %v1579_v7 = vmax.f32 %v1515_v30, 0.0  ;;  %v1580_v39 = vmax.f32 %v1516_v61, 0.0  ;;  %v1581_v42 = vmax.f32 %v1517_v22, 0.0  ;;  %v3701_v30 = vld [vmem:[#allocation12_spill] sm:$0xff]  ;;  %v3702_v22 = vld [vmem:[#allocation13_spill] sm:$0xff] }
 0x29f   : > { %v1582_v13 = vmax.f32 %v1518_v0, 0.0  ;;  %v1583_v19 = vmax.f32 %v1519_v3, 0.0  ;;  %v1584_v23 = vmax.f32 %v1520_v6, 0.0  ;;  %v1585_v28 = vmax.f32 %v1521_v33, 0.0  ;;  %v3703_v3 = vld [vmem:[#allocation14_spill] sm:$0xff]  ;;  %v3704_v33 = vld [vmem:[#allocation15_spill] sm:$0xff] }
 0x2a0   : > { %1642 = vst.msk [vmem:[%s3600_s4 + $0x140] sm:$0xff] %vm848_vm0, %v1578_v36  ;;  %1643 = vst.msk [vmem:[%s3600_s4 + $0x148] sm:$0xff] %vm848_vm0, %v1579_v7  ;;  %v1380_v59 = vmul.f32 %v3069_v57, %v3690_v32  ;;  %v1381_v20 = vmul.f32 %v3069_v57, %v3691_v50  ;;  %v1382_v12 = vmul.f32 %v3069_v57, %v3692_v9  ;;  %v3705_v7 = vld [vmem:[#allocation22_spill] sm:$0xff] }
 0x2a1   : > { %1644 = vst.msk [vmem:[%s3600_s4 + $0x150] sm:$0xff] %vm848_vm0, %v1580_v39  ;;  %1645 = vst.msk [vmem:[%s3600_s4 + $0x158] sm:$0xff] %vm848_vm0, %v1581_v42  ;;  %v1383_v41 = vmul.f32 %v3069_v57, %v3693_v37  ;;  %v1384_v46 = vmul.f32 %v3069_v57, %v3694_v55  ;;  %v1385_v15 = vmul.f32 %v3069_v57, %v3695_v54 }
 0x2a2   : > { %1646 = vst.msk [vmem:[%s3600_s4 + $0x160] sm:$0xff] %vm848_vm0, %v1582_v13  ;;  %1647 = vst.msk [vmem:[%s3600_s4 + $0x168] sm:$0xff] %vm848_vm0, %v1583_v19  ;;  %v1386_v58 = vmul.f32 %v3069_v57, %v3696_v18  ;;  %v1387_v49 = vmul.f32 %v3069_v57, %v3697_v34  ;;  %v1451_v8 = vmul.f32 %v3074_v29, %v1380_v59 }
 0x2a3   : > { %1648 = vst.msk [vmem:[%s3600_s4 + $0x170] sm:$0xff] %vm848_vm0, %v1584_v23  ;;  %1649 = vst.msk [vmem:[%s3600_s4 + $0x178] sm:$0xff] %vm848_vm0, %v1585_v28  ;;  %v1452_v51 = vmul.f32 %v3074_v29, %v1381_v20  ;;  %v1453_v53 = vmul.f32 %v3074_v29, %v1382_v12  ;;  %v1454_v43 = vmul.f32 %v3074_v29, %v1383_v41 }
 0x2a4   : > { %v1455_v38 = vmul.f32 %v3074_v29, %v1384_v46  ;;  %v1456_v16 = vmul.f32 %v3074_v29, %v1385_v15  ;;  %v1457_v45 = vmul.f32 %v3074_v29, %v1386_v58  ;;  %v1458_v52 = vmul.f32 %v3074_v29, %v1387_v49 }
 0x2a5   : > { %v1522_v56 = vadd.f32 %v3087_v48, %v1451_v8  ;;  %v1523_v60 = vadd.f32 %v3087_v48, %v1452_v51  ;;  %v1524_v31 = vadd.f32 %v3087_v48, %v1453_v53  ;;  %v1525_v25 = vadd.f32 %v3087_v48, %v1454_v43 }
 0x2a6   : > { %v1526_v26 = vadd.f32 %v3087_v48, %v1455_v38  ;;  %v1527_v62 = vadd.f32 %v3087_v48, %v1456_v16  ;;  %v1528_v4 = vadd.f32 %v3087_v48, %v1457_v45  ;;  %v1529_v11 = vadd.f32 %v3087_v48, %v1458_v52 }
 0x2a7   : > { %v1586_v17 = vmax.f32 %v1522_v56, 0.0  ;;  %v1587_v2 = vmax.f32 %v1523_v60, 0.0  ;;  %v1588_v40 = vmax.f32 %v1524_v31, 0.0  ;;  %v1589_v1 = vmax.f32 %v1525_v25, 0.0 }
 0x2a8   : > { %v1590_v5 = vmax.f32 %v1526_v26, 0.0  ;;  %v1591_v35 = vmax.f32 %v1527_v62, 0.0  ;;  %v1592_v10 = vmax.f32 %v1528_v4, 0.0  ;;  %v1593_v14 = vmax.f32 %v1529_v11, 0.0 }
 0x2a9   : > { %1650 = vst.msk [vmem:[%s3600_s4 + $0x180] sm:$0xff] %vm848_vm0, %v1586_v17  ;;  %1651 = vst.msk [vmem:[%s3600_s4 + $0x188] sm:$0xff] %vm848_vm0, %v1587_v2  ;;  %v1388_v44 = vmul.f32 %v3069_v57, %v3698_v47  ;;  %v1389_v21 = vmul.f32 %v3069_v57, %v3699_v63  ;;  %v1390_v27 = vmul.f32 %v3069_v57, %v3700_v24 }
 0x2aa   : > { %1652 = vst.msk [vmem:[%s3600_s4 + $0x190] sm:$0xff] %vm848_vm0, %v1588_v40  ;;  %1653 = vst.msk [vmem:[%s3600_s4 + $0x198] sm:$0xff] %vm848_vm0, %v1589_v1  ;;  %v1391_v61 = vmul.f32 %v3069_v57, %v3701_v30  ;;  %v1392_v0 = vmul.f32 %v3069_v57, %v3702_v22  ;;  %v1393_v6 = vmul.f32 %v3069_v57, %v3703_v3 }
 0x2ab   : > { %1654 = vst.msk [vmem:[%s3600_s4 + $0x1a0] sm:$0xff] %vm848_vm0, %v1590_v5  ;;  %1655 = vst.msk [vmem:[%s3600_s4 + $0x1a8] sm:$0xff] %vm848_vm0, %v1591_v35  ;;  %v1394_v36 = vmul.f32 %v3069_v57, %v3704_v33  ;;  %v1395_v39 = vmul.f32 %v3069_v57, %v3705_v7  ;;  %v1459_v42 = vmul.f32 %v3074_v29, %v1388_v44 }
 0x2ac   : > { %1656 = vst.msk [vmem:[%s3600_s4 + $0x1b0] sm:$0xff] %vm848_vm0, %v1592_v10  ;;  %1657 = vst.msk [vmem:[%s3600_s4 + $0x1b8] sm:$0xff] %vm848_vm0, %v1593_v14  ;;  %v1460_v13 = vmul.f32 %v3074_v29, %v1389_v21  ;;  %v1461_v19 = vmul.f32 %v3074_v29, %v1390_v27  ;;  %v1462_v23 = vmul.f32 %v3074_v29, %v1391_v61 }
 0x2ad   : > { %v1463_v28 = vmul.f32 %v3074_v29, %v1392_v0  ;;  %v1464_v32 = vmul.f32 %v3074_v29, %v1393_v6  ;;  %v1465_v59 = vmul.f32 %v3074_v29, %v1394_v36  ;;  %v1466_v50 = vmul.f32 %v3074_v29, %v1395_v39 }
 0x2ae   : > { %v1530_v20 = vadd.f32 %v3087_v48, %v1459_v42  ;;  %v1531_v57 = vadd.f32 %v3087_v48, %v1460_v13  ;;  %v1532_v9 = vadd.f32 %v3087_v48, %v1461_v19  ;;  %v1533_v12 = vadd.f32 %v3087_v48, %v1462_v23 }
 0x2af   : > { %v1534_v37 = vadd.f32 %v3087_v48, %v1463_v28  ;;  %v1535_v41 = vadd.f32 %v3087_v48, %v1464_v32  ;;  %v1536_v55 = vadd.f32 %v3087_v48, %v1465_v59  ;;  %v1537_v46 = vadd.f32 %v3087_v48, %v1466_v50 }
 0x2b0   : > { %v1594_v54 = vmax.f32 %v1530_v20, 0.0  ;;  %v1595_v15 = vmax.f32 %v1531_v57, 0.0  ;;  %v1596_v18 = vmax.f32 %v1532_v9, 0.0  ;;  %v1597_v29 = vmax.f32 %v1533_v12, 0.0 }
 0x2b1   : > { %v1598_v58 = vmax.f32 %v1534_v37, 0.0  ;;  %v1599_v34 = vmax.f32 %v1535_v41, 0.0  ;;  %v1600_v49 = vmax.f32 %v1536_v55, 0.0  ;;  %v1601_v8 = vmax.f32 %v1537_v46, 0.0 }
 0x2b2   : > { %1658 = vst.msk [vmem:[%s3600_s4 + $0x1c0] sm:$0xff] %vm848_vm0, %v1594_v54  ;;  %1659 = vst.msk [vmem:[%s3600_s4 + $0x1c8] sm:$0xff] %vm848_vm0, %v1595_v15 }
 0x2b3   : > { %1660 = vst.msk [vmem:[%s3600_s4 + $0x1d0] sm:$0xff] %vm848_vm0, %v1596_v18  ;;  %1661 = vst.msk [vmem:[%s3600_s4 + $0x1d8] sm:$0xff] %vm848_vm0, %v1597_v29 }
 0x2b4   : > { %1662 = vst.msk [vmem:[%s3600_s4 + $0x1e0] sm:$0xff] %vm848_vm0, %v1598_v58  ;;  %1663 = vst.msk [vmem:[%s3600_s4 + $0x1e8] sm:$0xff] %vm848_vm0, %v1599_v34 }
 0x2b5   : > { %1664 = vst.msk [vmem:[%s3600_s4 + $0x1f0] sm:$0xff] %vm848_vm0, %v1600_v49  ;;  %1665 = vst.msk [vmem:[%s3600_s4 + $0x1f8] sm:$0xff] %vm848_vm0, %v1601_v8 }
 0x2b6 PF: > { %s14_s15 = sadd.s32 1, %s2012_s15  }
 0x2b7   : > { %p11_p5 = scmp.ge.s32.totalorder %s14_s15, 6  }
 0x2b9   :  { %13 = sbr.rel (!%p11_p5) target bundleno = 1 (0x1), region = 70 }

// kernel: generator_forward.9
= control target key start
LH: loop header
LB: loop body
LE: loop exit
PB: predicated region body
PF: predicated region fallthrough
CT: control target
= control target key end

     0   :  { %s4763_s15 = smov 0   ;;  %s9613_s0 = inlined_call_operand.vmem [shape: bf16[4,512,256], index: 0, kind: input, shape index: {}]   ;;  %s9614_s1 = inlined_call_operand.vmem [shape: bf16[4,256,128], index: 1, kind: input, shape index: {}]   ;;  %s9615_s2 = inlined_call_operand.vmem [shape: f32[1,128], index: 2, kind: input, shape index: {}]   ;;  %s9616_s3 = inlined_call_operand.vmem [shape: f32[1,128], index: 3, kind: input, shape index: {}]   ;;  %s9617_s4 = inlined_call_operand.vmem [shape: f32[4,512,128], index: 4, kind: output, shape index: {}]  }
   0x1 LB: > { %s4769_s16 = sadd.s32 4294967295, %s4735_s15   ;;  %p3709_p0 = scmp.ge.s32.totalorder %s4735_s15, 1  ;;  %s4735_s15 = sphi %s4763_s15, %s14_s15  }
   0x2   : > { %p167_p1 = scmp.lt.s32.totalorder %s4735_s15, 5 }
   0x4   : > { %p168_p2 = pnand %p3709_p0, %p167_p1 }
   0x5   : > { %p193_p3 = scmp.lt.s32.totalorder (!%p168_p2), %s4769_s16, 3  ;;  %s3794_s26 = sshll.u32 (!%p168_p2), %s4769_s16, 9 }
   0x6   : > { %171 = sbr.rel (%p168_p2) target bundleno = 1748 (0x6d4), region = 36  ;;  %s4901_s29 = scalar_lea.vmem (!%p168_p2), %s9617_s4, %s3794_s26 }
   0x7   : > { %p3795_p4 = scmp.ne.s32.totalorder (!%p168_p2), %s4769_s16, 3 }
   0xb   : > { %v4737_v0 = vmov 0   ;;  %s194_s17 = scalar_select %p193_p3, %s4769_s16, 3 }
   0xc   : > { %716 = vmatprep.subr.bf16.mxu0 %v4737_v0  ;;  %3802 = vmatprep.subr.bf16.mxu1 %v4737_v0 }
   0xd   : > { %s3801_s18 = sshll.u32 %s194_s17, 7  ;;  %s3800_s22 = sshll.u32 %s194_s17, 9 }
   0xe   : > { %s4780_s21 = scalar_lea.vmem %s9614_s1, %s3801_s18  ;;  %s4795_s25 = scalar_lea.vmem %s9613_s0, %s3800_s22 }
   0xf   : > { %v3843_v1 = vld [vmem:[%s4780_s21 + $0x38] sm:$0xff]   ;;  %v3844_v2 = vld [vmem:[%s4780_s21 + $0x30] sm:$0xff]   ;;  %v3845_v3 = vld [vmem:[%s4780_s21 + $0x28] sm:$0xff]  }
  0x10   : > { %717 = vmatpush1.bf16.msra.mxu0 %v3843_v1  ;;  %3818 = vmatpush1.bf16.msra.mxu1 %v3843_v1  ;;  %v3846_v4 = vld [vmem:[%s4780_s21 + $0x20] sm:$0xff]   ;;  %v3847_v5 = vld [vmem:[%s4780_s21 + $0x18] sm:$0xff]   ;;  %v3848_v7 = vld [vmem:[%s4780_s21 + $0x10] sm:$0xff]  }
  0x11   : > { %718 = vmatprep.subr.bf16.mxu0 %v4737_v0  ;;  %3803 = vmatprep.subr.bf16.mxu1 %v4737_v0  ;;  %v3861_v6 = vld [vmem:[%s4795_s25 + $0x4] ss:$8 sps:$4 sm:$0xff]   ;;  %v3851_v11 = vld [vmem:[%s4780_s21 + $0x78] sm:$0xff]   ;;  %v3852_v12 = vld [vmem:[%s4780_s21 + $0x70] sm:$0xff]  }
  0x12   : > { %v3864_v8 = vld [vmem:[%s4795_s25 + $0x104] ss:$8 sps:$4 sm:$0xff]   ;;  %748 = vmatprep.mubr.bf16.mxu0 %v3861_v6  ;;  %v3855_v15 = vld [vmem:[%s4780_s21 + $0x58] sm:$0xff]   ;;  %v3856_v16 = vld [vmem:[%s4780_s21 + $0x50] sm:$0xff]  }
  0x13   : > { %876 = vmatprep.mubr.bf16.mxu1 %v3864_v8  ;;  %v3849_v9 = vld [vmem:[%s4780_s21 + $0x8] sm:$0xff]   ;;  %v3850_v10 = vld [vmem:[%s4780_s21] sm:$0xff]   ;;  %v3865_v21 = vld [vmem:[%s4795_s25 + $0x14] ss:$8 sps:$4 sm:$0xff]  }
  0x14   : > { %719 = vmatpush1.bf16.msra.mxu0 %v3844_v2  ;;  %3819 = vmatpush1.bf16.msra.mxu1 %v3844_v2  ;;  %v3853_v13 = vld [vmem:[%s4780_s21 + $0x68] sm:$0xff]   ;;  %v3854_v14 = vld [vmem:[%s4780_s21 + $0x60] sm:$0xff]   ;;  %v3867_v22 = vld [vmem:[%s4795_s25 + $0x114] ss:$8 sps:$4 sm:$0xff]  }
  0x15   : > { %720 = vmatprep.subr.bf16.mxu0 %v4737_v0  ;;  %3804 = vmatprep.subr.bf16.mxu1 %v4737_v0  ;;  %v3857_v17 = vld [vmem:[%s4780_s21 + $0x48] sm:$0xff]   ;;  %v3858_v18 = vld [vmem:[%s4780_s21 + $0x40] sm:$0xff]   ;;  %v3869_v23 = vld [vmem:[%s4795_s25 + $0x10] ss:$8 sps:$4 sm:$0xff]  }
  0x16   : > { %v3859_v19 = vld [vmem:[%s4795_s25] ss:$8 sps:$4 sm:$0xff]   ;;  %v3870_v24 = vld [vmem:[%s4795_s25 + $0x110] ss:$8 sps:$4 sm:$0xff]   ;;  %v3871_v25 = vld [vmem:[%s4795_s25 + $0x24] ss:$8 sps:$4 sm:$0xff]  }
  0x17   : > { %v3862_v20 = vld [vmem:[%s4795_s25 + $0x100] ss:$8 sps:$4 sm:$0xff]   ;;  %v3873_v26 = vld [vmem:[%s4795_s25 + $0x124] ss:$8 sps:$4 sm:$0xff]   ;;  %v3877_v29 = vld [vmem:[%s4795_s25 + $0x34] ss:$8 sps:$4 sm:$0xff]  }
  0x18   : > { %721 = vmatpush1.bf16.msra.mxu0 %v3845_v3  ;;  %3820 = vmatpush1.bf16.msra.mxu1 %v3845_v3  ;;  %v3875_v27 = vld [vmem:[%s4795_s25 + $0x20] ss:$8 sps:$4 sm:$0xff]   ;;  %v3879_v30 = vld [vmem:[%s4795_s25 + $0x134] ss:$8 sps:$4 sm:$0xff]   ;;  %v3881_v31 = vld [vmem:[%s4795_s25 + $0x30] ss:$8 sps:$4 sm:$0xff]  }
  0x19   : > { %722 = vmatprep.subr.bf16.mxu0 %v4737_v0  ;;  %3805 = vmatprep.subr.bf16.mxu1 %v4737_v0  ;;  %v3876_v28 = vld [vmem:[%s4795_s25 + $0x120] ss:$8 sps:$4 sm:$0xff]   ;;  %v3882_v32 = vld [vmem:[%s4795_s25 + $0x130] ss:$8 sps:$4 sm:$0xff]   ;;  %v3883_v33 = vld [vmem:[%s4795_s25 + $0x44] ss:$8 sps:$4 sm:$0xff]  }
  0x1a   : > { %v3885_v34 = vld [vmem:[%s4795_s25 + $0x144] ss:$8 sps:$4 sm:$0xff]   ;;  %v3887_v35 = vld [vmem:[%s4795_s25 + $0x40] ss:$8 sps:$4 sm:$0xff]   ;;  %v3889_v37 = vld [vmem:[%s4795_s25 + $0x54] ss:$8 sps:$4 sm:$0xff]  }
  0x1b   : > { %v3888_v36 = vld [vmem:[%s4795_s25 + $0x140] ss:$8 sps:$4 sm:$0xff]   ;;  %v3891_v38 = vld [vmem:[%s4795_s25 + $0x154] ss:$8 sps:$4 sm:$0xff]   ;;  %v3893_v39 = vld [vmem:[%s4795_s25 + $0x50] ss:$8 sps:$4 sm:$0xff]  }
  0x1c   : > { %723 = vmatpush1.bf16.msra.mxu0 %v3846_v4  ;;  %3821 = vmatpush1.bf16.msra.mxu1 %v3846_v4  ;;  %v3894_v40 = vld [vmem:[%s4795_s25 + $0x150] ss:$8 sps:$4 sm:$0xff]   ;;  %v3895_v41 = vld [vmem:[%s4795_s25 + $0x64] ss:$8 sps:$4 sm:$0xff]   ;;  %v3899_v43 = vld [vmem:[%s4795_s25 + $0x60] ss:$8 sps:$4 sm:$0xff]  }
  0x1d   : > { %724 = vmatprep.subr.bf16.mxu0 %v4737_v0  ;;  %3806 = vmatprep.subr.bf16.mxu1 %v4737_v0  ;;  %v3897_v42 = vld [vmem:[%s4795_s25 + $0x164] ss:$8 sps:$4 sm:$0xff]   ;;  %v3900_v44 = vld [vmem:[%s4795_s25 + $0x160] ss:$8 sps:$4 sm:$0xff]   ;;  %v3901_v45 = vld [vmem:[%s4795_s25 + $0x74] ss:$8 sps:$4 sm:$0xff]  }
  0x1e   : > { %v3903_v46 = vld [vmem:[%s4795_s25 + $0x174] ss:$8 sps:$4 sm:$0xff]   ;;  %v3905_v47 = vld [vmem:[%s4795_s25 + $0x70] ss:$8 sps:$4 sm:$0xff]   ;;  %v3907_v49 = vld [vmem:[%s4795_s25 + $0x84] ss:$8 sps:$4 sm:$0xff]  }
  0x1f   : > { %v3906_v48 = vld [vmem:[%s4795_s25 + $0x170] ss:$8 sps:$4 sm:$0xff]   ;;  %v3909_v50 = vld [vmem:[%s4795_s25 + $0x184] ss:$8 sps:$4 sm:$0xff]   ;;  %v3911_v51 = vld [vmem:[%s4795_s25 + $0x80] ss:$8 sps:$4 sm:$0xff]  }
  0x20   : > { %725 = vmatpush1.bf16.msra.mxu0 %v3847_v5  ;;  %3822 = vmatpush1.bf16.msra.mxu1 %v3847_v5  ;;  %v3912_v52 = vld [vmem:[%s4795_s25 + $0x180] ss:$8 sps:$4 sm:$0xff]   ;;  %v3913_v53 = vld [vmem:[%s4795_s25 + $0x94] ss:$8 sps:$4 sm:$0xff]   ;;  %v3917_v55 = vld [vmem:[%s4795_s25 + $0x90] ss:$8 sps:$4 sm:$0xff]  }
  0x21   : > { %726 = vmatprep.subr.bf16.mxu0 %v4737_v0  ;;  %3807 = vmatprep.subr.bf16.mxu1 %v4737_v0  ;;  %v3915_v54 = vld [vmem:[%s4795_s25 + $0x194] ss:$8 sps:$4 sm:$0xff]   ;;  %v3918_v56 = vld [vmem:[%s4795_s25 + $0x190] ss:$8 sps:$4 sm:$0xff]   ;;  %v3919_v57 = vld [vmem:[%s4795_s25 + $0xa4] ss:$8 sps:$4 sm:$0xff]  }
  0x22   : > { %v3921_v58 = vld [vmem:[%s4795_s25 + $0x1a4] ss:$8 sps:$4 sm:$0xff]   ;;  %v3923_v59 = vld [vmem:[%s4795_s25 + $0xa0] ss:$8 sps:$4 sm:$0xff]   ;;  %v3925_v61 = vld [vmem:[%s4795_s25 + $0xb4] ss:$8 sps:$4 sm:$0xff]  }
  0x23   : > { %v3924_v60 = vld [vmem:[%s4795_s25 + $0x1a0] ss:$8 sps:$4 sm:$0xff]   ;;  %v3927_v62 = vld [vmem:[%s4795_s25 + $0x1b4] ss:$8 sps:$4 sm:$0xff]   ;;  %v3929_v63 = vld [vmem:[%s4795_s25 + $0xb0] ss:$8 sps:$4 sm:$0xff]  }
  0x24   : > { %727 = vmatpush1.bf16.msra.mxu0 %v3848_v7  ;;  %3823 = vmatpush1.bf16.msra.mxu1 %v3848_v7  ;;  %v3931_v1 = vld [vmem:[%s4795_s25 + $0xc4] ss:$8 sps:$4 sm:$0xff]   ;;  %v3935_v3 = vld [vmem:[%s4795_s25 + $0xc0] ss:$8 sps:$4 sm:$0xff]   ;;  %v3937_v5 = vld [vmem:[%s4795_s25 + $0xd4] ss:$8 sps:$4 sm:$0xff]  }
  0x25   : > { %728 = vmatprep.subr.bf16.mxu0 %v4737_v0  ;;  %3808 = vmatprep.subr.bf16.mxu1 %v4737_v0  ;;  %v3933_v2 = vld [vmem:[%s4795_s25 + $0x1c4] ss:$8 sps:$4 sm:$0xff]   ;;  %v3936_v4 = vld [vmem:[%s4795_s25 + $0x1c0] ss:$8 sps:$4 sm:$0xff]   ;;  %v3939_v6 = vld [vmem:[%s4795_s25 + $0x1d4] ss:$8 sps:$4 sm:$0xff]  }
  0x26   : > { %v3941_v7 = vld [vmem:[%s4795_s25 + $0xd0] ss:$8 sps:$4 sm:$0xff]  }
  0x27   : > { %v3942_v8 = vld [vmem:[%s4795_s25 + $0x1d0] ss:$8 sps:$4 sm:$0xff]  }
  0x28   : > { %729 = vmatpush1.bf16.msra.mxu0 %v3849_v9  ;;  %3824 = vmatpush1.bf16.msra.mxu1 %v3849_v9  ;;  %v3943_v9 = vld [vmem:[%s4795_s25 + $0xe4] ss:$8 sps:$4 sm:$0xff]  }
  0x29   : > { %730 = vmatprep.subr.bf16.mxu0 %v4737_v0  ;;  %3809 = vmatprep.subr.bf16.mxu1 %v4737_v0 }
  0x2c   : > { %731 = vmatpush1.bf16.msra.mxu0 %v3850_v10  ;;  %3825 = vmatpush1.bf16.msra.mxu1 %v3850_v10  ;;  %v3945_v10 = vld [vmem:[%s4795_s25 + $0x1e4] ss:$8 sps:$4 sm:$0xff]  }
  0x2d   : > { %732 = vmatprep.subr.bf16.mxu0 %v4737_v0  ;;  %3810 = vmatprep.subr.bf16.mxu1 %v4737_v0 }
  0x30   : > { %733 = vmatpush2.bf16.msra.mxu0 %v3851_v11  ;;  %3826 = vmatpush2.bf16.msra.mxu1 %v3851_v11  ;;  %v3947_v11 = vld [vmem:[%s4795_s25 + $0xe0] ss:$8 sps:$4 sm:$0xff]  }
  0x31   : > { %734 = vmatprep.subr.bf16.mxu0 %v4737_v0  ;;  %3811 = vmatprep.subr.bf16.mxu1 %v4737_v0 }
  0x34   : > { %735 = vmatpush2.bf16.msra.mxu0 %v3852_v12  ;;  %3827 = vmatpush2.bf16.msra.mxu1 %v3852_v12  ;;  %v3948_v12 = vld [vmem:[%s4795_s25 + $0x1e0] ss:$8 sps:$4 sm:$0xff]  }
  0x35   : > { %736 = vmatprep.subr.bf16.mxu0 %v4737_v0  ;;  %3812 = vmatprep.subr.bf16.mxu1 %v4737_v0 }
  0x38   : > { %737 = vmatpush2.bf16.msra.mxu0 %v3853_v13  ;;  %3828 = vmatpush2.bf16.msra.mxu1 %v3853_v13  ;;  %v3949_v13 = vld [vmem:[%s4795_s25 + $0xf4] ss:$8 sps:$4 sm:$0xff]  }
  0x39   : > { %738 = vmatprep.subr.bf16.mxu0 %v4737_v0  ;;  %3813 = vmatprep.subr.bf16.mxu1 %v4737_v0 }
  0x3c   : > { %739 = vmatpush2.bf16.msra.mxu0 %v3854_v14  ;;  %3829 = vmatpush2.bf16.msra.mxu1 %v3854_v14  ;;  %v3951_v14 = vld [vmem:[%s4795_s25 + $0x1f4] ss:$8 sps:$4 sm:$0xff]  }
  0x3d   : > { %740 = vmatprep.subr.bf16.mxu0 %v4737_v0  ;;  %3814 = vmatprep.subr.bf16.mxu1 %v4737_v0 }
  0x40   : > { %741 = vmatpush2.bf16.msra.mxu0 %v3855_v15  ;;  %3830 = vmatpush2.bf16.msra.mxu1 %v3855_v15  ;;  %v3953_v15 = vld [vmem:[%s4795_s25 + $0xf0] ss:$8 sps:$4 sm:$0xff]  }
  0x41   : > { %742 = vmatprep.subr.bf16.mxu0 %v4737_v0  ;;  %3815 = vmatprep.subr.bf16.mxu1 %v4737_v0 }
  0x44   : > { %743 = vmatpush2.bf16.msra.mxu0 %v3856_v16  ;;  %3831 = vmatpush2.bf16.msra.mxu1 %v3856_v16  ;;  %v3954_v16 = vld [vmem:[%s4795_s25 + $0x1f0] ss:$8 sps:$4 sm:$0xff]  }
  0x45   : > { %744 = vmatprep.subr.bf16.mxu0 %v4737_v0  ;;  %3816 = vmatprep.subr.bf16.mxu1 %v4737_v0 }
  0x48   : > { %745 = vmatpush2.bf16.msra.mxu0 %v3857_v17  ;;  %3832 = vmatpush2.bf16.msra.mxu1 %v3857_v17 }
  0x49   : > { %746 = vmatprep.subr.bf16.mxu0 %v4737_v0  ;;  %3817 = vmatprep.subr.bf16.mxu1 %v4737_v0  ;;  %v3930_v0 = vld [vmem:[%s4795_s25 + $0x1b0] ss:$8 sps:$4 sm:$0xff]  }
  0x4c   : > { %747 = vmatpush2.bf16.msra.mxu0 %v3858_v18  ;;  %3833 = vmatpush2.bf16.msra.mxu1 %v3858_v18 }
  0x4f   : > { %749 = vmatmul.mubr.bf16.vlgmr.msra.gmra.mxu0 %v3859_v19  ;;  %877 = vmatmul.mubr.bf16.vlgmr.msra.gmra.mxu1 %v3862_v20 }
  0x50   : > { %756 = vmatprep.mubr.bf16.mxu0 %v3865_v21  ;;  %884 = vmatprep.mubr.bf16.mxu1 %v3867_v22 }
  0x57   : > { %757 = vmatmul.mubr.bf16.gmra.mxu0 %v3869_v23  ;;  %885 = vmatmul.mubr.bf16.gmra.mxu1 %v3870_v24 }
  0x58   : > { %764 = vmatprep.mubr.bf16.mxu0 %v3871_v25  ;;  %892 = vmatprep.mubr.bf16.mxu1 %v3873_v26 }
  0x5f   : > { %765 = vmatmul.mubr.bf16.gmra.mxu0 %v3875_v27  ;;  %893 = vmatmul.mubr.bf16.gmra.mxu1 %v3876_v28 }
  0x60   : > { %772 = vmatprep.mubr.bf16.mxu0 %v3877_v29  ;;  %900 = vmatprep.mubr.bf16.mxu1 %v3879_v30 }
  0x67   : > { %773 = vmatmul.mubr.bf16.gmra.mxu0 %v3881_v31  ;;  %901 = vmatmul.mubr.bf16.gmra.mxu1 %v3882_v32 }
  0x68   : > { %780 = vmatprep.mubr.bf16.mxu0 %v3883_v33  ;;  %908 = vmatprep.mubr.bf16.mxu1 %v3885_v34 }
  0x6f   : > { %781 = vmatmul.mubr.bf16.gmra.mxu0 %v3887_v35  ;;  %909 = vmatmul.mubr.bf16.gmra.mxu1 %v3888_v36 }
  0x70   : > { %788 = vmatprep.mubr.bf16.mxu0 %v3889_v37  ;;  %916 = vmatprep.mubr.bf16.mxu1 %v3891_v38 }
  0x77   : > { %789 = vmatmul.mubr.bf16.gmra.mxu0 %v3893_v39  ;;  %917 = vmatmul.mubr.bf16.gmra.mxu1 %v3894_v40 }
  0x78   : > { %796 = vmatprep.mubr.bf16.mxu0 %v3895_v41  ;;  %924 = vmatprep.mubr.bf16.mxu1 %v3897_v42 }
  0x7f   : > { %797 = vmatmul.mubr.bf16.gmra.mxu0 %v3899_v43  ;;  %925 = vmatmul.mubr.bf16.gmra.mxu1 %v3900_v44 }
  0x80   : > { %804 = vmatprep.mubr.bf16.mxu0 %v3901_v45  ;;  %932 = vmatprep.mubr.bf16.mxu1 %v3903_v46 }
  0x87   : > { %805 = vmatmul.mubr.bf16.gmra.mxu0 %v3905_v47  ;;  %933 = vmatmul.mubr.bf16.gmra.mxu1 %v3906_v48 }
  0x88   : > { %812 = vmatprep.mubr.bf16.mxu0 %v3907_v49  ;;  %940 = vmatprep.mubr.bf16.mxu1 %v3909_v50 }
  0x8f   : > { %813 = vmatmul.mubr.bf16.gmra.mxu0 %v3911_v51  ;;  %941 = vmatmul.mubr.bf16.gmra.mxu1 %v3912_v52 }
  0x90   : > { %820 = vmatprep.mubr.bf16.mxu0 %v3913_v53  ;;  %948 = vmatprep.mubr.bf16.mxu1 %v3915_v54 }
  0x97   : > { %821 = vmatmul.mubr.bf16.gmra.mxu0 %v3917_v55  ;;  %949 = vmatmul.mubr.bf16.gmra.mxu1 %v3918_v56 }
  0x98   : > { %828 = vmatprep.mubr.bf16.mxu0 %v3919_v57  ;;  %956 = vmatprep.mubr.bf16.mxu1 %v3921_v58 }
  0x9f   : > { %829 = vmatmul.mubr.bf16.gmra.mxu0 %v3923_v59  ;;  %957 = vmatmul.mubr.bf16.gmra.mxu1 %v3924_v60 }
  0xa0   : > { %836 = vmatprep.mubr.bf16.mxu0 %v3925_v61  ;;  %964 = vmatprep.mubr.bf16.mxu1 %v3927_v62 }
  0xa7   : > { %837 = vmatmul.mubr.bf16.gmra.mxu0 %v3929_v63  ;;  %965 = vmatmul.mubr.bf16.gmra.mxu1 %v3930_v0 }
  0xa8   : > { %844 = vmatprep.mubr.bf16.mxu0 %v3931_v1  ;;  %972 = vmatprep.mubr.bf16.mxu1 %v3933_v2 }
  0xaf   : > { %845 = vmatmul.mubr.bf16.gmra.mxu0 %v3935_v3  ;;  %973 = vmatmul.mubr.bf16.gmra.mxu1 %v3936_v4 }
  0xb0   : > { %852 = vmatprep.mubr.bf16.mxu0 %v3937_v5  ;;  %980 = vmatprep.mubr.bf16.mxu1 %v3939_v6 }
  0xb7   : > { %853 = vmatmul.mubr.bf16.gmra.mxu0 %v3941_v7  ;;  %981 = vmatmul.mubr.bf16.gmra.mxu1 %v3942_v8 }
  0xb8   : > { %860 = vmatprep.mubr.bf16.mxu0 %v3943_v9  ;;  %988 = vmatprep.mubr.bf16.mxu1 %v3945_v10 }
  0xbf   : > { %861 = vmatmul.mubr.bf16.gmra.mxu0 %v3947_v11  ;;  %989 = vmatmul.mubr.bf16.gmra.mxu1 %v3948_v12 }
  0xc0   : > { %868 = vmatprep.mubr.bf16.mxu0 %v3949_v13  ;;  %996 = vmatprep.mubr.bf16.mxu1 %v3951_v14 }
  0xc7   : > { %869 = vmatmul.mubr.bf16.gmra.mxu0 %v3953_v15  ;;  %997 = vmatmul.mubr.bf16.gmra.mxu1 %v3954_v16 }
 0x10f   : > { %v750_v17 = vpop.f32.mrf.mxu0  ;;  %v878_v18 = vpop.f32.mrf.mxu1 }
 0x110   : > { %1007 = vst [vmem:[%s4901_s29] sm:$0xff] %v750_v17  ;;  %1039 = vst [vmem:[%s4901_s29 + $0x100] sm:$0xff] %v878_v18 }
 0x111   : > { %v752_v19 = vpop.f32.mrf.mxu0  ;;  %v880_v20 = vpop.f32.mrf.mxu1 }
 0x113   : > { %v753_v21 = vpop.f32.mrf.mxu0  ;;  %v881_v22 = vpop.f32.mrf.mxu1 }
 0x114   : > { %1008 = vst [vmem:[%s4901_s29 + $0x8] sm:$0xff] %v753_v21  ;;  %1040 = vst [vmem:[%s4901_s29 + $0x108] sm:$0xff] %v881_v22 }
 0x115   : > { %v755_v23 = vpop.f32.mrf.mxu0  ;;  %v883_v24 = vpop.f32.mrf.mxu1 }
 0x117   : > { %v758_v25 = vpop.f32.mrf.mxu0  ;;  %v886_v26 = vpop.f32.mrf.mxu1 }
 0x118   : > { %1009 = vst [vmem:[%s4901_s29 + $0x10] sm:$0xff] %v758_v25  ;;  %1041 = vst [vmem:[%s4901_s29 + $0x110] sm:$0xff] %v886_v26 }
 0x119   : > { %v760_v27 = vpop.f32.mrf.mxu0  ;;  %v888_v28 = vpop.f32.mrf.mxu1 }
 0x11b   : > { %v761_v29 = vpop.f32.mrf.mxu0  ;;  %v889_v30 = vpop.f32.mrf.mxu1 }
 0x11c   : > { %1010 = vst [vmem:[%s4901_s29 + $0x18] sm:$0xff] %v761_v29  ;;  %1042 = vst [vmem:[%s4901_s29 + $0x118] sm:$0xff] %v889_v30 }
 0x11d   : > { %v763_v31 = vpop.f32.mrf.mxu0  ;;  %v891_v32 = vpop.f32.mrf.mxu1 }
 0x11f   : > { %v766_v33 = vpop.f32.mrf.mxu0  ;;  %v894_v34 = vpop.f32.mrf.mxu1 }
 0x120   : > { %1011 = vst [vmem:[%s4901_s29 + $0x20] sm:$0xff] %v766_v33  ;;  %1043 = vst [vmem:[%s4901_s29 + $0x120] sm:$0xff] %v894_v34 }
 0x121   : > { %v768_v35 = vpop.f32.mrf.mxu0  ;;  %v896_v36 = vpop.f32.mrf.mxu1 }
 0x123   : > { %v769_v37 = vpop.f32.mrf.mxu0  ;;  %v897_v38 = vpop.f32.mrf.mxu1 }
 0x124   : > { %1012 = vst [vmem:[%s4901_s29 + $0x28] sm:$0xff] %v769_v37  ;;  %1044 = vst [vmem:[%s4901_s29 + $0x128] sm:$0xff] %v897_v38 }
 0x125   : > { %v771_v39 = vpop.f32.mrf.mxu0  ;;  %v899_v40 = vpop.f32.mrf.mxu1 }
 0x127   : > { %v774_v41 = vpop.f32.mrf.mxu0  ;;  %v902_v42 = vpop.f32.mrf.mxu1 }
 0x128   : > { %1013 = vst [vmem:[%s4901_s29 + $0x30] sm:$0xff] %v774_v41  ;;  %1045 = vst [vmem:[%s4901_s29 + $0x130] sm:$0xff] %v902_v42 }
 0x129   : > { %v776_v43 = vpop.f32.mrf.mxu0  ;;  %v904_v44 = vpop.f32.mrf.mxu1 }
 0x12b   : > { %v777_v45 = vpop.f32.mrf.mxu0  ;;  %v905_v46 = vpop.f32.mrf.mxu1 }
 0x12c   : > { %1014 = vst [vmem:[%s4901_s29 + $0x38] sm:$0xff] %v777_v45  ;;  %1046 = vst [vmem:[%s4901_s29 + $0x138] sm:$0xff] %v905_v46 }
 0x12d   : > { %v779_v47 = vpop.f32.mrf.mxu0  ;;  %v907_v48 = vpop.f32.mrf.mxu1 }
 0x12f   : > { %v782_v49 = vpop.f32.mrf.mxu0  ;;  %v910_v50 = vpop.f32.mrf.mxu1 }
 0x130   : > { %1015 = vst [vmem:[%s4901_s29 + $0x40] sm:$0xff] %v782_v49  ;;  %1047 = vst [vmem:[%s4901_s29 + $0x140] sm:$0xff] %v910_v50 }
 0x131   : > { %v784_v51 = vpop.f32.mrf.mxu0  ;;  %v912_v52 = vpop.f32.mrf.mxu1 }
 0x133   : > { %v785_v53 = vpop.f32.mrf.mxu0  ;;  %v913_v54 = vpop.f32.mrf.mxu1 }
 0x134   : > { %1016 = vst [vmem:[%s4901_s29 + $0x48] sm:$0xff] %v785_v53  ;;  %1048 = vst [vmem:[%s4901_s29 + $0x148] sm:$0xff] %v913_v54 }
 0x135   : > { %v787_v55 = vpop.f32.mrf.mxu0  ;;  %v915_v56 = vpop.f32.mrf.mxu1 }
 0x137   : > { %v790_v57 = vpop.f32.mrf.mxu0  ;;  %v918_v58 = vpop.f32.mrf.mxu1 }
 0x138   : > { %1017 = vst [vmem:[%s4901_s29 + $0x50] sm:$0xff] %v790_v57  ;;  %1049 = vst [vmem:[%s4901_s29 + $0x150] sm:$0xff] %v918_v58 }
 0x139   : > { %v792_v59 = vpop.f32.mrf.mxu0  ;;  %v920_v60 = vpop.f32.mrf.mxu1 }
 0x13b   : > { %v793_v61 = vpop.f32.mrf.mxu0  ;;  %v921_v62 = vpop.f32.mrf.mxu1 }
 0x13c   : > { %1018 = vst [vmem:[%s4901_s29 + $0x58] sm:$0xff] %v793_v61  ;;  %1050 = vst [vmem:[%s4901_s29 + $0x158] sm:$0xff] %v921_v62 }
 0x13d   : > { %v795_v63 = vpop.f32.mrf.mxu0  ;;  %v923_v0 = vpop.f32.mrf.mxu1 }
 0x13f   : > { %v798_v1 = vpop.f32.mrf.mxu0  ;;  %v926_v2 = vpop.f32.mrf.mxu1 }
 0x140   : > { %1019 = vst [vmem:[%s4901_s29 + $0x60] sm:$0xff] %v798_v1  ;;  %1051 = vst [vmem:[%s4901_s29 + $0x160] sm:$0xff] %v926_v2 }
 0x141   : > { %v800_v3 = vpop.f32.mrf.mxu0  ;;  %v928_v4 = vpop.f32.mrf.mxu1 }
 0x143   : > { %v801_v5 = vpop.f32.mrf.mxu0  ;;  %v929_v6 = vpop.f32.mrf.mxu1 }
 0x144   : > { %1020 = vst [vmem:[%s4901_s29 + $0x68] sm:$0xff] %v801_v5  ;;  %1052 = vst [vmem:[%s4901_s29 + $0x168] sm:$0xff] %v929_v6 }
 0x145   : > { %v803_v7 = vpop.f32.mrf.mxu0  ;;  %v931_v8 = vpop.f32.mrf.mxu1 }
 0x147   : > { %v806_v9 = vpop.f32.mrf.mxu0  ;;  %v934_v10 = vpop.f32.mrf.mxu1 }
 0x148   : > { %1021 = vst [vmem:[%s4901_s29 + $0x70] sm:$0xff] %v806_v9  ;;  %1053 = vst [vmem:[%s4901_s29 + $0x170] sm:$0xff] %v934_v10 }
 0x149   : > { %v808_v11 = vpop.f32.mrf.mxu0  ;;  %v936_v12 = vpop.f32.mrf.mxu1 }
 0x14b   : > { %v809_v13 = vpop.f32.mrf.mxu0  ;;  %v937_v14 = vpop.f32.mrf.mxu1 }
 0x14c   : > { %1022 = vst [vmem:[%s4901_s29 + $0x78] sm:$0xff] %v809_v13  ;;  %1054 = vst [vmem:[%s4901_s29 + $0x178] sm:$0xff] %v937_v14 }
 0x14d   : > { %v811_v15 = vpop.f32.mrf.mxu0  ;;  %v939_v16 = vpop.f32.mrf.mxu1 }
 0x14f   : > { %v814_v17 = vpop.f32.mrf.mxu0  ;;  %v942_v18 = vpop.f32.mrf.mxu1 }
 0x150   : > { %1023 = vst [vmem:[%s4901_s29 + $0x80] sm:$0xff] %v814_v17  ;;  %1055 = vst [vmem:[%s4901_s29 + $0x180] sm:$0xff] %v942_v18 }
 0x151   : > { %v816_v19 = vpop.f32.mrf.mxu0  ;;  %v944_v20 = vpop.f32.mrf.mxu1 }
 0x153   : > { %v817_v21 = vpop.f32.mrf.mxu0  ;;  %v945_v22 = vpop.f32.mrf.mxu1 }
 0x154   : > { %1024 = vst [vmem:[%s4901_s29 + $0x88] sm:$0xff] %v817_v21  ;;  %1056 = vst [vmem:[%s4901_s29 + $0x188] sm:$0xff] %v945_v22 }
 0x155   : > { %v819_v23 = vpop.f32.mrf.mxu0  ;;  %v947_v24 = vpop.f32.mrf.mxu1 }
 0x157   : > { %v822_v25 = vpop.f32.mrf.mxu0  ;;  %v950_v26 = vpop.f32.mrf.mxu1 }
 0x158   : > { %1025 = vst [vmem:[%s4901_s29 + $0x90] sm:$0xff] %v822_v25  ;;  %1057 = vst [vmem:[%s4901_s29 + $0x190] sm:$0xff] %v950_v26 }
 0x159   : > { %v824_v27 = vpop.f32.mrf.mxu0  ;;  %v952_v28 = vpop.f32.mrf.mxu1 }
 0x15b   : > { %v825_v29 = vpop.f32.mrf.mxu0  ;;  %v953_v30 = vpop.f32.mrf.mxu1 }
 0x15c   : > { %1026 = vst [vmem:[%s4901_s29 + $0x98] sm:$0xff] %v825_v29  ;;  %1058 = vst [vmem:[%s4901_s29 + $0x198] sm:$0xff] %v953_v30 }
 0x15d   : > { %v827_v31 = vpop.f32.mrf.mxu0  ;;  %v955_v32 = vpop.f32.mrf.mxu1 }
 0x15f   : > { %v830_v33 = vpop.f32.mrf.mxu0  ;;  %v958_v34 = vpop.f32.mrf.mxu1 }
 0x160   : > { %1027 = vst [vmem:[%s4901_s29 + $0xa0] sm:$0xff] %v830_v33  ;;  %1059 = vst [vmem:[%s4901_s29 + $0x1a0] sm:$0xff] %v958_v34 }
 0x161   : > { %v832_v35 = vpop.f32.mrf.mxu0  ;;  %v960_v36 = vpop.f32.mrf.mxu1 }
 0x163   : > { %v833_v37 = vpop.f32.mrf.mxu0  ;;  %v961_v38 = vpop.f32.mrf.mxu1 }
 0x164   : > { %1028 = vst [vmem:[%s4901_s29 + $0xa8] sm:$0xff] %v833_v37  ;;  %1060 = vst [vmem:[%s4901_s29 + $0x1a8] sm:$0xff] %v961_v38 }
 0x165   : > { %v835_v39 = vpop.f32.mrf.mxu0  ;;  %v963_v40 = vpop.f32.mrf.mxu1 }
 0x167   : > { %v838_v41 = vpop.f32.mrf.mxu0  ;;  %v966_v42 = vpop.f32.mrf.mxu1 }
 0x168   : > { %1029 = vst [vmem:[%s4901_s29 + $0xb0] sm:$0xff] %v838_v41  ;;  %1061 = vst [vmem:[%s4901_s29 + $0x1b0] sm:$0xff] %v966_v42 }
 0x169   : > { %v840_v43 = vpop.f32.mrf.mxu0  ;;  %v968_v44 = vpop.f32.mrf.mxu1 }
 0x16b   : > { %v841_v45 = vpop.f32.mrf.mxu0  ;;  %v969_v46 = vpop.f32.mrf.mxu1 }
 0x16c   : > { %1030 = vst [vmem:[%s4901_s29 + $0xb8] sm:$0xff] %v841_v45  ;;  %1062 = vst [vmem:[%s4901_s29 + $0x1b8] sm:$0xff] %v969_v46 }
 0x16d   : > { %v843_v47 = vpop.f32.mrf.mxu0  ;;  %v971_v48 = vpop.f32.mrf.mxu1 }
 0x16f   : > { %v846_v49 = vpop.f32.mrf.mxu0  ;;  %v974_v50 = vpop.f32.mrf.mxu1 }
 0x170   : > { %1031 = vst [vmem:[%s4901_s29 + $0xc0] sm:$0xff] %v846_v49  ;;  %1063 = vst [vmem:[%s4901_s29 + $0x1c0] sm:$0xff] %v974_v50 }
 0x171   : > { %v848_v51 = vpop.f32.mrf.mxu0  ;;  %v976_v52 = vpop.f32.mrf.mxu1 }
 0x173   : > { %v849_v53 = vpop.f32.mrf.mxu0  ;;  %v977_v54 = vpop.f32.mrf.mxu1 }
 0x174   : > { %1032 = vst [vmem:[%s4901_s29 + $0xc8] sm:$0xff] %v849_v53  ;;  %1064 = vst [vmem:[%s4901_s29 + $0x1c8] sm:$0xff] %v977_v54 }
 0x175   : > { %v851_v55 = vpop.f32.mrf.mxu0  ;;  %v979_v56 = vpop.f32.mrf.mxu1 }
 0x177   : > { %v854_v57 = vpop.f32.mrf.mxu0  ;;  %v982_v58 = vpop.f32.mrf.mxu1 }
 0x178   : > { %1033 = vst [vmem:[%s4901_s29 + $0xd0] sm:$0xff] %v854_v57  ;;  %1065 = vst [vmem:[%s4901_s29 + $0x1d0] sm:$0xff] %v982_v58 }
 0x179   : > { %v856_v59 = vpop.f32.mrf.mxu0  ;;  %v984_v60 = vpop.f32.mrf.mxu1 }
 0x17b   : > { %v857_v61 = vpop.f32.mrf.mxu0  ;;  %v985_v62 = vpop.f32.mrf.mxu1 }
 0x17c   : > { %1034 = vst [vmem:[%s4901_s29 + $0xd8] sm:$0xff] %v857_v61  ;;  %1066 = vst [vmem:[%s4901_s29 + $0x1d8] sm:$0xff] %v985_v62 }
 0x17d   : > { %v859_v63 = vpop.f32.mrf.mxu0  ;;  %v987_v0 = vpop.f32.mrf.mxu1 }
 0x17f   : > { %v862_v1 = vpop.f32.mrf.mxu0  ;;  %v990_v2 = vpop.f32.mrf.mxu1 }
 0x180   : > { %1035 = vst [vmem:[%s4901_s29 + $0xe0] sm:$0xff] %v862_v1  ;;  %1067 = vst [vmem:[%s4901_s29 + $0x1e0] sm:$0xff] %v990_v2 }
 0x181   : > { %v864_v3 = vpop.f32.mrf.mxu0  ;;  %v992_v4 = vpop.f32.mrf.mxu1 }
 0x183   : > { %v865_v5 = vpop.f32.mrf.mxu0  ;;  %v993_v6 = vpop.f32.mrf.mxu1 }
 0x184   : > { %1036 = vst [vmem:[%s4901_s29 + $0xe8] sm:$0xff] %v865_v5  ;;  %1068 = vst [vmem:[%s4901_s29 + $0x1e8] sm:$0xff] %v993_v6 }
 0x185   : > { %v867_v7 = vpop.f32.mrf.mxu0  ;;  %v995_v8 = vpop.f32.mrf.mxu1 }
 0x187   : > { %v870_v9 = vpop.f32.mrf.mxu0  ;;  %v998_v10 = vpop.f32.mrf.mxu1 }
 0x188   : > { %1037 = vst [vmem:[%s4901_s29 + $0xf0] sm:$0xff] %v870_v9  ;;  %1069 = vst [vmem:[%s4901_s29 + $0x1f0] sm:$0xff] %v998_v10 }
 0x189   : > { %v872_v11 = vpop.f32.mrf.mxu0  ;;  %v1000_v12 = vpop.f32.mrf.mxu1  ;;  %1074 = sbr.rel (%p3795_p4) target bundleno = 1748 (0x6d4), region = 40 }
 0x18b   : > { %v873_v13 = vpop.f32.mrf.mxu0  ;;  %v1001_v14 = vpop.f32.mrf.mxu1 }
 0x18c   : > { %1038 = vst [vmem:[%s4901_s29 + $0xf8] sm:$0xff] %v873_v13  ;;  %1070 = vst [vmem:[%s4901_s29 + $0x1f8] sm:$0xff] %v1001_v14 }
 0x18d   : > { %v875_v15 = vpop.f32.mrf.mxu0  ;;  %v1003_v16 = vpop.f32.mrf.mxu1 }
 0x193   : > { %v1075_v17 = vld [vmem:[%s9617_s4] sm:$0xff]  ;;  %v1076_v18 = vld [vmem:[%s9617_s4 + $0x8] sm:$0xff]  ;;  %v1077_v19 = vld [vmem:[%s9617_s4 + $0x10] sm:$0xff] }
 0x194   : > { %v1331_v20 = vadd.f32 %v1076_v18, %v1075_v17  ;;  %v1078_v21 = vld [vmem:[%s9617_s4 + $0x18] sm:$0xff]  ;;  %v1079_v23 = vld [vmem:[%s9617_s4 + $0x20] sm:$0xff]  ;;  %v1080_v25 = vld [vmem:[%s9617_s4 + $0x28] sm:$0xff] }
 0x195   : > { %v1081_v27 = vld [vmem:[%s9617_s4 + $0x30] sm:$0xff]  ;;  %v1082_v29 = vld [vmem:[%s9617_s4 + $0x38] sm:$0xff]  ;;  %v1083_v31 = vld [vmem:[%s9617_s4 + $0x40] sm:$0xff] }
 0x196   : > { %v1332_v22 = vadd.f32 %v1331_v20, %v1077_v19  ;;  %v1084_v33 = vld [vmem:[%s9617_s4 + $0x48] sm:$0xff]  ;;  %v1085_v35 = vld [vmem:[%s9617_s4 + $0x50] sm:$0xff]  ;;  %v1086_v37 = vld [vmem:[%s9617_s4 + $0x58] sm:$0xff] }
 0x197   : > { %v1087_v39 = vld [vmem:[%s9617_s4 + $0x60] sm:$0xff]  ;;  %v1088_v41 = vld [vmem:[%s9617_s4 + $0x68] sm:$0xff]  ;;  %v1089_v43 = vld [vmem:[%s9617_s4 + $0x70] sm:$0xff] }
 0x198   : > { %v1333_v24 = vadd.f32 %v1332_v22, %v1078_v21  ;;  %v1090_v45 = vld [vmem:[%s9617_s4 + $0x78] sm:$0xff]  ;;  %v1091_v47 = vld [vmem:[%s9617_s4 + $0x80] sm:$0xff]  ;;  %v1092_v49 = vld [vmem:[%s9617_s4 + $0x88] sm:$0xff] }
 0x199   : > { %v1093_v51 = vld [vmem:[%s9617_s4 + $0x90] sm:$0xff]  ;;  %v1094_v53 = vld [vmem:[%s9617_s4 + $0x98] sm:$0xff]  ;;  %v1095_v55 = vld [vmem:[%s9617_s4 + $0xa0] sm:$0xff] }
 0x19a   : > { %v1334_v26 = vadd.f32 %v1333_v24, %v1079_v23  ;;  %v1096_v57 = vld [vmem:[%s9617_s4 + $0xa8] sm:$0xff]  ;;  %v1097_v59 = vld [vmem:[%s9617_s4 + $0xb0] sm:$0xff]  ;;  %v1098_v61 = vld [vmem:[%s9617_s4 + $0xb8] sm:$0xff] }
 0x19b   : > { %v1099_v63 = vld [vmem:[%s9617_s4 + $0xc0] sm:$0xff]  ;;  %v1100_v1 = vld [vmem:[%s9617_s4 + $0xc8] sm:$0xff]  ;;  %v1101_v3 = vld [vmem:[%s9617_s4 + $0xd0] sm:$0xff] }
 0x19c   : > { %v1335_v28 = vadd.f32 %v1334_v26, %v1080_v25  ;;  %v1102_v5 = vld [vmem:[%s9617_s4 + $0xd8] sm:$0xff]  ;;  %v1103_v7 = vld [vmem:[%s9617_s4 + $0xe0] sm:$0xff]  ;;  %v1104_v9 = vld [vmem:[%s9617_s4 + $0xe8] sm:$0xff] }
 0x19d   : > { %v1105_v11 = vld [vmem:[%s9617_s4 + $0xf0] sm:$0xff]  ;;  %v1106_v13 = vld [vmem:[%s9617_s4 + $0xf8] sm:$0xff]  ;;  %v1107_v15 = vld [vmem:[%s9617_s4 + $0x100] sm:$0xff] }
 0x19e   : > { %v1336_v30 = vadd.f32 %v1335_v28, %v1081_v27  ;;  %v1108_v17 = vld [vmem:[%s9617_s4 + $0x108] sm:$0xff]  ;;  %v1109_v19 = vld [vmem:[%s9617_s4 + $0x110] sm:$0xff]  ;;  %v1110_v21 = vld [vmem:[%s9617_s4 + $0x118] sm:$0xff] }
 0x19f   : > { %v1111_v23 = vld [vmem:[%s9617_s4 + $0x120] sm:$0xff]  ;;  %v1112_v25 = vld [vmem:[%s9617_s4 + $0x128] sm:$0xff]  ;;  %v1113_v27 = vld [vmem:[%s9617_s4 + $0x130] sm:$0xff] }
 0x1a0   : > { %v1337_v32 = vadd.f32 %v1336_v30, %v1082_v29  ;;  %v1114_v29 = vld [vmem:[%s9617_s4 + $0x138] sm:$0xff] }
 0x1a2   : > { %v1338_v34 = vadd.f32 %v1337_v32, %v1083_v31  ;;  %v1115_v31 = vld [vmem:[%s9617_s4 + $0x140] sm:$0xff] }
 0x1a4   : > { %v1339_v36 = vadd.f32 %v1338_v34, %v1084_v33  ;;  %v1116_v33 = vld [vmem:[%s9617_s4 + $0x148] sm:$0xff] }
 0x1a6   : > { %v1340_v38 = vadd.f32 %v1339_v36, %v1085_v35  ;;  %v1117_v35 = vld [vmem:[%s9617_s4 + $0x150] sm:$0xff] }
 0x1a8   : > { %v1341_v40 = vadd.f32 %v1340_v38, %v1086_v37  ;;  %v1118_v37 = vld [vmem:[%s9617_s4 + $0x158] sm:$0xff] }
 0x1aa   : > { %v1342_v42 = vadd.f32 %v1341_v40, %v1087_v39  ;;  %v1119_v39 = vld [vmem:[%s9617_s4 + $0x160] sm:$0xff] }
 0x1ac   : > { %v1343_v44 = vadd.f32 %v1342_v42, %v1088_v41  ;;  %v1120_v41 = vld [vmem:[%s9617_s4 + $0x168] sm:$0xff] }
 0x1ae   : > { %v1344_v46 = vadd.f32 %v1343_v44, %v1089_v43  ;;  %v1121_v43 = vld [vmem:[%s9617_s4 + $0x170] sm:$0xff] }
 0x1b0   : > { %v1345_v48 = vadd.f32 %v1344_v46, %v1090_v45  ;;  %v1122_v45 = vld [vmem:[%s9617_s4 + $0x178] sm:$0xff] }
 0x1b2   : > { %v1346_v50 = vadd.f32 %v1345_v48, %v1091_v47  ;;  %v1123_v47 = vld [vmem:[%s9617_s4 + $0x180] sm:$0xff] }
 0x1b4   : > { %v1347_v52 = vadd.f32 %v1346_v50, %v1092_v49  ;;  %v1124_v49 = vld [vmem:[%s9617_s4 + $0x188] sm:$0xff] }
 0x1b6   : > { %v1348_v54 = vadd.f32 %v1347_v52, %v1093_v51  ;;  %v1125_v51 = vld [vmem:[%s9617_s4 + $0x190] sm:$0xff] }
 0x1b8   : > { %v1349_v56 = vadd.f32 %v1348_v54, %v1094_v53  ;;  %v1126_v53 = vld [vmem:[%s9617_s4 + $0x198] sm:$0xff] }
 0x1ba   : > { %v1350_v58 = vadd.f32 %v1349_v56, %v1095_v55  ;;  %v1127_v55 = vld [vmem:[%s9617_s4 + $0x1a0] sm:$0xff] }
 0x1bc   : > { %v1351_v60 = vadd.f32 %v1350_v58, %v1096_v57  ;;  %v1128_v57 = vld [vmem:[%s9617_s4 + $0x1a8] sm:$0xff] }
 0x1be   : > { %v1352_v62 = vadd.f32 %v1351_v60, %v1097_v59  ;;  %v1129_v59 = vld [vmem:[%s9617_s4 + $0x1b0] sm:$0xff] }
 0x1c0   : > { %v1353_v0 = vadd.f32 %v1352_v62, %v1098_v61  ;;  %v1130_v61 = vld [vmem:[%s9617_s4 + $0x1b8] sm:$0xff] }
 0x1c2   : > { %v1354_v2 = vadd.f32 %v1353_v0, %v1099_v63  ;;  %v1131_v63 = vld [vmem:[%s9617_s4 + $0x1c0] sm:$0xff] }
 0x1c4   : > { %v1355_v4 = vadd.f32 %v1354_v2, %v1100_v1  ;;  %v1132_v1 = vld [vmem:[%s9617_s4 + $0x1c8] sm:$0xff] }
 0x1c6   : > { %v1356_v6 = vadd.f32 %v1355_v4, %v1101_v3  ;;  %v1133_v3 = vld [vmem:[%s9617_s4 + $0x1d0] sm:$0xff] }
 0x1c8   : > { %v1357_v8 = vadd.f32 %v1356_v6, %v1102_v5  ;;  %v1134_v5 = vld [vmem:[%s9617_s4 + $0x1d8] sm:$0xff] }
 0x1ca   : > { %v1358_v10 = vadd.f32 %v1357_v8, %v1103_v7  ;;  %v1135_v7 = vld [vmem:[%s9617_s4 + $0x1e0] sm:$0xff] }
 0x1cc   : > { %v1359_v12 = vadd.f32 %v1358_v10, %v1104_v9  ;;  %v1136_v9 = vld [vmem:[%s9617_s4 + $0x1e8] sm:$0xff] }
 0x1ce   : > { %v1360_v14 = vadd.f32 %v1359_v12, %v1105_v11  ;;  %v1137_v11 = vld [vmem:[%s9617_s4 + $0x1f0] sm:$0xff] }
 0x1d0   : > { %v1361_v16 = vadd.f32 %v1360_v14, %v1106_v13  ;;  %v1138_v13 = vld [vmem:[%s9617_s4 + $0x1f8] sm:$0xff] }
 0x1d2   : > { %v1362_v18 = vadd.f32 %v1361_v16, %v1107_v15  ;;  %v1139_v15 = vld [vmem:[%s9617_s4 + $0x200] sm:$0xff] }
 0x1d4   : > { %v1363_v20 = vadd.f32 %v1362_v18, %v1108_v17  ;;  %v1140_v17 = vld [vmem:[%s9617_s4 + $0x208] sm:$0xff] }
 0x1d6   : > { %v1364_v22 = vadd.f32 %v1363_v20, %v1109_v19  ;;  %v1141_v19 = vld [vmem:[%s9617_s4 + $0x210] sm:$0xff] }
 0x1d8   : > { %v1365_v24 = vadd.f32 %v1364_v22, %v1110_v21  ;;  %v1142_v21 = vld [vmem:[%s9617_s4 + $0x218] sm:$0xff] }
 0x1da   : > { %v1366_v26 = vadd.f32 %v1365_v24, %v1111_v23  ;;  %v1143_v23 = vld [vmem:[%s9617_s4 + $0x220] sm:$0xff] }
 0x1dc   : > { %v1367_v28 = vadd.f32 %v1366_v26, %v1112_v25  ;;  %v1144_v25 = vld [vmem:[%s9617_s4 + $0x228] sm:$0xff] }
 0x1de   : > { %v1368_v30 = vadd.f32 %v1367_v28, %v1113_v27  ;;  %v1145_v27 = vld [vmem:[%s9617_s4 + $0x230] sm:$0xff] }
 0x1e0   : > { %v1369_v32 = vadd.f32 %v1368_v30, %v1114_v29  ;;  %v1146_v29 = vld [vmem:[%s9617_s4 + $0x238] sm:$0xff] }
 0x1e2   : > { %v1370_v34 = vadd.f32 %v1369_v32, %v1115_v31  ;;  %v1147_v31 = vld [vmem:[%s9617_s4 + $0x240] sm:$0xff] }
 0x1e4   : > { %v1371_v36 = vadd.f32 %v1370_v34, %v1116_v33  ;;  %v1148_v33 = vld [vmem:[%s9617_s4 + $0x248] sm:$0xff] }
 0x1e6   : > { %v1372_v38 = vadd.f32 %v1371_v36, %v1117_v35  ;;  %v1149_v35 = vld [vmem:[%s9617_s4 + $0x250] sm:$0xff] }
 0x1e8   : > { %v1373_v40 = vadd.f32 %v1372_v38, %v1118_v37  ;;  %v1150_v37 = vld [vmem:[%s9617_s4 + $0x258] sm:$0xff] }
 0x1ea   : > { %v1374_v42 = vadd.f32 %v1373_v40, %v1119_v39  ;;  %v1151_v39 = vld [vmem:[%s9617_s4 + $0x260] sm:$0xff] }
 0x1ec   : > { %v1375_v44 = vadd.f32 %v1374_v42, %v1120_v41  ;;  %v1152_v41 = vld [vmem:[%s9617_s4 + $0x268] sm:$0xff] }
 0x1ee   : > { %v1376_v46 = vadd.f32 %v1375_v44, %v1121_v43  ;;  %v1153_v43 = vld [vmem:[%s9617_s4 + $0x270] sm:$0xff] }
 0x1f0   : > { %v1377_v48 = vadd.f32 %v1376_v46, %v1122_v45  ;;  %v1154_v45 = vld [vmem:[%s9617_s4 + $0x278] sm:$0xff] }
 0x1f2   : > { %v1378_v50 = vadd.f32 %v1377_v48, %v1123_v47  ;;  %v1155_v47 = vld [vmem:[%s9617_s4 + $0x280] sm:$0xff] }
 0x1f4   : > { %v1379_v52 = vadd.f32 %v1378_v50, %v1124_v49  ;;  %v1156_v49 = vld [vmem:[%s9617_s4 + $0x288] sm:$0xff] }
 0x1f6   : > { %v1380_v54 = vadd.f32 %v1379_v52, %v1125_v51  ;;  %v1157_v51 = vld [vmem:[%s9617_s4 + $0x290] sm:$0xff] }
 0x1f8   : > { %v1381_v56 = vadd.f32 %v1380_v54, %v1126_v53  ;;  %v1158_v53 = vld [vmem:[%s9617_s4 + $0x298] sm:$0xff] }
 0x1fa   : > { %v1382_v58 = vadd.f32 %v1381_v56, %v1127_v55  ;;  %v1159_v55 = vld [vmem:[%s9617_s4 + $0x2a0] sm:$0xff] }
 0x1fc   : > { %v1383_v60 = vadd.f32 %v1382_v58, %v1128_v57  ;;  %v1160_v57 = vld [vmem:[%s9617_s4 + $0x2a8] sm:$0xff] }
 0x1fe   : > { %v1384_v62 = vadd.f32 %v1383_v60, %v1129_v59  ;;  %v1161_v59 = vld [vmem:[%s9617_s4 + $0x2b0] sm:$0xff] }
 0x200   : > { %v1385_v0 = vadd.f32 %v1384_v62, %v1130_v61  ;;  %v1162_v61 = vld [vmem:[%s9617_s4 + $0x2b8] sm:$0xff] }
 0x202   : > { %v1386_v2 = vadd.f32 %v1385_v0, %v1131_v63  ;;  %v1163_v63 = vld [vmem:[%s9617_s4 + $0x2c0] sm:$0xff] }
 0x204   : > { %v1387_v4 = vadd.f32 %v1386_v2, %v1132_v1  ;;  %v1164_v1 = vld [vmem:[%s9617_s4 + $0x2c8] sm:$0xff] }
 0x206   : > { %v1388_v6 = vadd.f32 %v1387_v4, %v1133_v3  ;;  %v1165_v3 = vld [vmem:[%s9617_s4 + $0x2d0] sm:$0xff] }
 0x208   : > { %v1389_v8 = vadd.f32 %v1388_v6, %v1134_v5  ;;  %v1166_v5 = vld [vmem:[%s9617_s4 + $0x2d8] sm:$0xff] }
 0x20a   : > { %v1390_v10 = vadd.f32 %v1389_v8, %v1135_v7  ;;  %v1167_v7 = vld [vmem:[%s9617_s4 + $0x2e0] sm:$0xff] }
 0x20c   : > { %v1391_v12 = vadd.f32 %v1390_v10, %v1136_v9  ;;  %v1168_v9 = vld [vmem:[%s9617_s4 + $0x2e8] sm:$0xff] }
 0x20e   : > { %v1392_v14 = vadd.f32 %v1391_v12, %v1137_v11  ;;  %v1169_v11 = vld [vmem:[%s9617_s4 + $0x2f0] sm:$0xff] }
 0x210   : > { %v1393_v16 = vadd.f32 %v1392_v14, %v1138_v13  ;;  %v1170_v13 = vld [vmem:[%s9617_s4 + $0x2f8] sm:$0xff] }
 0x212   : > { %v1394_v18 = vadd.f32 %v1393_v16, %v1139_v15  ;;  %v1171_v15 = vld [vmem:[%s9617_s4 + $0x300] sm:$0xff] }
 0x214   : > { %v1395_v20 = vadd.f32 %v1394_v18, %v1140_v17  ;;  %v1172_v17 = vld [vmem:[%s9617_s4 + $0x308] sm:$0xff] }
 0x216   : > { %v1396_v22 = vadd.f32 %v1395_v20, %v1141_v19  ;;  %v1173_v19 = vld [vmem:[%s9617_s4 + $0x310] sm:$0xff] }
 0x218   : > { %v1397_v24 = vadd.f32 %v1396_v22, %v1142_v21  ;;  %v1174_v21 = vld [vmem:[%s9617_s4 + $0x318] sm:$0xff] }
 0x21a   : > { %v1398_v26 = vadd.f32 %v1397_v24, %v1143_v23  ;;  %v1175_v23 = vld [vmem:[%s9617_s4 + $0x320] sm:$0xff] }
 0x21c   : > { %v1399_v28 = vadd.f32 %v1398_v26, %v1144_v25  ;;  %v1176_v25 = vld [vmem:[%s9617_s4 + $0x328] sm:$0xff] }
 0x21e   : > { %v1400_v30 = vadd.f32 %v1399_v28, %v1145_v27  ;;  %v1177_v27 = vld [vmem:[%s9617_s4 + $0x330] sm:$0xff] }
 0x220   : > { %v1401_v32 = vadd.f32 %v1400_v30, %v1146_v29  ;;  %v1178_v29 = vld [vmem:[%s9617_s4 + $0x338] sm:$0xff] }
 0x222   : > { %v1402_v34 = vadd.f32 %v1401_v32, %v1147_v31  ;;  %v1179_v31 = vld [vmem:[%s9617_s4 + $0x340] sm:$0xff] }
 0x224   : > { %v1403_v36 = vadd.f32 %v1402_v34, %v1148_v33  ;;  %v1180_v33 = vld [vmem:[%s9617_s4 + $0x348] sm:$0xff] }
 0x226   : > { %v1404_v38 = vadd.f32 %v1403_v36, %v1149_v35  ;;  %v1181_v35 = vld [vmem:[%s9617_s4 + $0x350] sm:$0xff] }
 0x228   : > { %v1405_v40 = vadd.f32 %v1404_v38, %v1150_v37  ;;  %v1182_v37 = vld [vmem:[%s9617_s4 + $0x358] sm:$0xff] }
 0x22a   : > { %v1406_v42 = vadd.f32 %v1405_v40, %v1151_v39  ;;  %v1183_v39 = vld [vmem:[%s9617_s4 + $0x360] sm:$0xff] }
 0x22c   : > { %v1407_v44 = vadd.f32 %v1406_v42, %v1152_v41  ;;  %v1184_v41 = vld [vmem:[%s9617_s4 + $0x368] sm:$0xff] }
 0x22e   : > { %v1408_v46 = vadd.f32 %v1407_v44, %v1153_v43  ;;  %v1185_v43 = vld [vmem:[%s9617_s4 + $0x370] sm:$0xff] }
 0x230   : > { %v1409_v48 = vadd.f32 %v1408_v46, %v1154_v45  ;;  %v1186_v45 = vld [vmem:[%s9617_s4 + $0x378] sm:$0xff] }
 0x232   : > { %v1410_v50 = vadd.f32 %v1409_v48, %v1155_v47  ;;  %v1187_v47 = vld [vmem:[%s9617_s4 + $0x380] sm:$0xff] }
 0x234   : > { %v1411_v52 = vadd.f32 %v1410_v50, %v1156_v49  ;;  %v1188_v49 = vld [vmem:[%s9617_s4 + $0x388] sm:$0xff] }
 0x236   : > { %v1412_v54 = vadd.f32 %v1411_v52, %v1157_v51  ;;  %v1189_v51 = vld [vmem:[%s9617_s4 + $0x390] sm:$0xff] }
 0x238   : > { %v1413_v56 = vadd.f32 %v1412_v54, %v1158_v53  ;;  %v1190_v53 = vld [vmem:[%s9617_s4 + $0x398] sm:$0xff] }
 0x23a   : > { %v1414_v58 = vadd.f32 %v1413_v56, %v1159_v55  ;;  %v1191_v55 = vld [vmem:[%s9617_s4 + $0x3a0] sm:$0xff] }
 0x23c   : > { %v1415_v60 = vadd.f32 %v1414_v58, %v1160_v57  ;;  %v1192_v57 = vld [vmem:[%s9617_s4 + $0x3a8] sm:$0xff] }
 0x23e   : > { %v1416_v62 = vadd.f32 %v1415_v60, %v1161_v59  ;;  %v1193_v59 = vld [vmem:[%s9617_s4 + $0x3b0] sm:$0xff] }
 0x240   : > { %v1417_v0 = vadd.f32 %v1416_v62, %v1162_v61  ;;  %v1194_v61 = vld [vmem:[%s9617_s4 + $0x3b8] sm:$0xff] }
 0x242   : > { %v1418_v2 = vadd.f32 %v1417_v0, %v1163_v63  ;;  %v1195_v63 = vld [vmem:[%s9617_s4 + $0x3c0] sm:$0xff] }
 0x244   : > { %v1419_v4 = vadd.f32 %v1418_v2, %v1164_v1  ;;  %v1196_v1 = vld [vmem:[%s9617_s4 + $0x3c8] sm:$0xff] }
 0x246   : > { %v1420_v6 = vadd.f32 %v1419_v4, %v1165_v3  ;;  %v1197_v3 = vld [vmem:[%s9617_s4 + $0x3d0] sm:$0xff] }
 0x248   : > { %v1421_v8 = vadd.f32 %v1420_v6, %v1166_v5  ;;  %v1198_v5 = vld [vmem:[%s9617_s4 + $0x3d8] sm:$0xff] }
 0x24a   : > { %v1422_v10 = vadd.f32 %v1421_v8, %v1167_v7  ;;  %v1199_v7 = vld [vmem:[%s9617_s4 + $0x3e0] sm:$0xff] }
 0x24c   : > { %v1423_v12 = vadd.f32 %v1422_v10, %v1168_v9  ;;  %v1200_v9 = vld [vmem:[%s9617_s4 + $0x3e8] sm:$0xff] }
 0x24e   : > { %v1424_v14 = vadd.f32 %v1423_v12, %v1169_v11  ;;  %v1201_v11 = vld [vmem:[%s9617_s4 + $0x3f0] sm:$0xff] }
 0x250   : > { %v1425_v16 = vadd.f32 %v1424_v14, %v1170_v13  ;;  %v1202_v13 = vld [vmem:[%s9617_s4 + $0x3f8] sm:$0xff] }
 0x252   : > { %v1426_v18 = vadd.f32 %v1425_v16, %v1171_v15  ;;  %v1203_v15 = vld [vmem:[%s9617_s4 + $0x400] sm:$0xff] }
 0x254   : > { %v1427_v20 = vadd.f32 %v1426_v18, %v1172_v17  ;;  %v1204_v17 = vld [vmem:[%s9617_s4 + $0x408] sm:$0xff] }
 0x256   : > { %v1428_v22 = vadd.f32 %v1427_v20, %v1173_v19  ;;  %v1205_v19 = vld [vmem:[%s9617_s4 + $0x410] sm:$0xff] }
 0x258   : > { %v1429_v24 = vadd.f32 %v1428_v22, %v1174_v21  ;;  %v1206_v21 = vld [vmem:[%s9617_s4 + $0x418] sm:$0xff] }
 0x25a   : > { %v1430_v26 = vadd.f32 %v1429_v24, %v1175_v23  ;;  %v1207_v23 = vld [vmem:[%s9617_s4 + $0x420] sm:$0xff] }
 0x25c   : > { %v1431_v28 = vadd.f32 %v1430_v26, %v1176_v25  ;;  %v1208_v25 = vld [vmem:[%s9617_s4 + $0x428] sm:$0xff] }
 0x25e   : > { %v1432_v30 = vadd.f32 %v1431_v28, %v1177_v27  ;;  %v1209_v27 = vld [vmem:[%s9617_s4 + $0x430] sm:$0xff] }
 0x260   : > { %v1433_v32 = vadd.f32 %v1432_v30, %v1178_v29  ;;  %v1210_v29 = vld [vmem:[%s9617_s4 + $0x438] sm:$0xff] }
 0x262   : > { %v1434_v34 = vadd.f32 %v1433_v32, %v1179_v31  ;;  %v1211_v31 = vld [vmem:[%s9617_s4 + $0x440] sm:$0xff] }
 0x264   : > { %v1435_v36 = vadd.f32 %v1434_v34, %v1180_v33  ;;  %v1212_v33 = vld [vmem:[%s9617_s4 + $0x448] sm:$0xff] }
 0x266   : > { %v1436_v38 = vadd.f32 %v1435_v36, %v1181_v35  ;;  %v1213_v35 = vld [vmem:[%s9617_s4 + $0x450] sm:$0xff] }
 0x268   : > { %v1437_v40 = vadd.f32 %v1436_v38, %v1182_v37  ;;  %v1214_v37 = vld [vmem:[%s9617_s4 + $0x458] sm:$0xff] }
 0x26a   : > { %v1438_v42 = vadd.f32 %v1437_v40, %v1183_v39  ;;  %v1215_v39 = vld [vmem:[%s9617_s4 + $0x460] sm:$0xff] }
 0x26c   : > { %v1439_v44 = vadd.f32 %v1438_v42, %v1184_v41  ;;  %v1216_v41 = vld [vmem:[%s9617_s4 + $0x468] sm:$0xff] }
 0x26e   : > { %v1440_v46 = vadd.f32 %v1439_v44, %v1185_v43  ;;  %v1217_v43 = vld [vmem:[%s9617_s4 + $0x470] sm:$0xff] }
 0x270   : > { %v1441_v48 = vadd.f32 %v1440_v46, %v1186_v45  ;;  %v1218_v45 = vld [vmem:[%s9617_s4 + $0x478] sm:$0xff] }
 0x272   : > { %v1442_v50 = vadd.f32 %v1441_v48, %v1187_v47  ;;  %v1219_v47 = vld [vmem:[%s9617_s4 + $0x480] sm:$0xff] }
 0x274   : > { %v1443_v52 = vadd.f32 %v1442_v50, %v1188_v49  ;;  %v1220_v49 = vld [vmem:[%s9617_s4 + $0x488] sm:$0xff] }
 0x276   : > { %v1444_v54 = vadd.f32 %v1443_v52, %v1189_v51  ;;  %v1221_v51 = vld [vmem:[%s9617_s4 + $0x490] sm:$0xff] }
 0x278   : > { %v1445_v56 = vadd.f32 %v1444_v54, %v1190_v53  ;;  %v1222_v53 = vld [vmem:[%s9617_s4 + $0x498] sm:$0xff] }
 0x27a   : > { %v1446_v58 = vadd.f32 %v1445_v56, %v1191_v55  ;;  %v1223_v55 = vld [vmem:[%s9617_s4 + $0x4a0] sm:$0xff] }
 0x27c   : > { %v1447_v60 = vadd.f32 %v1446_v58, %v1192_v57  ;;  %v1224_v57 = vld [vmem:[%s9617_s4 + $0x4a8] sm:$0xff] }
 0x27e   : > { %v1448_v62 = vadd.f32 %v1447_v60, %v1193_v59  ;;  %v1225_v59 = vld [vmem:[%s9617_s4 + $0x4b0] sm:$0xff] }
 0x280   : > { %v1449_v0 = vadd.f32 %v1448_v62, %v1194_v61  ;;  %v1226_v61 = vld [vmem:[%s9617_s4 + $0x4b8] sm:$0xff] }
 0x282   : > { %v1450_v2 = vadd.f32 %v1449_v0, %v1195_v63  ;;  %v1227_v63 = vld [vmem:[%s9617_s4 + $0x4c0] sm:$0xff] }
 0x284   : > { %v1451_v4 = vadd.f32 %v1450_v2, %v1196_v1  ;;  %v1228_v1 = vld [vmem:[%s9617_s4 + $0x4c8] sm:$0xff] }
 0x286   : > { %v1452_v6 = vadd.f32 %v1451_v4, %v1197_v3  ;;  %v1229_v3 = vld [vmem:[%s9617_s4 + $0x4d0] sm:$0xff] }
 0x288   : > { %v1453_v8 = vadd.f32 %v1452_v6, %v1198_v5  ;;  %v1230_v5 = vld [vmem:[%s9617_s4 + $0x4d8] sm:$0xff] }
 0x28a   : > { %v1454_v10 = vadd.f32 %v1453_v8, %v1199_v7  ;;  %v1231_v7 = vld [vmem:[%s9617_s4 + $0x4e0] sm:$0xff] }
 0x28c   : > { %v1455_v12 = vadd.f32 %v1454_v10, %v1200_v9  ;;  %v1232_v9 = vld [vmem:[%s9617_s4 + $0x4e8] sm:$0xff] }
 0x28e   : > { %v1456_v14 = vadd.f32 %v1455_v12, %v1201_v11  ;;  %v1233_v11 = vld [vmem:[%s9617_s4 + $0x4f0] sm:$0xff] }
 0x290   : > { %v1457_v16 = vadd.f32 %v1456_v14, %v1202_v13  ;;  %v1234_v13 = vld [vmem:[%s9617_s4 + $0x4f8] sm:$0xff] }
 0x292   : > { %v1458_v18 = vadd.f32 %v1457_v16, %v1203_v15  ;;  %v1235_v15 = vld [vmem:[%s9617_s4 + $0x500] sm:$0xff] }
 0x294   : > { %v1459_v20 = vadd.f32 %v1458_v18, %v1204_v17  ;;  %v1236_v17 = vld [vmem:[%s9617_s4 + $0x508] sm:$0xff] }
 0x296   : > { %v1460_v22 = vadd.f32 %v1459_v20, %v1205_v19  ;;  %v1237_v19 = vld [vmem:[%s9617_s4 + $0x510] sm:$0xff] }
 0x298   : > { %v1461_v24 = vadd.f32 %v1460_v22, %v1206_v21  ;;  %v1238_v21 = vld [vmem:[%s9617_s4 + $0x518] sm:$0xff] }
 0x29a   : > { %v1462_v26 = vadd.f32 %v1461_v24, %v1207_v23  ;;  %v1239_v23 = vld [vmem:[%s9617_s4 + $0x520] sm:$0xff] }
 0x29c   : > { %v1463_v28 = vadd.f32 %v1462_v26, %v1208_v25  ;;  %v1240_v25 = vld [vmem:[%s9617_s4 + $0x528] sm:$0xff] }
 0x29e   : > { %v1464_v30 = vadd.f32 %v1463_v28, %v1209_v27  ;;  %v1241_v27 = vld [vmem:[%s9617_s4 + $0x530] sm:$0xff] }
 0x2a0   : > { %v1465_v32 = vadd.f32 %v1464_v30, %v1210_v29  ;;  %v1242_v29 = vld [vmem:[%s9617_s4 + $0x538] sm:$0xff] }
 0x2a2   : > { %v1466_v34 = vadd.f32 %v1465_v32, %v1211_v31  ;;  %v1243_v31 = vld [vmem:[%s9617_s4 + $0x540] sm:$0xff] }
 0x2a4   : > { %v1467_v36 = vadd.f32 %v1466_v34, %v1212_v33  ;;  %v1244_v33 = vld [vmem:[%s9617_s4 + $0x548] sm:$0xff] }
 0x2a6   : > { %v1468_v38 = vadd.f32 %v1467_v36, %v1213_v35  ;;  %v1245_v35 = vld [vmem:[%s9617_s4 + $0x550] sm:$0xff] }
 0x2a8   : > { %v1469_v40 = vadd.f32 %v1468_v38, %v1214_v37  ;;  %v1246_v37 = vld [vmem:[%s9617_s4 + $0x558] sm:$0xff] }
 0x2aa   : > { %v1470_v42 = vadd.f32 %v1469_v40, %v1215_v39  ;;  %v1247_v39 = vld [vmem:[%s9617_s4 + $0x560] sm:$0xff] }
 0x2ac   : > { %v1471_v44 = vadd.f32 %v1470_v42, %v1216_v41  ;;  %v1248_v41 = vld [vmem:[%s9617_s4 + $0x568] sm:$0xff] }
 0x2ae   : > { %v1472_v46 = vadd.f32 %v1471_v44, %v1217_v43  ;;  %v1249_v43 = vld [vmem:[%s9617_s4 + $0x570] sm:$0xff] }
 0x2b0   : > { %v1473_v48 = vadd.f32 %v1472_v46, %v1218_v45  ;;  %v1250_v45 = vld [vmem:[%s9617_s4 + $0x578] sm:$0xff] }
 0x2b2   : > { %v1474_v50 = vadd.f32 %v1473_v48, %v1219_v47  ;;  %v1251_v47 = vld [vmem:[%s9617_s4 + $0x580] sm:$0xff] }
 0x2b4   : > { %v1475_v52 = vadd.f32 %v1474_v50, %v1220_v49  ;;  %v1252_v49 = vld [vmem:[%s9617_s4 + $0x588] sm:$0xff] }
 0x2b6   : > { %v1476_v54 = vadd.f32 %v1475_v52, %v1221_v51  ;;  %v1253_v51 = vld [vmem:[%s9617_s4 + $0x590] sm:$0xff] }
 0x2b8   : > { %v1477_v56 = vadd.f32 %v1476_v54, %v1222_v53  ;;  %v1254_v53 = vld [vmem:[%s9617_s4 + $0x598] sm:$0xff] }
 0x2ba   : > { %v1478_v58 = vadd.f32 %v1477_v56, %v1223_v55  ;;  %v1255_v55 = vld [vmem:[%s9617_s4 + $0x5a0] sm:$0xff] }
 0x2bc   : > { %v1479_v60 = vadd.f32 %v1478_v58, %v1224_v57  ;;  %v1256_v57 = vld [vmem:[%s9617_s4 + $0x5a8] sm:$0xff] }
 0x2be   : > { %v1480_v62 = vadd.f32 %v1479_v60, %v1225_v59  ;;  %v1257_v59 = vld [vmem:[%s9617_s4 + $0x5b0] sm:$0xff] }
 0x2c0   : > { %v1481_v0 = vadd.f32 %v1480_v62, %v1226_v61  ;;  %v1258_v61 = vld [vmem:[%s9617_s4 + $0x5b8] sm:$0xff] }
 0x2c2   : > { %v1482_v2 = vadd.f32 %v1481_v0, %v1227_v63  ;;  %v1259_v63 = vld [vmem:[%s9617_s4 + $0x5c0] sm:$0xff] }
 0x2c4   : > { %v1483_v4 = vadd.f32 %v1482_v2, %v1228_v1  ;;  %v1260_v1 = vld [vmem:[%s9617_s4 + $0x5c8] sm:$0xff] }
 0x2c6   : > { %v1484_v6 = vadd.f32 %v1483_v4, %v1229_v3  ;;  %v1261_v3 = vld [vmem:[%s9617_s4 + $0x5d0] sm:$0xff] }
 0x2c8   : > { %v1485_v8 = vadd.f32 %v1484_v6, %v1230_v5  ;;  %v1262_v5 = vld [vmem:[%s9617_s4 + $0x5d8] sm:$0xff] }
 0x2ca   : > { %v1486_v10 = vadd.f32 %v1485_v8, %v1231_v7  ;;  %v1263_v7 = vld [vmem:[%s9617_s4 + $0x5e0] sm:$0xff] }
 0x2cc   : > { %v1487_v12 = vadd.f32 %v1486_v10, %v1232_v9  ;;  %v1264_v9 = vld [vmem:[%s9617_s4 + $0x5e8] sm:$0xff] }
 0x2ce   : > { %v1488_v14 = vadd.f32 %v1487_v12, %v1233_v11  ;;  %v1265_v11 = vld [vmem:[%s9617_s4 + $0x5f0] sm:$0xff] }
 0x2d0   : > { %v1489_v16 = vadd.f32 %v1488_v14, %v1234_v13  ;;  %v1266_v13 = vld [vmem:[%s9617_s4 + $0x5f8] sm:$0xff] }
 0x2d2   : > { %v1490_v18 = vadd.f32 %v1489_v16, %v1235_v15  ;;  %v1267_v15 = vld [vmem:[%s9617_s4 + $0x600] sm:$0xff] }
 0x2d4   : > { %v1491_v20 = vadd.f32 %v1490_v18, %v1236_v17  ;;  %v1268_v17 = vld [vmem:[%s9617_s4 + $0x608] sm:$0xff] }
 0x2d6   : > { %v1492_v22 = vadd.f32 %v1491_v20, %v1237_v19  ;;  %v1269_v19 = vld [vmem:[%s9617_s4 + $0x610] sm:$0xff] }
 0x2d8   : > { %v1493_v24 = vadd.f32 %v1492_v22, %v1238_v21  ;;  %v1270_v21 = vld [vmem:[%s9617_s4 + $0x618] sm:$0xff] }
 0x2da   : > { %v1494_v26 = vadd.f32 %v1493_v24, %v1239_v23  ;;  %v1271_v23 = vld [vmem:[%s9617_s4 + $0x620] sm:$0xff] }
 0x2dc   : > { %v1495_v28 = vadd.f32 %v1494_v26, %v1240_v25  ;;  %v1272_v25 = vld [vmem:[%s9617_s4 + $0x628] sm:$0xff] }
 0x2de   : > { %v1496_v30 = vadd.f32 %v1495_v28, %v1241_v27  ;;  %v1273_v27 = vld [vmem:[%s9617_s4 + $0x630] sm:$0xff] }
 0x2e0   : > { %v1497_v32 = vadd.f32 %v1496_v30, %v1242_v29  ;;  %v1274_v29 = vld [vmem:[%s9617_s4 + $0x638] sm:$0xff] }
 0x2e2   : > { %v1498_v34 = vadd.f32 %v1497_v32, %v1243_v31  ;;  %v1275_v31 = vld [vmem:[%s9617_s4 + $0x640] sm:$0xff] }
 0x2e4   : > { %v1499_v36 = vadd.f32 %v1498_v34, %v1244_v33  ;;  %v1276_v33 = vld [vmem:[%s9617_s4 + $0x648] sm:$0xff] }
 0x2e6   : > { %v1500_v38 = vadd.f32 %v1499_v36, %v1245_v35  ;;  %v1277_v35 = vld [vmem:[%s9617_s4 + $0x650] sm:$0xff] }
 0x2e8   : > { %v1501_v40 = vadd.f32 %v1500_v38, %v1246_v37  ;;  %v1278_v37 = vld [vmem:[%s9617_s4 + $0x658] sm:$0xff] }
 0x2ea   : > { %v1502_v42 = vadd.f32 %v1501_v40, %v1247_v39  ;;  %v1279_v40 = vld [vmem:[%s9617_s4 + $0x660] sm:$0xff] }
 0x2ec   : > { %v1503_v44 = vadd.f32 %v1502_v42, %v1248_v41  ;;  %v1280_v42 = vld [vmem:[%s9617_s4 + $0x668] sm:$0xff] }
 0x2ee   : > { %v1504_v46 = vadd.f32 %v1503_v44, %v1249_v43  ;;  %v1281_v44 = vld [vmem:[%s9617_s4 + $0x670] sm:$0xff] }
 0x2f0   : > { %v1505_v48 = vadd.f32 %v1504_v46, %v1250_v45  ;;  %v1282_v46 = vld [vmem:[%s9617_s4 + $0x678] sm:$0xff] }
 0x2f2   : > { %v1506_v50 = vadd.f32 %v1505_v48, %v1251_v47  ;;  %v1283_v48 = vld [vmem:[%s9617_s4 + $0x680] sm:$0xff] }
 0x2f4   : > { %v1507_v52 = vadd.f32 %v1506_v50, %v1252_v49  ;;  %v1284_v50 = vld [vmem:[%s9617_s4 + $0x688] sm:$0xff] }
 0x2f6   : > { %v1508_v54 = vadd.f32 %v1507_v52, %v1253_v51  ;;  %v1285_v52 = vld [vmem:[%s9617_s4 + $0x690] sm:$0xff] }
 0x2f8   : > { %v1509_v56 = vadd.f32 %v1508_v54, %v1254_v53  ;;  %v1286_v54 = vld [vmem:[%s9617_s4 + $0x698] sm:$0xff] }
 0x2fa   : > { %v1510_v58 = vadd.f32 %v1509_v56, %v1255_v55  ;;  %v1287_v56 = vld [vmem:[%s9617_s4 + $0x6a0] sm:$0xff] }
 0x2fc   : > { %v1511_v60 = vadd.f32 %v1510_v58, %v1256_v57  ;;  %v1288_v58 = vld [vmem:[%s9617_s4 + $0x6a8] sm:$0xff] }
 0x2fe   : > { %v1512_v62 = vadd.f32 %v1511_v60, %v1257_v59  ;;  %v1289_v60 = vld [vmem:[%s9617_s4 + $0x6b0] sm:$0xff] }
 0x300   : > { %v1513_v0 = vadd.f32 %v1512_v62, %v1258_v61  ;;  %v1290_v62 = vld [vmem:[%s9617_s4 + $0x6b8] sm:$0xff] }
 0x302   : > { %v1514_v2 = vadd.f32 %v1513_v0, %v1259_v63  ;;  %v1291_v0 = vld [vmem:[%s9617_s4 + $0x6c0] sm:$0xff] }
 0x304   : > { %v1515_v4 = vadd.f32 %v1514_v2, %v1260_v1  ;;  %v1292_v2 = vld [vmem:[%s9617_s4 + $0x6c8] sm:$0xff] }
 0x306   : > { %v1516_v6 = vadd.f32 %v1515_v4, %v1261_v3  ;;  %v1293_v4 = vld [vmem:[%s9617_s4 + $0x6d0] sm:$0xff] }
 0x308   : > { %v1517_v8 = vadd.f32 %v1516_v6, %v1262_v5  ;;  %v1294_v6 = vld [vmem:[%s9617_s4 + $0x6d8] sm:$0xff] }
 0x30a   : > { %v1518_v10 = vadd.f32 %v1517_v8, %v1263_v7  ;;  %v1295_v8 = vld [vmem:[%s9617_s4 + $0x6e0] sm:$0xff] }
 0x30c   : > { %v1519_v12 = vadd.f32 %v1518_v10, %v1264_v9  ;;  %v1296_v10 = vld [vmem:[%s9617_s4 + $0x6e8] sm:$0xff] }
 0x30e   : > { %v1520_v14 = vadd.f32 %v1519_v12, %v1265_v11  ;;  %v1297_v12 = vld [vmem:[%s9617_s4 + $0x6f0] sm:$0xff] }
 0x310   : > { %v1521_v16 = vadd.f32 %v1520_v14, %v1266_v13  ;;  %v1298_v14 = vld [vmem:[%s9617_s4 + $0x6f8] sm:$0xff] }
 0x312   : > { %v1522_v18 = vadd.f32 %v1521_v16, %v1267_v15  ;;  %v1299_v16 = vld [vmem:[%s9617_s4 + $0x700] sm:$0xff] }
 0x314   : > { %v1523_v20 = vadd.f32 %v1522_v18, %v1268_v17  ;;  %v1300_v18 = vld [vmem:[%s9617_s4 + $0x708] sm:$0xff] }
 0x316   : > { %v1524_v22 = vadd.f32 %v1523_v20, %v1269_v19  ;;  %v1301_v20 = vld [vmem:[%s9617_s4 + $0x710] sm:$0xff] }
 0x318   : > { %v1525_v24 = vadd.f32 %v1524_v22, %v1270_v21  ;;  %v1302_v22 = vld [vmem:[%s9617_s4 + $0x718] sm:$0xff] }
 0x31a   : > { %v1526_v26 = vadd.f32 %v1525_v24, %v1271_v23  ;;  %v1303_v24 = vld [vmem:[%s9617_s4 + $0x720] sm:$0xff] }
 0x31c   : > { %v1527_v28 = vadd.f32 %v1526_v26, %v1272_v25  ;;  %v1304_v26 = vld [vmem:[%s9617_s4 + $0x728] sm:$0xff] }
 0x31e   : > { %v1528_v30 = vadd.f32 %v1527_v28, %v1273_v27  ;;  %v1305_v28 = vld [vmem:[%s9617_s4 + $0x730] sm:$0xff] }
 0x320   : > { %v1529_v32 = vadd.f32 %v1528_v30, %v1274_v29  ;;  %v1306_v30 = vld [vmem:[%s9617_s4 + $0x738] sm:$0xff] }
 0x322   : > { %v1530_v34 = vadd.f32 %v1529_v32, %v1275_v31  ;;  %v1307_v32 = vld [vmem:[%s9617_s4 + $0x740] sm:$0xff] }
 0x324   : > { %v1531_v36 = vadd.f32 %v1530_v34, %v1276_v33  ;;  %v1308_v34 = vld [vmem:[%s9617_s4 + $0x748] sm:$0xff] }
 0x326   : > { %v1532_v38 = vadd.f32 %v1531_v36, %v1277_v35  ;;  %v1309_v36 = vld [vmem:[%s9617_s4 + $0x750] sm:$0xff] }
 0x328   : > { %v1533_v39 = vadd.f32 %v1532_v38, %v1278_v37  ;;  %v1310_v38 = vld [vmem:[%s9617_s4 + $0x758] sm:$0xff] }
 0x32a   : > { %v1534_v41 = vadd.f32 %v1533_v39, %v1279_v40  ;;  %v1311_v40 = vld [vmem:[%s9617_s4 + $0x760] sm:$0xff] }
 0x32c   : > { %v1535_v43 = vadd.f32 %v1534_v41, %v1280_v42  ;;  %v1312_v42 = vld [vmem:[%s9617_s4 + $0x768] sm:$0xff] }
 0x32e   : > { %v1536_v45 = vadd.f32 %v1535_v43, %v1281_v44  ;;  %v1313_v44 = vld [vmem:[%s9617_s4 + $0x770] sm:$0xff] }
 0x330   : > { %v1537_v47 = vadd.f32 %v1536_v45, %v1282_v46  ;;  %v1314_v46 = vld [vmem:[%s9617_s4 + $0x778] sm:$0xff] }
 0x332   : > { %v1538_v49 = vadd.f32 %v1537_v47, %v1283_v48  ;;  %v1315_v48 = vld [vmem:[%s9617_s4 + $0x780] sm:$0xff] }
 0x334   : > { %v1539_v51 = vadd.f32 %v1538_v49, %v1284_v50  ;;  %v1316_v50 = vld [vmem:[%s9617_s4 + $0x788] sm:$0xff] }
 0x336   : > { %v1540_v53 = vadd.f32 %v1539_v51, %v1285_v52  ;;  %v1317_v52 = vld [vmem:[%s9617_s4 + $0x790] sm:$0xff] }
 0x338   : > { %v1541_v55 = vadd.f32 %v1540_v53, %v1286_v54  ;;  %v1318_v54 = vld [vmem:[%s9617_s4 + $0x798] sm:$0xff] }
 0x33a   : > { %v1542_v57 = vadd.f32 %v1541_v55, %v1287_v56  ;;  %v1319_v56 = vld [vmem:[%s9617_s4 + $0x7a0] sm:$0xff] }
 0x33c   : > { %v1543_v59 = vadd.f32 %v1542_v57, %v1288_v58  ;;  %v1320_v58 = vld [vmem:[%s9617_s4 + $0x7a8] sm:$0xff] }
 0x33e   : > { %v1544_v61 = vadd.f32 %v1543_v59, %v1289_v60  ;;  %v1321_v60 = vld [vmem:[%s9617_s4 + $0x7b0] sm:$0xff] }
 0x340   : > { %v1545_v63 = vadd.f32 %v1544_v61, %v1290_v62  ;;  %v1322_v62 = vld [vmem:[%s9617_s4 + $0x7b8] sm:$0xff] }
 0x342   : > { %v1546_v1 = vadd.f32 %v1545_v63, %v1291_v0  ;;  %v1323_v0 = vld [vmem:[%s9617_s4 + $0x7c0] sm:$0xff] }
 0x344   : > { %v1547_v3 = vadd.f32 %v1546_v1, %v1292_v2  ;;  %v1324_v2 = vld [vmem:[%s9617_s4 + $0x7c8] sm:$0xff] }
 0x346   : > { %v1548_v5 = vadd.f32 %v1547_v3, %v1293_v4  ;;  %v1325_v4 = vld [vmem:[%s9617_s4 + $0x7d0] sm:$0xff] }
 0x348   : > { %v1549_v7 = vadd.f32 %v1548_v5, %v1294_v6  ;;  %v1326_v6 = vld [vmem:[%s9617_s4 + $0x7d8] sm:$0xff] }
 0x34a   : > { %v1550_v9 = vadd.f32 %v1549_v7, %v1295_v8  ;;  %v1327_v8 = vld [vmem:[%s9617_s4 + $0x7e0] sm:$0xff] }
 0x34c   : > { %v1551_v11 = vadd.f32 %v1550_v9, %v1296_v10  ;;  %v1328_v10 = vld [vmem:[%s9617_s4 + $0x7e8] sm:$0xff] }
 0x34e   : > { %v1552_v13 = vadd.f32 %v1551_v11, %v1297_v12  ;;  %v1329_v12 = vld [vmem:[%s9617_s4 + $0x7f0] sm:$0xff] }
 0x350   : > { %v1553_v15 = vadd.f32 %v1552_v13, %v1298_v14  ;;  %v1330_v14 = vld [vmem:[%s9617_s4 + $0x7f8] sm:$0xff] }
 0x352   : > { %v1554_v17 = vadd.f32 %v1553_v15, %v1299_v16 }
 0x354   : > { %v1555_v19 = vadd.f32 %v1554_v17, %v1300_v18 }
 0x356   : > { %v1556_v21 = vadd.f32 %v1555_v19, %v1301_v20 }
 0x358   : > { %v1557_v23 = vadd.f32 %v1556_v21, %v1302_v22 }
 0x35a   : > { %v1558_v25 = vadd.f32 %v1557_v23, %v1303_v24  ;;  %v4469_v23 = vld [vmem:[%s9617_s4] sm:$0xff] }
 0x35c   : > { %v1559_v27 = vadd.f32 %v1558_v25, %v1304_v26  ;;  %v4470_v25 = vld [vmem:[%s9617_s4 + $0x8] sm:$0xff] }
 0x35e   : > { %v1560_v29 = vadd.f32 %v1559_v27, %v1305_v28  ;;  %v4471_v27 = vld [vmem:[%s9617_s4 + $0x10] sm:$0xff] }
 0x360   : > { %v1561_v31 = vadd.f32 %v1560_v29, %v1306_v30  ;;  %v4472_v29 = vld [vmem:[%s9617_s4 + $0x18] sm:$0xff] }
 0x362   : > { %v1562_v33 = vadd.f32 %v1561_v31, %v1307_v32 }
 0x364   : > { %v1563_v35 = vadd.f32 %v1562_v33, %v1308_v34  ;;  %v4473_v33 = vld [vmem:[%s9617_s4 + $0x20] sm:$0xff] }
 0x366   : > { %v1564_v37 = vadd.f32 %v1563_v35, %v1309_v36  ;;  %v4474_v36 = vld [vmem:[%s9617_s4 + $0x28] sm:$0xff] }
 0x368   : > { %v1565_v39 = vadd.f32 %v1564_v37, %v1310_v38 }
 0x36a   : > { %v1566_v41 = vadd.f32 %v1565_v39, %v1311_v40  ;;  %v4475_v40 = vld [vmem:[%s9617_s4 + $0x30] sm:$0xff] }
 0x36c   : > { %v1567_v43 = vadd.f32 %v1566_v41, %v1312_v42 }
 0x36e   : > { %v1568_v45 = vadd.f32 %v1567_v43, %v1313_v44  ;;  %v4476_v44 = vld [vmem:[%s9617_s4 + $0x38] sm:$0xff] }
 0x370   : > { %v1569_v47 = vadd.f32 %v1568_v45, %v1314_v46 }
 0x372   : > { %v1570_v49 = vadd.f32 %v1569_v47, %v1315_v48  ;;  %v4477_v48 = vld [vmem:[%s9617_s4 + $0x40] sm:$0xff] }
 0x374   : > { %v1571_v51 = vadd.f32 %v1570_v49, %v1316_v50 }
 0x376   : > { %v1572_v53 = vadd.f32 %v1571_v51, %v1317_v52  ;;  %v4478_v52 = vld [vmem:[%s9617_s4 + $0x48] sm:$0xff] }
 0x378   : > { %v1573_v55 = vadd.f32 %v1572_v53, %v1318_v54 }
 0x37a   : > { %v1574_v57 = vadd.f32 %v1573_v55, %v1319_v56  ;;  %v4479_v56 = vld [vmem:[%s9617_s4 + $0x50] sm:$0xff] }
 0x37c   : > { %v1575_v59 = vadd.f32 %v1574_v57, %v1320_v58 }
 0x37e   : > { %v1576_v61 = vadd.f32 %v1575_v59, %v1321_v60  ;;  %v4480_v60 = vld [vmem:[%s9617_s4 + $0x58] sm:$0xff] }
 0x380   : > { %v1577_v63 = vadd.f32 %v1576_v61, %v1322_v62 }
 0x382   : > { %v1578_v1 = vadd.f32 %v1577_v63, %v1323_v0  ;;  %v4481_v0 = vld [vmem:[%s9617_s4 + $0x60] sm:$0xff] }
 0x384   : > { %v1579_v3 = vadd.f32 %v1578_v1, %v1324_v2 }
 0x386   : > { %v1580_v5 = vadd.f32 %v1579_v3, %v1325_v4  ;;  %v4482_v4 = vld [vmem:[%s9617_s4 + $0x68] sm:$0xff] }
 0x388   : > { %v1581_v7 = vadd.f32 %v1580_v5, %v1326_v6 }
 0x38a   : > { %v1582_v9 = vadd.f32 %v1581_v7, %v1327_v8  ;;  %v4483_v8 = vld [vmem:[%s9617_s4 + $0x70] sm:$0xff] }
 0x38c   : > { %v1583_v11 = vadd.f32 %v1582_v9, %v1328_v10 }
 0x38e   : > { %v1584_v13 = vadd.f32 %v1583_v11, %v1329_v12  ;;  %v4484_v12 = vld [vmem:[%s9617_s4 + $0x78] sm:$0xff] }
 0x390   : > { %v1585_v15 = vadd.f32 %v1584_v13, %v1330_v14 }
 0x392   : > { %v1586_v16 = vrot.slane %v1585_v15, 4 }
 0x394   : > { %v1587_v17 = vadd.f32 %v1586_v16, %v1585_v15  ;;  %v4485_v16 = vld [vmem:[%s9617_s4 + $0x80] sm:$0xff] }
 0x396   : > { %v1588_v18 = vrot.slane %v1587_v17, 2 }
 0x398   : > { %v1589_v19 = vadd.f32 %v1588_v18, %v1587_v17 }
 0x39a   : > { %v1590_v20 = vrot.slane %v1589_v19, 1 }
 0x39c   : > { %v1591_v21 = vadd.f32 %v1590_v20, %v1589_v19  ;;  %v4486_v20 = vld [vmem:[%s9617_s4 + $0x88] sm:$0xff] }
 0x39e   : > { %v5736_v22 = vmul.f32 0.00048828125, %v1591_v21 }
 0x3a0   : > { %v5742_v24 = vsub.f32 %v4469_v23, %v5736_v22  ;;  %v5748_v26 = vsub.f32 %v4470_v25, %v5736_v22  ;;  %v5754_v28 = vsub.f32 %v4471_v27, %v5736_v22  ;;  %v5760_v30 = vsub.f32 %v4472_v29, %v5736_v22  ;;  %v4487_v27 = vld [vmem:[%s9617_s4 + $0x90] sm:$0xff] }
 0x3a1   : > { %v5770_v34 = vsub.f32 %v4473_v33, %v5736_v22  ;;  %v5778_v37 = vsub.f32 %v4474_v36, %v5736_v22  ;;  %v5786_v41 = vsub.f32 %v4475_v40, %v5736_v22  ;;  %v5794_v45 = vsub.f32 %v4476_v44, %v5736_v22  ;;  %v4488_v33 = vld [vmem:[%s9617_s4 + $0x98] sm:$0xff]  ;;  %v4490_v44 = vld [vmem:[%s9617_s4 + $0xa8] sm:$0xff] }
 0x3a2   : > { %v1850_v31 = vmul.f32 %v5742_v24, %v5742_v24  ;;  %v1851_v32 = vmul.f32 %v5748_v26, %v5748_v26  ;;  %v1852_v35 = vmul.f32 %v5754_v28, %v5754_v28  ;;  %v1853_v38 = vmul.f32 %v5760_v30, %v5760_v30 }
 0x3a3   : > { %v1854_v42 = vmul.f32 %v5770_v34, %v5770_v34  ;;  %v1855_v46 = vmul.f32 %v5778_v37, %v5778_v37  ;;  %v5802_v49 = vsub.f32 %v4477_v48, %v5736_v22  ;;  %v1856_v50 = vmul.f32 %v5786_v41, %v5786_v41 }
 0x3a4   : > { %v2106_v39 = vadd.f32 %v1851_v32, %v1850_v31  ;;  %v5810_v53 = vsub.f32 %v4478_v52, %v5736_v22  ;;  %v1857_v54 = vmul.f32 %v5794_v45, %v5794_v45  ;;  %v5818_v57 = vsub.f32 %v4479_v56, %v5736_v22 }
 0x3a5   : > { %v1858_v58 = vmul.f32 %v5802_v49, %v5802_v49  ;;  %v5826_v61 = vsub.f32 %v4480_v60, %v5736_v22  ;;  %v5834_v1 = vsub.f32 %v4481_v0, %v5736_v22  ;;  %v5842_v5 = vsub.f32 %v4482_v4, %v5736_v22  ;;  %v4493_v60 = vld [vmem:[%s9617_s4 + $0xc0] sm:$0xff] }
 0x3a6   : > { %v2107_v43 = vadd.f32 %v2106_v39, %v1852_v35  ;;  %v1859_v62 = vmul.f32 %v5810_v53, %v5810_v53  ;;  %v1860_v2 = vmul.f32 %v5818_v57, %v5818_v57  ;;  %v5850_v9 = vsub.f32 %v4483_v8, %v5736_v22  ;;  %v4489_v39 = vld [vmem:[%s9617_s4 + $0xa0] sm:$0xff] }
 0x3a7   : > { %v1861_v6 = vmul.f32 %v5826_v61, %v5826_v61  ;;  %v1862_v10 = vmul.f32 %v5834_v1, %v5834_v1  ;;  %v5858_v13 = vsub.f32 %v4484_v12, %v5736_v22  ;;  %v1863_v14 = vmul.f32 %v5842_v5, %v5842_v5  ;;  %v4496_v12 = vld [vmem:[%s9617_s4 + $0xd8] sm:$0xff] }
 0x3a8   : > { %v2108_v47 = vadd.f32 %v2107_v43, %v1853_v38  ;;  %v5866_v17 = vsub.f32 %v4485_v16, %v5736_v22  ;;  %v1864_v18 = vmul.f32 %v5850_v9, %v5850_v9  ;;  %v5874_v21 = vsub.f32 %v4486_v20, %v5736_v22 }
 0x3a9   : > { %v1865_v23 = vmul.f32 %v5858_v13, %v5858_v13  ;;  %v5882_v29 = vsub.f32 %v4487_v27, %v5736_v22  ;;  %v5890_v35 = vsub.f32 %v4488_v33, %v5736_v22  ;;  %v5898_v40 = vsub.f32 %v4489_v39, %v5736_v22  ;;  %v4499_v33 = vld [vmem:[%s9617_s4 + $0xf0] sm:$0xff] }
 0x3aa   : > { %v2109_v51 = vadd.f32 %v2108_v47, %v1854_v42  ;;  %v1866_v31 = vmul.f32 %v5866_v17, %v5866_v17  ;;  %v1867_v36 = vmul.f32 %v5874_v21, %v5874_v21 }
 0x3ab   : > { %v1868_v42 = vmul.f32 %v5882_v29, %v5882_v29  ;;  %v1869_v47 = vmul.f32 %v5890_v35, %v5890_v35  ;;  %v1870_v52 = vmul.f32 %v5898_v40, %v5898_v40 }
 0x3ac   : > { %v2110_v55 = vadd.f32 %v2109_v51, %v1855_v46  ;;  %v5906_v46 = vsub.f32 %v4490_v44, %v5736_v22 }
 0x3ae   : > { %v2111_v59 = vadd.f32 %v2110_v55, %v1856_v50  ;;  %v4491_v50 = vld [vmem:[%s9617_s4 + $0xb0] sm:$0xff]  ;;  %v4492_v55 = vld [vmem:[%s9617_s4 + $0xb8] sm:$0xff] }
 0x3af   : > { %v5914_v51 = vsub.f32 %v4491_v50, %v5736_v22  ;;  %v5922_v56 = vsub.f32 %v4492_v55, %v5736_v22  ;;  %v4502_v55 = vld [vmem:[%s9617_s4 + $0x108] sm:$0xff] }
 0x3b0   : > { %v2112_v63 = vadd.f32 %v2111_v59, %v1857_v54 }
 0x3b1   : > { %v1873_v4 = vmul.f32 %v5922_v56, %v5922_v56 }
 0x3b2   : > { %v2113_v3 = vadd.f32 %v2112_v63, %v1858_v58  ;;  %v1871_v58 = vmul.f32 %v5906_v46, %v5906_v46  ;;  %v1872_v63 = vmul.f32 %v5914_v51, %v5914_v51 }
 0x3b4   : > { %v2114_v7 = vadd.f32 %v2113_v3, %v1859_v62  ;;  %v5930_v62 = vsub.f32 %v4493_v60, %v5736_v22 }
 0x3b6   : > { %v2115_v11 = vadd.f32 %v2114_v7, %v1860_v2  ;;  %v4494_v2 = vld [vmem:[%s9617_s4 + $0xc8] sm:$0xff]  ;;  %v4495_v7 = vld [vmem:[%s9617_s4 + $0xd0] sm:$0xff] }
 0x3b7   : > { %v5938_v3 = vsub.f32 %v4494_v2, %v5736_v22  ;;  %v5946_v8 = vsub.f32 %v4495_v7, %v5736_v22 }
 0x3b8   : > { %v2116_v15 = vadd.f32 %v2115_v11, %v1861_v6 }
 0x3b9   : > { %v1876_v20 = vmul.f32 %v5946_v8, %v5946_v8 }
 0x3ba   : > { %v2117_v19 = vadd.f32 %v2116_v15, %v1862_v10  ;;  %v1874_v10 = vmul.f32 %v5930_v62, %v5930_v62  ;;  %v1875_v15 = vmul.f32 %v5938_v3, %v5938_v3 }
 0x3bc   : > { %v2118_v25 = vadd.f32 %v2117_v19, %v1863_v14  ;;  %v5954_v14 = vsub.f32 %v4496_v12, %v5736_v22  ;;  %v4505_v12 = vld [vmem:[%s9617_s4 + $0x120] sm:$0xff] }
 0x3be   : > { %v2119_v32 = vadd.f32 %v2118_v25, %v1864_v18  ;;  %v4497_v18 = vld [vmem:[%s9617_s4 + $0xe0] sm:$0xff]  ;;  %v4498_v25 = vld [vmem:[%s9617_s4 + $0xe8] sm:$0xff] }
 0x3bf   : > { %v5962_v19 = vsub.f32 %v4497_v18, %v5736_v22  ;;  %v5970_v27 = vsub.f32 %v4498_v25, %v5736_v22 }
 0x3c0   : > { %v2120_v38 = vadd.f32 %v2119_v32, %v1865_v23 }
 0x3c1   : > { %v1879_v44 = vmul.f32 %v5970_v27, %v5970_v27 }
 0x3c2   : > { %v2121_v43 = vadd.f32 %v2120_v38, %v1866_v31  ;;  %v1877_v31 = vmul.f32 %v5954_v14, %v5954_v14  ;;  %v1878_v38 = vmul.f32 %v5962_v19, %v5962_v19 }
 0x3c4   : > { %v2122_v48 = vadd.f32 %v2121_v43, %v1867_v36  ;;  %v5978_v36 = vsub.f32 %v4499_v33, %v5736_v22 }
 0x3c6   : > { %v2123_v54 = vadd.f32 %v2122_v48, %v1868_v42  ;;  %v4500_v42 = vld [vmem:[%s9617_s4 + $0xf8] sm:$0xff]  ;;  %v4501_v48 = vld [vmem:[%s9617_s4 + $0x100] sm:$0xff] }
 0x3c7   : > { %v5986_v43 = vsub.f32 %v4500_v42, %v5736_v22  ;;  %v5994_v50 = vsub.f32 %v4501_v48, %v5736_v22  ;;  %v4508_v42 = vld [vmem:[%s9617_s4 + $0x138] sm:$0xff] }
 0x3c8   : > { %v2124_v59 = vadd.f32 %v2123_v54, %v1869_v47 }
 0x3c9   : > { %v1882_v2 = vmul.f32 %v5994_v50, %v5994_v50 }
 0x3ca   : > { %v2125_v0 = vadd.f32 %v2124_v59, %v1870_v52  ;;  %v1880_v52 = vmul.f32 %v5978_v36, %v5978_v36  ;;  %v1881_v59 = vmul.f32 %v5986_v43, %v5986_v43 }
 0x3cc   : > { %v2126_v6 = vadd.f32 %v2125_v0, %v1871_v58  ;;  %v6002_v58 = vsub.f32 %v4502_v55, %v5736_v22 }
 0x3ce   : > { %v2127_v11 = vadd.f32 %v2126_v6, %v1872_v63  ;;  %v4503_v63 = vld [vmem:[%s9617_s4 + $0x110] sm:$0xff]  ;;  %v4504_v6 = vld [vmem:[%s9617_s4 + $0x118] sm:$0xff] }
 0x3cf   : > { %v6010_v0 = vsub.f32 %v4503_v63, %v5736_v22  ;;  %v6018_v7 = vsub.f32 %v4504_v6, %v5736_v22  ;;  %v4511_v6 = vld [vmem:[%s9617_s4 + $0x150] sm:$0xff] }
 0x3d0   : > { %v2128_v16 = vadd.f32 %v2127_v11, %v1873_v4 }
 0x3d1   : > { %v1885_v25 = vmul.f32 %v6018_v7, %v6018_v7 }
 0x3d2   : > { %v2129_v23 = vadd.f32 %v2128_v16, %v1874_v10  ;;  %v1883_v10 = vmul.f32 %v6002_v58, %v6002_v58  ;;  %v1884_v16 = vmul.f32 %v6010_v0, %v6010_v0 }
 0x3d4   : > { %v2130_v32 = vadd.f32 %v2129_v23, %v1875_v15  ;;  %v6026_v15 = vsub.f32 %v4505_v12, %v5736_v22 }
 0x3d6   : > { %v2131_v39 = vadd.f32 %v2130_v32, %v1876_v20  ;;  %v4506_v20 = vld [vmem:[%s9617_s4 + $0x128] sm:$0xff]  ;;  %v4507_v32 = vld [vmem:[%s9617_s4 + $0x130] sm:$0xff] }
 0x3d7   : > { %v6034_v23 = vsub.f32 %v4506_v20, %v5736_v22  ;;  %v6042_v33 = vsub.f32 %v4507_v32, %v5736_v22 }
 0x3d8   : > { %v2132_v47 = vadd.f32 %v2131_v39, %v1877_v31 }
 0x3d9   : > { %v1888_v55 = vmul.f32 %v6042_v33, %v6042_v33 }
 0x3da   : > { %v2133_v54 = vadd.f32 %v2132_v47, %v1878_v38  ;;  %v1886_v38 = vmul.f32 %v6026_v15, %v6026_v15  ;;  %v1887_v47 = vmul.f32 %v6034_v23, %v6034_v23 }
 0x3dc   : > { %v2134_v60 = vadd.f32 %v2133_v54, %v1879_v44  ;;  %v6050_v44 = vsub.f32 %v4508_v42, %v5736_v22  ;;  %v4514_v42 = vld [vmem:[%s9617_s4 + $0x168] sm:$0xff] }
 0x3de   : > { %v2135_v4 = vadd.f32 %v2134_v60, %v1880_v52  ;;  %v4509_v52 = vld [vmem:[%s9617_s4 + $0x140] sm:$0xff]  ;;  %v4510_v60 = vld [vmem:[%s9617_s4 + $0x148] sm:$0xff] }
 0x3df   : > { %v6058_v54 = vsub.f32 %v4509_v52, %v5736_v22  ;;  %v6066_v63 = vsub.f32 %v4510_v60, %v5736_v22 }
 0x3e0   : > { %v2136_v11 = vadd.f32 %v2135_v4, %v1881_v59 }
 0x3e1   : > { %v1891_v20 = vmul.f32 %v6066_v63, %v6066_v63 }
 0x3e2   : > { %v2137_v18 = vadd.f32 %v2136_v11, %v1882_v2  ;;  %v1889_v2 = vmul.f32 %v6050_v44, %v6050_v44  ;;  %v1890_v11 = vmul.f32 %v6058_v54, %v6058_v54 }
 0x3e4   : > { %v2138_v31 = vadd.f32 %v2137_v18, %v1883_v10  ;;  %v6074_v10 = vsub.f32 %v4511_v6, %v5736_v22 }
 0x3e6   : > { %v2139_v39 = vadd.f32 %v2138_v31, %v1884_v16  ;;  %9829 = vst [vmem:[#allocation2_spill] sm:$0xff] %v6074_v10  ;;  %v4512_v16 = vld [vmem:[%s9617_s4 + $0x158] sm:$0xff]  ;;  %v4513_v31 = vld [vmem:[%s9617_s4 + $0x160] sm:$0xff] }
 0x3e7   : > { %v6082_v18 = vsub.f32 %v4512_v16, %v5736_v22  ;;  %v6090_v32 = vsub.f32 %v4513_v31, %v5736_v22  ;;  %v4517_v16 = vld [vmem:[%s9617_s4 + $0x180] sm:$0xff] }
 0x3e8   : > { %v2140_v48 = vadd.f32 %v2139_v39, %v1885_v25 }
 0x3e9   : > { %9830 = vst [vmem:[#allocation3_spill] sm:$0xff] %v6082_v18  ;;  %9831 = vst [vmem:[#allocation4_spill] sm:$0xff] %v6090_v32  ;;  %v1894_v60 = vmul.f32 %v6090_v32, %v6090_v32 }
 0x3ea   : > { %v2141_v59 = vadd.f32 %v2140_v48, %v1886_v38  ;;  %v1892_v38 = vmul.f32 %v6074_v10, %v6074_v10  ;;  %v1893_v48 = vmul.f32 %v6082_v18, %v6082_v18 }
 0x3ec   : > { %v2142_v4 = vadd.f32 %v2141_v59, %v1887_v47  ;;  %v6098_v47 = vsub.f32 %v4514_v42, %v5736_v22 }
 0x3ee   : > { %v2143_v12 = vadd.f32 %v2142_v4, %v1888_v55  ;;  %9832 = vst [vmem:[#allocation5_spill] sm:$0xff] %v6098_v47  ;;  %v4515_v55 = vld [vmem:[%s9617_s4 + $0x170] sm:$0xff]  ;;  %v4516_v4 = vld [vmem:[%s9617_s4 + $0x178] sm:$0xff] }
 0x3ef   : > { %v6106_v59 = vsub.f32 %v4515_v55, %v5736_v22  ;;  %v6114_v6 = vsub.f32 %v4516_v4, %v5736_v22  ;;  %v4520_v4 = vld [vmem:[%s9617_s4 + $0x198] sm:$0xff] }
 0x3f0   : > { %v2144_v25 = vadd.f32 %v2143_v12, %v1889_v2 }
 0x3f1   : > { %9833 = vst [vmem:[#allocation6_spill] sm:$0xff] %v6106_v59  ;;  %9834 = vst [vmem:[#allocation7_spill] sm:$0xff] %v6114_v6  ;;  %v1897_v42 = vmul.f32 %v6114_v6, %v6114_v6 }
 0x3f2   : > { %v2145_v39 = vadd.f32 %v2144_v25, %v1890_v11  ;;  %v1895_v11 = vmul.f32 %v6098_v47, %v6098_v47  ;;  %v1896_v25 = vmul.f32 %v6106_v59, %v6106_v59 }
 0x3f4   : > { %v2146_v52 = vadd.f32 %v2145_v39, %v1891_v20  ;;  %v6122_v20 = vsub.f32 %v4517_v16, %v5736_v22 }
 0x3f6   : > { %v2147_v2 = vadd.f32 %v2146_v52, %v1892_v38  ;;  %9835 = vst [vmem:[#allocation8_spill] sm:$0xff] %v6122_v20  ;;  %v4518_v38 = vld [vmem:[%s9617_s4 + $0x188] sm:$0xff]  ;;  %v4519_v52 = vld [vmem:[%s9617_s4 + $0x190] sm:$0xff] }
 0x3f7   : > { %v6130_v39 = vsub.f32 %v4518_v38, %v5736_v22  ;;  %v6138_v55 = vsub.f32 %v4519_v52, %v5736_v22  ;;  %v4522_v52 = vld [vmem:[%s9617_s4 + $0x1a8] sm:$0xff] }
 0x3f8   : > { %v2148_v12 = vadd.f32 %v2147_v2, %v1893_v48 }
 0x3f9   : > { %9836 = vst [vmem:[#allocation9_spill] sm:$0xff] %v6130_v39  ;;  %9837 = vst [vmem:[#allocation10_spill] sm:$0xff] %v6138_v55 }
 0x3fa   : > { %v2149_v31 = vadd.f32 %v2148_v12, %v1894_v60  ;;  %v1898_v60 = vmul.f32 %v6122_v20, %v6122_v20  ;;  %v6146_v12 = vsub.f32 %v4520_v4, %v5736_v22  ;;  %v6162_v4 = vsub.f32 %v4522_v52, %v5736_v22  ;;  %v4524_v52 = vld [vmem:[%s9617_s4 + $0x1b8] sm:$0xff] }
 0x3fc   : > { %v2150_v48 = vadd.f32 %v2149_v31, %v1895_v11  ;;  %9838 = vst [vmem:[#allocation11_spill] sm:$0xff] %v6146_v12  ;;  %v1899_v11 = vmul.f32 %v6130_v39, %v6130_v39  ;;  %v4521_v31 = vld [vmem:[%s9617_s4 + $0x1a0] sm:$0xff]  ;;  %9840 = vst [vmem:[#allocation13_spill] sm:$0xff] %v6162_v4 }
 0x3fd   : > { %v6154_v38 = vsub.f32 %v4521_v31, %v5736_v22  ;;  %v4523_v31 = vld [vmem:[%s9617_s4 + $0x1b0] sm:$0xff] }
 0x3fe   : > { %v2151_v2 = vadd.f32 %v2150_v48, %v1896_v25  ;;  %v1900_v25 = vmul.f32 %v6138_v55, %v6138_v55  ;;  %v6170_v39 = vsub.f32 %v4523_v31, %v5736_v22  ;;  %v6178_v55 = vsub.f32 %v4524_v52, %v5736_v22  ;;  %v4525_v31 = vld [vmem:[%s9617_s4 + $0x1c0] sm:$0xff]  ;;  %v4526_v52 = vld [vmem:[%s9617_s4 + $0x1c8] sm:$0xff] }
 0x3ff   : > { %9839 = vst [vmem:[#allocation12_spill] sm:$0xff] %v6154_v38 }
 0x400   : > { %v2152_v16 = vadd.f32 %v2151_v2, %v1897_v42  ;;  %v1901_v42 = vmul.f32 %v6146_v12, %v6146_v12  ;;  %9841 = vst [vmem:[#allocation14_spill] sm:$0xff] %v6170_v39  ;;  %9842 = vst [vmem:[#allocation15_spill] sm:$0xff] %v6178_v55  ;;  %v6186_v12 = vsub.f32 %v4525_v31, %v5736_v22  ;;  %v4527_v31 = vld [vmem:[%s9617_s4 + $0x1d0] sm:$0xff] }
 0x402   : > { %v2153_v48 = vadd.f32 %v2152_v16, %v1898_v60  ;;  %v1902_v60 = vmul.f32 %v6154_v38, %v6154_v38  ;;  %9843 = vst [vmem:[#allocation16_spill] sm:$0xff] %v6186_v12  ;;  %v6194_v38 = vsub.f32 %v4526_v52, %v5736_v22  ;;  %v4528_v52 = vld [vmem:[%s9617_s4 + $0x1d8] sm:$0xff] }
 0x404   : > { %v2154_v2 = vadd.f32 %v2153_v48, %v1899_v11  ;;  %v1903_v11 = vmul.f32 %v6162_v4, %v6162_v4  ;;  %9844 = vst [vmem:[#allocation17_spill] sm:$0xff] %v6194_v38  ;;  %v6202_v4 = vsub.f32 %v4527_v31, %v5736_v22  ;;  %v4529_v31 = vld [vmem:[%s9617_s4 + $0x1e0] sm:$0xff] }
 0x406   : > { %v2155_v16 = vadd.f32 %v2154_v2, %v1900_v25  ;;  %v1904_v25 = vmul.f32 %v6170_v39, %v6170_v39  ;;  %9845 = vst [vmem:[#allocation18_spill] sm:$0xff] %v6202_v4  ;;  %v6210_v39 = vsub.f32 %v4528_v52, %v5736_v22  ;;  %v4530_v52 = vld [vmem:[%s9617_s4 + $0x1e8] sm:$0xff] }
 0x408   : > { %v2156_v48 = vadd.f32 %v2155_v16, %v1901_v42  ;;  %v1905_v42 = vmul.f32 %v6178_v55, %v6178_v55  ;;  %9846 = vst [vmem:[#allocation19_spill] sm:$0xff] %v6210_v39  ;;  %v6218_v55 = vsub.f32 %v4529_v31, %v5736_v22  ;;  %v4531_v31 = vld [vmem:[%s9617_s4 + $0x1f0] sm:$0xff] }
 0x40a   : > { %v2157_v2 = vadd.f32 %v2156_v48, %v1902_v60  ;;  %v1906_v60 = vmul.f32 %v6186_v12, %v6186_v12  ;;  %9847 = vst [vmem:[#allocation20_spill] sm:$0xff] %v6218_v55  ;;  %v6226_v12 = vsub.f32 %v4530_v52, %v5736_v22  ;;  %v4532_v52 = vld [vmem:[%s9617_s4 + $0x1f8] sm:$0xff] }
 0x40c   : > { %v2158_v16 = vadd.f32 %v2157_v2, %v1903_v11  ;;  %v1907_v11 = vmul.f32 %v6194_v38, %v6194_v38  ;;  %9848 = vst [vmem:[#allocation21_spill] sm:$0xff] %v6226_v12  ;;  %v6234_v38 = vsub.f32 %v4531_v31, %v5736_v22  ;;  %v4533_v31 = vld [vmem:[%s9617_s4 + $0x200] sm:$0xff] }
 0x40e   : > { %v2159_v48 = vadd.f32 %v2158_v16, %v1904_v25  ;;  %v1908_v25 = vmul.f32 %v6202_v4, %v6202_v4  ;;  %9849 = vst [vmem:[#allocation22_spill] sm:$0xff] %v6234_v38  ;;  %v6242_v4 = vsub.f32 %v4532_v52, %v5736_v22  ;;  %v4534_v52 = vld [vmem:[%s9617_s4 + $0x208] sm:$0xff] }
 0x410   : > { %v2160_v2 = vadd.f32 %v2159_v48, %v1905_v42  ;;  %v1909_v42 = vmul.f32 %v6210_v39, %v6210_v39  ;;  %9850 = vst [vmem:[#allocation23_spill] sm:$0xff] %v6242_v4  ;;  %v6250_v39 = vsub.f32 %v4533_v31, %v5736_v22  ;;  %v4535_v31 = vld [vmem:[%s9617_s4 + $0x210] sm:$0xff] }
 0x412   : > { %v2161_v16 = vadd.f32 %v2160_v2, %v1906_v60  ;;  %v1910_v60 = vmul.f32 %v6218_v55, %v6218_v55  ;;  %9851 = vst [vmem:[#allocation24_spill] sm:$0xff] %v6250_v39  ;;  %v6258_v55 = vsub.f32 %v4534_v52, %v5736_v22  ;;  %v4536_v52 = vld [vmem:[%s9617_s4 + $0x218] sm:$0xff] }
 0x414   : > { %v2162_v48 = vadd.f32 %v2161_v16, %v1907_v11  ;;  %v1911_v11 = vmul.f32 %v6226_v12, %v6226_v12  ;;  %9852 = vst [vmem:[#allocation25_spill] sm:$0xff] %v6258_v55  ;;  %v6266_v12 = vsub.f32 %v4535_v31, %v5736_v22  ;;  %v4537_v31 = vld [vmem:[%s9617_s4 + $0x220] sm:$0xff] }
 0x416   : > { %v2163_v2 = vadd.f32 %v2162_v48, %v1908_v25  ;;  %v1912_v25 = vmul.f32 %v6234_v38, %v6234_v38  ;;  %9853 = vst [vmem:[#allocation26_spill] sm:$0xff] %v6266_v12  ;;  %v6274_v38 = vsub.f32 %v4536_v52, %v5736_v22  ;;  %v4538_v52 = vld [vmem:[%s9617_s4 + $0x228] sm:$0xff] }
 0x418   : > { %v2164_v16 = vadd.f32 %v2163_v2, %v1909_v42  ;;  %v1913_v42 = vmul.f32 %v6242_v4, %v6242_v4  ;;  %9854 = vst [vmem:[#allocation27_spill] sm:$0xff] %v6274_v38  ;;  %v6282_v4 = vsub.f32 %v4537_v31, %v5736_v22  ;;  %v4539_v31 = vld [vmem:[%s9617_s4 + $0x230] sm:$0xff] }
 0x41a   : > { %v2165_v48 = vadd.f32 %v2164_v16, %v1910_v60  ;;  %v1914_v60 = vmul.f32 %v6250_v39, %v6250_v39  ;;  %9855 = vst [vmem:[#allocation28_spill] sm:$0xff] %v6282_v4  ;;  %v6290_v39 = vsub.f32 %v4538_v52, %v5736_v22  ;;  %v4540_v52 = vld [vmem:[%s9617_s4 + $0x238] sm:$0xff] }
 0x41c   : > { %v2166_v2 = vadd.f32 %v2165_v48, %v1911_v11  ;;  %v1915_v11 = vmul.f32 %v6258_v55, %v6258_v55  ;;  %9856 = vst [vmem:[#allocation29_spill] sm:$0xff] %v6290_v39  ;;  %v6298_v55 = vsub.f32 %v4539_v31, %v5736_v22  ;;  %v4541_v31 = vld [vmem:[%s9617_s4 + $0x240] sm:$0xff] }
 0x41e   : > { %v2167_v16 = vadd.f32 %v2166_v2, %v1912_v25  ;;  %v1916_v25 = vmul.f32 %v6266_v12, %v6266_v12  ;;  %9857 = vst [vmem:[#allocation30_spill] sm:$0xff] %v6298_v55  ;;  %v6306_v12 = vsub.f32 %v4540_v52, %v5736_v22  ;;  %v4542_v52 = vld [vmem:[%s9617_s4 + $0x248] sm:$0xff] }
 0x420   : > { %v2168_v48 = vadd.f32 %v2167_v16, %v1913_v42  ;;  %v1917_v42 = vmul.f32 %v6274_v38, %v6274_v38  ;;  %9858 = vst [vmem:[#allocation31_spill] sm:$0xff] %v6306_v12  ;;  %v6314_v38 = vsub.f32 %v4541_v31, %v5736_v22  ;;  %v4543_v31 = vld [vmem:[%s9617_s4 + $0x250] sm:$0xff] }
 0x422   : > { %v2169_v2 = vadd.f32 %v2168_v48, %v1914_v60  ;;  %v1918_v60 = vmul.f32 %v6282_v4, %v6282_v4  ;;  %9859 = vst [vmem:[#allocation32_spill] sm:$0xff] %v6314_v38  ;;  %v6322_v4 = vsub.f32 %v4542_v52, %v5736_v22  ;;  %v4544_v52 = vld [vmem:[%s9617_s4 + $0x258] sm:$0xff] }
 0x424   : > { %v2170_v16 = vadd.f32 %v2169_v2, %v1915_v11  ;;  %v1919_v11 = vmul.f32 %v6290_v39, %v6290_v39  ;;  %9860 = vst [vmem:[#allocation33_spill] sm:$0xff] %v6322_v4  ;;  %v6330_v39 = vsub.f32 %v4543_v31, %v5736_v22  ;;  %v4545_v31 = vld [vmem:[%s9617_s4 + $0x260] sm:$0xff] }
 0x426   : > { %v2171_v48 = vadd.f32 %v2170_v16, %v1916_v25  ;;  %v1920_v25 = vmul.f32 %v6298_v55, %v6298_v55  ;;  %9861 = vst [vmem:[#allocation34_spill] sm:$0xff] %v6330_v39  ;;  %v6338_v55 = vsub.f32 %v4544_v52, %v5736_v22  ;;  %v4546_v52 = vld [vmem:[%s9617_s4 + $0x268] sm:$0xff] }
 0x428   : > { %v2172_v2 = vadd.f32 %v2171_v48, %v1917_v42  ;;  %v1921_v42 = vmul.f32 %v6306_v12, %v6306_v12  ;;  %9862 = vst [vmem:[#allocation35_spill] sm:$0xff] %v6338_v55  ;;  %v6346_v12 = vsub.f32 %v4545_v31, %v5736_v22  ;;  %v4547_v31 = vld [vmem:[%s9617_s4 + $0x270] sm:$0xff] }
 0x42a   : > { %v2173_v16 = vadd.f32 %v2172_v2, %v1918_v60  ;;  %v1922_v60 = vmul.f32 %v6314_v38, %v6314_v38  ;;  %9863 = vst [vmem:[#allocation36_spill] sm:$0xff] %v6346_v12  ;;  %v6354_v38 = vsub.f32 %v4546_v52, %v5736_v22  ;;  %v4548_v52 = vld [vmem:[%s9617_s4 + $0x278] sm:$0xff] }
 0x42c   : > { %v2174_v48 = vadd.f32 %v2173_v16, %v1919_v11  ;;  %v1923_v11 = vmul.f32 %v6322_v4, %v6322_v4  ;;  %9864 = vst [vmem:[#allocation37_spill] sm:$0xff] %v6354_v38  ;;  %v6362_v4 = vsub.f32 %v4547_v31, %v5736_v22  ;;  %v4549_v31 = vld [vmem:[%s9617_s4 + $0x280] sm:$0xff] }
 0x42e   : > { %v2175_v2 = vadd.f32 %v2174_v48, %v1920_v25  ;;  %v1924_v25 = vmul.f32 %v6330_v39, %v6330_v39  ;;  %9865 = vst [vmem:[#allocation38_spill] sm:$0xff] %v6362_v4  ;;  %v6370_v39 = vsub.f32 %v4548_v52, %v5736_v22  ;;  %v4550_v52 = vld [vmem:[%s9617_s4 + $0x288] sm:$0xff] }
 0x430   : > { %v2176_v16 = vadd.f32 %v2175_v2, %v1921_v42  ;;  %v1925_v42 = vmul.f32 %v6338_v55, %v6338_v55  ;;  %9866 = vst [vmem:[#allocation39_spill] sm:$0xff] %v6370_v39  ;;  %v6378_v55 = vsub.f32 %v4549_v31, %v5736_v22  ;;  %v4551_v31 = vld [vmem:[%s9617_s4 + $0x290] sm:$0xff] }
 0x432   : > { %v2177_v48 = vadd.f32 %v2176_v16, %v1922_v60  ;;  %v1926_v60 = vmul.f32 %v6346_v12, %v6346_v12  ;;  %9867 = vst [vmem:[#allocation40_spill] sm:$0xff] %v6378_v55  ;;  %v6386_v12 = vsub.f32 %v4550_v52, %v5736_v22  ;;  %v4552_v52 = vld [vmem:[%s9617_s4 + $0x298] sm:$0xff] }
 0x434   : > { %v2178_v2 = vadd.f32 %v2177_v48, %v1923_v11  ;;  %v1927_v11 = vmul.f32 %v6354_v38, %v6354_v38  ;;  %9868 = vst [vmem:[#allocation41_spill] sm:$0xff] %v6386_v12  ;;  %v6394_v38 = vsub.f32 %v4551_v31, %v5736_v22  ;;  %v4553_v31 = vld [vmem:[%s9617_s4 + $0x2a0] sm:$0xff] }
 0x436   : > { %v2179_v16 = vadd.f32 %v2178_v2, %v1924_v25  ;;  %v1928_v25 = vmul.f32 %v6362_v4, %v6362_v4  ;;  %9869 = vst [vmem:[#allocation42_spill] sm:$0xff] %v6394_v38  ;;  %v6402_v4 = vsub.f32 %v4552_v52, %v5736_v22  ;;  %v4554_v52 = vld [vmem:[%s9617_s4 + $0x2a8] sm:$0xff] }
 0x438   : > { %v2180_v48 = vadd.f32 %v2179_v16, %v1925_v42  ;;  %v1929_v42 = vmul.f32 %v6370_v39, %v6370_v39  ;;  %9870 = vst [vmem:[#allocation43_spill] sm:$0xff] %v6402_v4  ;;  %v6410_v39 = vsub.f32 %v4553_v31, %v5736_v22  ;;  %v4555_v31 = vld [vmem:[%s9617_s4 + $0x2b0] sm:$0xff] }
 0x43a   : > { %v2181_v2 = vadd.f32 %v2180_v48, %v1926_v60  ;;  %v1930_v60 = vmul.f32 %v6378_v55, %v6378_v55  ;;  %9871 = vst [vmem:[#allocation44_spill] sm:$0xff] %v6410_v39  ;;  %v6418_v55 = vsub.f32 %v4554_v52, %v5736_v22  ;;  %v4556_v52 = vld [vmem:[%s9617_s4 + $0x2b8] sm:$0xff] }
 0x43c   : > { %v2182_v16 = vadd.f32 %v2181_v2, %v1927_v11  ;;  %v1931_v11 = vmul.f32 %v6386_v12, %v6386_v12  ;;  %9872 = vst [vmem:[#allocation45_spill] sm:$0xff] %v6418_v55  ;;  %v6426_v12 = vsub.f32 %v4555_v31, %v5736_v22  ;;  %v4557_v31 = vld [vmem:[%s9617_s4 + $0x2c0] sm:$0xff] }
 0x43e   : > { %v2183_v48 = vadd.f32 %v2182_v16, %v1928_v25  ;;  %v1932_v25 = vmul.f32 %v6394_v38, %v6394_v38  ;;  %9873 = vst [vmem:[#allocation46_spill] sm:$0xff] %v6426_v12  ;;  %v6434_v38 = vsub.f32 %v4556_v52, %v5736_v22  ;;  %v4558_v52 = vld [vmem:[%s9617_s4 + $0x2c8] sm:$0xff] }
 0x440   : > { %v2184_v2 = vadd.f32 %v2183_v48, %v1929_v42  ;;  %v1933_v42 = vmul.f32 %v6402_v4, %v6402_v4  ;;  %9874 = vst [vmem:[#allocation47_spill] sm:$0xff] %v6434_v38  ;;  %v6442_v4 = vsub.f32 %v4557_v31, %v5736_v22  ;;  %v4559_v31 = vld [vmem:[%s9617_s4 + $0x2d0] sm:$0xff] }
 0x442   : > { %v2185_v16 = vadd.f32 %v2184_v2, %v1930_v60  ;;  %v1934_v60 = vmul.f32 %v6410_v39, %v6410_v39  ;;  %9875 = vst [vmem:[#allocation48_spill] sm:$0xff] %v6442_v4  ;;  %v6450_v39 = vsub.f32 %v4558_v52, %v5736_v22  ;;  %v4560_v52 = vld [vmem:[%s9617_s4 + $0x2d8] sm:$0xff] }
 0x444   : > { %v2186_v48 = vadd.f32 %v2185_v16, %v1931_v11  ;;  %v1935_v11 = vmul.f32 %v6418_v55, %v6418_v55  ;;  %9876 = vst [vmem:[#allocation49_spill] sm:$0xff] %v6450_v39  ;;  %v6458_v55 = vsub.f32 %v4559_v31, %v5736_v22  ;;  %v4561_v31 = vld [vmem:[%s9617_s4 + $0x2e0] sm:$0xff] }
 0x446   : > { %v2187_v2 = vadd.f32 %v2186_v48, %v1932_v25  ;;  %v1936_v25 = vmul.f32 %v6426_v12, %v6426_v12  ;;  %9877 = vst [vmem:[#allocation50_spill] sm:$0xff] %v6458_v55  ;;  %v6466_v12 = vsub.f32 %v4560_v52, %v5736_v22  ;;  %v4562_v52 = vld [vmem:[%s9617_s4 + $0x2e8] sm:$0xff] }
 0x448   : > { %v2188_v16 = vadd.f32 %v2187_v2, %v1933_v42  ;;  %v1937_v42 = vmul.f32 %v6434_v38, %v6434_v38  ;;  %9878 = vst [vmem:[#allocation51_spill] sm:$0xff] %v6466_v12  ;;  %v6474_v38 = vsub.f32 %v4561_v31, %v5736_v22  ;;  %v4563_v31 = vld [vmem:[%s9617_s4 + $0x2f0] sm:$0xff] }
 0x44a   : > { %v2189_v48 = vadd.f32 %v2188_v16, %v1934_v60  ;;  %v1938_v60 = vmul.f32 %v6442_v4, %v6442_v4  ;;  %9879 = vst [vmem:[#allocation52_spill] sm:$0xff] %v6474_v38  ;;  %v6482_v4 = vsub.f32 %v4562_v52, %v5736_v22  ;;  %v4564_v52 = vld [vmem:[%s9617_s4 + $0x2f8] sm:$0xff] }
 0x44c   : > { %v2190_v2 = vadd.f32 %v2189_v48, %v1935_v11  ;;  %v1939_v11 = vmul.f32 %v6450_v39, %v6450_v39  ;;  %9880 = vst [vmem:[#allocation53_spill] sm:$0xff] %v6482_v4  ;;  %v6490_v39 = vsub.f32 %v4563_v31, %v5736_v22  ;;  %v4565_v31 = vld [vmem:[%s9617_s4 + $0x300] sm:$0xff] }
 0x44e   : > { %v2191_v16 = vadd.f32 %v2190_v2, %v1936_v25  ;;  %v1940_v25 = vmul.f32 %v6458_v55, %v6458_v55  ;;  %9881 = vst [vmem:[#allocation54_spill] sm:$0xff] %v6490_v39  ;;  %v6498_v55 = vsub.f32 %v4564_v52, %v5736_v22  ;;  %v4566_v52 = vld [vmem:[%s9617_s4 + $0x308] sm:$0xff] }
 0x450   : > { %v2192_v48 = vadd.f32 %v2191_v16, %v1937_v42  ;;  %v1941_v42 = vmul.f32 %v6466_v12, %v6466_v12  ;;  %9882 = vst [vmem:[#allocation55_spill] sm:$0xff] %v6498_v55  ;;  %v6506_v12 = vsub.f32 %v4565_v31, %v5736_v22  ;;  %v4567_v31 = vld [vmem:[%s9617_s4 + $0x310] sm:$0xff] }
 0x452   : > { %v2193_v2 = vadd.f32 %v2192_v48, %v1938_v60  ;;  %v1942_v60 = vmul.f32 %v6474_v38, %v6474_v38  ;;  %9883 = vst [vmem:[#allocation56_spill] sm:$0xff] %v6506_v12  ;;  %v6514_v38 = vsub.f32 %v4566_v52, %v5736_v22  ;;  %v4568_v52 = vld [vmem:[%s9617_s4 + $0x318] sm:$0xff] }
 0x454   : > { %v2194_v16 = vadd.f32 %v2193_v2, %v1939_v11  ;;  %v1943_v11 = vmul.f32 %v6482_v4, %v6482_v4  ;;  %9884 = vst [vmem:[#allocation57_spill] sm:$0xff] %v6514_v38  ;;  %v6522_v4 = vsub.f32 %v4567_v31, %v5736_v22  ;;  %v4569_v31 = vld [vmem:[%s9617_s4 + $0x320] sm:$0xff] }
 0x456   : > { %v2195_v48 = vadd.f32 %v2194_v16, %v1940_v25  ;;  %v1944_v25 = vmul.f32 %v6490_v39, %v6490_v39  ;;  %9885 = vst [vmem:[#allocation58_spill] sm:$0xff] %v6522_v4  ;;  %v6530_v39 = vsub.f32 %v4568_v52, %v5736_v22  ;;  %v4570_v52 = vld [vmem:[%s9617_s4 + $0x328] sm:$0xff] }
 0x458   : > { %v2196_v2 = vadd.f32 %v2195_v48, %v1941_v42  ;;  %v1945_v42 = vmul.f32 %v6498_v55, %v6498_v55  ;;  %9886 = vst [vmem:[#allocation59_spill] sm:$0xff] %v6530_v39  ;;  %v6538_v55 = vsub.f32 %v4569_v31, %v5736_v22  ;;  %v4571_v31 = vld [vmem:[%s9617_s4 + $0x330] sm:$0xff] }
 0x45a   : > { %v2197_v16 = vadd.f32 %v2196_v2, %v1942_v60  ;;  %v1946_v60 = vmul.f32 %v6506_v12, %v6506_v12  ;;  %9887 = vst [vmem:[#allocation60_spill] sm:$0xff] %v6538_v55  ;;  %v6546_v12 = vsub.f32 %v4570_v52, %v5736_v22  ;;  %v4572_v52 = vld [vmem:[%s9617_s4 + $0x338] sm:$0xff] }
 0x45c   : > { %v2198_v48 = vadd.f32 %v2197_v16, %v1943_v11  ;;  %v1947_v11 = vmul.f32 %v6514_v38, %v6514_v38  ;;  %9888 = vst [vmem:[#allocation61_spill] sm:$0xff] %v6546_v12  ;;  %v6554_v38 = vsub.f32 %v4571_v31, %v5736_v22  ;;  %v4573_v31 = vld [vmem:[%s9617_s4 + $0x340] sm:$0xff] }
 0x45e   : > { %v2199_v2 = vadd.f32 %v2198_v48, %v1944_v25  ;;  %v1948_v25 = vmul.f32 %v6522_v4, %v6522_v4  ;;  %9889 = vst [vmem:[#allocation62_spill] sm:$0xff] %v6554_v38  ;;  %v6562_v4 = vsub.f32 %v4572_v52, %v5736_v22  ;;  %v4574_v52 = vld [vmem:[%s9617_s4 + $0x348] sm:$0xff] }
 0x460   : > { %v2200_v16 = vadd.f32 %v2199_v2, %v1945_v42  ;;  %v1949_v42 = vmul.f32 %v6530_v39, %v6530_v39  ;;  %9890 = vst [vmem:[#allocation63_spill] sm:$0xff] %v6562_v4  ;;  %v6570_v39 = vsub.f32 %v4573_v31, %v5736_v22  ;;  %v4575_v31 = vld [vmem:[%s9617_s4 + $0x350] sm:$0xff] }
 0x462   : > { %v2201_v48 = vadd.f32 %v2200_v16, %v1946_v60  ;;  %v1950_v60 = vmul.f32 %v6538_v55, %v6538_v55  ;;  %9891 = vst [vmem:[#allocation64_spill] sm:$0xff] %v6570_v39  ;;  %v6578_v55 = vsub.f32 %v4574_v52, %v5736_v22  ;;  %v4576_v52 = vld [vmem:[%s9617_s4 + $0x358] sm:$0xff] }
 0x464   : > { %v2202_v2 = vadd.f32 %v2201_v48, %v1947_v11  ;;  %v1951_v11 = vmul.f32 %v6546_v12, %v6546_v12  ;;  %9892 = vst [vmem:[#allocation65_spill] sm:$0xff] %v6578_v55  ;;  %v6586_v12 = vsub.f32 %v4575_v31, %v5736_v22  ;;  %v4577_v31 = vld [vmem:[%s9617_s4 + $0x360] sm:$0xff] }
 0x466   : > { %v2203_v16 = vadd.f32 %v2202_v2, %v1948_v25  ;;  %v1952_v25 = vmul.f32 %v6554_v38, %v6554_v38  ;;  %9893 = vst [vmem:[#allocation66_spill] sm:$0xff] %v6586_v12  ;;  %v6594_v38 = vsub.f32 %v4576_v52, %v5736_v22  ;;  %v4578_v52 = vld [vmem:[%s9617_s4 + $0x368] sm:$0xff] }
 0x468   : > { %v2204_v48 = vadd.f32 %v2203_v16, %v1949_v42  ;;  %v1953_v42 = vmul.f32 %v6562_v4, %v6562_v4  ;;  %9894 = vst [vmem:[#allocation67_spill] sm:$0xff] %v6594_v38  ;;  %v6602_v4 = vsub.f32 %v4577_v31, %v5736_v22  ;;  %v4579_v31 = vld [vmem:[%s9617_s4 + $0x370] sm:$0xff] }
 0x46a   : > { %v2205_v2 = vadd.f32 %v2204_v48, %v1950_v60  ;;  %v1954_v60 = vmul.f32 %v6570_v39, %v6570_v39  ;;  %9895 = vst [vmem:[#allocation68_spill] sm:$0xff] %v6602_v4  ;;  %v6610_v39 = vsub.f32 %v4578_v52, %v5736_v22  ;;  %v4580_v52 = vld [vmem:[%s9617_s4 + $0x378] sm:$0xff] }
 0x46c   : > { %v2206_v16 = vadd.f32 %v2205_v2, %v1951_v11  ;;  %v1955_v11 = vmul.f32 %v6578_v55, %v6578_v55  ;;  %9896 = vst [vmem:[#allocation69_spill] sm:$0xff] %v6610_v39  ;;  %v6618_v55 = vsub.f32 %v4579_v31, %v5736_v22  ;;  %v4581_v31 = vld [vmem:[%s9617_s4 + $0x380] sm:$0xff] }
 0x46e   : > { %v2207_v48 = vadd.f32 %v2206_v16, %v1952_v25  ;;  %v1956_v25 = vmul.f32 %v6586_v12, %v6586_v12  ;;  %9897 = vst [vmem:[#allocation70_spill] sm:$0xff] %v6618_v55  ;;  %v6626_v12 = vsub.f32 %v4580_v52, %v5736_v22  ;;  %v4582_v52 = vld [vmem:[%s9617_s4 + $0x388] sm:$0xff] }
 0x470   : > { %v2208_v2 = vadd.f32 %v2207_v48, %v1953_v42  ;;  %v1957_v42 = vmul.f32 %v6594_v38, %v6594_v38  ;;  %9898 = vst [vmem:[#allocation71_spill] sm:$0xff] %v6626_v12  ;;  %v6634_v38 = vsub.f32 %v4581_v31, %v5736_v22  ;;  %v4583_v31 = vld [vmem:[%s9617_s4 + $0x390] sm:$0xff] }
 0x472   : > { %v2209_v16 = vadd.f32 %v2208_v2, %v1954_v60  ;;  %v1958_v60 = vmul.f32 %v6602_v4, %v6602_v4  ;;  %9899 = vst [vmem:[#allocation72_spill] sm:$0xff] %v6634_v38  ;;  %v6642_v4 = vsub.f32 %v4582_v52, %v5736_v22  ;;  %v4584_v52 = vld [vmem:[%s9617_s4 + $0x398] sm:$0xff] }
 0x474   : > { %v2210_v48 = vadd.f32 %v2209_v16, %v1955_v11  ;;  %v1959_v11 = vmul.f32 %v6610_v39, %v6610_v39  ;;  %9900 = vst [vmem:[#allocation73_spill] sm:$0xff] %v6642_v4  ;;  %v6650_v39 = vsub.f32 %v4583_v31, %v5736_v22  ;;  %v4585_v31 = vld [vmem:[%s9617_s4 + $0x3a0] sm:$0xff] }
 0x476   : > { %v2211_v2 = vadd.f32 %v2210_v48, %v1956_v25  ;;  %v1960_v25 = vmul.f32 %v6618_v55, %v6618_v55  ;;  %9901 = vst [vmem:[#allocation74_spill] sm:$0xff] %v6650_v39  ;;  %v6658_v55 = vsub.f32 %v4584_v52, %v5736_v22  ;;  %v4586_v52 = vld [vmem:[%s9617_s4 + $0x3a8] sm:$0xff] }
 0x478   : > { %v2212_v16 = vadd.f32 %v2211_v2, %v1957_v42  ;;  %v1961_v42 = vmul.f32 %v6626_v12, %v6626_v12  ;;  %9902 = vst [vmem:[#allocation75_spill] sm:$0xff] %v6658_v55  ;;  %v6666_v12 = vsub.f32 %v4585_v31, %v5736_v22  ;;  %v4587_v31 = vld [vmem:[%s9617_s4 + $0x3b0] sm:$0xff] }
 0x47a   : > { %v2213_v48 = vadd.f32 %v2212_v16, %v1958_v60  ;;  %v1962_v60 = vmul.f32 %v6634_v38, %v6634_v38  ;;  %9903 = vst [vmem:[#allocation76_spill] sm:$0xff] %v6666_v12  ;;  %v6674_v38 = vsub.f32 %v4586_v52, %v5736_v22  ;;  %v4588_v52 = vld [vmem:[%s9617_s4 + $0x3b8] sm:$0xff] }
 0x47c   : > { %v2214_v2 = vadd.f32 %v2213_v48, %v1959_v11  ;;  %v1963_v11 = vmul.f32 %v6642_v4, %v6642_v4  ;;  %9904 = vst [vmem:[#allocation77_spill] sm:$0xff] %v6674_v38  ;;  %v6682_v4 = vsub.f32 %v4587_v31, %v5736_v22  ;;  %v4589_v31 = vld [vmem:[%s9617_s4 + $0x3c0] sm:$0xff] }
 0x47e   : > { %v2215_v16 = vadd.f32 %v2214_v2, %v1960_v25  ;;  %v1964_v25 = vmul.f32 %v6650_v39, %v6650_v39  ;;  %9905 = vst [vmem:[#allocation78_spill] sm:$0xff] %v6682_v4  ;;  %v6690_v39 = vsub.f32 %v4588_v52, %v5736_v22  ;;  %v4590_v52 = vld [vmem:[%s9617_s4 + $0x3c8] sm:$0xff] }
 0x480   : > { %v2216_v48 = vadd.f32 %v2215_v16, %v1961_v42  ;;  %v1965_v42 = vmul.f32 %v6658_v55, %v6658_v55  ;;  %9906 = vst [vmem:[#allocation79_spill] sm:$0xff] %v6690_v39  ;;  %v6698_v55 = vsub.f32 %v4589_v31, %v5736_v22  ;;  %v4591_v31 = vld [vmem:[%s9617_s4 + $0x3d0] sm:$0xff] }
 0x482   : > { %v2217_v2 = vadd.f32 %v2216_v48, %v1962_v60  ;;  %v1966_v60 = vmul.f32 %v6666_v12, %v6666_v12  ;;  %9907 = vst [vmem:[#allocation80_spill] sm:$0xff] %v6698_v55  ;;  %v6706_v12 = vsub.f32 %v4590_v52, %v5736_v22  ;;  %v4592_v52 = vld [vmem:[%s9617_s4 + $0x3d8] sm:$0xff] }
 0x484   : > { %v2218_v16 = vadd.f32 %v2217_v2, %v1963_v11  ;;  %v1967_v11 = vmul.f32 %v6674_v38, %v6674_v38  ;;  %9908 = vst [vmem:[#allocation81_spill] sm:$0xff] %v6706_v12  ;;  %v6714_v38 = vsub.f32 %v4591_v31, %v5736_v22  ;;  %v4593_v31 = vld [vmem:[%s9617_s4 + $0x3e0] sm:$0xff] }
 0x486   : > { %v2219_v48 = vadd.f32 %v2218_v16, %v1964_v25  ;;  %v1968_v25 = vmul.f32 %v6682_v4, %v6682_v4  ;;  %9909 = vst [vmem:[#allocation82_spill] sm:$0xff] %v6714_v38  ;;  %v6722_v4 = vsub.f32 %v4592_v52, %v5736_v22  ;;  %v4594_v52 = vld [vmem:[%s9617_s4 + $0x3e8] sm:$0xff] }
 0x488   : > { %v2220_v2 = vadd.f32 %v2219_v48, %v1965_v42  ;;  %v1969_v42 = vmul.f32 %v6690_v39, %v6690_v39  ;;  %9910 = vst [vmem:[#allocation83_spill] sm:$0xff] %v6722_v4  ;;  %v6730_v39 = vsub.f32 %v4593_v31, %v5736_v22  ;;  %v4595_v31 = vld [vmem:[%s9617_s4 + $0x3f0] sm:$0xff] }
 0x48a   : > { %v2221_v16 = vadd.f32 %v2220_v2, %v1966_v60  ;;  %v1970_v60 = vmul.f32 %v6698_v55, %v6698_v55  ;;  %9911 = vst [vmem:[#allocation84_spill] sm:$0xff] %v6730_v39  ;;  %v6738_v55 = vsub.f32 %v4594_v52, %v5736_v22  ;;  %v4596_v52 = vld [vmem:[%s9617_s4 + $0x3f8] sm:$0xff] }
 0x48c   : > { %v2222_v48 = vadd.f32 %v2221_v16, %v1967_v11  ;;  %v1971_v11 = vmul.f32 %v6706_v12, %v6706_v12  ;;  %9912 = vst [vmem:[#allocation85_spill] sm:$0xff] %v6738_v55  ;;  %v6746_v12 = vsub.f32 %v4595_v31, %v5736_v22  ;;  %v4597_v31 = vld [vmem:[%s9617_s4 + $0x400] sm:$0xff] }
 0x48e   : > { %v2223_v2 = vadd.f32 %v2222_v48, %v1968_v25  ;;  %v1972_v25 = vmul.f32 %v6714_v38, %v6714_v38  ;;  %9913 = vst [vmem:[#allocation86_spill] sm:$0xff] %v6746_v12  ;;  %v6754_v38 = vsub.f32 %v4596_v52, %v5736_v22  ;;  %v4598_v52 = vld [vmem:[%s9617_s4 + $0x408] sm:$0xff] }
 0x490   : > { %v2224_v16 = vadd.f32 %v2223_v2, %v1969_v42  ;;  %v1973_v42 = vmul.f32 %v6722_v4, %v6722_v4  ;;  %9914 = vst [vmem:[#allocation87_spill] sm:$0xff] %v6754_v38  ;;  %v6762_v4 = vsub.f32 %v4597_v31, %v5736_v22  ;;  %v4599_v31 = vld [vmem:[%s9617_s4 + $0x410] sm:$0xff] }
 0x492   : > { %v2225_v48 = vadd.f32 %v2224_v16, %v1970_v60  ;;  %v1974_v60 = vmul.f32 %v6730_v39, %v6730_v39  ;;  %9915 = vst [vmem:[#allocation88_spill] sm:$0xff] %v6762_v4  ;;  %v6770_v39 = vsub.f32 %v4598_v52, %v5736_v22  ;;  %v4600_v52 = vld [vmem:[%s9617_s4 + $0x418] sm:$0xff] }
 0x494   : > { %v2226_v2 = vadd.f32 %v2225_v48, %v1971_v11  ;;  %v1975_v11 = vmul.f32 %v6738_v55, %v6738_v55  ;;  %9916 = vst [vmem:[#allocation89_spill] sm:$0xff] %v6770_v39  ;;  %v6778_v55 = vsub.f32 %v4599_v31, %v5736_v22  ;;  %v4601_v31 = vld [vmem:[%s9617_s4 + $0x420] sm:$0xff] }
 0x496   : > { %v2227_v16 = vadd.f32 %v2226_v2, %v1972_v25  ;;  %v1976_v25 = vmul.f32 %v6746_v12, %v6746_v12  ;;  %9917 = vst [vmem:[#allocation90_spill] sm:$0xff] %v6778_v55  ;;  %v6786_v12 = vsub.f32 %v4600_v52, %v5736_v22  ;;  %v4602_v52 = vld [vmem:[%s9617_s4 + $0x428] sm:$0xff] }
 0x498   : > { %v2228_v48 = vadd.f32 %v2227_v16, %v1973_v42  ;;  %v1977_v42 = vmul.f32 %v6754_v38, %v6754_v38  ;;  %9918 = vst [vmem:[#allocation91_spill] sm:$0xff] %v6786_v12  ;;  %v6794_v38 = vsub.f32 %v4601_v31, %v5736_v22  ;;  %v4603_v31 = vld [vmem:[%s9617_s4 + $0x430] sm:$0xff] }
 0x49a   : > { %v2229_v2 = vadd.f32 %v2228_v48, %v1974_v60  ;;  %v1978_v60 = vmul.f32 %v6762_v4, %v6762_v4  ;;  %9919 = vst [vmem:[#allocation92_spill] sm:$0xff] %v6794_v38  ;;  %v6802_v4 = vsub.f32 %v4602_v52, %v5736_v22  ;;  %v4604_v52 = vld [vmem:[%s9617_s4 + $0x438] sm:$0xff] }
 0x49c   : > { %v2230_v16 = vadd.f32 %v2229_v2, %v1975_v11  ;;  %v1979_v11 = vmul.f32 %v6770_v39, %v6770_v39  ;;  %9920 = vst [vmem:[#allocation93_spill] sm:$0xff] %v6802_v4  ;;  %v6810_v39 = vsub.f32 %v4603_v31, %v5736_v22  ;;  %v4605_v31 = vld [vmem:[%s9617_s4 + $0x440] sm:$0xff] }
 0x49e   : > { %v2231_v48 = vadd.f32 %v2230_v16, %v1976_v25  ;;  %v1980_v25 = vmul.f32 %v6778_v55, %v6778_v55  ;;  %9921 = vst [vmem:[#allocation94_spill] sm:$0xff] %v6810_v39  ;;  %v6818_v55 = vsub.f32 %v4604_v52, %v5736_v22  ;;  %v4606_v52 = vld [vmem:[%s9617_s4 + $0x448] sm:$0xff] }
 0x4a0   : > { %v2232_v2 = vadd.f32 %v2231_v48, %v1977_v42  ;;  %v1981_v42 = vmul.f32 %v6786_v12, %v6786_v12  ;;  %9922 = vst [vmem:[#allocation95_spill] sm:$0xff] %v6818_v55  ;;  %v6826_v12 = vsub.f32 %v4605_v31, %v5736_v22  ;;  %v4607_v31 = vld [vmem:[%s9617_s4 + $0x450] sm:$0xff] }
 0x4a2   : > { %v2233_v16 = vadd.f32 %v2232_v2, %v1978_v60  ;;  %v1982_v60 = vmul.f32 %v6794_v38, %v6794_v38  ;;  %9923 = vst [vmem:[#allocation96_spill] sm:$0xff] %v6826_v12  ;;  %v6834_v38 = vsub.f32 %v4606_v52, %v5736_v22  ;;  %v4608_v52 = vld [vmem:[%s9617_s4 + $0x458] sm:$0xff] }
 0x4a4   : > { %v2234_v48 = vadd.f32 %v2233_v16, %v1979_v11  ;;  %v1983_v11 = vmul.f32 %v6802_v4, %v6802_v4  ;;  %9924 = vst [vmem:[#allocation97_spill] sm:$0xff] %v6834_v38  ;;  %v6842_v4 = vsub.f32 %v4607_v31, %v5736_v22  ;;  %v4609_v31 = vld [vmem:[%s9617_s4 + $0x460] sm:$0xff] }
 0x4a6   : > { %v2235_v2 = vadd.f32 %v2234_v48, %v1980_v25  ;;  %v1984_v25 = vmul.f32 %v6810_v39, %v6810_v39  ;;  %9925 = vst [vmem:[#allocation98_spill] sm:$0xff] %v6842_v4  ;;  %v6850_v39 = vsub.f32 %v4608_v52, %v5736_v22  ;;  %v4610_v52 = vld [vmem:[%s9617_s4 + $0x468] sm:$0xff] }
 0x4a8   : > { %v2236_v16 = vadd.f32 %v2235_v2, %v1981_v42  ;;  %v1985_v42 = vmul.f32 %v6818_v55, %v6818_v55  ;;  %9926 = vst [vmem:[#allocation99_spill] sm:$0xff] %v6850_v39  ;;  %v6858_v55 = vsub.f32 %v4609_v31, %v5736_v22  ;;  %v4611_v31 = vld [vmem:[%s9617_s4 + $0x470] sm:$0xff] }
 0x4aa   : > { %v2237_v48 = vadd.f32 %v2236_v16, %v1982_v60  ;;  %v1986_v60 = vmul.f32 %v6826_v12, %v6826_v12  ;;  %9927 = vst [vmem:[#allocation100_spill] sm:$0xff] %v6858_v55  ;;  %v6866_v12 = vsub.f32 %v4610_v52, %v5736_v22  ;;  %v4612_v52 = vld [vmem:[%s9617_s4 + $0x478] sm:$0xff] }
 0x4ac   : > { %v2238_v2 = vadd.f32 %v2237_v48, %v1983_v11  ;;  %v1987_v11 = vmul.f32 %v6834_v38, %v6834_v38  ;;  %9928 = vst [vmem:[#allocation101_spill] sm:$0xff] %v6866_v12  ;;  %v6874_v38 = vsub.f32 %v4611_v31, %v5736_v22  ;;  %v4613_v31 = vld [vmem:[%s9617_s4 + $0x480] sm:$0xff] }
 0x4ae   : > { %v2239_v16 = vadd.f32 %v2238_v2, %v1984_v25  ;;  %v1988_v25 = vmul.f32 %v6842_v4, %v6842_v4  ;;  %9929 = vst [vmem:[#allocation102_spill] sm:$0xff] %v6874_v38  ;;  %v6882_v4 = vsub.f32 %v4612_v52, %v5736_v22  ;;  %v4614_v52 = vld [vmem:[%s9617_s4 + $0x488] sm:$0xff] }
 0x4b0   : > { %v2240_v48 = vadd.f32 %v2239_v16, %v1985_v42  ;;  %v1989_v42 = vmul.f32 %v6850_v39, %v6850_v39  ;;  %9930 = vst [vmem:[#allocation103_spill] sm:$0xff] %v6882_v4  ;;  %v6890_v39 = vsub.f32 %v4613_v31, %v5736_v22  ;;  %v4615_v31 = vld [vmem:[%s9617_s4 + $0x490] sm:$0xff] }
 0x4b2   : > { %v2241_v2 = vadd.f32 %v2240_v48, %v1986_v60  ;;  %v1990_v60 = vmul.f32 %v6858_v55, %v6858_v55  ;;  %9931 = vst [vmem:[#allocation104_spill] sm:$0xff] %v6890_v39  ;;  %v6898_v55 = vsub.f32 %v4614_v52, %v5736_v22  ;;  %v4616_v52 = vld [vmem:[%s9617_s4 + $0x498] sm:$0xff] }
 0x4b4   : > { %v2242_v16 = vadd.f32 %v2241_v2, %v1987_v11  ;;  %v1991_v11 = vmul.f32 %v6866_v12, %v6866_v12  ;;  %9932 = vst [vmem:[#allocation105_spill] sm:$0xff] %v6898_v55  ;;  %v6906_v12 = vsub.f32 %v4615_v31, %v5736_v22  ;;  %v4617_v31 = vld [vmem:[%s9617_s4 + $0x4a0] sm:$0xff] }
 0x4b6   : > { %v2243_v48 = vadd.f32 %v2242_v16, %v1988_v25  ;;  %v1992_v25 = vmul.f32 %v6874_v38, %v6874_v38  ;;  %9933 = vst [vmem:[#allocation106_spill] sm:$0xff] %v6906_v12  ;;  %v6914_v38 = vsub.f32 %v4616_v52, %v5736_v22  ;;  %v4618_v52 = vld [vmem:[%s9617_s4 + $0x4a8] sm:$0xff] }
 0x4b8   : > { %v2244_v2 = vadd.f32 %v2243_v48, %v1989_v42  ;;  %v1993_v42 = vmul.f32 %v6882_v4, %v6882_v4  ;;  %9934 = vst [vmem:[#allocation107_spill] sm:$0xff] %v6914_v38  ;;  %v6922_v4 = vsub.f32 %v4617_v31, %v5736_v22  ;;  %v4619_v31 = vld [vmem:[%s9617_s4 + $0x4b0] sm:$0xff] }
 0x4ba   : > { %v2245_v16 = vadd.f32 %v2244_v2, %v1990_v60  ;;  %v1994_v60 = vmul.f32 %v6890_v39, %v6890_v39  ;;  %9935 = vst [vmem:[#allocation108_spill] sm:$0xff] %v6922_v4  ;;  %v6930_v39 = vsub.f32 %v4618_v52, %v5736_v22  ;;  %v4620_v52 = vld [vmem:[%s9617_s4 + $0x4b8] sm:$0xff] }
 0x4bc   : > { %v2246_v48 = vadd.f32 %v2245_v16, %v1991_v11  ;;  %v1995_v11 = vmul.f32 %v6898_v55, %v6898_v55  ;;  %9936 = vst [vmem:[#allocation109_spill] sm:$0xff] %v6930_v39  ;;  %v6938_v55 = vsub.f32 %v4619_v31, %v5736_v22  ;;  %v4621_v31 = vld [vmem:[%s9617_s4 + $0x4c0] sm:$0xff] }
 0x4be   : > { %v2247_v2 = vadd.f32 %v2246_v48, %v1992_v25  ;;  %v1996_v25 = vmul.f32 %v6906_v12, %v6906_v12  ;;  %9937 = vst [vmem:[#allocation110_spill] sm:$0xff] %v6938_v55  ;;  %v6946_v12 = vsub.f32 %v4620_v52, %v5736_v22  ;;  %v4622_v52 = vld [vmem:[%s9617_s4 + $0x4c8] sm:$0xff] }
 0x4c0   : > { %v2248_v16 = vadd.f32 %v2247_v2, %v1993_v42  ;;  %v1997_v42 = vmul.f32 %v6914_v38, %v6914_v38  ;;  %9938 = vst [vmem:[#allocation111_spill] sm:$0xff] %v6946_v12  ;;  %v6954_v38 = vsub.f32 %v4621_v31, %v5736_v22  ;;  %v4623_v31 = vld [vmem:[%s9617_s4 + $0x4d0] sm:$0xff] }
 0x4c2   : > { %v2249_v48 = vadd.f32 %v2248_v16, %v1994_v60  ;;  %v1998_v60 = vmul.f32 %v6922_v4, %v6922_v4  ;;  %9939 = vst [vmem:[#allocation112_spill] sm:$0xff] %v6954_v38  ;;  %v6962_v4 = vsub.f32 %v4622_v52, %v5736_v22  ;;  %v4624_v52 = vld [vmem:[%s9617_s4 + $0x4d8] sm:$0xff] }
 0x4c4   : > { %v2250_v2 = vadd.f32 %v2249_v48, %v1995_v11  ;;  %v1999_v11 = vmul.f32 %v6930_v39, %v6930_v39  ;;  %9940 = vst [vmem:[#allocation113_spill] sm:$0xff] %v6962_v4  ;;  %v6970_v39 = vsub.f32 %v4623_v31, %v5736_v22  ;;  %v4625_v31 = vld [vmem:[%s9617_s4 + $0x4e0] sm:$0xff] }
 0x4c6   : > { %v2251_v16 = vadd.f32 %v2250_v2, %v1996_v25  ;;  %v2000_v25 = vmul.f32 %v6938_v55, %v6938_v55  ;;  %9941 = vst [vmem:[#allocation114_spill] sm:$0xff] %v6970_v39  ;;  %v6978_v55 = vsub.f32 %v4624_v52, %v5736_v22  ;;  %v4626_v52 = vld [vmem:[%s9617_s4 + $0x4e8] sm:$0xff] }
 0x4c8   : > { %v2252_v48 = vadd.f32 %v2251_v16, %v1997_v42  ;;  %v2001_v42 = vmul.f32 %v6946_v12, %v6946_v12  ;;  %9942 = vst [vmem:[#allocation115_spill] sm:$0xff] %v6978_v55  ;;  %v6986_v12 = vsub.f32 %v4625_v31, %v5736_v22  ;;  %v4627_v31 = vld [vmem:[%s9617_s4 + $0x4f0] sm:$0xff] }
 0x4ca   : > { %v2253_v2 = vadd.f32 %v2252_v48, %v1998_v60  ;;  %v2002_v60 = vmul.f32 %v6954_v38, %v6954_v38  ;;  %9943 = vst [vmem:[#allocation116_spill] sm:$0xff] %v6986_v12  ;;  %v6994_v38 = vsub.f32 %v4626_v52, %v5736_v22  ;;  %v4628_v52 = vld [vmem:[%s9617_s4 + $0x4f8] sm:$0xff] }
 0x4cc   : > { %v2254_v16 = vadd.f32 %v2253_v2, %v1999_v11  ;;  %v2003_v11 = vmul.f32 %v6962_v4, %v6962_v4  ;;  %9944 = vst [vmem:[#allocation117_spill] sm:$0xff] %v6994_v38  ;;  %v7002_v4 = vsub.f32 %v4627_v31, %v5736_v22  ;;  %v4629_v31 = vld [vmem:[%s9617_s4 + $0x500] sm:$0xff] }
 0x4ce   : > { %v2255_v48 = vadd.f32 %v2254_v16, %v2000_v25  ;;  %v2004_v25 = vmul.f32 %v6970_v39, %v6970_v39  ;;  %9945 = vst [vmem:[#allocation118_spill] sm:$0xff] %v7002_v4  ;;  %v7010_v39 = vsub.f32 %v4628_v52, %v5736_v22  ;;  %v4630_v52 = vld [vmem:[%s9617_s4 + $0x508] sm:$0xff] }
 0x4d0   : > { %v2256_v2 = vadd.f32 %v2255_v48, %v2001_v42  ;;  %v2005_v42 = vmul.f32 %v6978_v55, %v6978_v55  ;;  %9946 = vst [vmem:[#allocation119_spill] sm:$0xff] %v7010_v39  ;;  %v7018_v55 = vsub.f32 %v4629_v31, %v5736_v22  ;;  %v4631_v31 = vld [vmem:[%s9617_s4 + $0x510] sm:$0xff] }
 0x4d2   : > { %v2257_v16 = vadd.f32 %v2256_v2, %v2002_v60  ;;  %v2006_v60 = vmul.f32 %v6986_v12, %v6986_v12  ;;  %9947 = vst [vmem:[#allocation120_spill] sm:$0xff] %v7018_v55  ;;  %v7026_v12 = vsub.f32 %v4630_v52, %v5736_v22  ;;  %v4632_v52 = vld [vmem:[%s9617_s4 + $0x518] sm:$0xff] }
 0x4d4   : > { %v2258_v48 = vadd.f32 %v2257_v16, %v2003_v11  ;;  %v2007_v11 = vmul.f32 %v6994_v38, %v6994_v38  ;;  %9948 = vst [vmem:[#allocation121_spill] sm:$0xff] %v7026_v12  ;;  %v7034_v38 = vsub.f32 %v4631_v31, %v5736_v22  ;;  %v4633_v31 = vld [vmem:[%s9617_s4 + $0x520] sm:$0xff] }
 0x4d6   : > { %v2259_v2 = vadd.f32 %v2258_v48, %v2004_v25  ;;  %v2008_v25 = vmul.f32 %v7002_v4, %v7002_v4  ;;  %9949 = vst [vmem:[#allocation122_spill] sm:$0xff] %v7034_v38  ;;  %v7042_v4 = vsub.f32 %v4632_v52, %v5736_v22  ;;  %v4634_v52 = vld [vmem:[%s9617_s4 + $0x528] sm:$0xff] }
 0x4d8   : > { %v2260_v16 = vadd.f32 %v2259_v2, %v2005_v42  ;;  %v2009_v42 = vmul.f32 %v7010_v39, %v7010_v39  ;;  %9950 = vst [vmem:[#allocation123_spill] sm:$0xff] %v7042_v4  ;;  %v7050_v39 = vsub.f32 %v4633_v31, %v5736_v22  ;;  %v4635_v31 = vld [vmem:[%s9617_s4 + $0x530] sm:$0xff] }
 0x4da   : > { %v2261_v48 = vadd.f32 %v2260_v16, %v2006_v60  ;;  %v2010_v60 = vmul.f32 %v7018_v55, %v7018_v55  ;;  %9951 = vst [vmem:[#allocation124_spill] sm:$0xff] %v7050_v39  ;;  %v7058_v55 = vsub.f32 %v4634_v52, %v5736_v22  ;;  %v4636_v52 = vld [vmem:[%s9617_s4 + $0x538] sm:$0xff] }
 0x4dc   : > { %v2262_v2 = vadd.f32 %v2261_v48, %v2007_v11  ;;  %v2011_v11 = vmul.f32 %v7026_v12, %v7026_v12  ;;  %9952 = vst [vmem:[#allocation125_spill] sm:$0xff] %v7058_v55  ;;  %v7066_v12 = vsub.f32 %v4635_v31, %v5736_v22  ;;  %v4637_v31 = vld [vmem:[%s9617_s4 + $0x540] sm:$0xff] }
 0x4de   : > { %v2263_v16 = vadd.f32 %v2262_v2, %v2008_v25  ;;  %v2012_v25 = vmul.f32 %v7034_v38, %v7034_v38  ;;  %9953 = vst [vmem:[#allocation126_spill] sm:$0xff] %v7066_v12  ;;  %v7074_v38 = vsub.f32 %v4636_v52, %v5736_v22  ;;  %v4638_v52 = vld [vmem:[%s9617_s4 + $0x548] sm:$0xff] }
 0x4e0   : > { %v2264_v48 = vadd.f32 %v2263_v16, %v2009_v42  ;;  %v2013_v42 = vmul.f32 %v7042_v4, %v7042_v4  ;;  %9954 = vst [vmem:[#allocation127_spill] sm:$0xff] %v7074_v38  ;;  %v7082_v4 = vsub.f32 %v4637_v31, %v5736_v22  ;;  %v4639_v31 = vld [vmem:[%s9617_s4 + $0x550] sm:$0xff] }
 0x4e2   : > { %v2265_v2 = vadd.f32 %v2264_v48, %v2010_v60  ;;  %v2014_v60 = vmul.f32 %v7050_v39, %v7050_v39  ;;  %9955 = vst [vmem:[#allocation128_spill] sm:$0xff] %v7082_v4  ;;  %v7090_v39 = vsub.f32 %v4638_v52, %v5736_v22  ;;  %v4640_v52 = vld [vmem:[%s9617_s4 + $0x558] sm:$0xff] }
 0x4e4   : > { %v2266_v16 = vadd.f32 %v2265_v2, %v2011_v11  ;;  %v2015_v11 = vmul.f32 %v7058_v55, %v7058_v55  ;;  %9956 = vst [vmem:[#allocation129_spill] sm:$0xff] %v7090_v39  ;;  %v7098_v55 = vsub.f32 %v4639_v31, %v5736_v22  ;;  %v4641_v31 = vld [vmem:[%s9617_s4 + $0x560] sm:$0xff] }
 0x4e6   : > { %v2267_v48 = vadd.f32 %v2266_v16, %v2012_v25  ;;  %v2016_v25 = vmul.f32 %v7066_v12, %v7066_v12  ;;  %9957 = vst [vmem:[#allocation130_spill] sm:$0xff] %v7098_v55  ;;  %v7106_v12 = vsub.f32 %v4640_v52, %v5736_v22  ;;  %v4642_v52 = vld [vmem:[%s9617_s4 + $0x568] sm:$0xff] }
 0x4e8   : > { %v2268_v2 = vadd.f32 %v2267_v48, %v2013_v42  ;;  %v2017_v42 = vmul.f32 %v7074_v38, %v7074_v38  ;;  %9958 = vst [vmem:[#allocation131_spill] sm:$0xff] %v7106_v12  ;;  %v7114_v38 = vsub.f32 %v4641_v31, %v5736_v22  ;;  %v4643_v31 = vld [vmem:[%s9617_s4 + $0x570] sm:$0xff] }
 0x4ea   : > { %v2269_v16 = vadd.f32 %v2268_v2, %v2014_v60  ;;  %v2018_v60 = vmul.f32 %v7082_v4, %v7082_v4  ;;  %9959 = vst [vmem:[#allocation132_spill] sm:$0xff] %v7114_v38  ;;  %v7122_v4 = vsub.f32 %v4642_v52, %v5736_v22  ;;  %v4644_v52 = vld [vmem:[%s9617_s4 + $0x578] sm:$0xff] }
 0x4ec   : > { %v2270_v48 = vadd.f32 %v2269_v16, %v2015_v11  ;;  %v2019_v11 = vmul.f32 %v7090_v39, %v7090_v39  ;;  %9960 = vst [vmem:[#allocation133_spill] sm:$0xff] %v7122_v4  ;;  %v7130_v39 = vsub.f32 %v4643_v31, %v5736_v22  ;;  %v4645_v31 = vld [vmem:[%s9617_s4 + $0x580] sm:$0xff] }
 0x4ee   : > { %v2271_v2 = vadd.f32 %v2270_v48, %v2016_v25  ;;  %v2020_v25 = vmul.f32 %v7098_v55, %v7098_v55  ;;  %9961 = vst [vmem:[#allocation134_spill] sm:$0xff] %v7130_v39  ;;  %v7138_v55 = vsub.f32 %v4644_v52, %v5736_v22  ;;  %v4646_v52 = vld [vmem:[%s9617_s4 + $0x588] sm:$0xff] }
 0x4f0   : > { %v2272_v16 = vadd.f32 %v2271_v2, %v2017_v42  ;;  %v2021_v42 = vmul.f32 %v7106_v12, %v7106_v12  ;;  %9962 = vst [vmem:[#allocation135_spill] sm:$0xff] %v7138_v55  ;;  %v7146_v12 = vsub.f32 %v4645_v31, %v5736_v22  ;;  %v4647_v31 = vld [vmem:[%s9617_s4 + $0x590] sm:$0xff] }
 0x4f2   : > { %v2273_v48 = vadd.f32 %v2272_v16, %v2018_v60  ;;  %v2022_v60 = vmul.f32 %v7114_v38, %v7114_v38  ;;  %9963 = vst [vmem:[#allocation136_spill] sm:$0xff] %v7146_v12  ;;  %v7154_v38 = vsub.f32 %v4646_v52, %v5736_v22  ;;  %v4648_v52 = vld [vmem:[%s9617_s4 + $0x598] sm:$0xff] }
 0x4f4   : > { %v2274_v2 = vadd.f32 %v2273_v48, %v2019_v11  ;;  %v2023_v11 = vmul.f32 %v7122_v4, %v7122_v4  ;;  %9964 = vst [vmem:[#allocation137_spill] sm:$0xff] %v7154_v38  ;;  %v7162_v4 = vsub.f32 %v4647_v31, %v5736_v22  ;;  %v4649_v31 = vld [vmem:[%s9617_s4 + $0x5a0] sm:$0xff] }
 0x4f6   : > { %v2275_v16 = vadd.f32 %v2274_v2, %v2020_v25  ;;  %v2024_v25 = vmul.f32 %v7130_v39, %v7130_v39  ;;  %9965 = vst [vmem:[#allocation138_spill] sm:$0xff] %v7162_v4  ;;  %v7170_v39 = vsub.f32 %v4648_v52, %v5736_v22  ;;  %v4650_v52 = vld [vmem:[%s9617_s4 + $0x5a8] sm:$0xff] }
 0x4f8   : > { %v2276_v48 = vadd.f32 %v2275_v16, %v2021_v42  ;;  %v2025_v42 = vmul.f32 %v7138_v55, %v7138_v55  ;;  %9966 = vst [vmem:[#allocation139_spill] sm:$0xff] %v7170_v39  ;;  %v7178_v55 = vsub.f32 %v4649_v31, %v5736_v22  ;;  %v4651_v31 = vld [vmem:[%s9617_s4 + $0x5b0] sm:$0xff] }
 0x4fa   : > { %v2277_v2 = vadd.f32 %v2276_v48, %v2022_v60  ;;  %v2026_v60 = vmul.f32 %v7146_v12, %v7146_v12  ;;  %9967 = vst [vmem:[#allocation140_spill] sm:$0xff] %v7178_v55  ;;  %v7186_v12 = vsub.f32 %v4650_v52, %v5736_v22  ;;  %v4652_v52 = vld [vmem:[%s9617_s4 + $0x5b8] sm:$0xff] }
 0x4fc   : > { %v2278_v16 = vadd.f32 %v2277_v2, %v2023_v11  ;;  %v2027_v11 = vmul.f32 %v7154_v38, %v7154_v38  ;;  %9968 = vst [vmem:[#allocation141_spill] sm:$0xff] %v7186_v12  ;;  %v7194_v38 = vsub.f32 %v4651_v31, %v5736_v22  ;;  %v4653_v31 = vld [vmem:[%s9617_s4 + $0x5c0] sm:$0xff] }
 0x4fe   : > { %v2279_v48 = vadd.f32 %v2278_v16, %v2024_v25  ;;  %v2028_v25 = vmul.f32 %v7162_v4, %v7162_v4  ;;  %9969 = vst [vmem:[#allocation142_spill] sm:$0xff] %v7194_v38  ;;  %v7202_v4 = vsub.f32 %v4652_v52, %v5736_v22  ;;  %v4654_v52 = vld [vmem:[%s9617_s4 + $0x5c8] sm:$0xff] }
 0x500   : > { %v2280_v2 = vadd.f32 %v2279_v48, %v2025_v42  ;;  %v2029_v42 = vmul.f32 %v7170_v39, %v7170_v39  ;;  %9970 = vst [vmem:[#allocation143_spill] sm:$0xff] %v7202_v4  ;;  %v7210_v39 = vsub.f32 %v4653_v31, %v5736_v22  ;;  %v4655_v31 = vld [vmem:[%s9617_s4 + $0x5d0] sm:$0xff] }
 0x502   : > { %v2281_v16 = vadd.f32 %v2280_v2, %v2026_v60  ;;  %v2030_v60 = vmul.f32 %v7178_v55, %v7178_v55  ;;  %9971 = vst [vmem:[#allocation144_spill] sm:$0xff] %v7210_v39  ;;  %v7218_v55 = vsub.f32 %v4654_v52, %v5736_v22  ;;  %v4656_v52 = vld [vmem:[%s9617_s4 + $0x5d8] sm:$0xff] }
 0x504   : > { %v2282_v48 = vadd.f32 %v2281_v16, %v2027_v11  ;;  %v2031_v11 = vmul.f32 %v7186_v12, %v7186_v12  ;;  %9972 = vst [vmem:[#allocation145_spill] sm:$0xff] %v7218_v55  ;;  %v7226_v12 = vsub.f32 %v4655_v31, %v5736_v22  ;;  %v4657_v31 = vld [vmem:[%s9617_s4 + $0x5e0] sm:$0xff] }
 0x506   : > { %v2283_v2 = vadd.f32 %v2282_v48, %v2028_v25  ;;  %v2032_v25 = vmul.f32 %v7194_v38, %v7194_v38  ;;  %9973 = vst [vmem:[#allocation146_spill] sm:$0xff] %v7226_v12  ;;  %v7234_v38 = vsub.f32 %v4656_v52, %v5736_v22  ;;  %v4658_v52 = vld [vmem:[%s9617_s4 + $0x5e8] sm:$0xff] }
 0x508   : > { %v2284_v16 = vadd.f32 %v2283_v2, %v2029_v42  ;;  %v2033_v42 = vmul.f32 %v7202_v4, %v7202_v4  ;;  %9974 = vst [vmem:[#allocation147_spill] sm:$0xff] %v7234_v38  ;;  %v7242_v4 = vsub.f32 %v4657_v31, %v5736_v22  ;;  %v4659_v31 = vld [vmem:[%s9617_s4 + $0x5f0] sm:$0xff] }
 0x50a   : > { %v2285_v48 = vadd.f32 %v2284_v16, %v2030_v60  ;;  %v2034_v60 = vmul.f32 %v7210_v39, %v7210_v39  ;;  %9975 = vst [vmem:[#allocation148_spill] sm:$0xff] %v7242_v4  ;;  %v7250_v39 = vsub.f32 %v4658_v52, %v5736_v22  ;;  %v4660_v52 = vld [vmem:[%s9617_s4 + $0x5f8] sm:$0xff] }
 0x50c   : > { %v2286_v2 = vadd.f32 %v2285_v48, %v2031_v11  ;;  %v2035_v11 = vmul.f32 %v7218_v55, %v7218_v55  ;;  %9976 = vst [vmem:[#allocation149_spill] sm:$0xff] %v7250_v39  ;;  %v7258_v55 = vsub.f32 %v4659_v31, %v5736_v22  ;;  %v4661_v31 = vld [vmem:[%s9617_s4 + $0x600] sm:$0xff] }
 0x50e   : > { %v2287_v16 = vadd.f32 %v2286_v2, %v2032_v25  ;;  %v2036_v25 = vmul.f32 %v7226_v12, %v7226_v12  ;;  %9977 = vst [vmem:[#allocation150_spill] sm:$0xff] %v7258_v55  ;;  %v7266_v12 = vsub.f32 %v4660_v52, %v5736_v22  ;;  %v4662_v52 = vld [vmem:[%s9617_s4 + $0x608] sm:$0xff] }
 0x510   : > { %v2288_v48 = vadd.f32 %v2287_v16, %v2033_v42  ;;  %v2037_v42 = vmul.f32 %v7234_v38, %v7234_v38  ;;  %9978 = vst [vmem:[#allocation151_spill] sm:$0xff] %v7266_v12  ;;  %v7274_v38 = vsub.f32 %v4661_v31, %v5736_v22  ;;  %v4663_v31 = vld [vmem:[%s9617_s4 + $0x610] sm:$0xff] }
 0x512   : > { %v2289_v2 = vadd.f32 %v2288_v48, %v2034_v60  ;;  %v2038_v60 = vmul.f32 %v7242_v4, %v7242_v4  ;;  %9979 = vst [vmem:[#allocation152_spill] sm:$0xff] %v7274_v38  ;;  %v7282_v4 = vsub.f32 %v4662_v52, %v5736_v22  ;;  %v4664_v52 = vld [vmem:[%s9617_s4 + $0x618] sm:$0xff] }
 0x514   : > { %v2290_v16 = vadd.f32 %v2289_v2, %v2035_v11  ;;  %v2039_v11 = vmul.f32 %v7250_v39, %v7250_v39  ;;  %9980 = vst [vmem:[#allocation153_spill] sm:$0xff] %v7282_v4  ;;  %v7290_v39 = vsub.f32 %v4663_v31, %v5736_v22  ;;  %v4665_v31 = vld [vmem:[%s9617_s4 + $0x620] sm:$0xff] }
 0x516   : > { %v2291_v48 = vadd.f32 %v2290_v16, %v2036_v25  ;;  %v2040_v25 = vmul.f32 %v7258_v55, %v7258_v55  ;;  %9981 = vst [vmem:[#allocation154_spill] sm:$0xff] %v7290_v39  ;;  %v7298_v55 = vsub.f32 %v4664_v52, %v5736_v22  ;;  %v4666_v52 = vld [vmem:[%s9617_s4 + $0x628] sm:$0xff] }
 0x518   : > { %v2292_v2 = vadd.f32 %v2291_v48, %v2037_v42  ;;  %v2041_v42 = vmul.f32 %v7266_v12, %v7266_v12  ;;  %9982 = vst [vmem:[#allocation155_spill] sm:$0xff] %v7298_v55  ;;  %v7306_v12 = vsub.f32 %v4665_v31, %v5736_v22  ;;  %v4667_v31 = vld [vmem:[%s9617_s4 + $0x630] sm:$0xff] }
 0x51a   : > { %v2293_v16 = vadd.f32 %v2292_v2, %v2038_v60  ;;  %v2042_v60 = vmul.f32 %v7274_v38, %v7274_v38  ;;  %9983 = vst [vmem:[#allocation156_spill] sm:$0xff] %v7306_v12  ;;  %v7314_v38 = vsub.f32 %v4666_v52, %v5736_v22  ;;  %v4668_v52 = vld [vmem:[%s9617_s4 + $0x638] sm:$0xff] }
 0x51c   : > { %v2294_v48 = vadd.f32 %v2293_v16, %v2039_v11  ;;  %v2043_v11 = vmul.f32 %v7282_v4, %v7282_v4  ;;  %9984 = vst [vmem:[#allocation157_spill] sm:$0xff] %v7314_v38  ;;  %v7322_v4 = vsub.f32 %v4667_v31, %v5736_v22  ;;  %v4669_v31 = vld [vmem:[%s9617_s4 + $0x640] sm:$0xff] }
 0x51e   : > { %v2295_v2 = vadd.f32 %v2294_v48, %v2040_v25  ;;  %v2044_v25 = vmul.f32 %v7290_v39, %v7290_v39  ;;  %9985 = vst [vmem:[#allocation158_spill] sm:$0xff] %v7322_v4  ;;  %v7330_v39 = vsub.f32 %v4668_v52, %v5736_v22  ;;  %v4670_v52 = vld [vmem:[%s9617_s4 + $0x648] sm:$0xff] }
 0x520   : > { %v2296_v16 = vadd.f32 %v2295_v2, %v2041_v42  ;;  %v2045_v42 = vmul.f32 %v7298_v55, %v7298_v55  ;;  %9986 = vst [vmem:[#allocation159_spill] sm:$0xff] %v7330_v39  ;;  %v7338_v55 = vsub.f32 %v4669_v31, %v5736_v22  ;;  %v4671_v31 = vld [vmem:[%s9617_s4 + $0x650] sm:$0xff] }
 0x522   : > { %v2297_v48 = vadd.f32 %v2296_v16, %v2042_v60  ;;  %v2046_v60 = vmul.f32 %v7306_v12, %v7306_v12  ;;  %9987 = vst [vmem:[#allocation160_spill] sm:$0xff] %v7338_v55  ;;  %v7346_v12 = vsub.f32 %v4670_v52, %v5736_v22  ;;  %v4672_v52 = vld [vmem:[%s9617_s4 + $0x658] sm:$0xff] }
 0x524   : > { %v2298_v2 = vadd.f32 %v2297_v48, %v2043_v11  ;;  %v2047_v11 = vmul.f32 %v7314_v38, %v7314_v38  ;;  %9988 = vst [vmem:[#allocation161_spill] sm:$0xff] %v7346_v12  ;;  %v7354_v38 = vsub.f32 %v4671_v31, %v5736_v22  ;;  %v4673_v31 = vld [vmem:[%s9617_s4 + $0x660] sm:$0xff] }
 0x526   : > { %v2299_v16 = vadd.f32 %v2298_v2, %v2044_v25  ;;  %v2048_v25 = vmul.f32 %v7322_v4, %v7322_v4  ;;  %9989 = vst [vmem:[#allocation162_spill] sm:$0xff] %v7354_v38  ;;  %v7362_v4 = vsub.f32 %v4672_v52, %v5736_v22  ;;  %v4674_v52 = vld [vmem:[%s9617_s4 + $0x668] sm:$0xff] }
 0x528   : > { %v2300_v48 = vadd.f32 %v2299_v16, %v2045_v42  ;;  %v2049_v42 = vmul.f32 %v7330_v39, %v7330_v39  ;;  %9990 = vst [vmem:[#allocation163_spill] sm:$0xff] %v7362_v4  ;;  %v7370_v39 = vsub.f32 %v4673_v31, %v5736_v22  ;;  %v4675_v31 = vld [vmem:[%s9617_s4 + $0x670] sm:$0xff] }
 0x52a   : > { %v2301_v2 = vadd.f32 %v2300_v48, %v2046_v60  ;;  %v2050_v60 = vmul.f32 %v7338_v55, %v7338_v55  ;;  %9991 = vst [vmem:[#allocation164_spill] sm:$0xff] %v7370_v39  ;;  %v7378_v55 = vsub.f32 %v4674_v52, %v5736_v22  ;;  %v4676_v52 = vld [vmem:[%s9617_s4 + $0x678] sm:$0xff] }
 0x52c   : > { %v2302_v16 = vadd.f32 %v2301_v2, %v2047_v11  ;;  %v2051_v11 = vmul.f32 %v7346_v12, %v7346_v12  ;;  %9992 = vst [vmem:[#allocation165_spill] sm:$0xff] %v7378_v55  ;;  %v7386_v12 = vsub.f32 %v4675_v31, %v5736_v22  ;;  %v4677_v31 = vld [vmem:[%s9617_s4 + $0x680] sm:$0xff] }
 0x52e   : > { %v2303_v48 = vadd.f32 %v2302_v16, %v2048_v25  ;;  %v2052_v25 = vmul.f32 %v7354_v38, %v7354_v38  ;;  %9993 = vst [vmem:[#allocation166_spill] sm:$0xff] %v7386_v12  ;;  %v7394_v38 = vsub.f32 %v4676_v52, %v5736_v22  ;;  %v4678_v52 = vld [vmem:[%s9617_s4 + $0x688] sm:$0xff] }
 0x530   : > { %v2304_v2 = vadd.f32 %v2303_v48, %v2049_v42  ;;  %v2053_v42 = vmul.f32 %v7362_v4, %v7362_v4  ;;  %9994 = vst [vmem:[#allocation167_spill] sm:$0xff] %v7394_v38  ;;  %v7402_v4 = vsub.f32 %v4677_v31, %v5736_v22  ;;  %v4679_v31 = vld [vmem:[%s9617_s4 + $0x690] sm:$0xff] }
 0x532   : > { %v2305_v16 = vadd.f32 %v2304_v2, %v2050_v60  ;;  %v2054_v60 = vmul.f32 %v7370_v39, %v7370_v39  ;;  %9995 = vst [vmem:[#allocation168_spill] sm:$0xff] %v7402_v4  ;;  %v7410_v39 = vsub.f32 %v4678_v52, %v5736_v22  ;;  %v4680_v52 = vld [vmem:[%s9617_s4 + $0x698] sm:$0xff] }
 0x534   : > { %v2306_v48 = vadd.f32 %v2305_v16, %v2051_v11  ;;  %v2055_v11 = vmul.f32 %v7378_v55, %v7378_v55  ;;  %9996 = vst [vmem:[#allocation169_spill] sm:$0xff] %v7410_v39  ;;  %v7418_v55 = vsub.f32 %v4679_v31, %v5736_v22  ;;  %v4681_v31 = vld [vmem:[%s9617_s4 + $0x6a0] sm:$0xff] }
 0x536   : > { %v2307_v2 = vadd.f32 %v2306_v48, %v2052_v25  ;;  %v2056_v25 = vmul.f32 %v7386_v12, %v7386_v12  ;;  %9997 = vst [vmem:[#allocation170_spill] sm:$0xff] %v7418_v55  ;;  %v7426_v12 = vsub.f32 %v4680_v52, %v5736_v22  ;;  %v4682_v52 = vld [vmem:[%s9617_s4 + $0x6a8] sm:$0xff] }
 0x538   : > { %v2308_v16 = vadd.f32 %v2307_v2, %v2053_v42  ;;  %v2057_v42 = vmul.f32 %v7394_v38, %v7394_v38  ;;  %9998 = vst [vmem:[#allocation171_spill] sm:$0xff] %v7426_v12  ;;  %v7434_v38 = vsub.f32 %v4681_v31, %v5736_v22  ;;  %v4683_v31 = vld [vmem:[%s9617_s4 + $0x6b0] sm:$0xff] }
 0x53a   : > { %v2309_v48 = vadd.f32 %v2308_v16, %v2054_v60  ;;  %v2058_v60 = vmul.f32 %v7402_v4, %v7402_v4  ;;  %9999 = vst [vmem:[#allocation172_spill] sm:$0xff] %v7434_v38  ;;  %v7442_v4 = vsub.f32 %v4682_v52, %v5736_v22  ;;  %v4684_v52 = vld [vmem:[%s9617_s4 + $0x6b8] sm:$0xff] }
 0x53c   : > { %v2310_v2 = vadd.f32 %v2309_v48, %v2055_v11  ;;  %v2059_v11 = vmul.f32 %v7410_v39, %v7410_v39  ;;  %10000 = vst [vmem:[#allocation173_spill] sm:$0xff] %v7442_v4  ;;  %v7450_v39 = vsub.f32 %v4683_v31, %v5736_v22  ;;  %v4685_v31 = vld [vmem:[%s9617_s4 + $0x6c0] sm:$0xff] }
 0x53e   : > { %v2311_v16 = vadd.f32 %v2310_v2, %v2056_v25  ;;  %v2060_v25 = vmul.f32 %v7418_v55, %v7418_v55  ;;  %10001 = vst [vmem:[#allocation174_spill] sm:$0xff] %v7450_v39  ;;  %v7458_v55 = vsub.f32 %v4684_v52, %v5736_v22  ;;  %v4686_v52 = vld [vmem:[%s9617_s4 + $0x6c8] sm:$0xff] }
 0x540   : > { %v2312_v48 = vadd.f32 %v2311_v16, %v2057_v42  ;;  %v2061_v42 = vmul.f32 %v7426_v12, %v7426_v12  ;;  %10002 = vst [vmem:[#allocation175_spill] sm:$0xff] %v7458_v55  ;;  %v7466_v12 = vsub.f32 %v4685_v31, %v5736_v22  ;;  %v4687_v31 = vld [vmem:[%s9617_s4 + $0x6d0] sm:$0xff] }
 0x542   : > { %v2313_v2 = vadd.f32 %v2312_v48, %v2058_v60  ;;  %v2062_v60 = vmul.f32 %v7434_v38, %v7434_v38  ;;  %10003 = vst [vmem:[#allocation176_spill] sm:$0xff] %v7466_v12  ;;  %v7474_v38 = vsub.f32 %v4686_v52, %v5736_v22  ;;  %v4688_v52 = vld [vmem:[%s9617_s4 + $0x6d8] sm:$0xff] }
 0x544   : > { %v2314_v16 = vadd.f32 %v2313_v2, %v2059_v11  ;;  %v2063_v11 = vmul.f32 %v7442_v4, %v7442_v4  ;;  %10004 = vst [vmem:[#allocation177_spill] sm:$0xff] %v7474_v38  ;;  %v7482_v4 = vsub.f32 %v4687_v31, %v5736_v22  ;;  %v4689_v31 = vld [vmem:[%s9617_s4 + $0x6e0] sm:$0xff] }
 0x546   : > { %v2315_v48 = vadd.f32 %v2314_v16, %v2060_v25  ;;  %v2064_v25 = vmul.f32 %v7450_v39, %v7450_v39  ;;  %10005 = vst [vmem:[#allocation178_spill] sm:$0xff] %v7482_v4  ;;  %v7490_v39 = vsub.f32 %v4688_v52, %v5736_v22  ;;  %v4690_v52 = vld [vmem:[%s9617_s4 + $0x6e8] sm:$0xff] }
 0x548   : > { %v2316_v2 = vadd.f32 %v2315_v48, %v2061_v42  ;;  %v2065_v42 = vmul.f32 %v7458_v55, %v7458_v55  ;;  %10006 = vst [vmem:[#allocation179_spill] sm:$0xff] %v7490_v39  ;;  %v7498_v55 = vsub.f32 %v4689_v31, %v5736_v22  ;;  %v4691_v31 = vld [vmem:[%s9617_s4 + $0x6f0] sm:$0xff] }
 0x54a   : > { %v2317_v16 = vadd.f32 %v2316_v2, %v2062_v60  ;;  %v2066_v60 = vmul.f32 %v7466_v12, %v7466_v12  ;;  %10007 = vst [vmem:[#allocation180_spill] sm:$0xff] %v7498_v55  ;;  %v7506_v12 = vsub.f32 %v4690_v52, %v5736_v22  ;;  %v4692_v52 = vld [vmem:[%s9617_s4 + $0x6f8] sm:$0xff] }
 0x54c   : > { %v2318_v48 = vadd.f32 %v2317_v16, %v2063_v11  ;;  %v2067_v11 = vmul.f32 %v7474_v38, %v7474_v38  ;;  %10008 = vst [vmem:[#allocation181_spill] sm:$0xff] %v7506_v12  ;;  %v7514_v38 = vsub.f32 %v4691_v31, %v5736_v22  ;;  %v4693_v31 = vld [vmem:[%s9617_s4 + $0x700] sm:$0xff] }
 0x54e   : > { %v2319_v2 = vadd.f32 %v2318_v48, %v2064_v25  ;;  %v2068_v25 = vmul.f32 %v7482_v4, %v7482_v4  ;;  %10009 = vst [vmem:[#allocation182_spill] sm:$0xff] %v7514_v38  ;;  %v7522_v4 = vsub.f32 %v4692_v52, %v5736_v22  ;;  %v4694_v52 = vld [vmem:[%s9617_s4 + $0x708] sm:$0xff] }
 0x550   : > { %v2320_v16 = vadd.f32 %v2319_v2, %v2065_v42  ;;  %v2069_v42 = vmul.f32 %v7490_v39, %v7490_v39  ;;  %10010 = vst [vmem:[#allocation183_spill] sm:$0xff] %v7522_v4  ;;  %v7530_v39 = vsub.f32 %v4693_v31, %v5736_v22  ;;  %v4695_v31 = vld [vmem:[%s9617_s4 + $0x710] sm:$0xff] }
 0x552   : > { %v2321_v48 = vadd.f32 %v2320_v16, %v2066_v60  ;;  %v2070_v60 = vmul.f32 %v7498_v55, %v7498_v55  ;;  %10011 = vst [vmem:[#allocation184_spill] sm:$0xff] %v7530_v39  ;;  %v7538_v55 = vsub.f32 %v4694_v52, %v5736_v22  ;;  %v4696_v52 = vld [vmem:[%s9617_s4 + $0x718] sm:$0xff] }
 0x554   : > { %v2322_v2 = vadd.f32 %v2321_v48, %v2067_v11  ;;  %v2071_v11 = vmul.f32 %v7506_v12, %v7506_v12  ;;  %10012 = vst [vmem:[#allocation185_spill] sm:$0xff] %v7538_v55  ;;  %v7546_v12 = vsub.f32 %v4695_v31, %v5736_v22  ;;  %v4697_v31 = vld [vmem:[%s9617_s4 + $0x720] sm:$0xff] }
 0x556   : > { %v2323_v16 = vadd.f32 %v2322_v2, %v2068_v25  ;;  %v2072_v25 = vmul.f32 %v7514_v38, %v7514_v38  ;;  %10013 = vst [vmem:[#allocation186_spill] sm:$0xff] %v7546_v12  ;;  %v7554_v38 = vsub.f32 %v4696_v52, %v5736_v22  ;;  %v4698_v52 = vld [vmem:[%s9617_s4 + $0x728] sm:$0xff] }
 0x558   : > { %v2324_v48 = vadd.f32 %v2323_v16, %v2069_v42  ;;  %v2073_v42 = vmul.f32 %v7522_v4, %v7522_v4  ;;  %10014 = vst [vmem:[#allocation187_spill] sm:$0xff] %v7554_v38  ;;  %v7562_v4 = vsub.f32 %v4697_v31, %v5736_v22  ;;  %v4699_v31 = vld [vmem:[%s9617_s4 + $0x730] sm:$0xff] }
 0x55a   : > { %v2325_v2 = vadd.f32 %v2324_v48, %v2070_v60  ;;  %v2074_v60 = vmul.f32 %v7530_v39, %v7530_v39  ;;  %10015 = vst [vmem:[#allocation188_spill] sm:$0xff] %v7562_v4  ;;  %v7570_v39 = vsub.f32 %v4698_v52, %v5736_v22  ;;  %v4700_v52 = vld [vmem:[%s9617_s4 + $0x738] sm:$0xff] }
 0x55c   : > { %v2326_v16 = vadd.f32 %v2325_v2, %v2071_v11  ;;  %v2075_v11 = vmul.f32 %v7538_v55, %v7538_v55  ;;  %10016 = vst [vmem:[#allocation189_spill] sm:$0xff] %v7570_v39  ;;  %v7578_v55 = vsub.f32 %v4699_v31, %v5736_v22  ;;  %v4701_v31 = vld [vmem:[%s9617_s4 + $0x740] sm:$0xff] }
 0x55e   : > { %v2327_v48 = vadd.f32 %v2326_v16, %v2072_v25  ;;  %v2076_v25 = vmul.f32 %v7546_v12, %v7546_v12  ;;  %10017 = vst [vmem:[#allocation190_spill] sm:$0xff] %v7578_v55  ;;  %v7586_v12 = vsub.f32 %v4700_v52, %v5736_v22  ;;  %v4702_v52 = vld [vmem:[%s9617_s4 + $0x748] sm:$0xff] }
 0x560   : > { %v2328_v2 = vadd.f32 %v2327_v48, %v2073_v42  ;;  %v2077_v42 = vmul.f32 %v7554_v38, %v7554_v38  ;;  %10018 = vst [vmem:[#allocation191_spill] sm:$0xff] %v7586_v12  ;;  %v7594_v38 = vsub.f32 %v4701_v31, %v5736_v22  ;;  %v4703_v31 = vld [vmem:[%s9617_s4 + $0x750] sm:$0xff] }
 0x562   : > { %v2329_v16 = vadd.f32 %v2328_v2, %v2074_v60  ;;  %v2078_v60 = vmul.f32 %v7562_v4, %v7562_v4  ;;  %10019 = vst [vmem:[#allocation192_spill] sm:$0xff] %v7594_v38  ;;  %v7602_v4 = vsub.f32 %v4702_v52, %v5736_v22  ;;  %v4704_v52 = vld [vmem:[%s9617_s4 + $0x758] sm:$0xff] }
 0x564   : > { %v2330_v48 = vadd.f32 %v2329_v16, %v2075_v11  ;;  %v2079_v11 = vmul.f32 %v7570_v39, %v7570_v39  ;;  %10020 = vst [vmem:[#allocation193_spill] sm:$0xff] %v7602_v4  ;;  %v7610_v39 = vsub.f32 %v4703_v31, %v5736_v22  ;;  %v4705_v31 = vld [vmem:[%s9617_s4 + $0x760] sm:$0xff] }
 0x566   : > { %v2331_v2 = vadd.f32 %v2330_v48, %v2076_v25  ;;  %v2080_v25 = vmul.f32 %v7578_v55, %v7578_v55  ;;  %10021 = vst [vmem:[#allocation194_spill] sm:$0xff] %v7610_v39  ;;  %v7618_v55 = vsub.f32 %v4704_v52, %v5736_v22  ;;  %v4706_v52 = vld [vmem:[%s9617_s4 + $0x768] sm:$0xff] }
 0x568   : > { %v2332_v16 = vadd.f32 %v2331_v2, %v2077_v42  ;;  %v2081_v42 = vmul.f32 %v7586_v12, %v7586_v12  ;;  %10022 = vst [vmem:[#allocation195_spill] sm:$0xff] %v7618_v55  ;;  %v7626_v12 = vsub.f32 %v4705_v31, %v5736_v22  ;;  %v4707_v31 = vld [vmem:[%s9617_s4 + $0x770] sm:$0xff] }
 0x56a   : > { %v2333_v48 = vadd.f32 %v2332_v16, %v2078_v60  ;;  %v2082_v60 = vmul.f32 %v7594_v38, %v7594_v38  ;;  %10023 = vst [vmem:[#allocation196_spill] sm:$0xff] %v7626_v12  ;;  %v7634_v38 = vsub.f32 %v4706_v52, %v5736_v22  ;;  %v4708_v52 = vld [vmem:[%s9617_s4 + $0x778] sm:$0xff] }
 0x56c   : > { %v2334_v2 = vadd.f32 %v2333_v48, %v2079_v11  ;;  %v2083_v11 = vmul.f32 %v7602_v4, %v7602_v4  ;;  %10024 = vst [vmem:[#allocation197_spill] sm:$0xff] %v7634_v38  ;;  %v7642_v4 = vsub.f32 %v4707_v31, %v5736_v22  ;;  %v4709_v31 = vld [vmem:[%s9617_s4 + $0x780] sm:$0xff] }
 0x56e   : > { %v2335_v16 = vadd.f32 %v2334_v2, %v2080_v25  ;;  %v2084_v25 = vmul.f32 %v7610_v39, %v7610_v39  ;;  %10025 = vst [vmem:[#allocation198_spill] sm:$0xff] %v7642_v4  ;;  %v7650_v39 = vsub.f32 %v4708_v52, %v5736_v22  ;;  %v4710_v52 = vld [vmem:[%s9617_s4 + $0x788] sm:$0xff] }
 0x570   : > { %v2336_v48 = vadd.f32 %v2335_v16, %v2081_v42  ;;  %v2085_v42 = vmul.f32 %v7618_v55, %v7618_v55  ;;  %10026 = vst [vmem:[#allocation199_spill] sm:$0xff] %v7650_v39  ;;  %v7658_v55 = vsub.f32 %v4709_v31, %v5736_v22  ;;  %v4711_v31 = vld [vmem:[%s9617_s4 + $0x790] sm:$0xff] }
 0x572   : > { %v2337_v2 = vadd.f32 %v2336_v48, %v2082_v60  ;;  %v2086_v60 = vmul.f32 %v7626_v12, %v7626_v12  ;;  %10027 = vst [vmem:[#allocation200_spill] sm:$0xff] %v7658_v55  ;;  %v7666_v12 = vsub.f32 %v4710_v52, %v5736_v22  ;;  %v4712_v52 = vld [vmem:[%s9617_s4 + $0x798] sm:$0xff] }
 0x574   : > { %v2338_v16 = vadd.f32 %v2337_v2, %v2083_v11  ;;  %v2087_v11 = vmul.f32 %v7634_v38, %v7634_v38  ;;  %10028 = vst [vmem:[#allocation201_spill] sm:$0xff] %v7666_v12  ;;  %v7674_v38 = vsub.f32 %v4711_v31, %v5736_v22  ;;  %v4713_v31 = vld [vmem:[%s9617_s4 + $0x7a0] sm:$0xff] }
 0x576   : > { %v2339_v48 = vadd.f32 %v2338_v16, %v2084_v25  ;;  %v2088_v25 = vmul.f32 %v7642_v4, %v7642_v4  ;;  %10029 = vst [vmem:[#allocation202_spill] sm:$0xff] %v7674_v38  ;;  %v7682_v4 = vsub.f32 %v4712_v52, %v5736_v22  ;;  %v4714_v52 = vld [vmem:[%s9617_s4 + $0x7a8] sm:$0xff] }
 0x578   : > { %v2340_v2 = vadd.f32 %v2339_v48, %v2085_v42  ;;  %v2089_v42 = vmul.f32 %v7650_v39, %v7650_v39  ;;  %10030 = vst [vmem:[#allocation203_spill] sm:$0xff] %v7682_v4  ;;  %v7690_v39 = vsub.f32 %v4713_v31, %v5736_v22  ;;  %v4715_v31 = vld [vmem:[%s9617_s4 + $0x7b0] sm:$0xff] }
 0x57a   : > { %v2341_v16 = vadd.f32 %v2340_v2, %v2086_v60  ;;  %v2090_v60 = vmul.f32 %v7658_v55, %v7658_v55  ;;  %10031 = vst [vmem:[#allocation204_spill] sm:$0xff] %v7690_v39  ;;  %v7698_v55 = vsub.f32 %v4714_v52, %v5736_v22  ;;  %v4716_v52 = vld [vmem:[%s9617_s4 + $0x7b8] sm:$0xff] }
 0x57c   : > { %v2342_v48 = vadd.f32 %v2341_v16, %v2087_v11  ;;  %v2091_v11 = vmul.f32 %v7666_v12, %v7666_v12  ;;  %10032 = vst [vmem:[#allocation205_spill] sm:$0xff] %v7698_v55  ;;  %v7706_v12 = vsub.f32 %v4715_v31, %v5736_v22  ;;  %v4717_v31 = vld [vmem:[%s9617_s4 + $0x7c0] sm:$0xff] }
 0x57e   : > { %v2343_v2 = vadd.f32 %v2342_v48, %v2088_v25  ;;  %v2092_v25 = vmul.f32 %v7674_v38, %v7674_v38  ;;  %10033 = vst [vmem:[#allocation206_spill] sm:$0xff] %v7706_v12  ;;  %v7714_v38 = vsub.f32 %v4716_v52, %v5736_v22  ;;  %v4718_v52 = vld [vmem:[%s9617_s4 + $0x7c8] sm:$0xff] }
 0x580   : > { %v2344_v16 = vadd.f32 %v2343_v2, %v2089_v42  ;;  %v2093_v42 = vmul.f32 %v7682_v4, %v7682_v4  ;;  %10034 = vst [vmem:[#allocation207_spill] sm:$0xff] %v7714_v38  ;;  %v7722_v4 = vsub.f32 %v4717_v31, %v5736_v22  ;;  %v4719_v31 = vld [vmem:[%s9617_s4 + $0x7d0] sm:$0xff] }
 0x582   : > { %v2345_v48 = vadd.f32 %v2344_v16, %v2090_v60  ;;  %v2094_v60 = vmul.f32 %v7690_v39, %v7690_v39  ;;  %10035 = vst [vmem:[#allocation208_spill] sm:$0xff] %v7722_v4  ;;  %v7730_v39 = vsub.f32 %v4718_v52, %v5736_v22  ;;  %v4720_v52 = vld [vmem:[%s9617_s4 + $0x7d8] sm:$0xff] }
 0x584   : > { %v2346_v2 = vadd.f32 %v2345_v48, %v2091_v11  ;;  %v2095_v11 = vmul.f32 %v7698_v55, %v7698_v55  ;;  %10036 = vst [vmem:[#allocation209_spill] sm:$0xff] %v7730_v39  ;;  %v7738_v55 = vsub.f32 %v4719_v31, %v5736_v22  ;;  %v4721_v31 = vld [vmem:[%s9617_s4 + $0x7e0] sm:$0xff] }
 0x586   : > { %v2347_v16 = vadd.f32 %v2346_v2, %v2092_v25  ;;  %v2096_v25 = vmul.f32 %v7706_v12, %v7706_v12  ;;  %10037 = vst [vmem:[#allocation210_spill] sm:$0xff] %v7738_v55  ;;  %v7746_v12 = vsub.f32 %v4720_v52, %v5736_v22  ;;  %v4722_v52 = vld [vmem:[%s9617_s4 + $0x7e8] sm:$0xff] }
 0x588   : > { %v2348_v48 = vadd.f32 %v2347_v16, %v2093_v42  ;;  %v2097_v42 = vmul.f32 %v7714_v38, %v7714_v38  ;;  %10038 = vst [vmem:[#allocation211_spill] sm:$0xff] %v7746_v12  ;;  %v7754_v38 = vsub.f32 %v4721_v31, %v5736_v22  ;;  %v4723_v31 = vld [vmem:[%s9617_s4 + $0x7f0] sm:$0xff] }
 0x58a   : > { %v2349_v2 = vadd.f32 %v2348_v48, %v2094_v60  ;;  %v2098_v60 = vmul.f32 %v7722_v4, %v7722_v4  ;;  %10039 = vst [vmem:[#allocation212_spill] sm:$0xff] %v7754_v38  ;;  %v7762_v4 = vsub.f32 %v4722_v52, %v5736_v22  ;;  %v4724_v52 = vld [vmem:[%s9617_s4 + $0x7f8] sm:$0xff] }
 0x58c   : > { %v2350_v16 = vadd.f32 %v2349_v2, %v2095_v11  ;;  %v2099_v11 = vmul.f32 %v7730_v39, %v7730_v39  ;;  %v7770_v39 = vsub.f32 %v4723_v31, %v5736_v22 }
 0x58e   : > { %v2351_v48 = vadd.f32 %v2350_v16, %v2096_v25  ;;  %v2100_v25 = vmul.f32 %v7738_v55, %v7738_v55  ;;  %v7778_v55 = vsub.f32 %v4724_v52, %v5736_v22 }
 0x590   : > { %v2352_v2 = vadd.f32 %v2351_v48, %v2097_v42  ;;  %v2101_v42 = vmul.f32 %v7746_v12, %v7746_v12  ;;  %v2104_v12 = vmul.f32 %v7770_v39, %v7770_v39  ;;  %v2105_v20 = vmul.f32 %v7778_v55, %v7778_v55 }
 0x592   : > { %v2353_v16 = vadd.f32 %v2352_v2, %v2098_v60  ;;  %v2102_v60 = vmul.f32 %v7754_v38, %v7754_v38 }
 0x594   : > { %v2354_v48 = vadd.f32 %v2353_v16, %v2099_v11  ;;  %v2103_v11 = vmul.f32 %v7762_v4, %v7762_v4 }
 0x596   : > { %v2355_v2 = vadd.f32 %v2354_v48, %v2100_v25 }
 0x598   : > { %v2356_v16 = vadd.f32 %v2355_v2, %v2101_v42 }
 0x59a   : > { %v2357_v31 = vadd.f32 %v2356_v16, %v2102_v60  ;;  %v7791_v60 = vld [vmem:[%s9615_s2] ss:$0 sm:$0xff] }
 0x59c   : > { %v2358_v38 = vadd.f32 %v2357_v31, %v2103_v11 }
 0x59e   : > { %v2359_v25 = vadd.f32 %v2358_v38, %v2104_v12 }
 0x5a0   : > { %v2360_v48 = vadd.f32 %v2359_v25, %v2105_v20 }
 0x5a2   : > { %v2361_v6 = vrot.slane %v2360_v48, 4 }
 0x5a4   : > { %v2362_v59 = vadd.f32 %v2361_v6, %v2360_v48 }
 0x5a6   : > { %v2363_v47 = vrot.slane %v2362_v59, 2 }
 0x5a8   : > { %v2364_v32 = vadd.f32 %v2363_v47, %v2362_v59 }
 0x5aa   : > { %v2365_v22 = vrot.slane %v2364_v32, 1 }
 0x5ac   : > { %v2366_v52 = vadd.f32 %v2365_v22, %v2364_v32  ;;  %v7806_v32 = vld [vmem:[%s9616_s3] ss:$0 sm:$0xff] }
 0x5ae   : > { %v2367_v18 = vmul.f32 0.00048828125, %v2366_v52 }
 0x5b0   : > { %v2368_v10 = vadd.f32 1e-05, %v2367_v18 }
 0x5b2   : > { %3955 = vrsqrt.f32 %v2368_v10 }
 0x5bf   : > { %v7786_v42 = vpop.eup %3955 }
 0x5c0   : > { %v2370_v12 = vmul.f32 %v7786_v42, %v5742_v24  ;;  %v2371_v6 = vmul.f32 %v7786_v42, %v5748_v26  ;;  %v2372_v47 = vmul.f32 %v7786_v42, %v5754_v28  ;;  %v2373_v18 = vmul.f32 %v7786_v42, %v5760_v30 }
 0x5c1   : > { %v2374_v10 = vmul.f32 %v7786_v42, %v5770_v34  ;;  %v2375_v24 = vmul.f32 %v7786_v42, %v5778_v37  ;;  %v2376_v26 = vmul.f32 %v7786_v42, %v5786_v41  ;;  %v2377_v28 = vmul.f32 %v7786_v42, %v5794_v45 }
 0x5c2   : > { %v2633_v59 = vmul.f32 %v7791_v60, %v2370_v12  ;;  %v2634_v30 = vmul.f32 %v7791_v60, %v2371_v6  ;;  %v2635_v34 = vmul.f32 %v7791_v60, %v2372_v47  ;;  %v2636_v20 = vmul.f32 %v7791_v60, %v2373_v18 }
 0x5c3   : > { %v2637_v38 = vmul.f32 %v7791_v60, %v2374_v10  ;;  %v2638_v2 = vmul.f32 %v7791_v60, %v2375_v24  ;;  %v2639_v37 = vmul.f32 %v7791_v60, %v2376_v26  ;;  %v2640_v16 = vmul.f32 %v7791_v60, %v2377_v28 }
 0x5c4   : > { %v2896_v11 = vadd.f32 %v7806_v32, %v2633_v59  ;;  %v2897_v41 = vadd.f32 %v7806_v32, %v2634_v30  ;;  %v2898_v45 = vadd.f32 %v7806_v32, %v2635_v34  ;;  %v2899_v31 = vadd.f32 %v7806_v32, %v2636_v20 }
 0x5c5   : > { %v2900_v25 = vadd.f32 %v7806_v32, %v2637_v38  ;;  %v2901_v48 = vadd.f32 %v7806_v32, %v2638_v2  ;;  %v2902_v22 = vadd.f32 %v7806_v32, %v2639_v37  ;;  %v2378_v52 = vmul.f32 %v7786_v42, %v5802_v49 }
 0x5c6   : > { %3957 = vtanh.f32 %v2896_v11  ;;  %v2379_v12 = vmul.f32 %v7786_v42, %v5810_v53  ;;  %v2380_v6 = vmul.f32 %v7786_v42, %v5818_v57  ;;  %v2381_v47 = vmul.f32 %v7786_v42, %v5826_v61 }
 0x5c7   : > { %3959 = vtanh.f32 %v2897_v41  ;;  %v2382_v18 = vmul.f32 %v7786_v42, %v5834_v1  ;;  %v2383_v10 = vmul.f32 %v7786_v42, %v5842_v5  ;;  %v2641_v24 = vmul.f32 %v7791_v60, %v2378_v52 }
 0x5c8   : > { %3961 = vtanh.f32 %v2898_v45  ;;  %v2642_v49 = vmul.f32 %v7791_v60, %v2379_v12  ;;  %v2643_v53 = vmul.f32 %v7791_v60, %v2380_v6  ;;  %v2903_v57 = vadd.f32 %v7806_v32, %v2640_v16 }
 0x5c9   : > { %3963 = vtanh.f32 %v2899_v31  ;;  %v2644_v26 = vmul.f32 %v7791_v60, %v2381_v47  ;;  %v2645_v61 = vmul.f32 %v7791_v60, %v2382_v18  ;;  %v2904_v1 = vadd.f32 %v7806_v32, %v2641_v24 }
 0x5ca   : > { %3965 = vtanh.f32 %v2900_v25  ;;  %v2905_v28 = vadd.f32 %v7806_v32, %v2642_v49  ;;  %v2646_v5 = vmul.f32 %v7791_v60, %v2383_v10  ;;  %v2906_v59 = vadd.f32 %v7806_v32, %v2643_v53 }
 0x5cb   : > { %3967 = vtanh.f32 %v2901_v48  ;;  %v2907_v30 = vadd.f32 %v7806_v32, %v2644_v26  ;;  %v2908_v34 = vadd.f32 %v7806_v32, %v2645_v61  ;;  %v2384_v20 = vmul.f32 %v7786_v42, %v5850_v9 }
 0x5cc   : > { %3969 = vtanh.f32 %v2902_v22  ;;  %v2385_v38 = vmul.f32 %v7786_v42, %v5858_v13  ;;  %v2386_v2 = vmul.f32 %v7786_v42, %v5866_v17  ;;  %v2387_v37 = vmul.f32 %v7786_v42, %v5874_v21 }
 0x5cd   : > { %3971 = vtanh.f32 %v2903_v57  ;;  %v2388_v11 = vmul.f32 %v7786_v42, %v5882_v29  ;;  %v2389_v41 = vmul.f32 %v7786_v42, %v5890_v35  ;;  %v2647_v45 = vmul.f32 %v7791_v60, %v2384_v20 }
 0x5ce   : > { %3973 = vtanh.f32 %v2904_v1  ;;  %v2648_v9 = vmul.f32 %v7791_v60, %v2385_v38  ;;  %v2649_v13 = vmul.f32 %v7791_v60, %v2386_v2  ;;  %v2909_v17 = vadd.f32 %v7806_v32, %v2646_v5 }
 0x5cf   : > { %3975 = vtanh.f32 %v2905_v28  ;;  %v2650_v16 = vmul.f32 %v7791_v60, %v2387_v37  ;;  %v2651_v21 = vmul.f32 %v7791_v60, %v2388_v11  ;;  %v2910_v29 = vadd.f32 %v7806_v32, %v2647_v45 }
 0x5d0   : > { %3977 = vtanh.f32 %v2906_v59  ;;  %v2911_v31 = vadd.f32 %v7806_v32, %v2648_v9  ;;  %v2652_v35 = vmul.f32 %v7791_v60, %v2389_v41  ;;  %v2912_v25 = vadd.f32 %v7806_v32, %v2649_v13 }
 0x5d1   : > { %3979 = vtanh.f32 %v2907_v30  ;;  %v2913_v48 = vadd.f32 %v7806_v32, %v2650_v16  ;;  %v2914_v22 = vadd.f32 %v7806_v32, %v2651_v21  ;;  %v2390_v52 = vmul.f32 %v7786_v42, %v5898_v40 }
 0x5d2   : > { %3981 = vtanh.f32 %v2908_v34  ;;  %v2391_v12 = vmul.f32 %v7786_v42, %v5906_v46  ;;  %v2392_v6 = vmul.f32 %v7786_v42, %v5914_v51  ;;  %v2393_v18 = vmul.f32 %v7786_v42, %v5922_v56 }
 0x5d3   : > { %v3958_v47 = vpop.eup %3957  ;;  %3983 = vtanh.f32 %v2909_v17  ;;  %v2394_v10 = vmul.f32 %v7786_v42, %v5930_v62  ;;  %v2395_v24 = vmul.f32 %v7786_v42, %v5938_v3  ;;  %v2653_v40 = vmul.f32 %v7791_v60, %v2390_v52 }
 0x5d4   : > { %v3960_v49 = vpop.eup %3959  ;;  %3408 = vst [vmem:[%s9617_s4] sm:$0xff] %v3958_v47  ;;  %3985 = vtanh.f32 %v2910_v29  ;;  %v2654_v46 = vmul.f32 %v7791_v60, %v2391_v12  ;;  %v2655_v51 = vmul.f32 %v7791_v60, %v2392_v6  ;;  %v2915_v56 = vadd.f32 %v7806_v32, %v2652_v35 }
 0x5d5   : > { %v3962_v53 = vpop.eup %3961  ;;  %3409 = vst [vmem:[%s9617_s4 + $0x8] sm:$0xff] %v3960_v49  ;;  %3987 = vtanh.f32 %v2911_v31  ;;  %v2656_v62 = vmul.f32 %v7791_v60, %v2393_v18  ;;  %v2657_v3 = vmul.f32 %v7791_v60, %v2394_v10  ;;  %v2916_v26 = vadd.f32 %v7806_v32, %v2653_v40 }
 0x5d6   : > { %v3964_v57 = vpop.eup %3963  ;;  %3410 = vst [vmem:[%s9617_s4 + $0x10] sm:$0xff] %v3962_v53  ;;  %3989 = vtanh.f32 %v2912_v25  ;;  %v2917_v61 = vadd.f32 %v7806_v32, %v2654_v46  ;;  %v2658_v1 = vmul.f32 %v7791_v60, %v2395_v24  ;;  %v2918_v5 = vadd.f32 %v7806_v32, %v2655_v51 }
 0x5d7   : > { %v3966_v28 = vpop.eup %3965  ;;  %3411 = vst [vmem:[%s9617_s4 + $0x18] sm:$0xff] %v3964_v57  ;;  %3991 = vtanh.f32 %v2913_v48  ;;  %v2919_v59 = vadd.f32 %v7806_v32, %v2656_v62  ;;  %v2920_v30 = vadd.f32 %v7806_v32, %v2657_v3  ;;  %v2396_v20 = vmul.f32 %v7786_v42, %v5946_v8 }
 0x5d8   : > { %v3968_v34 = vpop.eup %3967  ;;  %3412 = vst [vmem:[%s9617_s4 + $0x20] sm:$0xff] %v3966_v28  ;;  %3993 = vtanh.f32 %v2914_v22  ;;  %v2397_v38 = vmul.f32 %v7786_v42, %v5954_v14  ;;  %v2398_v2 = vmul.f32 %v7786_v42, %v5962_v19  ;;  %v2399_v11 = vmul.f32 %v7786_v42, %v5970_v27 }
 0x5d9   : > { %v3970_v37 = vpop.eup %3969  ;;  %3413 = vst [vmem:[%s9617_s4 + $0x28] sm:$0xff] %v3968_v34  ;;  %3995 = vtanh.f32 %v2915_v56  ;;  %v2400_v41 = vmul.f32 %v7786_v42, %v5978_v36  ;;  %v2401_v8 = vmul.f32 %v7786_v42, %v5986_v43  ;;  %v2659_v14 = vmul.f32 %v7791_v60, %v2396_v20  ;;  %v10040_v34 = vld [vmem:[#allocation2_spill] sm:$0xff] }
 0x5da   : > { %v3972_v45 = vpop.eup %3971  ;;  %3414 = vst [vmem:[%s9617_s4 + $0x30] sm:$0xff] %v3970_v37  ;;  %3997 = vtanh.f32 %v2916_v26  ;;  %v2660_v19 = vmul.f32 %v7791_v60, %v2397_v38  ;;  %v2661_v9 = vmul.f32 %v7791_v60, %v2398_v2  ;;  %v2921_v27 = vadd.f32 %v7806_v32, %v2658_v1  ;;  %v10041_v38 = vld [vmem:[#allocation3_spill] sm:$0xff] }
 0x5db   : > { %v3974_v13 = vpop.eup %3973  ;;  %3415 = vst [vmem:[%s9617_s4 + $0x38] sm:$0xff] %v3972_v45  ;;  %3999 = vtanh.f32 %v2917_v61  ;;  %v2662_v36 = vmul.f32 %v7791_v60, %v2399_v11  ;;  %v2663_v43 = vmul.f32 %v7791_v60, %v2400_v41  ;;  %v2922_v16 = vadd.f32 %v7806_v32, %v2659_v14 }
 0x5dc   : > { %v3976_v17 = vpop.eup %3975  ;;  %3416 = vst [vmem:[%s9617_s4 + $0x40] sm:$0xff] %v3974_v13  ;;  %4001 = vtanh.f32 %v2918_v5  ;;  %v2923_v21 = vadd.f32 %v7806_v32, %v2660_v19  ;;  %v2664_v29 = vmul.f32 %v7791_v60, %v2401_v8  ;;  %v2924_v35 = vadd.f32 %v7806_v32, %v2661_v9 }
 0x5dd   : > { %v3978_v31 = vpop.eup %3977  ;;  %3417 = vst [vmem:[%s9617_s4 + $0x48] sm:$0xff] %v3976_v17  ;;  %4003 = vtanh.f32 %v2919_v59  ;;  %v2925_v25 = vadd.f32 %v7806_v32, %v2662_v36  ;;  %v2926_v48 = vadd.f32 %v7806_v32, %v2663_v43  ;;  %v2402_v52 = vmul.f32 %v7786_v42, %v5994_v50 }
 0x5de   : > { %v3980_v22 = vpop.eup %3979  ;;  %3418 = vst [vmem:[%s9617_s4 + $0x50] sm:$0xff] %v3978_v31  ;;  %4005 = vtanh.f32 %v2920_v30  ;;  %v2403_v12 = vmul.f32 %v7786_v42, %v6002_v58  ;;  %v2404_v6 = vmul.f32 %v7786_v42, %v6010_v0  ;;  %v2405_v18 = vmul.f32 %v7786_v42, %v6018_v7 }
 0x5df   : > { %v3982_v47 = vpop.eup %3981  ;;  %3419 = vst [vmem:[%s9617_s4 + $0x58] sm:$0xff] %v3980_v22  ;;  %4007 = vtanh.f32 %v2921_v27  ;;  %v2406_v10 = vmul.f32 %v7786_v42, %v6026_v15  ;;  %v2407_v50 = vmul.f32 %v7786_v42, %v6034_v23  ;;  %v2665_v58 = vmul.f32 %v7791_v60, %v2402_v52  ;;  %v10045_v22 = vld [vmem:[#allocation7_spill] sm:$0xff] }
 0x5e0   : > { %v3984_v24 = vpop.eup %3983  ;;  %3420 = vst [vmem:[%s9617_s4 + $0x60] sm:$0xff] %v3982_v47  ;;  %4009 = vtanh.f32 %v2922_v16  ;;  %v2666_v0 = vmul.f32 %v7791_v60, %v2403_v12  ;;  %v2667_v49 = vmul.f32 %v7791_v60, %v2404_v6  ;;  %v2927_v7 = vadd.f32 %v7806_v32, %v2664_v29  ;;  %v10042_v16 = vld [vmem:[#allocation4_spill] sm:$0xff]  ;;  %v10043_v29 = vld [vmem:[#allocation5_spill] sm:$0xff] }
 0x5e1   : > { %v3986_v40 = vpop.eup %3985  ;;  %3421 = vst [vmem:[%s9617_s4 + $0x68] sm:$0xff] %v3984_v24  ;;  %4011 = vtanh.f32 %v2923_v21  ;;  %v2668_v15 = vmul.f32 %v7791_v60, %v2405_v18  ;;  %v2669_v23 = vmul.f32 %v7791_v60, %v2406_v10  ;;  %v2928_v51 = vadd.f32 %v7806_v32, %v2665_v58  ;;  %v10046_v12 = vld [vmem:[#allocation8_spill] sm:$0xff]  ;;  %v10047_v47 = vld [vmem:[#allocation9_spill] sm:$0xff] }
 0x5e2   : > { %v3988_v46 = vpop.eup %3987  ;;  %3422 = vst [vmem:[%s9617_s4 + $0x70] sm:$0xff] %v3986_v40  ;;  %4013 = vtanh.f32 %v2924_v35  ;;  %v2929_v53 = vadd.f32 %v7806_v32, %v2666_v0  ;;  %v2670_v56 = vmul.f32 %v7791_v60, %v2407_v50  ;;  %v2930_v3 = vadd.f32 %v7806_v32, %v2667_v49  ;;  %v10044_v35 = vld [vmem:[#allocation6_spill] sm:$0xff] }
 0x5e3   : > { %v3990_v62 = vpop.eup %3989  ;;  %3423 = vst [vmem:[%s9617_s4 + $0x78] sm:$0xff] %v3988_v46  ;;  %4015 = vtanh.f32 %v2925_v25  ;;  %v2931_v57 = vadd.f32 %v7806_v32, %v2668_v15  ;;  %v2932_v26 = vadd.f32 %v7806_v32, %v2669_v23  ;;  %v2408_v1 = vmul.f32 %v7786_v42, %v6042_v33 }
 0x5e4   : > { %v3992_v61 = vpop.eup %3991  ;;  %3424 = vst [vmem:[%s9617_s4 + $0x80] sm:$0xff] %v3990_v62  ;;  %4017 = vtanh.f32 %v2926_v48  ;;  %v2409_v28 = vmul.f32 %v7786_v42, %v6050_v44  ;;  %v2410_v5 = vmul.f32 %v7786_v42, %v6058_v54  ;;  %v2411_v30 = vmul.f32 %v7786_v42, %v6066_v63 }
 0x5e5   : > { %v3994_v59 = vpop.eup %3993  ;;  %3425 = vst [vmem:[%s9617_s4 + $0x88] sm:$0xff] %v3992_v61  ;;  %4019 = vtanh.f32 %v2927_v7  ;;  %v2412_v20 = vmul.f32 %v7786_v42, %v10040_v34  ;;  %v2413_v33 = vmul.f32 %v7786_v42, %v10041_v38  ;;  %v2671_v44 = vmul.f32 %v7791_v60, %v2408_v1  ;;  %v10049_v1 = vld [vmem:[#allocation11_spill] sm:$0xff]  ;;  %v10051_v34 = vld [vmem:[#allocation13_spill] sm:$0xff]  ;;  %v10052_v38 = vld [vmem:[#allocation14_spill] sm:$0xff] }
 0x5e6   : > { %v3996_v2 = vpop.eup %3995  ;;  %3426 = vst [vmem:[%s9617_s4 + $0x90] sm:$0xff] %v3994_v59  ;;  %4021 = vtanh.f32 %v2928_v51  ;;  %v2672_v54 = vmul.f32 %v7791_v60, %v2409_v28  ;;  %v2673_v37 = vmul.f32 %v7791_v60, %v2410_v5  ;;  %v2933_v63 = vadd.f32 %v7806_v32, %v2670_v56  ;;  %v10050_v5 = vld [vmem:[#allocation12_spill] sm:$0xff] }
 0x5e7   : > { %v3998_v11 = vpop.eup %3997  ;;  %3427 = vst [vmem:[%s9617_s4 + $0x98] sm:$0xff] %v3996_v2  ;;  %4023 = vtanh.f32 %v2929_v53  ;;  %v2674_v41 = vmul.f32 %v7791_v60, %v2411_v30  ;;  %v2675_v8 = vmul.f32 %v7791_v60, %v2412_v20  ;;  %v2934_v14 = vadd.f32 %v7806_v32, %v2671_v44  ;;  %v10053_v2 = vld [vmem:[#allocation15_spill] sm:$0xff] }
 0x5e8   : > { %v4000_v45 = vpop.eup %3999  ;;  %3428 = vst [vmem:[%s9617_s4 + $0xa0] sm:$0xff] %v3998_v11  ;;  %4025 = vtanh.f32 %v2930_v3  ;;  %v2935_v19 = vadd.f32 %v7806_v32, %v2672_v54  ;;  %v2676_v9 = vmul.f32 %v7791_v60, %v2413_v33  ;;  %v2936_v27 = vadd.f32 %v7806_v32, %v2673_v37 }
 0x5e9   : > { %v4002_v13 = vpop.eup %4001  ;;  %3429 = vst [vmem:[%s9617_s4 + $0xa8] sm:$0xff] %v4000_v45  ;;  %4027 = vtanh.f32 %v2931_v57  ;;  %v2937_v36 = vadd.f32 %v7806_v32, %v2674_v41  ;;  %v2938_v43 = vadd.f32 %v7806_v32, %v2675_v8  ;;  %v2414_v21 = vmul.f32 %v7786_v42, %v10042_v16 }
 0x5ea   : > { %v4004_v17 = vpop.eup %4003  ;;  %3430 = vst [vmem:[%s9617_s4 + $0xb0] sm:$0xff] %v4002_v13  ;;  %4029 = vtanh.f32 %v2932_v26  ;;  %v2415_v31 = vmul.f32 %v7786_v42, %v10043_v29  ;;  %v2416_v25 = vmul.f32 %v7786_v42, %v10044_v35  ;;  %v2417_v52 = vmul.f32 %v7786_v42, %v10045_v22  ;;  %v10048_v26 = vld [vmem:[#allocation10_spill] sm:$0xff]  ;;  %v10054_v29 = vld [vmem:[#allocation16_spill] sm:$0xff]  ;;  %v10055_v35 = vld [vmem:[#allocation17_spill] sm:$0xff] }
 0x5eb   : > { %v4006_v48 = vpop.eup %4005  ;;  %3431 = vst [vmem:[%s9617_s4 + $0xb8] sm:$0xff] %v4004_v17  ;;  %4031 = vtanh.f32 %v2933_v63  ;;  %v2418_v6 = vmul.f32 %v7786_v42, %v10046_v12  ;;  %v2419_v18 = vmul.f32 %v7786_v42, %v10047_v47  ;;  %v2677_v50 = vmul.f32 %v7791_v60, %v2414_v21  ;;  %v10057_v12 = vld [vmem:[#allocation19_spill] sm:$0xff]  ;;  %v10058_v47 = vld [vmem:[#allocation20_spill] sm:$0xff] }
 0x5ec   : > { %v4008_v10 = vpop.eup %4007  ;;  %3432 = vst [vmem:[%s9617_s4 + $0xc0] sm:$0xff] %v4006_v48  ;;  %4033 = vtanh.f32 %v2934_v14  ;;  %v2678_v24 = vmul.f32 %v7791_v60, %v2415_v31  ;;  %v2679_v58 = vmul.f32 %v7791_v60, %v2416_v25  ;;  %v2939_v49 = vadd.f32 %v7806_v32, %v2676_v9  ;;  %v10056_v48 = vld [vmem:[#allocation18_spill] sm:$0xff] }
 0x5ed   : > { %v4010_v0 = vpop.eup %4009  ;;  %3433 = vst [vmem:[%s9617_s4 + $0xc8] sm:$0xff] %v4008_v10  ;;  %4035 = vtanh.f32 %v2935_v19  ;;  %v2680_v40 = vmul.f32 %v7791_v60, %v2417_v52  ;;  %v2681_v7 = vmul.f32 %v7791_v60, %v2418_v6  ;;  %v2940_v23 = vadd.f32 %v7806_v32, %v2677_v50  ;;  %v10059_v10 = vld [vmem:[#allocation21_spill] sm:$0xff] }
 0x5ee   : > { %v4012_v15 = vpop.eup %4011  ;;  %3434 = vst [vmem:[%s9617_s4 + $0xd0] sm:$0xff] %v4010_v0  ;;  %4037 = vtanh.f32 %v2936_v27  ;;  %v2941_v46 = vadd.f32 %v7806_v32, %v2678_v24  ;;  %v2682_v51 = vmul.f32 %v7791_v60, %v2419_v18  ;;  %v2942_v56 = vadd.f32 %v7806_v32, %v2679_v58 }
 0x5ef   : > { %v4014_v53 = vpop.eup %4013  ;;  %3435 = vst [vmem:[%s9617_s4 + $0xd8] sm:$0xff] %v4012_v15  ;;  %4039 = vtanh.f32 %v2937_v36  ;;  %v2943_v62 = vadd.f32 %v7806_v32, %v2680_v40  ;;  %v2944_v3 = vadd.f32 %v7806_v32, %v2681_v7  ;;  %v2420_v61 = vmul.f32 %v7786_v42, %v10048_v26 }
 0x5f0   : > { %v4016_v57 = vpop.eup %4015  ;;  %3436 = vst [vmem:[%s9617_s4 + $0xe0] sm:$0xff] %v4014_v53  ;;  %4041 = vtanh.f32 %v2938_v43  ;;  %v2421_v28 = vmul.f32 %v7786_v42, %v10049_v1  ;;  %v2422_v59 = vmul.f32 %v7786_v42, %v10050_v5  ;;  %v2423_v20 = vmul.f32 %v7786_v42, %v10051_v34  ;;  %v10060_v1 = vld [vmem:[#allocation22_spill] sm:$0xff]  ;;  %v10061_v5 = vld [vmem:[#allocation23_spill] sm:$0xff] }
 0x5f1   : > { %v4018_v30 = vpop.eup %4017  ;;  %3437 = vst [vmem:[%s9617_s4 + $0xe8] sm:$0xff] %v4016_v57  ;;  %4043 = vtanh.f32 %v2939_v49  ;;  %v2424_v33 = vmul.f32 %v7786_v42, %v10052_v38  ;;  %v2425_v44 = vmul.f32 %v7786_v42, %v10053_v2  ;;  %v2683_v37 = vmul.f32 %v7791_v60, %v2420_v61  ;;  %v10063_v38 = vld [vmem:[#allocation25_spill] sm:$0xff]  ;;  %v10064_v2 = vld [vmem:[#allocation26_spill] sm:$0xff] }
 0x5f2   : > { %v4020_v54 = vpop.eup %4019  ;;  %3438 = vst [vmem:[%s9617_s4 + $0xf0] sm:$0xff] %v4018_v30  ;;  %4045 = vtanh.f32 %v2940_v23  ;;  %v2684_v11 = vmul.f32 %v7791_v60, %v2421_v28  ;;  %v2685_v63 = vmul.f32 %v7791_v60, %v2422_v59  ;;  %v2945_v8 = vadd.f32 %v7806_v32, %v2682_v51  ;;  %v10062_v30 = vld [vmem:[#allocation24_spill] sm:$0xff] }
 0x5f3   : > { %v4022_v41 = vpop.eup %4021  ;;  %3439 = vst [vmem:[%s9617_s4 + $0xf8] sm:$0xff] %v4020_v54  ;;  %4047 = vtanh.f32 %v2941_v46  ;;  %v2686_v45 = vmul.f32 %v7791_v60, %v2423_v20  ;;  %v2687_v14 = vmul.f32 %v7791_v60, %v2424_v33  ;;  %v2946_v9 = vadd.f32 %v7806_v32, %v2683_v37  ;;  %v10065_v54 = vld [vmem:[#allocation27_spill] sm:$0xff] }
 0x5f4   : > { %v4024_v19 = vpop.eup %4023  ;;  %3440 = vst [vmem:[%s9617_s4 + $0x100] sm:$0xff] %v4022_v41  ;;  %4049 = vtanh.f32 %v2942_v56  ;;  %v2947_v13 = vadd.f32 %v7806_v32, %v2684_v11  ;;  %v2688_v27 = vmul.f32 %v7791_v60, %v2425_v44  ;;  %v2948_v43 = vadd.f32 %v7806_v32, %v2685_v63 }
 0x5f5   : > { %v4026_v36 = vpop.eup %4025  ;;  %3441 = vst [vmem:[%s9617_s4 + $0x108] sm:$0xff] %v4024_v19  ;;  %4051 = vtanh.f32 %v2943_v62  ;;  %v2949_v17 = vadd.f32 %v7806_v32, %v2686_v45  ;;  %v2950_v16 = vadd.f32 %v7806_v32, %v2687_v14  ;;  %v2426_v31 = vmul.f32 %v7786_v42, %v10054_v29 }
 0x5f6   : > { %v4028_v21 = vpop.eup %4027  ;;  %3442 = vst [vmem:[%s9617_s4 + $0x110] sm:$0xff] %v4026_v36  ;;  %4053 = vtanh.f32 %v2944_v3  ;;  %v2427_v25 = vmul.f32 %v7786_v42, %v10055_v35  ;;  %v2428_v22 = vmul.f32 %v7786_v42, %v10056_v48  ;;  %v2429_v6 = vmul.f32 %v7786_v42, %v10057_v12  ;;  %v10066_v35 = vld [vmem:[#allocation28_spill] sm:$0xff]  ;;  %v10067_v48 = vld [vmem:[#allocation29_spill] sm:$0xff] }
 0x5f7   : > { %v4030_v52 = vpop.eup %4029  ;;  %3443 = vst [vmem:[%s9617_s4 + $0x118] sm:$0xff] %v4028_v21  ;;  %4055 = vtanh.f32 %v2945_v8  ;;  %v2430_v18 = vmul.f32 %v7786_v42, %v10058_v47  ;;  %v2431_v50 = vmul.f32 %v7786_v42, %v10059_v10  ;;  %v2689_v58 = vmul.f32 %v7791_v60, %v2426_v31  ;;  %v10069_v47 = vld [vmem:[#allocation31_spill] sm:$0xff]  ;;  %v10070_v10 = vld [vmem:[#allocation32_spill] sm:$0xff] }
 0x5f8   : > { %v4032_v24 = vpop.eup %4031  ;;  %3444 = vst [vmem:[%s9617_s4 + $0x120] sm:$0xff] %v4030_v52  ;;  %4057 = vtanh.f32 %v2946_v9  ;;  %v2690_v0 = vmul.f32 %v7791_v60, %v2427_v25  ;;  %v2691_v49 = vmul.f32 %v7791_v60, %v2428_v22  ;;  %v2951_v7 = vadd.f32 %v7806_v32, %v2688_v27  ;;  %v10068_v52 = vld [vmem:[#allocation30_spill] sm:$0xff] }
 0x5f9   : > { %v4034_v40 = vpop.eup %4033  ;;  %3445 = vst [vmem:[%s9617_s4 + $0x128] sm:$0xff] %v4032_v24  ;;  %4059 = vtanh.f32 %v2947_v13  ;;  %v2692_v15 = vmul.f32 %v7791_v60, %v2429_v6  ;;  %v2693_v23 = vmul.f32 %v7791_v60, %v2430_v18  ;;  %v2952_v51 = vadd.f32 %v7806_v32, %v2689_v58  ;;  %v10071_v24 = vld [vmem:[#allocation33_spill] sm:$0xff] }
 0x5fa   : > { %v4036_v46 = vpop.eup %4035  ;;  %3446 = vst [vmem:[%s9617_s4 + $0x130] sm:$0xff] %v4034_v40  ;;  %4061 = vtanh.f32 %v2948_v43  ;;  %v2953_v53 = vadd.f32 %v7806_v32, %v2690_v0  ;;  %v2694_v56 = vmul.f32 %v7791_v60, %v2431_v50  ;;  %v2954_v3 = vadd.f32 %v7806_v32, %v2691_v49 }
 0x5fb   : > { %v4038_v62 = vpop.eup %4037  ;;  %3447 = vst [vmem:[%s9617_s4 + $0x138] sm:$0xff] %v4036_v46  ;;  %4063 = vtanh.f32 %v2949_v17  ;;  %v2955_v57 = vadd.f32 %v7806_v32, %v2692_v15  ;;  %v2956_v26 = vadd.f32 %v7806_v32, %v2693_v23  ;;  %v2432_v28 = vmul.f32 %v7786_v42, %v10060_v1 }
 0x5fc   : > { %v4040_v61 = vpop.eup %4039  ;;  %3448 = vst [vmem:[%s9617_s4 + $0x140] sm:$0xff] %v4038_v62  ;;  %4065 = vtanh.f32 %v2950_v16  ;;  %v2433_v59 = vmul.f32 %v7786_v42, %v10061_v5  ;;  %v2434_v34 = vmul.f32 %v7786_v42, %v10062_v30  ;;  %v2435_v33 = vmul.f32 %v7786_v42, %v10063_v38  ;;  %v10072_v5 = vld [vmem:[#allocation34_spill] sm:$0xff]  ;;  %v10073_v30 = vld [vmem:[#allocation35_spill] sm:$0xff] }
 0x5fd   : > { %v4042_v20 = vpop.eup %4041  ;;  %3449 = vst [vmem:[%s9617_s4 + $0x148] sm:$0xff] %v4040_v61  ;;  %4067 = vtanh.f32 %v2951_v7  ;;  %v2436_v44 = vmul.f32 %v7786_v42, %v10064_v2  ;;  %v2437_v37 = vmul.f32 %v7786_v42, %v10065_v54  ;;  %v2695_v63 = vmul.f32 %v7791_v60, %v2432_v28  ;;  %v10075_v2 = vld [vmem:[#allocation37_spill] sm:$0xff]  ;;  %v10076_v54 = vld [vmem:[#allocation38_spill] sm:$0xff] }
 0x5fe   : > { %v4044_v11 = vpop.eup %4043  ;;  %3450 = vst [vmem:[%s9617_s4 + $0x150] sm:$0xff] %v4042_v20  ;;  %4069 = vtanh.f32 %v2952_v51  ;;  %v2696_v41 = vmul.f32 %v7791_v60, %v2433_v59  ;;  %v2697_v8 = vmul.f32 %v7791_v60, %v2434_v34  ;;  %v2957_v14 = vadd.f32 %v7806_v32, %v2694_v56  ;;  %v10074_v20 = vld [vmem:[#allocation36_spill] sm:$0xff] }
 0x5ff   : > { %v4046_v45 = vpop.eup %4045  ;;  %3451 = vst [vmem:[%s9617_s4 + $0x158] sm:$0xff] %v4044_v11  ;;  %4071 = vtanh.f32 %v2953_v53  ;;  %v2698_v19 = vmul.f32 %v7791_v60, %v2435_v33  ;;  %v2699_v9 = vmul.f32 %v7791_v60, %v2436_v44  ;;  %v2958_v27 = vadd.f32 %v7806_v32, %v2695_v63  ;;  %v10077_v11 = vld [vmem:[#allocation39_spill] sm:$0xff] }
 0x600   : > { %v4048_v13 = vpop.eup %4047  ;;  %3452 = vst [vmem:[%s9617_s4 + $0x160] sm:$0xff] %v4046_v45  ;;  %4073 = vtanh.f32 %v2954_v3  ;;  %v2959_v36 = vadd.f32 %v7806_v32, %v2696_v41  ;;  %v2700_v43 = vmul.f32 %v7791_v60, %v2437_v37  ;;  %v2960_v16 = vadd.f32 %v7806_v32, %v2697_v8 }
 0x601   : > { %v4050_v17 = vpop.eup %4049  ;;  %3453 = vst [vmem:[%s9617_s4 + $0x168] sm:$0xff] %v4048_v13  ;;  %4075 = vtanh.f32 %v2955_v57  ;;  %v2961_v21 = vadd.f32 %v7806_v32, %v2698_v19  ;;  %v2962_v29 = vadd.f32 %v7806_v32, %v2699_v9  ;;  %v2438_v25 = vmul.f32 %v7786_v42, %v10066_v35 }
 0x602   : > { %v4052_v31 = vpop.eup %4051  ;;  %3454 = vst [vmem:[%s9617_s4 + $0x170] sm:$0xff] %v4050_v17  ;;  %4077 = vtanh.f32 %v2956_v26  ;;  %v2439_v22 = vmul.f32 %v7786_v42, %v10067_v48  ;;  %v2440_v12 = vmul.f32 %v7786_v42, %v10068_v52  ;;  %v2441_v18 = vmul.f32 %v7786_v42, %v10069_v47  ;;  %v10078_v48 = vld [vmem:[#allocation40_spill] sm:$0xff]  ;;  %v10079_v52 = vld [vmem:[#allocation41_spill] sm:$0xff] }
 0x603   : > { %v4054_v6 = vpop.eup %4053  ;;  %3455 = vst [vmem:[%s9617_s4 + $0x178] sm:$0xff] %v4052_v31  ;;  %4079 = vtanh.f32 %v2957_v14  ;;  %v2442_v50 = vmul.f32 %v7786_v42, %v10070_v10  ;;  %v2443_v58 = vmul.f32 %v7786_v42, %v10071_v24  ;;  %v2701_v49 = vmul.f32 %v7791_v60, %v2438_v25  ;;  %v10081_v10 = vld [vmem:[#allocation43_spill] sm:$0xff]  ;;  %v10082_v24 = vld [vmem:[#allocation44_spill] sm:$0xff] }
 0x604   : > { %v4056_v0 = vpop.eup %4055  ;;  %3456 = vst [vmem:[%s9617_s4 + $0x180] sm:$0xff] %v4054_v6  ;;  %4081 = vtanh.f32 %v2958_v27  ;;  %v2702_v40 = vmul.f32 %v7791_v60, %v2439_v22  ;;  %v2703_v7 = vmul.f32 %v7791_v60, %v2440_v12  ;;  %v2963_v23 = vadd.f32 %v7806_v32, %v2700_v43  ;;  %v10080_v6 = vld [vmem:[#allocation42_spill] sm:$0xff] }
 0x605   : > { %v4058_v15 = vpop.eup %4057  ;;  %3457 = vst [vmem:[%s9617_s4 + $0x188] sm:$0xff] %v4056_v0  ;;  %4083 = vtanh.f32 %v2959_v36  ;;  %v2704_v46 = vmul.f32 %v7791_v60, %v2441_v18  ;;  %v2705_v51 = vmul.f32 %v7791_v60, %v2442_v50  ;;  %v2964_v56 = vadd.f32 %v7806_v32, %v2701_v49  ;;  %v10083_v0 = vld [vmem:[#allocation45_spill] sm:$0xff] }
 0x606   : > { %v4060_v53 = vpop.eup %4059  ;;  %3458 = vst [vmem:[%s9617_s4 + $0x190] sm:$0xff] %v4058_v15  ;;  %4085 = vtanh.f32 %v2960_v16  ;;  %v2965_v62 = vadd.f32 %v7806_v32, %v2702_v40  ;;  %v2706_v3 = vmul.f32 %v7791_v60, %v2443_v58  ;;  %v2966_v26 = vadd.f32 %v7806_v32, %v2703_v7 }
 0x607   : > { %v4062_v57 = vpop.eup %4061  ;;  %3459 = vst [vmem:[%s9617_s4 + $0x198] sm:$0xff] %v4060_v53  ;;  %4087 = vtanh.f32 %v2961_v21  ;;  %v2967_v61 = vadd.f32 %v7806_v32, %v2704_v46  ;;  %v2968_v1 = vadd.f32 %v7806_v32, %v2705_v51  ;;  %v2444_v59 = vmul.f32 %v7786_v42, %v10072_v5 }
 0x608   : > { %v4064_v28 = vpop.eup %4063  ;;  %3460 = vst [vmem:[%s9617_s4 + $0x1a0] sm:$0xff] %v4062_v57  ;;  %4089 = vtanh.f32 %v2962_v29  ;;  %v2445_v34 = vmul.f32 %v7786_v42, %v10073_v30  ;;  %v2446_v38 = vmul.f32 %v7786_v42, %v10074_v20  ;;  %v2447_v44 = vmul.f32 %v7786_v42, %v10075_v2  ;;  %v10084_v30 = vld [vmem:[#allocation46_spill] sm:$0xff]  ;;  %v10085_v20 = vld [vmem:[#allocation47_spill] sm:$0xff] }
 0x609   : > { %v4066_v33 = vpop.eup %4065  ;;  %3461 = vst [vmem:[%s9617_s4 + $0x1a8] sm:$0xff] %v4064_v28  ;;  %4091 = vtanh.f32 %v2963_v23  ;;  %v2448_v37 = vmul.f32 %v7786_v42, %v10076_v54  ;;  %v2449_v63 = vmul.f32 %v7786_v42, %v10077_v11  ;;  %v2707_v8 = vmul.f32 %v7791_v60, %v2444_v59  ;;  %v10087_v54 = vld [vmem:[#allocation49_spill] sm:$0xff]  ;;  %v10088_v11 = vld [vmem:[#allocation50_spill] sm:$0xff] }
 0x60a   : > { %v4068_v41 = vpop.eup %4067  ;;  %3462 = vst [vmem:[%s9617_s4 + $0x1b0] sm:$0xff] %v4066_v33  ;;  %4093 = vtanh.f32 %v2964_v56  ;;  %v2708_v45 = vmul.f32 %v7791_v60, %v2445_v34  ;;  %v2709_v14 = vmul.f32 %v7791_v60, %v2446_v38  ;;  %v2969_v9 = vadd.f32 %v7806_v32, %v2706_v3  ;;  %v10086_v33 = vld [vmem:[#allocation48_spill] sm:$0xff] }
 0x60b   : > { %v4070_v19 = vpop.eup %4069  ;;  %3463 = vst [vmem:[%s9617_s4 + $0x1b8] sm:$0xff] %v4068_v41  ;;  %4095 = vtanh.f32 %v2965_v62  ;;  %v2710_v13 = vmul.f32 %v7791_v60, %v2447_v44  ;;  %v2711_v27 = vmul.f32 %v7791_v60, %v2448_v37  ;;  %v2970_v43 = vadd.f32 %v7806_v32, %v2707_v8  ;;  %v10089_v41 = vld [vmem:[#allocation51_spill] sm:$0xff] }
 0x60c   : > { %v4072_v36 = vpop.eup %4071  ;;  %3464 = vst [vmem:[%s9617_s4 + $0x1c0] sm:$0xff] %v4070_v19  ;;  %4097 = vtanh.f32 %v2966_v26  ;;  %v2971_v17 = vadd.f32 %v7806_v32, %v2708_v45  ;;  %v2712_v16 = vmul.f32 %v7791_v60, %v2449_v63  ;;  %v2972_v29 = vadd.f32 %v7806_v32, %v2709_v14 }
 0x60d   : > { %v4074_v21 = vpop.eup %4073  ;;  %3465 = vst [vmem:[%s9617_s4 + $0x1c8] sm:$0xff] %v4072_v36  ;;  %4099 = vtanh.f32 %v2967_v61  ;;  %v2973_v31 = vadd.f32 %v7806_v32, %v2710_v13  ;;  %v2974_v35 = vadd.f32 %v7806_v32, %v2711_v27  ;;  %v2450_v22 = vmul.f32 %v7786_v42, %v10078_v48 }
 0x60e   : > { %v4076_v25 = vpop.eup %4075  ;;  %3466 = vst [vmem:[%s9617_s4 + $0x1d0] sm:$0xff] %v4074_v21  ;;  %4101 = vtanh.f32 %v2968_v1  ;;  %v2451_v12 = vmul.f32 %v7786_v42, %v10079_v52  ;;  %v2452_v47 = vmul.f32 %v7786_v42, %v10080_v6  ;;  %v2453_v50 = vmul.f32 %v7786_v42, %v10081_v10  ;;  %v10090_v52 = vld [vmem:[#allocation52_spill] sm:$0xff] }
 0x60f   : > { %v4078_v18 = vpop.eup %4077  ;;  %3467 = vst [vmem:[%s9617_s4 + $0x1d8] sm:$0xff] %v4076_v25  ;;  %4103 = vtanh.f32 %v2969_v9  ;;  %v2454_v58 = vmul.f32 %v7786_v42, %v10082_v24  ;;  %v2455_v49 = vmul.f32 %v7786_v42, %v10083_v0  ;;  %v2713_v7 = vmul.f32 %v7791_v60, %v2450_v22  ;;  %v10094_v24 = vld [vmem:[#allocation56_spill] sm:$0xff]  ;;  %v10095_v0 = vld [vmem:[#allocation57_spill] sm:$0xff] }
 0x610   : > { %v4080_v40 = vpop.eup %4079  ;;  %3468 = vst [vmem:[%s9617_s4 + $0x1e0] sm:$0xff] %v4078_v18  ;;  %4105 = vtanh.f32 %v2970_v43  ;;  %v2714_v15 = vmul.f32 %v7791_v60, %v2451_v12  ;;  %v2715_v23 = vmul.f32 %v7791_v60, %v2452_v47  ;;  %v2975_v51 = vadd.f32 %v7806_v32, %v2712_v16  ;;  %v10091_v12 = vld [vmem:[#allocation53_spill] sm:$0xff]  ;;  %v10092_v47 = vld [vmem:[#allocation54_spill] sm:$0xff] }
 0x611   : > { %v4082_v46 = vpop.eup %4081  ;;  %3469 = vst [vmem:[%s9617_s4 + $0x1e8] sm:$0xff] %v4080_v40  ;;  %4107 = vtanh.f32 %v2971_v17  ;;  %v2716_v53 = vmul.f32 %v7791_v60, %v2453_v50  ;;  %v2717_v56 = vmul.f32 %v7791_v60, %v2454_v58  ;;  %v2976_v3 = vadd.f32 %v7806_v32, %v2713_v7  ;;  %v8399_v7 = vld [vmem:[%s9615_s2] ss:$0 sm:$0xff] }
 0x612   : > { %v4084_v62 = vpop.eup %4083  ;;  %3470 = vst [vmem:[%s9617_s4 + $0x1f0] sm:$0xff] %v4082_v46  ;;  %4109 = vtanh.f32 %v2972_v29  ;;  %v2977_v57 = vadd.f32 %v7806_v32, %v2714_v15  ;;  %v2718_v26 = vmul.f32 %v7791_v60, %v2455_v49  ;;  %v2978_v1 = vadd.f32 %v7806_v32, %v2715_v23 }
 0x613   : > { %v4086_v61 = vpop.eup %4085  ;;  %3471 = vst [vmem:[%s9617_s4 + $0x1f8] sm:$0xff] %v4084_v62  ;;  %4111 = vtanh.f32 %v2973_v31  ;;  %v2979_v28 = vadd.f32 %v7806_v32, %v2716_v53  ;;  %v2980_v5 = vadd.f32 %v7806_v32, %v2717_v56  ;;  %v2456_v34 = vmul.f32 %v7786_v42, %v10084_v30  ;;  %v8410_v53 = vld [vmem:[%s9616_s3] ss:$0 sm:$0xff] }
 0x614   : > { %v4088_v59 = vpop.eup %4087  ;;  %3472 = vst [vmem:[%s9617_s4 + $0x200] sm:$0xff] %v4086_v61  ;;  %4113 = vtanh.f32 %v2974_v35  ;;  %v2457_v38 = vmul.f32 %v7786_v42, %v10085_v20  ;;  %v2458_v2 = vmul.f32 %v7786_v42, %v10086_v33  ;;  %v2459_v37 = vmul.f32 %v7786_v42, %v10087_v54  ;;  %v10096_v20 = vld [vmem:[#allocation58_spill] sm:$0xff]  ;;  %v10097_v33 = vld [vmem:[#allocation59_spill] sm:$0xff] }
 0x615   : > { %v4090_v44 = vpop.eup %4089  ;;  %3473 = vst [vmem:[%s9617_s4 + $0x208] sm:$0xff] %v4088_v59  ;;  %4115 = vtanh.f32 %v2975_v51  ;;  %v2460_v63 = vmul.f32 %v7786_v42, %v10088_v11  ;;  %v2461_v8 = vmul.f32 %v7786_v42, %v10089_v41  ;;  %v2719_v14 = vmul.f32 %v7791_v60, %v2456_v34  ;;  %v10099_v11 = vld [vmem:[#allocation61_spill] sm:$0xff]  ;;  %v10100_v41 = vld [vmem:[#allocation62_spill] sm:$0xff] }
 0x616   : > { %v4092_v45 = vpop.eup %4091  ;;  %3474 = vst [vmem:[%s9617_s4 + $0x210] sm:$0xff] %v4090_v44  ;;  %4117 = vtanh.f32 %v2976_v3  ;;  %v2720_v19 = vmul.f32 %v7791_v60, %v2457_v38  ;;  %v2721_v9 = vmul.f32 %v7791_v60, %v2458_v2  ;;  %v2981_v27 = vadd.f32 %v7806_v32, %v2718_v26  ;;  %v10098_v44 = vld [vmem:[#allocation60_spill] sm:$0xff] }
 0x617   : > { %v4094_v13 = vpop.eup %4093  ;;  %3475 = vst [vmem:[%s9617_s4 + $0x218] sm:$0xff] %v4092_v45  ;;  %4119 = vtanh.f32 %v2977_v57  ;;  %v2722_v36 = vmul.f32 %v7791_v60, %v2459_v37  ;;  %v2723_v43 = vmul.f32 %v7791_v60, %v2460_v63  ;;  %v2982_v16 = vadd.f32 %v7806_v32, %v2719_v14  ;;  %v10101_v45 = vld [vmem:[#allocation63_spill] sm:$0xff] }
 0x618   : > { %v4096_v17 = vpop.eup %4095  ;;  %3476 = vst [vmem:[%s9617_s4 + $0x220] sm:$0xff] %v4094_v13  ;;  %4121 = vtanh.f32 %v2978_v1  ;;  %v2983_v21 = vadd.f32 %v7806_v32, %v2720_v19  ;;  %v2724_v29 = vmul.f32 %v7791_v60, %v2461_v8  ;;  %v2984_v35 = vadd.f32 %v7806_v32, %v2721_v9 }
 0x619   : > { %v4098_v31 = vpop.eup %4097  ;;  %3477 = vst [vmem:[%s9617_s4 + $0x228] sm:$0xff] %v4096_v17  ;;  %4123 = vtanh.f32 %v2979_v28  ;;  %v2985_v25 = vadd.f32 %v7806_v32, %v2722_v36  ;;  %v2986_v48 = vadd.f32 %v7806_v32, %v2723_v43  ;;  %v2462_v60 = vmul.f32 %v7786_v42, %v10090_v52  ;;  %v10093_v32 = vld [vmem:[#allocation55_spill] sm:$0xff] }
 0x61a   : > { %v4100_v22 = vpop.eup %4099  ;;  %3478 = vst [vmem:[%s9617_s4 + $0x230] sm:$0xff] %v4098_v31  ;;  %4125 = vtanh.f32 %v2980_v5  ;;  %v2463_v6 = vmul.f32 %v7786_v42, %v10091_v12  ;;  %v2464_v18 = vmul.f32 %v7786_v42, %v10092_v47  ;;  %v2465_v50 = vmul.f32 %v7786_v42, %v10093_v32  ;;  %v10102_v12 = vld [vmem:[#allocation64_spill] sm:$0xff]  ;;  %v10103_v47 = vld [vmem:[#allocation65_spill] sm:$0xff] }
 0x61b   : > { %v4102_v10 = vpop.eup %4101  ;;  %3479 = vst [vmem:[%s9617_s4 + $0x238] sm:$0xff] %v4100_v22  ;;  %4127 = vtanh.f32 %v2981_v27  ;;  %v2466_v58 = vmul.f32 %v7786_v42, %v10094_v24  ;;  %v2467_v49 = vmul.f32 %v7786_v42, %v10095_v0  ;;  %v2725_v15 = vmul.f32 %v8399_v7, %v2462_v60  ;;  %v10105_v24 = vld [vmem:[#allocation67_spill] sm:$0xff]  ;;  %v10106_v0 = vld [vmem:[#allocation68_spill] sm:$0xff] }
 0x61c   : > { %v4104_v40 = vpop.eup %4103  ;;  %3480 = vst [vmem:[%s9617_s4 + $0x240] sm:$0xff] %v4102_v10  ;;  %4129 = vtanh.f32 %v2982_v16  ;;  %v2726_v23 = vmul.f32 %v8399_v7, %v2463_v6  ;;  %v2727_v46 = vmul.f32 %v8399_v7, %v2464_v18  ;;  %v2987_v56 = vadd.f32 %v8410_v53, %v2724_v29  ;;  %v10104_v10 = vld [vmem:[#allocation66_spill] sm:$0xff] }
 0x61d   : > { %v4106_v51 = vpop.eup %4105  ;;  %3481 = vst [vmem:[%s9617_s4 + $0x248] sm:$0xff] %v4104_v40  ;;  %4131 = vtanh.f32 %v2983_v21  ;;  %v2728_v62 = vmul.f32 %v8399_v7, %v2465_v50  ;;  %v2729_v3 = vmul.f32 %v8399_v7, %v2466_v58  ;;  %v2988_v26 = vadd.f32 %v8410_v53, %v2725_v15  ;;  %v10107_v40 = vld [vmem:[#allocation69_spill] sm:$0xff] }
 0x61e   : > { %v4108_v57 = vpop.eup %4107  ;;  %3482 = vst [vmem:[%s9617_s4 + $0x250] sm:$0xff] %v4106_v51  ;;  %4133 = vtanh.f32 %v2984_v35  ;;  %v2989_v61 = vadd.f32 %v8410_v53, %v2726_v23  ;;  %v2730_v1 = vmul.f32 %v8399_v7, %v2467_v49  ;;  %v2990_v5 = vadd.f32 %v8410_v53, %v2727_v46 }
 0x61f   : > { %v4110_v28 = vpop.eup %4109  ;;  %3483 = vst [vmem:[%s9617_s4 + $0x258] sm:$0xff] %v4108_v57  ;;  %4135 = vtanh.f32 %v2985_v25  ;;  %v2991_v59 = vadd.f32 %v8410_v53, %v2728_v62  ;;  %v2992_v30 = vadd.f32 %v8410_v53, %v2729_v3  ;;  %v2468_v38 = vmul.f32 %v7786_v42, %v10096_v20 }
 0x620   : > { %v4112_v34 = vpop.eup %4111  ;;  %3484 = vst [vmem:[%s9617_s4 + $0x260] sm:$0xff] %v4110_v28  ;;  %4137 = vtanh.f32 %v2986_v48  ;;  %v2469_v2 = vmul.f32 %v7786_v42, %v10097_v33  ;;  %v2470_v54 = vmul.f32 %v7786_v42, %v10098_v44  ;;  %v2471_v63 = vmul.f32 %v7786_v42, %v10099_v11  ;;  %v10108_v33 = vld [vmem:[#allocation70_spill] sm:$0xff]  ;;  %v10109_v44 = vld [vmem:[#allocation71_spill] sm:$0xff] }
 0x621   : > { %v4114_v37 = vpop.eup %4113  ;;  %3485 = vst [vmem:[%s9617_s4 + $0x268] sm:$0xff] %v4112_v34  ;;  %4139 = vtanh.f32 %v2987_v56  ;;  %v2472_v8 = vmul.f32 %v7786_v42, %v10100_v41  ;;  %v2473_v14 = vmul.f32 %v7786_v42, %v10101_v45  ;;  %v2731_v9 = vmul.f32 %v8399_v7, %v2468_v38  ;;  %v10111_v41 = vld [vmem:[#allocation73_spill] sm:$0xff]  ;;  %v10112_v45 = vld [vmem:[#allocation74_spill] sm:$0xff] }
 0x622   : > { %v4116_v19 = vpop.eup %4115  ;;  %3486 = vst [vmem:[%s9617_s4 + $0x270] sm:$0xff] %v4114_v37  ;;  %4141 = vtanh.f32 %v2988_v26  ;;  %v2732_v13 = vmul.f32 %v8399_v7, %v2469_v2  ;;  %v2733_v27 = vmul.f32 %v8399_v7, %v2470_v54  ;;  %v2993_v43 = vadd.f32 %v8410_v53, %v2730_v1  ;;  %v10110_v37 = vld [vmem:[#allocation72_spill] sm:$0xff] }
 0x623   : > { %v4118_v36 = vpop.eup %4117  ;;  %3487 = vst [vmem:[%s9617_s4 + $0x278] sm:$0xff] %v4116_v19  ;;  %4143 = vtanh.f32 %v2989_v61  ;;  %v2734_v17 = vmul.f32 %v8399_v7, %v2471_v63  ;;  %v2735_v16 = vmul.f32 %v8399_v7, %v2472_v8  ;;  %v2994_v29 = vadd.f32 %v8410_v53, %v2731_v9  ;;  %v10113_v19 = vld [vmem:[#allocation75_spill] sm:$0xff] }
 0x624   : > { %v4120_v21 = vpop.eup %4119  ;;  %3488 = vst [vmem:[%s9617_s4 + $0x280] sm:$0xff] %v4118_v36  ;;  %4145 = vtanh.f32 %v2990_v5  ;;  %v2995_v31 = vadd.f32 %v8410_v53, %v2732_v13  ;;  %v2736_v35 = vmul.f32 %v8399_v7, %v2473_v14  ;;  %v2996_v48 = vadd.f32 %v8410_v53, %v2733_v27 }
 0x625   : > { %v4122_v25 = vpop.eup %4121  ;;  %3489 = vst [vmem:[%s9617_s4 + $0x288] sm:$0xff] %v4120_v21  ;;  %4147 = vtanh.f32 %v2991_v59  ;;  %v2997_v22 = vadd.f32 %v8410_v53, %v2734_v17  ;;  %v2998_v52 = vadd.f32 %v8410_v53, %v2735_v16  ;;  %v2474_v6 = vmul.f32 %v7786_v42, %v10102_v12 }
 0x626   : > { %v4124_v60 = vpop.eup %4123  ;;  %3490 = vst [vmem:[%s9617_s4 + $0x290] sm:$0xff] %v4122_v25  ;;  %4149 = vtanh.f32 %v2992_v30  ;;  %v2475_v18 = vmul.f32 %v7786_v42, %v10103_v47  ;;  %v2476_v32 = vmul.f32 %v7786_v42, %v10104_v10  ;;  %v2477_v58 = vmul.f32 %v7786_v42, %v10105_v24  ;;  %v10114_v47 = vld [vmem:[#allocation76_spill] sm:$0xff]  ;;  %v10115_v10 = vld [vmem:[#allocation77_spill] sm:$0xff] }
 0x627   : > { %v4126_v50 = vpop.eup %4125  ;;  %3491 = vst [vmem:[%s9617_s4 + $0x298] sm:$0xff] %v4124_v60  ;;  %4151 = vtanh.f32 %v2993_v43  ;;  %v2478_v49 = vmul.f32 %v7786_v42, %v10106_v0  ;;  %v2479_v15 = vmul.f32 %v7786_v42, %v10107_v40  ;;  %v2737_v46 = vmul.f32 %v8399_v7, %v2474_v6  ;;  %v10117_v0 = vld [vmem:[#allocation79_spill] sm:$0xff]  ;;  %v10118_v40 = vld [vmem:[#allocation80_spill] sm:$0xff] }
 0x628   : > { %v4128_v23 = vpop.eup %4127  ;;  %3492 = vst [vmem:[%s9617_s4 + $0x2a0] sm:$0xff] %v4126_v50  ;;  %4153 = vtanh.f32 %v2994_v29  ;;  %v2738_v51 = vmul.f32 %v8399_v7, %v2475_v18  ;;  %v2739_v56 = vmul.f32 %v8399_v7, %v2476_v32  ;;  %v2999_v3 = vadd.f32 %v8410_v53, %v2736_v35  ;;  %v10116_v50 = vld [vmem:[#allocation78_spill] sm:$0xff] }
 0x629   : > { %v4130_v62 = vpop.eup %4129  ;;  %3493 = vst [vmem:[%s9617_s4 + $0x2a8] sm:$0xff] %v4128_v23  ;;  %4155 = vtanh.f32 %v2995_v31  ;;  %v2740_v57 = vmul.f32 %v8399_v7, %v2477_v58  ;;  %v2741_v26 = vmul.f32 %v8399_v7, %v2478_v49  ;;  %v3000_v1 = vadd.f32 %v8410_v53, %v2737_v46  ;;  %v10119_v23 = vld [vmem:[#allocation81_spill] sm:$0xff] }
 0x62a   : > { %v4132_v61 = vpop.eup %4131  ;;  %3494 = vst [vmem:[%s9617_s4 + $0x2b0] sm:$0xff] %v4130_v62  ;;  %4157 = vtanh.f32 %v2996_v48  ;;  %v3001_v28 = vadd.f32 %v8410_v53, %v2738_v51  ;;  %v2742_v5 = vmul.f32 %v8399_v7, %v2479_v15  ;;  %v3002_v30 = vadd.f32 %v8410_v53, %v2739_v56 }
 0x62b   : > { %v4134_v59 = vpop.eup %4133  ;;  %3495 = vst [vmem:[%s9617_s4 + $0x2b8] sm:$0xff] %v4132_v61  ;;  %4159 = vtanh.f32 %v2997_v22  ;;  %v3003_v34 = vadd.f32 %v8410_v53, %v2740_v57  ;;  %v3004_v20 = vadd.f32 %v8410_v53, %v2741_v26  ;;  %v2480_v2 = vmul.f32 %v7786_v42, %v10108_v33 }
 0x62c   : > { %v4136_v38 = vpop.eup %4135  ;;  %3496 = vst [vmem:[%s9617_s4 + $0x2c0] sm:$0xff] %v4134_v59  ;;  %4161 = vtanh.f32 %v2998_v52  ;;  %v2481_v54 = vmul.f32 %v7786_v42, %v10109_v44  ;;  %v2482_v11 = vmul.f32 %v7786_v42, %v10110_v37  ;;  %v2483_v8 = vmul.f32 %v7786_v42, %v10111_v41  ;;  %v10120_v44 = vld [vmem:[#allocation82_spill] sm:$0xff]  ;;  %v10121_v37 = vld [vmem:[#allocation83_spill] sm:$0xff] }
 0x62d   : > { %v4138_v63 = vpop.eup %4137  ;;  %3497 = vst [vmem:[%s9617_s4 + $0x2c8] sm:$0xff] %v4136_v38  ;;  %4163 = vtanh.f32 %v2999_v3  ;;  %v2484_v14 = vmul.f32 %v7786_v42, %v10112_v45  ;;  %v2485_v9 = vmul.f32 %v7786_v42, %v10113_v19  ;;  %v2743_v27 = vmul.f32 %v8399_v7, %v2480_v2  ;;  %v10123_v45 = vld [vmem:[#allocation85_spill] sm:$0xff]  ;;  %v10124_v19 = vld [vmem:[#allocation86_spill] sm:$0xff] }
 0x62e   : > { %v4140_v13 = vpop.eup %4139  ;;  %3498 = vst [vmem:[%s9617_s4 + $0x2d0] sm:$0xff] %v4138_v63  ;;  %4165 = vtanh.f32 %v3000_v1  ;;  %v2744_v36 = vmul.f32 %v8399_v7, %v2481_v54  ;;  %v2745_v43 = vmul.f32 %v8399_v7, %v2482_v11  ;;  %v3005_v16 = vadd.f32 %v8410_v53, %v2742_v5  ;;  %v10122_v63 = vld [vmem:[#allocation84_spill] sm:$0xff] }
 0x62f   : > { %v4142_v17 = vpop.eup %4141  ;;  %3499 = vst [vmem:[%s9617_s4 + $0x2d8] sm:$0xff] %v4140_v13  ;;  %4167 = vtanh.f32 %v3001_v28  ;;  %v2746_v21 = vmul.f32 %v8399_v7, %v2483_v8  ;;  %v2747_v29 = vmul.f32 %v8399_v7, %v2484_v14  ;;  %v3006_v35 = vadd.f32 %v8410_v53, %v2743_v27  ;;  %v10125_v13 = vld [vmem:[#allocation87_spill] sm:$0xff] }
 0x630   : > { %v4144_v31 = vpop.eup %4143  ;;  %3500 = vst [vmem:[%s9617_s4 + $0x2e0] sm:$0xff] %v4142_v17  ;;  %4169 = vtanh.f32 %v3002_v30  ;;  %v3007_v25 = vadd.f32 %v8410_v53, %v2744_v36  ;;  %v2748_v48 = vmul.f32 %v8399_v7, %v2485_v9  ;;  %v3008_v52 = vadd.f32 %v8410_v53, %v2745_v43 }
 0x631   : > { %v4146_v22 = vpop.eup %4145  ;;  %3501 = vst [vmem:[%s9617_s4 + $0x2e8] sm:$0xff] %v4144_v31  ;;  %4171 = vtanh.f32 %v3003_v34  ;;  %v3009_v60 = vadd.f32 %v8410_v53, %v2746_v21  ;;  %v3010_v12 = vadd.f32 %v8410_v53, %v2747_v29  ;;  %v2486_v18 = vmul.f32 %v7786_v42, %v10114_v47 }
 0x632   : > { %v4148_v6 = vpop.eup %4147  ;;  %3502 = vst [vmem:[%s9617_s4 + $0x2f0] sm:$0xff] %v4146_v22  ;;  %4173 = vtanh.f32 %v3004_v20  ;;  %v2487_v32 = vmul.f32 %v7786_v42, %v10115_v10  ;;  %v2488_v24 = vmul.f32 %v7786_v42, %v10116_v50  ;;  %v2489_v49 = vmul.f32 %v7786_v42, %v10117_v0  ;;  %v10126_v10 = vld [vmem:[#allocation88_spill] sm:$0xff]  ;;  %v10127_v50 = vld [vmem:[#allocation89_spill] sm:$0xff] }
 0x633   : > { %v4150_v58 = vpop.eup %4149  ;;  %3503 = vst [vmem:[%s9617_s4 + $0x2f8] sm:$0xff] %v4148_v6  ;;  %4175 = vtanh.f32 %v3005_v16  ;;  %v2490_v15 = vmul.f32 %v7786_v42, %v10118_v40  ;;  %v2491_v46 = vmul.f32 %v7786_v42, %v10119_v23  ;;  %v2749_v56 = vmul.f32 %v8399_v7, %v2486_v18  ;;  %v10129_v40 = vld [vmem:[#allocation91_spill] sm:$0xff]  ;;  %v10130_v23 = vld [vmem:[#allocation92_spill] sm:$0xff] }
 0x634   : > { %v4152_v51 = vpop.eup %4151  ;;  %3504 = vst [vmem:[%s9617_s4 + $0x300] sm:$0xff] %v4150_v58  ;;  %4177 = vtanh.f32 %v3006_v35  ;;  %v2750_v62 = vmul.f32 %v8399_v7, %v2487_v32  ;;  %v2751_v3 = vmul.f32 %v8399_v7, %v2488_v24  ;;  %v3011_v26 = vadd.f32 %v8410_v53, %v2748_v48  ;;  %v10128_v58 = vld [vmem:[#allocation90_spill] sm:$0xff] }
 0x635   : > { %v4154_v57 = vpop.eup %4153  ;;  %3505 = vst [vmem:[%s9617_s4 + $0x308] sm:$0xff] %v4152_v51  ;;  %4179 = vtanh.f32 %v3007_v25  ;;  %v2752_v61 = vmul.f32 %v8399_v7, %v2489_v49  ;;  %v2753_v1 = vmul.f32 %v8399_v7, %v2490_v15  ;;  %v3012_v5 = vadd.f32 %v8410_v53, %v2749_v56  ;;  %v10131_v51 = vld [vmem:[#allocation93_spill] sm:$0xff] }
 0x636   : > { %v4156_v28 = vpop.eup %4155  ;;  %3506 = vst [vmem:[%s9617_s4 + $0x310] sm:$0xff] %v4154_v57  ;;  %4181 = vtanh.f32 %v3008_v52  ;;  %v3013_v59 = vadd.f32 %v8410_v53, %v2750_v62  ;;  %v2754_v30 = vmul.f32 %v8399_v7, %v2491_v46  ;;  %v3014_v20 = vadd.f32 %v8410_v53, %v2751_v3 }
 0x637   : > { %v4158_v34 = vpop.eup %4157  ;;  %3507 = vst [vmem:[%s9617_s4 + $0x318] sm:$0xff] %v4156_v28  ;;  %4183 = vtanh.f32 %v3009_v60  ;;  %v3015_v38 = vadd.f32 %v8410_v53, %v2752_v61  ;;  %v3016_v33 = vadd.f32 %v8410_v53, %v2753_v1  ;;  %v2492_v54 = vmul.f32 %v7786_v42, %v10120_v44 }
 0x638   : > { %v4160_v2 = vpop.eup %4159  ;;  %3508 = vst [vmem:[%s9617_s4 + $0x320] sm:$0xff] %v4158_v34  ;;  %4185 = vtanh.f32 %v3010_v12  ;;  %v2493_v11 = vmul.f32 %v7786_v42, %v10121_v37  ;;  %v2494_v41 = vmul.f32 %v7786_v42, %v10122_v63  ;;  %v2495_v14 = vmul.f32 %v7786_v42, %v10123_v45  ;;  %v10132_v37 = vld [vmem:[#allocation94_spill] sm:$0xff]  ;;  %v10133_v63 = vld [vmem:[#allocation95_spill] sm:$0xff] }
 0x639   : > { %v4162_v8 = vpop.eup %4161  ;;  %3509 = vst [vmem:[%s9617_s4 + $0x328] sm:$0xff] %v4160_v2  ;;  %4187 = vtanh.f32 %v3011_v26  ;;  %v2496_v9 = vmul.f32 %v7786_v42, %v10124_v19  ;;  %v2497_v27 = vmul.f32 %v7786_v42, %v10125_v13  ;;  %v2755_v43 = vmul.f32 %v8399_v7, %v2492_v54  ;;  %v10135_v19 = vld [vmem:[#allocation97_spill] sm:$0xff]  ;;  %v10136_v13 = vld [vmem:[#allocation98_spill] sm:$0xff] }
 0x63a   : > { %v4164_v36 = vpop.eup %4163  ;;  %3510 = vst [vmem:[%s9617_s4 + $0x330] sm:$0xff] %v4162_v8  ;;  %4189 = vtanh.f32 %v3012_v5  ;;  %v2756_v17 = vmul.f32 %v8399_v7, %v2493_v11  ;;  %v2757_v16 = vmul.f32 %v8399_v7, %v2494_v41  ;;  %v3017_v29 = vadd.f32 %v8410_v53, %v2754_v30  ;;  %v10134_v8 = vld [vmem:[#allocation96_spill] sm:$0xff] }
 0x63b   : > { %v4166_v21 = vpop.eup %4165  ;;  %3511 = vst [vmem:[%s9617_s4 + $0x338] sm:$0xff] %v4164_v36  ;;  %4191 = vtanh.f32 %v3013_v59  ;;  %v2758_v31 = vmul.f32 %v8399_v7, %v2495_v14  ;;  %v2759_v35 = vmul.f32 %v8399_v7, %v2496_v9  ;;  %v3018_v48 = vadd.f32 %v8410_v53, %v2755_v43  ;;  %v10137_v36 = vld [vmem:[#allocation99_spill] sm:$0xff] }
 0x63c   : > { %v4168_v25 = vpop.eup %4167  ;;  %3512 = vst [vmem:[%s9617_s4 + $0x340] sm:$0xff] %v4166_v21  ;;  %4193 = vtanh.f32 %v3014_v20  ;;  %v3019_v22 = vadd.f32 %v8410_v53, %v2756_v17  ;;  %v2760_v52 = vmul.f32 %v8399_v7, %v2497_v27  ;;  %v3020_v12 = vadd.f32 %v8410_v53, %v2757_v16 }
 0x63d   : > { %v4170_v60 = vpop.eup %4169  ;;  %3513 = vst [vmem:[%s9617_s4 + $0x348] sm:$0xff] %v4168_v25  ;;  %4195 = vtanh.f32 %v3015_v38  ;;  %v3021_v6 = vadd.f32 %v8410_v53, %v2758_v31  ;;  %v3022_v47 = vadd.f32 %v8410_v53, %v2759_v35  ;;  %v2498_v32 = vmul.f32 %v7786_v42, %v10126_v10 }
 0x63e   : > { %v4172_v18 = vpop.eup %4171  ;;  %3514 = vst [vmem:[%s9617_s4 + $0x350] sm:$0xff] %v4170_v60  ;;  %4197 = vtanh.f32 %v3016_v33  ;;  %v2499_v24 = vmul.f32 %v7786_v42, %v10127_v50  ;;  %v2500_v0 = vmul.f32 %v7786_v42, %v10128_v58  ;;  %v2501_v15 = vmul.f32 %v7786_v42, %v10129_v40  ;;  %v10138_v50 = vld [vmem:[#allocation100_spill] sm:$0xff]  ;;  %v10139_v58 = vld [vmem:[#allocation101_spill] sm:$0xff] }
 0x63f   : > { %v4174_v49 = vpop.eup %4173  ;;  %3515 = vst [vmem:[%s9617_s4 + $0x358] sm:$0xff] %v4172_v18  ;;  %4199 = vtanh.f32 %v3017_v29  ;;  %v2502_v46 = vmul.f32 %v7786_v42, %v10130_v23  ;;  %v2503_v56 = vmul.f32 %v7786_v42, %v10131_v51  ;;  %v2761_v3 = vmul.f32 %v8399_v7, %v2498_v32  ;;  %v10141_v23 = vld [vmem:[#allocation103_spill] sm:$0xff]  ;;  %v10142_v51 = vld [vmem:[#allocation104_spill] sm:$0xff] }
 0x640   : > { %v4176_v62 = vpop.eup %4175  ;;  %3516 = vst [vmem:[%s9617_s4 + $0x360] sm:$0xff] %v4174_v49  ;;  %4201 = vtanh.f32 %v3018_v48  ;;  %v2762_v57 = vmul.f32 %v8399_v7, %v2499_v24  ;;  %v2763_v26 = vmul.f32 %v8399_v7, %v2500_v0  ;;  %v3023_v1 = vadd.f32 %v8410_v53, %v2760_v52  ;;  %v10140_v49 = vld [vmem:[#allocation102_spill] sm:$0xff] }
 0x641   : > { %v4178_v61 = vpop.eup %4177  ;;  %3517 = vst [vmem:[%s9617_s4 + $0x368] sm:$0xff] %v4176_v62  ;;  %4203 = vtanh.f32 %v3019_v22  ;;  %v2764_v28 = vmul.f32 %v8399_v7, %v2501_v15  ;;  %v2765_v5 = vmul.f32 %v8399_v7, %v2502_v46  ;;  %v3024_v30 = vadd.f32 %v8410_v53, %v2761_v3  ;;  %v10143_v62 = vld [vmem:[#allocation105_spill] sm:$0xff] }
 0x642   : > { %v4180_v59 = vpop.eup %4179  ;;  %3518 = vst [vmem:[%s9617_s4 + $0x370] sm:$0xff] %v4178_v61  ;;  %4205 = vtanh.f32 %v3020_v12  ;;  %v3025_v34 = vadd.f32 %v8410_v53, %v2762_v57  ;;  %v2766_v20 = vmul.f32 %v8399_v7, %v2503_v56  ;;  %v3026_v33 = vadd.f32 %v8410_v53, %v2763_v26 }
 0x643   : > { %v4182_v38 = vpop.eup %4181  ;;  %3519 = vst [vmem:[%s9617_s4 + $0x378] sm:$0xff] %v4180_v59  ;;  %4207 = vtanh.f32 %v3021_v6  ;;  %v3027_v2 = vadd.f32 %v8410_v53, %v2764_v28  ;;  %v3028_v44 = vadd.f32 %v8410_v53, %v2765_v5  ;;  %v2504_v11 = vmul.f32 %v7786_v42, %v10132_v37 }
 0x644   : > { %v4184_v54 = vpop.eup %4183  ;;  %3520 = vst [vmem:[%s9617_s4 + $0x380] sm:$0xff] %v4182_v38  ;;  %4209 = vtanh.f32 %v3022_v47  ;;  %v2505_v41 = vmul.f32 %v7786_v42, %v10133_v63  ;;  %v2506_v45 = vmul.f32 %v7786_v42, %v10134_v8  ;;  %v2507_v9 = vmul.f32 %v7786_v42, %v10135_v19  ;;  %v10144_v63 = vld [vmem:[#allocation106_spill] sm:$0xff]  ;;  %v10145_v8 = vld [vmem:[#allocation107_spill] sm:$0xff] }
 0x645   : > { %v4186_v14 = vpop.eup %4185  ;;  %3521 = vst [vmem:[%s9617_s4 + $0x388] sm:$0xff] %v4184_v54  ;;  %4211 = vtanh.f32 %v3023_v1  ;;  %v2508_v27 = vmul.f32 %v7786_v42, %v10136_v13  ;;  %v2509_v43 = vmul.f32 %v7786_v42, %v10137_v36  ;;  %v2767_v16 = vmul.f32 %v8399_v7, %v2504_v11  ;;  %v10147_v13 = vld [vmem:[#allocation109_spill] sm:$0xff]  ;;  %v10148_v36 = vld [vmem:[#allocation110_spill] sm:$0xff] }
 0x646   : > { %v4188_v17 = vpop.eup %4187  ;;  %3522 = vst [vmem:[%s9617_s4 + $0x390] sm:$0xff] %v4186_v14  ;;  %4213 = vtanh.f32 %v3024_v30  ;;  %v2768_v21 = vmul.f32 %v8399_v7, %v2505_v41  ;;  %v2769_v29 = vmul.f32 %v8399_v7, %v2506_v45  ;;  %v3029_v35 = vadd.f32 %v8410_v53, %v2766_v20  ;;  %v10146_v14 = vld [vmem:[#allocation108_spill] sm:$0xff] }
 0x647   : > { %v4190_v31 = vpop.eup %4189  ;;  %3523 = vst [vmem:[%s9617_s4 + $0x398] sm:$0xff] %v4188_v17  ;;  %4215 = vtanh.f32 %v3025_v34  ;;  %v2770_v25 = vmul.f32 %v8399_v7, %v2507_v9  ;;  %v2771_v48 = vmul.f32 %v8399_v7, %v2508_v27  ;;  %v3030_v52 = vadd.f32 %v8410_v53, %v2767_v16  ;;  %v10149_v17 = vld [vmem:[#allocation111_spill] sm:$0xff] }
 0x648   : > { %v4192_v22 = vpop.eup %4191  ;;  %3524 = vst [vmem:[%s9617_s4 + $0x3a0] sm:$0xff] %v4190_v31  ;;  %4217 = vtanh.f32 %v3026_v33  ;;  %v3031_v60 = vadd.f32 %v8410_v53, %v2768_v21  ;;  %v2772_v12 = vmul.f32 %v8399_v7, %v2509_v43  ;;  %v3032_v47 = vadd.f32 %v8410_v53, %v2769_v29 }
 0x649   : > { %v4194_v6 = vpop.eup %4193  ;;  %3525 = vst [vmem:[%s9617_s4 + $0x3a8] sm:$0xff] %v4192_v22  ;;  %4219 = vtanh.f32 %v3027_v2  ;;  %v3033_v18 = vadd.f32 %v8410_v53, %v2770_v25  ;;  %v3034_v10 = vadd.f32 %v8410_v53, %v2771_v48  ;;  %v2510_v24 = vmul.f32 %v7786_v42, %v10138_v50 }
 0x64a   : > { %v4196_v32 = vpop.eup %4195  ;;  %3526 = vst [vmem:[%s9617_s4 + $0x3b0] sm:$0xff] %v4194_v6  ;;  %4221 = vtanh.f32 %v3028_v44  ;;  %v2511_v0 = vmul.f32 %v7786_v42, %v10139_v58  ;;  %v2512_v40 = vmul.f32 %v7786_v42, %v10140_v49  ;;  %v2513_v46 = vmul.f32 %v7786_v42, %v10141_v23  ;;  %v10150_v58 = vld [vmem:[#allocation112_spill] sm:$0xff]  ;;  %v10151_v49 = vld [vmem:[#allocation113_spill] sm:$0xff] }
 0x64b   : > { %v4198_v15 = vpop.eup %4197  ;;  %3527 = vst [vmem:[%s9617_s4 + $0x3b8] sm:$0xff] %v4196_v32  ;;  %4223 = vtanh.f32 %v3029_v35  ;;  %v2514_v56 = vmul.f32 %v7786_v42, %v10142_v51  ;;  %v2515_v3 = vmul.f32 %v7786_v42, %v10143_v62  ;;  %v2773_v26 = vmul.f32 %v8399_v7, %v2510_v24  ;;  %v10153_v51 = vld [vmem:[#allocation115_spill] sm:$0xff]  ;;  %v10154_v62 = vld [vmem:[#allocation116_spill] sm:$0xff] }
 0x64c   : > { %v4200_v57 = vpop.eup %4199  ;;  %3528 = vst [vmem:[%s9617_s4 + $0x3c0] sm:$0xff] %v4198_v15  ;;  %4225 = vtanh.f32 %v3030_v52  ;;  %v2774_v61 = vmul.f32 %v8399_v7, %v2511_v0  ;;  %v2775_v1 = vmul.f32 %v8399_v7, %v2512_v40  ;;  %v3035_v5 = vadd.f32 %v8410_v53, %v2772_v12  ;;  %v10152_v15 = vld [vmem:[#allocation114_spill] sm:$0xff] }
 0x64d   : > { %v4202_v28 = vpop.eup %4201  ;;  %3529 = vst [vmem:[%s9617_s4 + $0x3c8] sm:$0xff] %v4200_v57  ;;  %4227 = vtanh.f32 %v3031_v60  ;;  %v2776_v59 = vmul.f32 %v8399_v7, %v2513_v46  ;;  %v2777_v30 = vmul.f32 %v8399_v7, %v2514_v56  ;;  %v3036_v20 = vadd.f32 %v8410_v53, %v2773_v26  ;;  %v10155_v57 = vld [vmem:[#allocation117_spill] sm:$0xff] }
 0x64e   : > { %v4204_v34 = vpop.eup %4203  ;;  %3530 = vst [vmem:[%s9617_s4 + $0x3d0] sm:$0xff] %v4202_v28  ;;  %4229 = vtanh.f32 %v3032_v47  ;;  %v3037_v38 = vadd.f32 %v8410_v53, %v2774_v61  ;;  %v2778_v33 = vmul.f32 %v8399_v7, %v2515_v3  ;;  %v3038_v44 = vadd.f32 %v8410_v53, %v2775_v1 }
 0x64f   : > { %v4206_v2 = vpop.eup %4205  ;;  %3531 = vst [vmem:[%s9617_s4 + $0x3d8] sm:$0xff] %v4204_v34  ;;  %4231 = vtanh.f32 %v3033_v18  ;;  %v3039_v54 = vadd.f32 %v8410_v53, %v2776_v59  ;;  %v3040_v37 = vadd.f32 %v8410_v53, %v2777_v30  ;;  %v2516_v41 = vmul.f32 %v7786_v42, %v10144_v63 }
 0x650   : > { %v4208_v11 = vpop.eup %4207  ;;  %3532 = vst [vmem:[%s9617_s4 + $0x3e0] sm:$0xff] %v4206_v2  ;;  %4233 = vtanh.f32 %v3034_v10  ;;  %v2517_v45 = vmul.f32 %v7786_v42, %v10145_v8  ;;  %v2518_v19 = vmul.f32 %v7786_v42, %v10146_v14  ;;  %v2519_v27 = vmul.f32 %v7786_v42, %v10147_v13  ;;  %v10156_v8 = vld [vmem:[#allocation118_spill] sm:$0xff]  ;;  %v10157_v14 = vld [vmem:[#allocation119_spill] sm:$0xff] }
 0x651   : > { %v4210_v9 = vpop.eup %4209  ;;  %3533 = vst [vmem:[%s9617_s4 + $0x3e8] sm:$0xff] %v4208_v11  ;;  %4235 = vtanh.f32 %v3035_v5  ;;  %v2520_v43 = vmul.f32 %v7786_v42, %v10148_v36  ;;  %v2521_v16 = vmul.f32 %v7786_v42, %v10149_v17  ;;  %v2779_v29 = vmul.f32 %v8399_v7, %v2516_v41  ;;  %v10159_v36 = vld [vmem:[#allocation121_spill] sm:$0xff]  ;;  %v10160_v17 = vld [vmem:[#allocation122_spill] sm:$0xff] }
 0x652   : > { %v4212_v21 = vpop.eup %4211  ;;  %3534 = vst [vmem:[%s9617_s4 + $0x3f0] sm:$0xff] %v4210_v9  ;;  %4237 = vtanh.f32 %v3036_v20  ;;  %v2780_v31 = vmul.f32 %v8399_v7, %v2517_v45  ;;  %v2781_v35 = vmul.f32 %v8399_v7, %v2518_v19  ;;  %v3041_v48 = vadd.f32 %v8410_v53, %v2778_v33  ;;  %v10158_v9 = vld [vmem:[#allocation120_spill] sm:$0xff] }
 0x653   : > { %v4214_v25 = vpop.eup %4213  ;;  %3535 = vst [vmem:[%s9617_s4 + $0x3f8] sm:$0xff] %v4212_v21  ;;  %4239 = vtanh.f32 %v3037_v38  ;;  %v2782_v22 = vmul.f32 %v8399_v7, %v2519_v27  ;;  %v2783_v52 = vmul.f32 %v8399_v7, %v2520_v43  ;;  %v3042_v12 = vadd.f32 %v8410_v53, %v2779_v29  ;;  %v10161_v21 = vld [vmem:[#allocation123_spill] sm:$0xff] }
 0x654   : > { %v4216_v60 = vpop.eup %4215  ;;  %3536 = vst [vmem:[%s9617_s4 + $0x400] sm:$0xff] %v4214_v25  ;;  %4241 = vtanh.f32 %v3038_v44  ;;  %v3043_v6 = vadd.f32 %v8410_v53, %v2780_v31  ;;  %v2784_v47 = vmul.f32 %v8399_v7, %v2521_v16  ;;  %v3044_v10 = vadd.f32 %v8410_v53, %v2781_v35 }
 0x655   : > { %v4218_v18 = vpop.eup %4217  ;;  %3537 = vst [vmem:[%s9617_s4 + $0x408] sm:$0xff] %v4216_v60  ;;  %4243 = vtanh.f32 %v3039_v54  ;;  %v3045_v32 = vadd.f32 %v8410_v53, %v2782_v22  ;;  %v3046_v50 = vadd.f32 %v8410_v53, %v2783_v52  ;;  %v2522_v0 = vmul.f32 %v7786_v42, %v10150_v58 }
 0x656   : > { %v4220_v24 = vpop.eup %4219  ;;  %3538 = vst [vmem:[%s9617_s4 + $0x410] sm:$0xff] %v4218_v18  ;;  %4245 = vtanh.f32 %v3040_v37  ;;  %v2523_v40 = vmul.f32 %v7786_v42, %v10151_v49  ;;  %v2524_v23 = vmul.f32 %v7786_v42, %v10152_v15  ;;  %v2525_v56 = vmul.f32 %v7786_v42, %v10153_v51  ;;  %v10162_v49 = vld [vmem:[#allocation124_spill] sm:$0xff]  ;;  %v10163_v15 = vld [vmem:[#allocation125_spill] sm:$0xff] }
 0x657   : > { %v4222_v46 = vpop.eup %4221  ;;  %3539 = vst [vmem:[%s9617_s4 + $0x418] sm:$0xff] %v4220_v24  ;;  %4247 = vtanh.f32 %v3041_v48  ;;  %v2526_v3 = vmul.f32 %v7786_v42, %v10154_v62  ;;  %v2527_v26 = vmul.f32 %v7786_v42, %v10155_v57  ;;  %v2785_v1 = vmul.f32 %v8399_v7, %v2522_v0  ;;  %v10165_v62 = vld [vmem:[#allocation127_spill] sm:$0xff]  ;;  %v10166_v57 = vld [vmem:[#allocation128_spill] sm:$0xff] }
 0x658   : > { %v4224_v61 = vpop.eup %4223  ;;  %3540 = vst [vmem:[%s9617_s4 + $0x420] sm:$0xff] %v4222_v46  ;;  %4249 = vtanh.f32 %v3042_v12  ;;  %v2786_v28 = vmul.f32 %v8399_v7, %v2523_v40  ;;  %v2787_v5 = vmul.f32 %v8399_v7, %v2524_v23  ;;  %v3047_v30 = vadd.f32 %v8410_v53, %v2784_v47  ;;  %v10164_v46 = vld [vmem:[#allocation126_spill] sm:$0xff] }
 0x659   : > { %v4226_v59 = vpop.eup %4225  ;;  %3541 = vst [vmem:[%s9617_s4 + $0x428] sm:$0xff] %v4224_v61  ;;  %4251 = vtanh.f32 %v3043_v6  ;;  %v2788_v34 = vmul.f32 %v8399_v7, %v2525_v56  ;;  %v2789_v20 = vmul.f32 %v8399_v7, %v2526_v3  ;;  %v3048_v33 = vadd.f32 %v8410_v53, %v2785_v1  ;;  %v10167_v61 = vld [vmem:[#allocation129_spill] sm:$0xff] }
 0x65a   : > { %v4228_v38 = vpop.eup %4227  ;;  %3542 = vst [vmem:[%s9617_s4 + $0x430] sm:$0xff] %v4226_v59  ;;  %4253 = vtanh.f32 %v3044_v10  ;;  %v3049_v2 = vadd.f32 %v8410_v53, %v2786_v28  ;;  %v2790_v44 = vmul.f32 %v8399_v7, %v2527_v26  ;;  %v3050_v37 = vadd.f32 %v8410_v53, %v2787_v5 }
 0x65b   : > { %v4230_v54 = vpop.eup %4229  ;;  %3543 = vst [vmem:[%s9617_s4 + $0x438] sm:$0xff] %v4228_v38  ;;  %4255 = vtanh.f32 %v3045_v32  ;;  %v3051_v11 = vadd.f32 %v8410_v53, %v2788_v34  ;;  %v3052_v63 = vadd.f32 %v8410_v53, %v2789_v20  ;;  %v2528_v45 = vmul.f32 %v7786_v42, %v10156_v8 }
 0x65c   : > { %v4232_v41 = vpop.eup %4231  ;;  %3544 = vst [vmem:[%s9617_s4 + $0x440] sm:$0xff] %v4230_v54  ;;  %4257 = vtanh.f32 %v3046_v50  ;;  %v2529_v19 = vmul.f32 %v7786_v42, %v10157_v14  ;;  %v2530_v13 = vmul.f32 %v7786_v42, %v10158_v9  ;;  %v2531_v43 = vmul.f32 %v7786_v42, %v10159_v36  ;;  %v10168_v14 = vld [vmem:[#allocation130_spill] sm:$0xff]  ;;  %v10169_v9 = vld [vmem:[#allocation131_spill] sm:$0xff] }
 0x65d   : > { %v4234_v27 = vpop.eup %4233  ;;  %3545 = vst [vmem:[%s9617_s4 + $0x448] sm:$0xff] %v4232_v41  ;;  %4259 = vtanh.f32 %v3047_v30  ;;  %v2532_v16 = vmul.f32 %v7786_v42, %v10160_v17  ;;  %v2533_v29 = vmul.f32 %v7786_v42, %v10161_v21  ;;  %v2791_v35 = vmul.f32 %v8399_v7, %v2528_v45  ;;  %v10171_v17 = vld [vmem:[#allocation133_spill] sm:$0xff]  ;;  %v10172_v21 = vld [vmem:[#allocation134_spill] sm:$0xff] }
 0x65e   : > { %v4236_v31 = vpop.eup %4235  ;;  %3546 = vst [vmem:[%s9617_s4 + $0x450] sm:$0xff] %v4234_v27  ;;  %4261 = vtanh.f32 %v3048_v33  ;;  %v2792_v25 = vmul.f32 %v8399_v7, %v2529_v19  ;;  %v2793_v48 = vmul.f32 %v8399_v7, %v2530_v13  ;;  %v3053_v52 = vadd.f32 %v8410_v53, %v2790_v44  ;;  %v10170_v27 = vld [vmem:[#allocation132_spill] sm:$0xff] }
 0x65f   : > { %v4238_v22 = vpop.eup %4237  ;;  %3547 = vst [vmem:[%s9617_s4 + $0x458] sm:$0xff] %v4236_v31  ;;  %4263 = vtanh.f32 %v3049_v2  ;;  %v2794_v60 = vmul.f32 %v8399_v7, %v2531_v43  ;;  %v2795_v12 = vmul.f32 %v8399_v7, %v2532_v16  ;;  %v3054_v47 = vadd.f32 %v8410_v53, %v2791_v35  ;;  %v10173_v31 = vld [vmem:[#allocation135_spill] sm:$0xff] }
 0x660   : > { %v4240_v6 = vpop.eup %4239  ;;  %3548 = vst [vmem:[%s9617_s4 + $0x460] sm:$0xff] %v4238_v22  ;;  %4265 = vtanh.f32 %v3050_v37  ;;  %v3055_v18 = vadd.f32 %v8410_v53, %v2792_v25  ;;  %v2796_v10 = vmul.f32 %v8399_v7, %v2533_v29  ;;  %v3056_v50 = vadd.f32 %v8410_v53, %v2793_v48 }
 0x661   : > { %v4242_v32 = vpop.eup %4241  ;;  %3549 = vst [vmem:[%s9617_s4 + $0x468] sm:$0xff] %v4240_v6  ;;  %4267 = vtanh.f32 %v3051_v11  ;;  %v3057_v24 = vadd.f32 %v8410_v53, %v2794_v60  ;;  %v3058_v58 = vadd.f32 %v8410_v53, %v2795_v12  ;;  %v2534_v40 = vmul.f32 %v7786_v42, %v10162_v49 }
 0x662   : > { %v4244_v0 = vpop.eup %4243  ;;  %3550 = vst [vmem:[%s9617_s4 + $0x470] sm:$0xff] %v4242_v32  ;;  %4269 = vtanh.f32 %v3052_v63  ;;  %v2535_v23 = vmul.f32 %v7786_v42, %v10163_v15  ;;  %v2536_v51 = vmul.f32 %v7786_v42, %v10164_v46  ;;  %v2537_v3 = vmul.f32 %v7786_v42, %v10165_v62  ;;  %v10174_v15 = vld [vmem:[#allocation136_spill] sm:$0xff]  ;;  %v10175_v46 = vld [vmem:[#allocation137_spill] sm:$0xff] }
 0x663   : > { %v4246_v56 = vpop.eup %4245  ;;  %3551 = vst [vmem:[%s9617_s4 + $0x478] sm:$0xff] %v4244_v0  ;;  %4271 = vtanh.f32 %v3053_v52  ;;  %v2538_v26 = vmul.f32 %v7786_v42, %v10166_v57  ;;  %v2539_v1 = vmul.f32 %v7786_v42, %v10167_v61  ;;  %v2797_v5 = vmul.f32 %v8399_v7, %v2534_v40  ;;  %v10177_v57 = vld [vmem:[#allocation139_spill] sm:$0xff]  ;;  %v10178_v61 = vld [vmem:[#allocation140_spill] sm:$0xff] }
 0x664   : > { %v4248_v28 = vpop.eup %4247  ;;  %3552 = vst [vmem:[%s9617_s4 + $0x480] sm:$0xff] %v4246_v56  ;;  %4273 = vtanh.f32 %v3054_v47  ;;  %v2798_v59 = vmul.f32 %v8399_v7, %v2535_v23  ;;  %v2799_v30 = vmul.f32 %v8399_v7, %v2536_v51  ;;  %v3059_v20 = vadd.f32 %v8410_v53, %v2796_v10  ;;  %v10176_v56 = vld [vmem:[#allocation138_spill] sm:$0xff] }
 0x665   : > { %v4250_v34 = vpop.eup %4249  ;;  %3553 = vst [vmem:[%s9617_s4 + $0x488] sm:$0xff] %v4248_v28  ;;  %4275 = vtanh.f32 %v3055_v18  ;;  %v2800_v38 = vmul.f32 %v8399_v7, %v2537_v3  ;;  %v2801_v33 = vmul.f32 %v8399_v7, %v2538_v26  ;;  %v3060_v44 = vadd.f32 %v8410_v53, %v2797_v5  ;;  %v10179_v28 = vld [vmem:[#allocation141_spill] sm:$0xff] }
 0x666   : > { %v4252_v2 = vpop.eup %4251  ;;  %3554 = vst [vmem:[%s9617_s4 + $0x490] sm:$0xff] %v4250_v34  ;;  %4277 = vtanh.f32 %v3056_v50  ;;  %v3061_v54 = vadd.f32 %v8410_v53, %v2798_v59  ;;  %v2802_v37 = vmul.f32 %v8399_v7, %v2539_v1  ;;  %v3062_v63 = vadd.f32 %v8410_v53, %v2799_v30 }
 0x667   : > { %v4254_v11 = vpop.eup %4253  ;;  %3555 = vst [vmem:[%s9617_s4 + $0x498] sm:$0xff] %v4252_v2  ;;  %4279 = vtanh.f32 %v3057_v24  ;;  %v3063_v41 = vadd.f32 %v8410_v53, %v2800_v38  ;;  %v3064_v8 = vadd.f32 %v8410_v53, %v2801_v33  ;;  %v2540_v19 = vmul.f32 %v7786_v42, %v10168_v14 }
 0x668   : > { %v4256_v45 = vpop.eup %4255  ;;  %3556 = vst [vmem:[%s9617_s4 + $0x4a0] sm:$0xff] %v4254_v11  ;;  %4281 = vtanh.f32 %v3058_v58  ;;  %v2541_v13 = vmul.f32 %v7786_v42, %v10169_v9  ;;  %v2542_v36 = vmul.f32 %v7786_v42, %v10170_v27  ;;  %v2543_v16 = vmul.f32 %v7786_v42, %v10171_v17  ;;  %v10180_v9 = vld [vmem:[#allocation142_spill] sm:$0xff]  ;;  %v10181_v27 = vld [vmem:[#allocation143_spill] sm:$0xff] }
 0x669   : > { %v4258_v43 = vpop.eup %4257  ;;  %3557 = vst [vmem:[%s9617_s4 + $0x4a8] sm:$0xff] %v4256_v45  ;;  %4283 = vtanh.f32 %v3059_v20  ;;  %v2544_v29 = vmul.f32 %v7786_v42, %v10172_v21  ;;  %v2545_v35 = vmul.f32 %v7786_v42, %v10173_v31  ;;  %v2803_v48 = vmul.f32 %v8399_v7, %v2540_v19  ;;  %v10183_v21 = vld [vmem:[#allocation145_spill] sm:$0xff]  ;;  %v10184_v31 = vld [vmem:[#allocation146_spill] sm:$0xff] }
 0x66a   : > { %v4260_v25 = vpop.eup %4259  ;;  %3558 = vst [vmem:[%s9617_s4 + $0x4b0] sm:$0xff] %v4258_v43  ;;  %4285 = vtanh.f32 %v3060_v44  ;;  %v2804_v22 = vmul.f32 %v8399_v7, %v2541_v13  ;;  %v2805_v52 = vmul.f32 %v8399_v7, %v2542_v36  ;;  %v3065_v12 = vadd.f32 %v8410_v53, %v2802_v37  ;;  %v9005_v44 = vld [vmem:[%s9615_s2] ss:$0 sm:$0xff]  ;;  %v10182_v43 = vld [vmem:[#allocation144_spill] sm:$0xff] }
 0x66b   : > { %v4262_v60 = vpop.eup %4261  ;;  %3559 = vst [vmem:[%s9617_s4 + $0x4b8] sm:$0xff] %v4260_v25  ;;  %4287 = vtanh.f32 %v3061_v54  ;;  %v2806_v6 = vmul.f32 %v8399_v7, %v2543_v16  ;;  %v2807_v47 = vmul.f32 %v8399_v7, %v2544_v29  ;;  %v3066_v10 = vadd.f32 %v8410_v53, %v2803_v48  ;;  %v10185_v25 = vld [vmem:[#allocation147_spill] sm:$0xff] }
 0x66c   : > { %v4264_v18 = vpop.eup %4263  ;;  %3560 = vst [vmem:[%s9617_s4 + $0x4c0] sm:$0xff] %v4262_v60  ;;  %4289 = vtanh.f32 %v3062_v63  ;;  %v3067_v32 = vadd.f32 %v8410_v53, %v2804_v22  ;;  %v2808_v50 = vmul.f32 %v8399_v7, %v2545_v35  ;;  %v3068_v58 = vadd.f32 %v8410_v53, %v2805_v52 }
 0x66d   : > { %v4266_v24 = vpop.eup %4265  ;;  %3561 = vst [vmem:[%s9617_s4 + $0x4c8] sm:$0xff] %v4264_v18  ;;  %4291 = vtanh.f32 %v3063_v41  ;;  %v3069_v0 = vadd.f32 %v8410_v53, %v2806_v6  ;;  %v3070_v49 = vadd.f32 %v8410_v53, %v2807_v47  ;;  %v2546_v23 = vmul.f32 %v7786_v42, %v10174_v15 }
 0x66e   : > { %v4268_v40 = vpop.eup %4267  ;;  %3562 = vst [vmem:[%s9617_s4 + $0x4d0] sm:$0xff] %v4266_v24  ;;  %4293 = vtanh.f32 %v3064_v8  ;;  %v2547_v51 = vmul.f32 %v7786_v42, %v10175_v46  ;;  %v2548_v62 = vmul.f32 %v7786_v42, %v10176_v56  ;;  %v2549_v26 = vmul.f32 %v7786_v42, %v10177_v57  ;;  %v9020_v8 = vld [vmem:[%s9616_s3] ss:$0 sm:$0xff]  ;;  %v10186_v46 = vld [vmem:[#allocation148_spill] sm:$0xff]  ;;  %v10187_v56 = vld [vmem:[#allocation149_spill] sm:$0xff] }
 0x66f   : > { %v4270_v3 = vpop.eup %4269  ;;  %3563 = vst [vmem:[%s9617_s4 + $0x4d8] sm:$0xff] %v4268_v40  ;;  %4295 = vtanh.f32 %v3065_v12  ;;  %v2550_v1 = vmul.f32 %v7786_v42, %v10178_v61  ;;  %v2551_v5 = vmul.f32 %v7786_v42, %v10179_v28  ;;  %v2809_v30 = vmul.f32 %v8399_v7, %v2546_v23  ;;  %v10189_v61 = vld [vmem:[#allocation151_spill] sm:$0xff]  ;;  %v10190_v28 = vld [vmem:[#allocation152_spill] sm:$0xff] }
 0x670   : > { %v4272_v59 = vpop.eup %4271  ;;  %3564 = vst [vmem:[%s9617_s4 + $0x4e0] sm:$0xff] %v4270_v3  ;;  %4297 = vtanh.f32 %v3066_v10  ;;  %v2810_v34 = vmul.f32 %v8399_v7, %v2547_v51  ;;  %v2811_v20 = vmul.f32 %v8399_v7, %v2548_v62  ;;  %v3071_v33 = vadd.f32 %v8410_v53, %v2808_v50  ;;  %v10188_v3 = vld [vmem:[#allocation150_spill] sm:$0xff] }
 0x671   : > { %v4274_v38 = vpop.eup %4273  ;;  %3565 = vst [vmem:[%s9617_s4 + $0x4e8] sm:$0xff] %v4272_v59  ;;  %4299 = vtanh.f32 %v3067_v32  ;;  %v2812_v2 = vmul.f32 %v8399_v7, %v2549_v26  ;;  %v2813_v54 = vmul.f32 %v9005_v44, %v2550_v1  ;;  %v3072_v11 = vadd.f32 %v8410_v53, %v2809_v30  ;;  %v10191_v59 = vld [vmem:[#allocation153_spill] sm:$0xff] }
 0x672   : > { %v4276_v37 = vpop.eup %4275  ;;  %3566 = vst [vmem:[%s9617_s4 + $0x4f0] sm:$0xff] %v4274_v38  ;;  %4301 = vtanh.f32 %v3068_v58  ;;  %v3073_v63 = vadd.f32 %v8410_v53, %v2810_v34  ;;  %v2814_v41 = vmul.f32 %v9005_v44, %v2551_v5  ;;  %v3074_v45 = vadd.f32 %v9020_v8, %v2811_v20 }
 0x673   : > { %v4278_v7 = vpop.eup %4277  ;;  %3567 = vst [vmem:[%s9617_s4 + $0x4f8] sm:$0xff] %v4276_v37  ;;  %4303 = vtanh.f32 %v3069_v0  ;;  %v3075_v14 = vadd.f32 %v9020_v8, %v2812_v2  ;;  %v3076_v19 = vadd.f32 %v9020_v8, %v2813_v54  ;;  %v2552_v13 = vmul.f32 %v7786_v42, %v10180_v9 }
 0x674   : > { %v4280_v53 = vpop.eup %4279  ;;  %3568 = vst [vmem:[%s9617_s4 + $0x500] sm:$0xff] %v4278_v7  ;;  %4305 = vtanh.f32 %v3070_v49  ;;  %v2553_v36 = vmul.f32 %v7786_v42, %v10181_v27  ;;  %v2554_v17 = vmul.f32 %v7786_v42, %v10182_v43  ;;  %v2555_v29 = vmul.f32 %v7786_v42, %v10183_v21  ;;  %v10192_v27 = vld [vmem:[#allocation154_spill] sm:$0xff]  ;;  %v10193_v43 = vld [vmem:[#allocation155_spill] sm:$0xff] }
 0x675   : > { %v4282_v16 = vpop.eup %4281  ;;  %3569 = vst [vmem:[%s9617_s4 + $0x508] sm:$0xff] %v4280_v53  ;;  %4307 = vtanh.f32 %v3071_v33  ;;  %v2556_v35 = vmul.f32 %v7786_v42, %v10184_v31  ;;  %v2557_v48 = vmul.f32 %v7786_v42, %v10185_v25  ;;  %v2815_v52 = vmul.f32 %v9005_v44, %v2552_v13  ;;  %v10195_v31 = vld [vmem:[#allocation157_spill] sm:$0xff]  ;;  %v10196_v25 = vld [vmem:[#allocation158_spill] sm:$0xff] }
 0x676   : > { %v4284_v22 = vpop.eup %4283  ;;  %3570 = vst [vmem:[%s9617_s4 + $0x510] sm:$0xff] %v4282_v16  ;;  %4309 = vtanh.f32 %v3072_v11  ;;  %v2816_v60 = vmul.f32 %v9005_v44, %v2553_v36  ;;  %v2817_v12 = vmul.f32 %v9005_v44, %v2554_v17  ;;  %v3077_v47 = vadd.f32 %v9020_v8, %v2814_v41  ;;  %v10194_v16 = vld [vmem:[#allocation156_spill] sm:$0xff] }
 0x677   : > { %v4286_v6 = vpop.eup %4285  ;;  %3571 = vst [vmem:[%s9617_s4 + $0x518] sm:$0xff] %v4284_v22  ;;  %4311 = vtanh.f32 %v3073_v63  ;;  %v2818_v18 = vmul.f32 %v9005_v44, %v2555_v29  ;;  %v2819_v10 = vmul.f32 %v9005_v44, %v2556_v35  ;;  %v3078_v50 = vadd.f32 %v9020_v8, %v2815_v52  ;;  %v10197_v22 = vld [vmem:[#allocation159_spill] sm:$0xff] }
 0x678   : > { %v4288_v32 = vpop.eup %4287  ;;  %3572 = vst [vmem:[%s9617_s4 + $0x520] sm:$0xff] %v4286_v6  ;;  %4313 = vtanh.f32 %v3074_v45  ;;  %v3079_v24 = vadd.f32 %v9020_v8, %v2816_v60  ;;  %v2820_v58 = vmul.f32 %v9005_v44, %v2557_v48  ;;  %v3080_v49 = vadd.f32 %v9020_v8, %v2817_v12 }
 0x679   : > { %v4290_v0 = vpop.eup %4289  ;;  %3573 = vst [vmem:[%s9617_s4 + $0x528] sm:$0xff] %v4288_v32  ;;  %4315 = vtanh.f32 %v3075_v14  ;;  %v3081_v40 = vadd.f32 %v9020_v8, %v2818_v18  ;;  %v3082_v15 = vadd.f32 %v9020_v8, %v2819_v10  ;;  %v2558_v51 = vmul.f32 %v7786_v42, %v10186_v46 }
 0x67a   : > { %v4292_v23 = vpop.eup %4291  ;;  %3574 = vst [vmem:[%s9617_s4 + $0x530] sm:$0xff] %v4290_v0  ;;  %4317 = vtanh.f32 %v3076_v19  ;;  %v2559_v62 = vmul.f32 %v7786_v42, %v10187_v56  ;;  %v2560_v57 = vmul.f32 %v7786_v42, %v10188_v3  ;;  %v2561_v1 = vmul.f32 %v7786_v42, %v10189_v61  ;;  %v10198_v56 = vld [vmem:[#allocation160_spill] sm:$0xff]  ;;  %v10199_v3 = vld [vmem:[#allocation161_spill] sm:$0xff] }
 0x67b   : > { %v4294_v26 = vpop.eup %4293  ;;  %3575 = vst [vmem:[%s9617_s4 + $0x538] sm:$0xff] %v4292_v23  ;;  %4319 = vtanh.f32 %v3077_v47  ;;  %v2562_v5 = vmul.f32 %v7786_v42, %v10190_v28  ;;  %v2563_v30 = vmul.f32 %v7786_v42, %v10191_v59  ;;  %v2821_v20 = vmul.f32 %v9005_v44, %v2558_v51  ;;  %v10201_v28 = vld [vmem:[#allocation163_spill] sm:$0xff]  ;;  %v10202_v59 = vld [vmem:[#allocation164_spill] sm:$0xff] }
 0x67c   : > { %v4296_v34 = vpop.eup %4295  ;;  %3576 = vst [vmem:[%s9617_s4 + $0x540] sm:$0xff] %v4294_v26  ;;  %4321 = vtanh.f32 %v3078_v50  ;;  %v2822_v38 = vmul.f32 %v9005_v44, %v2559_v62  ;;  %v2823_v33 = vmul.f32 %v9005_v44, %v2560_v57  ;;  %v3083_v54 = vadd.f32 %v9020_v8, %v2820_v58  ;;  %v10200_v26 = vld [vmem:[#allocation162_spill] sm:$0xff] }
 0x67d   : > { %v4298_v2 = vpop.eup %4297  ;;  %3577 = vst [vmem:[%s9617_s4 + $0x548] sm:$0xff] %v4296_v34  ;;  %4323 = vtanh.f32 %v3079_v24  ;;  %v2824_v37 = vmul.f32 %v9005_v44, %v2561_v1  ;;  %v2825_v11 = vmul.f32 %v9005_v44, %v2562_v5  ;;  %v3084_v41 = vadd.f32 %v9020_v8, %v2821_v20  ;;  %v10203_v34 = vld [vmem:[#allocation165_spill] sm:$0xff] }
 0x67e   : > { %v4300_v63 = vpop.eup %4299  ;;  %3578 = vst [vmem:[%s9617_s4 + $0x550] sm:$0xff] %v4298_v2  ;;  %4325 = vtanh.f32 %v3080_v49  ;;  %v3085_v7 = vadd.f32 %v9020_v8, %v2822_v38  ;;  %v2826_v45 = vmul.f32 %v9005_v44, %v2563_v30  ;;  %v3086_v19 = vadd.f32 %v9020_v8, %v2823_v33 }
 0x67f   : > { %v4302_v14 = vpop.eup %4301  ;;  %3579 = vst [vmem:[%s9617_s4 + $0x558] sm:$0xff] %v4300_v63  ;;  %4327 = vtanh.f32 %v3081_v40  ;;  %v3087_v53 = vadd.f32 %v9020_v8, %v2824_v37  ;;  %v3088_v9 = vadd.f32 %v9020_v8, %v2825_v11  ;;  %v2564_v36 = vmul.f32 %v7786_v42, %v10192_v27 }
 0x680   : > { %v4304_v13 = vpop.eup %4303  ;;  %3580 = vst [vmem:[%s9617_s4 + $0x560] sm:$0xff] %v4302_v14  ;;  %4329 = vtanh.f32 %v3082_v15  ;;  %v2565_v17 = vmul.f32 %v7786_v42, %v10193_v43  ;;  %v2566_v21 = vmul.f32 %v7786_v42, %v10194_v16  ;;  %v2567_v35 = vmul.f32 %v7786_v42, %v10195_v31  ;;  %v10204_v43 = vld [vmem:[#allocation166_spill] sm:$0xff]  ;;  %v10205_v16 = vld [vmem:[#allocation167_spill] sm:$0xff] }
 0x681   : > { %v4306_v29 = vpop.eup %4305  ;;  %3581 = vst [vmem:[%s9617_s4 + $0x568] sm:$0xff] %v4304_v13  ;;  %4331 = vtanh.f32 %v3083_v54  ;;  %v2568_v48 = vmul.f32 %v7786_v42, %v10196_v25  ;;  %v2569_v52 = vmul.f32 %v7786_v42, %v10197_v22  ;;  %v2827_v12 = vmul.f32 %v9005_v44, %v2564_v36  ;;  %v10207_v25 = vld [vmem:[#allocation169_spill] sm:$0xff]  ;;  %v10208_v22 = vld [vmem:[#allocation170_spill] sm:$0xff] }
 0x682   : > { %v4308_v60 = vpop.eup %4307  ;;  %3582 = vst [vmem:[%s9617_s4 + $0x570] sm:$0xff] %v4306_v29  ;;  %4333 = vtanh.f32 %v3084_v41  ;;  %v2828_v6 = vmul.f32 %v9005_v44, %v2565_v17  ;;  %v2829_v47 = vmul.f32 %v9005_v44, %v2566_v21  ;;  %v3089_v10 = vadd.f32 %v9020_v8, %v2826_v45  ;;  %v10206_v29 = vld [vmem:[#allocation168_spill] sm:$0xff] }
 0x683   : > { %v4310_v18 = vpop.eup %4309  ;;  %3583 = vst [vmem:[%s9617_s4 + $0x578] sm:$0xff] %v4308_v60  ;;  %4335 = vtanh.f32 %v3085_v7  ;;  %v2830_v32 = vmul.f32 %v9005_v44, %v2567_v35  ;;  %v2831_v50 = vmul.f32 %v9005_v44, %v2568_v48  ;;  %v3090_v58 = vadd.f32 %v9020_v8, %v2827_v12  ;;  %v10209_v60 = vld [vmem:[#allocation171_spill] sm:$0xff] }
 0x684   : > { %v4312_v24 = vpop.eup %4311  ;;  %3584 = vst [vmem:[%s9617_s4 + $0x580] sm:$0xff] %v4310_v18  ;;  %4337 = vtanh.f32 %v3086_v19  ;;  %v3091_v0 = vadd.f32 %v9020_v8, %v2828_v6  ;;  %v2832_v49 = vmul.f32 %v9005_v44, %v2569_v52  ;;  %v3092_v15 = vadd.f32 %v9020_v8, %v2829_v47 }
 0x685   : > { %v4314_v40 = vpop.eup %4313  ;;  %3585 = vst [vmem:[%s9617_s4 + $0x588] sm:$0xff] %v4312_v24  ;;  %4339 = vtanh.f32 %v3087_v53  ;;  %v3093_v23 = vadd.f32 %v9020_v8, %v2830_v32  ;;  %v3094_v46 = vadd.f32 %v9020_v8, %v2831_v50  ;;  %v2570_v62 = vmul.f32 %v7786_v42, %v10198_v56 }
 0x686   : > { %v4316_v51 = vpop.eup %4315  ;;  %3586 = vst [vmem:[%s9617_s4 + $0x590] sm:$0xff] %v4314_v40  ;;  %4341 = vtanh.f32 %v3088_v9  ;;  %v2571_v57 = vmul.f32 %v7786_v42, %v10199_v3  ;;  %v2572_v61 = vmul.f32 %v7786_v42, %v10200_v26  ;;  %v2573_v5 = vmul.f32 %v7786_v42, %v10201_v28  ;;  %v10210_v3 = vld [vmem:[#allocation172_spill] sm:$0xff]  ;;  %v10211_v26 = vld [vmem:[#allocation173_spill] sm:$0xff] }
 0x687   : > { %v4318_v1 = vpop.eup %4317  ;;  %3587 = vst [vmem:[%s9617_s4 + $0x598] sm:$0xff] %v4316_v51  ;;  %4343 = vtanh.f32 %v3089_v10  ;;  %v2574_v30 = vmul.f32 %v7786_v42, %v10202_v59  ;;  %v2575_v20 = vmul.f32 %v7786_v42, %v10203_v34  ;;  %v2833_v33 = vmul.f32 %v9005_v44, %v2570_v62  ;;  %v10213_v59 = vld [vmem:[#allocation175_spill] sm:$0xff]  ;;  %v10214_v34 = vld [vmem:[#allocation176_spill] sm:$0xff] }
 0x688   : > { %v4320_v38 = vpop.eup %4319  ;;  %3588 = vst [vmem:[%s9617_s4 + $0x5a0] sm:$0xff] %v4318_v1  ;;  %4345 = vtanh.f32 %v3090_v58  ;;  %v2834_v2 = vmul.f32 %v9005_v44, %v2571_v57  ;;  %v2835_v54 = vmul.f32 %v9005_v44, %v2572_v61  ;;  %v3095_v11 = vadd.f32 %v9020_v8, %v2832_v49  ;;  %v10212_v1 = vld [vmem:[#allocation174_spill] sm:$0xff] }
 0x689   : > { %v4322_v37 = vpop.eup %4321  ;;  %3589 = vst [vmem:[%s9617_s4 + $0x5a8] sm:$0xff] %v4320_v38  ;;  %4347 = vtanh.f32 %v3091_v0  ;;  %v2836_v63 = vmul.f32 %v9005_v44, %v2573_v5  ;;  %v2837_v41 = vmul.f32 %v9005_v44, %v2574_v30  ;;  %v3096_v45 = vadd.f32 %v9020_v8, %v2833_v33  ;;  %v10215_v38 = vld [vmem:[#allocation177_spill] sm:$0xff] }
 0x68a   : > { %v4324_v7 = vpop.eup %4323  ;;  %3590 = vst [vmem:[%s9617_s4 + $0x5b0] sm:$0xff] %v4322_v37  ;;  %4349 = vtanh.f32 %v3092_v15  ;;  %v3097_v14 = vadd.f32 %v9020_v8, %v2834_v2  ;;  %v2838_v19 = vmul.f32 %v9005_v44, %v2575_v20  ;;  %v3098_v9 = vadd.f32 %v9020_v8, %v2835_v54 }
 0x68b   : > { %v4326_v53 = vpop.eup %4325  ;;  %3591 = vst [vmem:[%s9617_s4 + $0x5b8] sm:$0xff] %v4324_v7  ;;  %4351 = vtanh.f32 %v3093_v23  ;;  %v3099_v13 = vadd.f32 %v9020_v8, %v2836_v63  ;;  %v3100_v27 = vadd.f32 %v9020_v8, %v2837_v41  ;;  %v2576_v17 = vmul.f32 %v7786_v42, %v10204_v43 }
 0x68c   : > { %v4328_v36 = vpop.eup %4327  ;;  %3592 = vst [vmem:[%s9617_s4 + $0x5c0] sm:$0xff] %v4326_v53  ;;  %4353 = vtanh.f32 %v3094_v46  ;;  %v2577_v21 = vmul.f32 %v7786_v42, %v10205_v16  ;;  %v2578_v31 = vmul.f32 %v7786_v42, %v10206_v29  ;;  %v2579_v48 = vmul.f32 %v7786_v42, %v10207_v25  ;;  %v10216_v16 = vld [vmem:[#allocation178_spill] sm:$0xff]  ;;  %v10217_v29 = vld [vmem:[#allocation179_spill] sm:$0xff] }
 0x68d   : > { %v4330_v35 = vpop.eup %4329  ;;  %3593 = vst [vmem:[%s9617_s4 + $0x5c8] sm:$0xff] %v4328_v36  ;;  %4355 = vtanh.f32 %v3095_v11  ;;  %v2580_v52 = vmul.f32 %v7786_v42, %v10208_v22  ;;  %v2581_v12 = vmul.f32 %v7786_v42, %v10209_v60  ;;  %v2839_v47 = vmul.f32 %v9005_v44, %v2576_v17  ;;  %v10219_v22 = vld [vmem:[#allocation181_spill] sm:$0xff]  ;;  %v10220_v60 = vld [vmem:[#allocation182_spill] sm:$0xff] }
 0x68e   : > { %v4332_v6 = vpop.eup %4331  ;;  %3594 = vst [vmem:[%s9617_s4 + $0x5d0] sm:$0xff] %v4330_v35  ;;  %4357 = vtanh.f32 %v3096_v45  ;;  %v2840_v18 = vmul.f32 %v9005_v44, %v2577_v21  ;;  %v2841_v10 = vmul.f32 %v9005_v44, %v2578_v31  ;;  %v3101_v50 = vadd.f32 %v9020_v8, %v2838_v19  ;;  %v10218_v35 = vld [vmem:[#allocation180_spill] sm:$0xff] }
 0x68f   : > { %v4334_v32 = vpop.eup %4333  ;;  %3595 = vst [vmem:[%s9617_s4 + $0x5d8] sm:$0xff] %v4332_v6  ;;  %4359 = vtanh.f32 %v3097_v14  ;;  %v2842_v24 = vmul.f32 %v9005_v44, %v2579_v48  ;;  %v2843_v58 = vmul.f32 %v9005_v44, %v2580_v52  ;;  %v3102_v49 = vadd.f32 %v9020_v8, %v2839_v47  ;;  %v10221_v6 = vld [vmem:[#allocation183_spill] sm:$0xff] }
 0x690   : > { %v4336_v0 = vpop.eup %4335  ;;  %3596 = vst [vmem:[%s9617_s4 + $0x5e0] sm:$0xff] %v4334_v32  ;;  %4361 = vtanh.f32 %v3098_v9  ;;  %v3103_v40 = vadd.f32 %v9020_v8, %v2840_v18  ;;  %v2844_v15 = vmul.f32 %v9005_v44, %v2581_v12  ;;  %v3104_v46 = vadd.f32 %v9020_v8, %v2841_v10 }
 0x691   : > { %v4338_v23 = vpop.eup %4337  ;;  %3597 = vst [vmem:[%s9617_s4 + $0x5e8] sm:$0xff] %v4336_v0  ;;  %4363 = vtanh.f32 %v3099_v13  ;;  %v3105_v51 = vadd.f32 %v9020_v8, %v2842_v24  ;;  %v3106_v56 = vadd.f32 %v9020_v8, %v2843_v58  ;;  %v2582_v57 = vmul.f32 %v7786_v42, %v10210_v3 }
 0x692   : > { %v4340_v62 = vpop.eup %4339  ;;  %3598 = vst [vmem:[%s9617_s4 + $0x5f0] sm:$0xff] %v4338_v23  ;;  %4365 = vtanh.f32 %v3100_v27  ;;  %v2583_v61 = vmul.f32 %v7786_v42, %v10211_v26  ;;  %v2584_v28 = vmul.f32 %v7786_v42, %v10212_v1  ;;  %v2585_v30 = vmul.f32 %v7786_v42, %v10213_v59  ;;  %v10222_v26 = vld [vmem:[#allocation184_spill] sm:$0xff]  ;;  %v10223_v1 = vld [vmem:[#allocation185_spill] sm:$0xff] }
 0x693   : > { %v4342_v5 = vpop.eup %4341  ;;  %3599 = vst [vmem:[%s9617_s4 + $0x5f8] sm:$0xff] %v4340_v62  ;;  %4367 = vtanh.f32 %v3101_v50  ;;  %v2586_v20 = vmul.f32 %v7786_v42, %v10214_v34  ;;  %v2587_v33 = vmul.f32 %v7786_v42, %v10215_v38  ;;  %v2845_v54 = vmul.f32 %v9005_v44, %v2582_v57  ;;  %v10225_v34 = vld [vmem:[#allocation187_spill] sm:$0xff]  ;;  %v10226_v38 = vld [vmem:[#allocation188_spill] sm:$0xff] }
 0x694   : > { %v4344_v2 = vpop.eup %4343  ;;  %3600 = vst [vmem:[%s9617_s4 + $0x600] sm:$0xff] %v4342_v5  ;;  %4369 = vtanh.f32 %v3102_v49  ;;  %v2846_v37 = vmul.f32 %v9005_v44, %v2583_v61  ;;  %v2847_v11 = vmul.f32 %v9005_v44, %v2584_v28  ;;  %v3107_v41 = vadd.f32 %v9020_v8, %v2844_v15  ;;  %v10224_v5 = vld [vmem:[#allocation186_spill] sm:$0xff] }
 0x695   : > { %v4346_v63 = vpop.eup %4345  ;;  %3601 = vst [vmem:[%s9617_s4 + $0x608] sm:$0xff] %v4344_v2  ;;  %4371 = vtanh.f32 %v3103_v40  ;;  %v2848_v7 = vmul.f32 %v9005_v44, %v2585_v30  ;;  %v2849_v45 = vmul.f32 %v9005_v44, %v2586_v20  ;;  %v3108_v19 = vadd.f32 %v9020_v8, %v2845_v54  ;;  %v10227_v2 = vld [vmem:[#allocation189_spill] sm:$0xff] }
 0x696   : > { %v4348_v14 = vpop.eup %4347  ;;  %3602 = vst [vmem:[%s9617_s4 + $0x610] sm:$0xff] %v4346_v63  ;;  %4373 = vtanh.f32 %v3104_v46  ;;  %v3109_v53 = vadd.f32 %v9020_v8, %v2846_v37  ;;  %v2850_v9 = vmul.f32 %v9005_v44, %v2587_v33  ;;  %v3110_v27 = vadd.f32 %v9020_v8, %v2847_v11 }
 0x697   : > { %v4350_v13 = vpop.eup %4349  ;;  %3603 = vst [vmem:[%s9617_s4 + $0x618] sm:$0xff] %v4348_v14  ;;  %4375 = vtanh.f32 %v3105_v51  ;;  %v3111_v36 = vadd.f32 %v9020_v8, %v2848_v7  ;;  %v3112_v43 = vadd.f32 %v9020_v8, %v2849_v45  ;;  %v2588_v21 = vmul.f32 %v7786_v42, %v10216_v16 }
 0x698   : > { %v4352_v17 = vpop.eup %4351  ;;  %3604 = vst [vmem:[%s9617_s4 + $0x620] sm:$0xff] %v4350_v13  ;;  %4377 = vtanh.f32 %v3106_v56  ;;  %v2589_v31 = vmul.f32 %v7786_v42, %v10217_v29  ;;  %v2590_v25 = vmul.f32 %v7786_v42, %v10218_v35  ;;  %v2591_v52 = vmul.f32 %v7786_v42, %v10219_v22  ;;  %v10228_v29 = vld [vmem:[#allocation190_spill] sm:$0xff]  ;;  %v10229_v35 = vld [vmem:[#allocation191_spill] sm:$0xff] }
 0x699   : > { %v4354_v48 = vpop.eup %4353  ;;  %3605 = vst [vmem:[%s9617_s4 + $0x628] sm:$0xff] %v4352_v17  ;;  %4379 = vtanh.f32 %v3107_v41  ;;  %v2592_v12 = vmul.f32 %v7786_v42, %v10220_v60  ;;  %v2593_v47 = vmul.f32 %v7786_v42, %v10221_v6  ;;  %v2851_v10 = vmul.f32 %v9005_v44, %v2588_v21  ;;  %v10231_v60 = vld [vmem:[#allocation193_spill] sm:$0xff]  ;;  %v10232_v6 = vld [vmem:[#allocation194_spill] sm:$0xff] }
 0x69a   : > { %v4356_v18 = vpop.eup %4355  ;;  %3606 = vst [vmem:[%s9617_s4 + $0x630] sm:$0xff] %v4354_v48  ;;  %4381 = vtanh.f32 %v3108_v19  ;;  %v2852_v32 = vmul.f32 %v9005_v44, %v2589_v31  ;;  %v2853_v50 = vmul.f32 %v9005_v44, %v2590_v25  ;;  %v3113_v58 = vadd.f32 %v9020_v8, %v2850_v9  ;;  %v10230_v48 = vld [vmem:[#allocation192_spill] sm:$0xff] }
 0x69b   : > { %v4358_v24 = vpop.eup %4357  ;;  %3607 = vst [vmem:[%s9617_s4 + $0x638] sm:$0xff] %v4356_v18  ;;  %4383 = vtanh.f32 %v3109_v53  ;;  %v2854_v0 = vmul.f32 %v9005_v44, %v2591_v52  ;;  %v2855_v49 = vmul.f32 %v9005_v44, %v2592_v12  ;;  %v3114_v15 = vadd.f32 %v9020_v8, %v2851_v10  ;;  %v10233_v18 = vld [vmem:[#allocation195_spill] sm:$0xff] }
 0x69c   : > { %v4360_v40 = vpop.eup %4359  ;;  %3608 = vst [vmem:[%s9617_s4 + $0x640] sm:$0xff] %v4358_v24  ;;  %4385 = vtanh.f32 %v3110_v27  ;;  %v3115_v23 = vadd.f32 %v9020_v8, %v2852_v32  ;;  %v2856_v46 = vmul.f32 %v9005_v44, %v2593_v47  ;;  %v3116_v56 = vadd.f32 %v9020_v8, %v2853_v50 }
 0x69d   : > { %v4362_v51 = vpop.eup %4361  ;;  %3609 = vst [vmem:[%s9617_s4 + $0x648] sm:$0xff] %v4360_v40  ;;  %4387 = vtanh.f32 %v3111_v36  ;;  %v3117_v62 = vadd.f32 %v9020_v8, %v2854_v0  ;;  %v3118_v3 = vadd.f32 %v9020_v8, %v2855_v49  ;;  %v2594_v61 = vmul.f32 %v7786_v42, %v10222_v26 }
 0x69e   : > { %v4364_v57 = vpop.eup %4363  ;;  %3610 = vst [vmem:[%s9617_s4 + $0x650] sm:$0xff] %v4362_v51  ;;  %4389 = vtanh.f32 %v3112_v43  ;;  %v2595_v28 = vmul.f32 %v7786_v42, %v10223_v1  ;;  %v2596_v59 = vmul.f32 %v7786_v42, %v10224_v5  ;;  %v2597_v20 = vmul.f32 %v7786_v42, %v10225_v34  ;;  %v10234_v1 = vld [vmem:[#allocation196_spill] sm:$0xff]  ;;  %v10235_v5 = vld [vmem:[#allocation197_spill] sm:$0xff] }
 0x69f   : > { %v4366_v30 = vpop.eup %4365  ;;  %3611 = vst [vmem:[%s9617_s4 + $0x658] sm:$0xff] %v4364_v57  ;;  %4391 = vtanh.f32 %v3113_v58  ;;  %v2598_v33 = vmul.f32 %v7786_v42, %v10226_v38  ;;  %v2599_v54 = vmul.f32 %v7786_v42, %v10227_v2  ;;  %v2857_v11 = vmul.f32 %v9005_v44, %v2594_v61  ;;  %v10237_v38 = vld [vmem:[#allocation199_spill] sm:$0xff]  ;;  %v10238_v2 = vld [vmem:[#allocation200_spill] sm:$0xff] }
 0x6a0   : > { %v4368_v37 = vpop.eup %4367  ;;  %3612 = vst [vmem:[%s9617_s4 + $0x660] sm:$0xff] %v4366_v30  ;;  %4393 = vtanh.f32 %v3114_v15  ;;  %v2858_v63 = vmul.f32 %v9005_v44, %v2595_v28  ;;  %v2859_v41 = vmul.f32 %v9005_v44, %v2596_v59  ;;  %v3119_v45 = vadd.f32 %v9020_v8, %v2856_v46  ;;  %v10236_v30 = vld [vmem:[#allocation198_spill] sm:$0xff] }
 0x6a1   : > { %v4370_v7 = vpop.eup %4369  ;;  %3613 = vst [vmem:[%s9617_s4 + $0x668] sm:$0xff] %v4368_v37  ;;  %4395 = vtanh.f32 %v3115_v23  ;;  %v2860_v14 = vmul.f32 %v9005_v44, %v2597_v20  ;;  %v2861_v19 = vmul.f32 %v9005_v44, %v2598_v33  ;;  %v3120_v9 = vadd.f32 %v9020_v8, %v2857_v11  ;;  %v10239_v37 = vld [vmem:[#allocation201_spill] sm:$0xff] }
 0x6a2   : > { %v4372_v53 = vpop.eup %4371  ;;  %3614 = vst [vmem:[%s9617_s4 + $0x670] sm:$0xff] %v4370_v7  ;;  %4397 = vtanh.f32 %v3116_v56  ;;  %v3121_v13 = vadd.f32 %v9020_v8, %v2858_v63  ;;  %v2862_v27 = vmul.f32 %v9005_v44, %v2599_v54  ;;  %v3122_v43 = vadd.f32 %v9020_v8, %v2859_v41 }
 0x6a3   : > { %v4374_v36 = vpop.eup %4373  ;;  %3615 = vst [vmem:[%s9617_s4 + $0x678] sm:$0xff] %v4372_v53  ;;  %4399 = vtanh.f32 %v3117_v62  ;;  %v3123_v17 = vadd.f32 %v9020_v8, %v2860_v14  ;;  %v3124_v16 = vadd.f32 %v9020_v8, %v2861_v19  ;;  %v2600_v31 = vmul.f32 %v7786_v42, %v10228_v29 }
 0x6a4   : > { %v4376_v21 = vpop.eup %4375  ;;  %3616 = vst [vmem:[%s9617_s4 + $0x680] sm:$0xff] %v4374_v36  ;;  %4401 = vtanh.f32 %v3118_v3  ;;  %v2601_v25 = vmul.f32 %v7786_v42, %v10229_v35  ;;  %v2602_v22 = vmul.f32 %v7786_v42, %v10230_v48  ;;  %v2603_v12 = vmul.f32 %v7786_v42, %v10231_v60  ;;  %v10240_v35 = vld [vmem:[#allocation202_spill] sm:$0xff]  ;;  %v10241_v48 = vld [vmem:[#allocation203_spill] sm:$0xff] }
 0x6a5   : > { %v4378_v52 = vpop.eup %4377  ;;  %3617 = vst [vmem:[%s9617_s4 + $0x688] sm:$0xff] %v4376_v21  ;;  %4403 = vtanh.f32 %v3119_v45  ;;  %v2604_v47 = vmul.f32 %v7786_v42, %v10232_v6  ;;  %v2605_v10 = vmul.f32 %v7786_v42, %v10233_v18  ;;  %v2863_v50 = vmul.f32 %v9005_v44, %v2600_v31  ;;  %v10243_v6 = vld [vmem:[#allocation205_spill] sm:$0xff]  ;;  %v10244_v18 = vld [vmem:[#allocation206_spill] sm:$0xff] }
 0x6a6   : > { %v4380_v32 = vpop.eup %4379  ;;  %3618 = vst [vmem:[%s9617_s4 + $0x690] sm:$0xff] %v4378_v52  ;;  %4405 = vtanh.f32 %v3120_v9  ;;  %v2864_v24 = vmul.f32 %v9005_v44, %v2601_v25  ;;  %v2865_v58 = vmul.f32 %v9005_v44, %v2602_v22  ;;  %v3125_v49 = vadd.f32 %v9020_v8, %v2862_v27  ;;  %v10242_v52 = vld [vmem:[#allocation204_spill] sm:$0xff] }
 0x6a7   : > { %v4382_v0 = vpop.eup %4381  ;;  %3619 = vst [vmem:[%s9617_s4 + $0x698] sm:$0xff] %v4380_v32  ;;  %4407 = vtanh.f32 %v3121_v13  ;;  %v2866_v40 = vmul.f32 %v9005_v44, %v2603_v12  ;;  %v2867_v15 = vmul.f32 %v9005_v44, %v2604_v47  ;;  %v3126_v46 = vadd.f32 %v9020_v8, %v2863_v50  ;;  %v10245_v32 = vld [vmem:[#allocation207_spill] sm:$0xff] }
 0x6a8   : > { %v4384_v23 = vpop.eup %4383  ;;  %3620 = vst [vmem:[%s9617_s4 + $0x6a0] sm:$0xff] %v4382_v0  ;;  %4409 = vtanh.f32 %v3122_v43  ;;  %v3127_v51 = vadd.f32 %v9020_v8, %v2864_v24  ;;  %v2868_v56 = vmul.f32 %v9005_v44, %v2605_v10  ;;  %v3128_v3 = vadd.f32 %v9020_v8, %v2865_v58 }
 0x6a9   : > { %v4386_v62 = vpop.eup %4385  ;;  %3621 = vst [vmem:[%s9617_s4 + $0x6a8] sm:$0xff] %v4384_v23  ;;  %4411 = vtanh.f32 %v3123_v17  ;;  %v3129_v57 = vadd.f32 %v9020_v8, %v2866_v40  ;;  %v3130_v26 = vadd.f32 %v9020_v8, %v2867_v15  ;;  %v2606_v28 = vmul.f32 %v7786_v42, %v10234_v1 }
 0x6aa   : > { %v4388_v61 = vpop.eup %4387  ;;  %3622 = vst [vmem:[%s9617_s4 + $0x6b0] sm:$0xff] %v4386_v62  ;;  %4413 = vtanh.f32 %v3124_v16  ;;  %v2607_v59 = vmul.f32 %v7786_v42, %v10235_v5  ;;  %v2608_v34 = vmul.f32 %v7786_v42, %v10236_v30  ;;  %v2609_v33 = vmul.f32 %v7786_v42, %v10237_v38  ;;  %v10246_v5 = vld [vmem:[#allocation208_spill] sm:$0xff]  ;;  %v10247_v30 = vld [vmem:[#allocation209_spill] sm:$0xff] }
 0x6ab   : > { %v4390_v20 = vpop.eup %4389  ;;  %3623 = vst [vmem:[%s9617_s4 + $0x6b8] sm:$0xff] %v4388_v61  ;;  %4415 = vtanh.f32 %v3125_v49  ;;  %v2610_v54 = vmul.f32 %v7786_v42, %v10238_v2  ;;  %v2611_v11 = vmul.f32 %v7786_v42, %v10239_v37  ;;  %v2869_v41 = vmul.f32 %v9005_v44, %v2606_v28  ;;  %v10249_v2 = vld [vmem:[#allocation211_spill] sm:$0xff]  ;;  %v10250_v37 = vld [vmem:[#allocation212_spill] sm:$0xff] }
 0x6ac   : > { %v4392_v63 = vpop.eup %4391  ;;  %3624 = vst [vmem:[%s9617_s4 + $0x6c0] sm:$0xff] %v4390_v20  ;;  %4417 = vtanh.f32 %v3126_v46  ;;  %v2870_v7 = vmul.f32 %v9005_v44, %v2607_v59  ;;  %v2871_v45 = vmul.f32 %v9005_v44, %v2608_v34  ;;  %v3131_v19 = vadd.f32 %v9020_v8, %v2868_v56  ;;  %v10248_v20 = vld [vmem:[#allocation210_spill] sm:$0xff] }
 0x6ad   : > { %v4394_v14 = vpop.eup %4393  ;;  %3625 = vst [vmem:[%s9617_s4 + $0x6c8] sm:$0xff] %v4392_v63  ;;  %4419 = vtanh.f32 %v3127_v51  ;;  %v2872_v53 = vmul.f32 %v9005_v44, %v2609_v33  ;;  %v2873_v9 = vmul.f32 %v9005_v44, %v2610_v54  ;;  %v3132_v27 = vadd.f32 %v9020_v8, %v2869_v41 }
 0x6ae   : > { %v4396_v13 = vpop.eup %4395  ;;  %3626 = vst [vmem:[%s9617_s4 + $0x6d0] sm:$0xff] %v4394_v14  ;;  %4421 = vtanh.f32 %v3128_v3  ;;  %v3133_v36 = vadd.f32 %v9020_v8, %v2870_v7  ;;  %v2874_v43 = vmul.f32 %v9005_v44, %v2611_v11  ;;  %v3134_v16 = vadd.f32 %v9020_v8, %v2871_v45 }
 0x6af   : > { %v4398_v17 = vpop.eup %4397  ;;  %3627 = vst [vmem:[%s9617_s4 + $0x6d8] sm:$0xff] %v4396_v13  ;;  %4423 = vtanh.f32 %v3129_v57  ;;  %v3135_v21 = vadd.f32 %v9020_v8, %v2872_v53  ;;  %v3136_v29 = vadd.f32 %v9020_v8, %v2873_v9  ;;  %v2612_v25 = vmul.f32 %v7786_v42, %v10240_v35 }
 0x6b0   : > { %v4400_v31 = vpop.eup %4399  ;;  %3628 = vst [vmem:[%s9617_s4 + $0x6e0] sm:$0xff] %v4398_v17  ;;  %4425 = vtanh.f32 %v3130_v26  ;;  %v2613_v22 = vmul.f32 %v7786_v42, %v10241_v48  ;;  %v2614_v60 = vmul.f32 %v7786_v42, %v10242_v52  ;;  %v2615_v47 = vmul.f32 %v7786_v42, %v10243_v6 }
 0x6b1   : > { %v4402_v12 = vpop.eup %4401  ;;  %3629 = vst [vmem:[%s9617_s4 + $0x6e8] sm:$0xff] %v4400_v31  ;;  %4427 = vtanh.f32 %v3131_v19  ;;  %v2616_v10 = vmul.f32 %v7786_v42, %v10244_v18  ;;  %v2617_v50 = vmul.f32 %v7786_v42, %v10245_v32  ;;  %v2875_v58 = vmul.f32 %v9005_v44, %v2612_v25 }
 0x6b2   : > { %v4404_v24 = vpop.eup %4403  ;;  %3630 = vst [vmem:[%s9617_s4 + $0x6f0] sm:$0xff] %v4402_v12  ;;  %4429 = vtanh.f32 %v3132_v27  ;;  %v2876_v0 = vmul.f32 %v9005_v44, %v2613_v22  ;;  %v2877_v49 = vmul.f32 %v9005_v44, %v2614_v60  ;;  %v3137_v15 = vadd.f32 %v9020_v8, %v2874_v43 }
 0x6b3   : > { %v4406_v40 = vpop.eup %4405  ;;  %3631 = vst [vmem:[%s9617_s4 + $0x6f8] sm:$0xff] %v4404_v24  ;;  %4431 = vtanh.f32 %v3133_v36  ;;  %v2878_v23 = vmul.f32 %v9005_v44, %v2615_v47  ;;  %v2879_v46 = vmul.f32 %v9005_v44, %v2616_v10  ;;  %v3138_v56 = vadd.f32 %v9020_v8, %v2875_v58 }
 0x6b4   : > { %v4408_v51 = vpop.eup %4407  ;;  %3632 = vst [vmem:[%s9617_s4 + $0x700] sm:$0xff] %v4406_v40  ;;  %4433 = vtanh.f32 %v3134_v16  ;;  %v3139_v62 = vadd.f32 %v9020_v8, %v2876_v0  ;;  %v2880_v3 = vmul.f32 %v9005_v44, %v2617_v50  ;;  %v3140_v26 = vadd.f32 %v9020_v8, %v2877_v49 }
 0x6b5   : > { %v4410_v57 = vpop.eup %4409  ;;  %3633 = vst [vmem:[%s9617_s4 + $0x708] sm:$0xff] %v4408_v51  ;;  %4435 = vtanh.f32 %v3135_v21  ;;  %v3141_v61 = vadd.f32 %v9020_v8, %v2878_v23  ;;  %v3142_v1 = vadd.f32 %v9020_v8, %v2879_v46  ;;  %v2618_v59 = vmul.f32 %v7786_v42, %v10246_v5 }
 0x6b6   : > { %v4412_v28 = vpop.eup %4411  ;;  %3634 = vst [vmem:[%s9617_s4 + $0x710] sm:$0xff] %v4410_v57  ;;  %4437 = vtanh.f32 %v3136_v29  ;;  %v2619_v34 = vmul.f32 %v7786_v42, %v10247_v30  ;;  %v2620_v38 = vmul.f32 %v7786_v42, %v10248_v20  ;;  %v2621_v54 = vmul.f32 %v7786_v42, %v10249_v2 }
 0x6b7   : > { %v4414_v33 = vpop.eup %4413  ;;  %3635 = vst [vmem:[%s9617_s4 + $0x718] sm:$0xff] %v4412_v28  ;;  %4439 = vtanh.f32 %v3137_v15  ;;  %v2622_v11 = vmul.f32 %v7786_v42, %v10250_v37  ;;  %v2623_v63 = vmul.f32 %v7786_v42, %v7762_v4  ;;  %v2881_v7 = vmul.f32 %v9005_v44, %v2618_v59 }
 0x6b8   : > { %v4416_v41 = vpop.eup %4415  ;;  %3636 = vst [vmem:[%s9617_s4 + $0x720] sm:$0xff] %v4414_v33  ;;  %4441 = vtanh.f32 %v3138_v56  ;;  %v2882_v45 = vmul.f32 %v9005_v44, %v2619_v34  ;;  %v2883_v14 = vmul.f32 %v9005_v44, %v2620_v38  ;;  %v3143_v4 = vadd.f32 %v9020_v8, %v2880_v3 }
 0x6b9   : > { %v4418_v19 = vpop.eup %4417  ;;  %3637 = vst [vmem:[%s9617_s4 + $0x728] sm:$0xff] %v4416_v41  ;;  %4443 = vtanh.f32 %v3139_v62  ;;  %v2884_v53 = vmul.f32 %v9005_v44, %v2621_v54  ;;  %v3144_v13 = vadd.f32 %v9020_v8, %v2881_v7  ;;  %v2885_v27 = vmul.f32 %v9005_v44, %v2622_v11 }
 0x6ba   : > { %v4420_v9 = vpop.eup %4419  ;;  %3638 = vst [vmem:[%s9617_s4 + $0x730] sm:$0xff] %v4418_v19  ;;  %4445 = vtanh.f32 %v3140_v26  ;;  %v3145_v43 = vadd.f32 %v9020_v8, %v2882_v45  ;;  %v2886_v17 = vmul.f32 %v9005_v44, %v2623_v63  ;;  %v3146_v21 = vadd.f32 %v9020_v8, %v2883_v14 }
 0x6bb   : > { %v4422_v36 = vpop.eup %4421  ;;  %3639 = vst [vmem:[%s9617_s4 + $0x738] sm:$0xff] %v4420_v9  ;;  %4447 = vtanh.f32 %v3141_v61  ;;  %v2624_v29 = vmul.f32 %v7786_v42, %v7770_v39  ;;  %v2625_v31 = vmul.f32 %v7786_v42, %v7778_v55  ;;  %v3147_v25 = vadd.f32 %v9020_v8, %v2884_v53 }
 0x6bc   : > { %v4424_v16 = vpop.eup %4423  ;;  %3640 = vst [vmem:[%s9617_s4 + $0x740] sm:$0xff] %v4422_v36  ;;  %4449 = vtanh.f32 %v3142_v1  ;;  %v3148_v22 = vadd.f32 %v9020_v8, %v2885_v27  ;;  %v3149_v52 = vadd.f32 %v9020_v8, %v2886_v17 }
 0x6bd   : > { %v4426_v35 = vpop.eup %4425  ;;  %3641 = vst [vmem:[%s9617_s4 + $0x748] sm:$0xff] %v4424_v16  ;;  %4451 = vtanh.f32 %v3143_v4  ;;  %v2887_v39 = vmul.f32 %v9005_v44, %v2624_v29  ;;  %v2888_v55 = vmul.f32 %v9005_v44, %v2625_v31 }
 0x6be   : > { %v4428_v48 = vpop.eup %4427  ;;  %3642 = vst [vmem:[%s9617_s4 + $0x750] sm:$0xff] %v4426_v35  ;;  %4453 = vtanh.f32 %v3144_v13 }
 0x6bf   : > { %v4430_v42 = vpop.eup %4429  ;;  %3643 = vst [vmem:[%s9617_s4 + $0x758] sm:$0xff] %v4428_v48  ;;  %4455 = vtanh.f32 %v3145_v43  ;;  %v3150_v12 = vadd.f32 %v9020_v8, %v2887_v39  ;;  %v3151_v44 = vadd.f32 %v9020_v8, %v2888_v55 }
 0x6c0   : > { %v4432_v60 = vpop.eup %4431  ;;  %3644 = vst [vmem:[%s9617_s4 + $0x760] sm:$0xff] %v4430_v42  ;;  %4457 = vtanh.f32 %v3146_v21 }
 0x6c1   : > { %v4434_v6 = vpop.eup %4433  ;;  %3645 = vst [vmem:[%s9617_s4 + $0x768] sm:$0xff] %v4432_v60  ;;  %4459 = vtanh.f32 %v3147_v25 }
 0x6c2   : > { %v4436_v47 = vpop.eup %4435  ;;  %3646 = vst [vmem:[%s9617_s4 + $0x770] sm:$0xff] %v4434_v6  ;;  %4461 = vtanh.f32 %v3148_v22 }
 0x6c3   : > { %v4438_v18 = vpop.eup %4437  ;;  %3647 = vst [vmem:[%s9617_s4 + $0x778] sm:$0xff] %v4436_v47  ;;  %4463 = vtanh.f32 %v3149_v52 }
 0x6c4   : > { %v4440_v10 = vpop.eup %4439  ;;  %3648 = vst [vmem:[%s9617_s4 + $0x780] sm:$0xff] %v4438_v18  ;;  %4465 = vtanh.f32 %v3150_v12 }
 0x6c5   : > { %v4442_v32 = vpop.eup %4441  ;;  %3649 = vst [vmem:[%s9617_s4 + $0x788] sm:$0xff] %v4440_v10  ;;  %4467 = vtanh.f32 %v3151_v44 }
 0x6c6   : > { %v4444_v8 = vpop.eup %4443  ;;  %3650 = vst [vmem:[%s9617_s4 + $0x790] sm:$0xff] %v4442_v32 }
 0x6c7   : > { %v4446_v50 = vpop.eup %4445  ;;  %3651 = vst [vmem:[%s9617_s4 + $0x798] sm:$0xff] %v4444_v8 }
 0x6c8   : > { %v4448_v24 = vpop.eup %4447  ;;  %3652 = vst [vmem:[%s9617_s4 + $0x7a0] sm:$0xff] %v4446_v50 }
 0x6c9   : > { %v4450_v58 = vpop.eup %4449  ;;  %3653 = vst [vmem:[%s9617_s4 + $0x7a8] sm:$0xff] %v4448_v24 }
 0x6ca   : > { %v4452_v0 = vpop.eup %4451  ;;  %3654 = vst [vmem:[%s9617_s4 + $0x7b0] sm:$0xff] %v4450_v58 }
 0x6cb   : > { %v4454_v49 = vpop.eup %4453  ;;  %3655 = vst [vmem:[%s9617_s4 + $0x7b8] sm:$0xff] %v4452_v0 }
 0x6cc   : > { %v4456_v40 = vpop.eup %4455  ;;  %3656 = vst [vmem:[%s9617_s4 + $0x7c0] sm:$0xff] %v4454_v49 }
 0x6cd   : > { %v4458_v15 = vpop.eup %4457  ;;  %3657 = vst [vmem:[%s9617_s4 + $0x7c8] sm:$0xff] %v4456_v40 }
 0x6ce   : > { %v4460_v23 = vpop.eup %4459  ;;  %3658 = vst [vmem:[%s9617_s4 + $0x7d0] sm:$0xff] %v4458_v15 }
 0x6cf   : > { %v4462_v46 = vpop.eup %4461  ;;  %3659 = vst [vmem:[%s9617_s4 + $0x7d8] sm:$0xff] %v4460_v23 }
 0x6d0   : > { %v4464_v51 = vpop.eup %4463  ;;  %3660 = vst [vmem:[%s9617_s4 + $0x7e0] sm:$0xff] %v4462_v46 }
 0x6d1   : > { %v4466_v56 = vpop.eup %4465  ;;  %3661 = vst [vmem:[%s9617_s4 + $0x7e8] sm:$0xff] %v4464_v51 }
 0x6d2   : > { %v4468_v62 = vpop.eup %4467  ;;  %3662 = vst [vmem:[%s9617_s4 + $0x7f0] sm:$0xff] %v4466_v56 }
 0x6d3   : > { %3663 = vst [vmem:[%s9617_s4 + $0x7f8] sm:$0xff] %v4468_v62 }
 0x6d4 PF: > { %s14_s15 = sadd.s32 1, %s4735_s15  }
 0x6d5   : > { %p11_p5 = scmp.ge.s32.totalorder %s14_s15, 6  }
 0x6d7   :  { %13 = sbr.rel (!%p11_p5) target bundleno = 1 (0x1), region = 70 }

</bundles_post_ra>
